<compile_context>
chip_gen: v7x
topology: tpu7x:2x2x1
jax: 0.10.0
libtpu: 0.0.40
codegen_flags: <defaults>
</compile_context>

<pallas_src>
import math
from functools import partial

import numpy as np
import jax
import jax.numpy as jnp
from jax.experimental import pallas as pl
from jax.experimental.pallas import tpu as pltpu

WINDOW_SIZE = 11
SIGMA = 1.5
PAD = WINDOW_SIZE // 2
C1 = 0.01 ** 2
C2 = 0.03 ** 2
LEVELS = 5
MS_WEIGHTS = np.array([0.0448, 0.2856, 0.3001, 0.2363, 0.1333], dtype=np.float32)
OUT_LANES = 128  # lane-dense packed output row; lanes [0,2*LEVELS) are used


def _gaussian_1d(window_size: int, sigma: float) -> np.ndarray:
    g = np.array(
        [math.exp(-((x - window_size // 2) ** 2) / float(2 * sigma ** 2))
         for x in range(window_size)],
        dtype=np.float64,
    )
    return (g / g.sum()).astype(np.float32)


_G1D = _gaussian_1d(WINDOW_SIZE, SIGMA)


def _band_matrix(size: int) -> np.ndarray:
    """Symmetric banded (size,size) matrix B with B[i,j] = g[j-i+PAD].

    `x @ B` along an axis equals the zero-padded 'same' 1-D gaussian conv
    (padding = WINDOW_SIZE//2); the truncated border bands absorb the padding,
    and since g is symmetric the same matrix works for both axes / both sides.
    """
    m = np.zeros((size, size), dtype=np.float32)
    for i in range(size):
        for j in range(max(0, i - PAD), min(size, i + PAD + 1)):
            m[i, j] = _G1D[j - i + PAD]
    return m


def _pool_matrix(size: int) -> np.ndarray:
    """F.avg_pool2d(kernel=2, stride=2) along one axis: x @ P, P is (size, size//2)."""
    p = np.zeros((size, size // 2), dtype=np.float32)
    c = np.arange(size // 2)
    p[2 * c, c] = 0.5
    p[2 * c + 1, c] = 0.5
    return p


def _aligned(*dims) -> bool:
    return all(d % 8 == 0 for d in dims)


def _fast_recip(v):
    # EUP approx reciprocal + one Newton step (err ~e^2) -- review concern addressed.
    r = pl.reciprocal(v, approx=True)
    return r * (2.0 - v * r)


def _sep_conv(s, b_lane, b_sub, n, d0, d1, cdtype):
    """Per-plane gaussian filter of s: (n, d0, d1) along both axes.

    Fast path (8-aligned dims): two flattened 2-D MXU matmuls (band matrix stays
    stationary, M = n*rows) with one minor-dim transpose in between; returns the
    per-plane result TRANSPOSED as (n, d1, d0).  Fallback (tiny unaligned levels):
    proven batched-einsum path, returns (n, d0, d1).  Downstream consumers are
    orientation-agnostic, and every conv at a given level uses the same path.
    """
    if _aligned(d0, d1):
        t = jnp.dot(s.reshape(n * d0, d1).astype(cdtype), b_lane.astype(cdtype),
                    preferred_element_type=jnp.float32).reshape(n, d0, d1)
        tt = jnp.swapaxes(t, 1, 2).reshape(n * d1, d0)
        e = jnp.dot(tt.astype(cdtype), b_sub.astype(cdtype),
                    preferred_element_type=jnp.float32)
        return e.reshape(n, d1, d0)
    # Tiny-level fallback (f32; broadcast is negligible at these sizes).
    bl = jnp.broadcast_to(b_lane[None], (n, d1, d1))
    t = jnp.einsum('nhw,nwv->nhv', s, bl, preferred_element_type=jnp.float32)
    bs = jnp.broadcast_to(b_sub[None], (n, d0, d0))
    return jnp.einsum('nih,nhw->niw', bs, t, preferred_element_type=jnp.float32)


def _avg_pool2(s, p_lane, p_sub, n, d0, d1):
    """2x2 stride-2 average pooling of s: (n, d0, d1). Returns (pooled, (nd0, nd1))."""
    if _aligned(d0, d1 // 2):
        t = jnp.dot(s.reshape(n * d0, d1), p_lane,
                    preferred_element_type=jnp.float32).reshape(n, d0, d1 // 2)
        tt = jnp.swapaxes(t, 1, 2).reshape(n * (d1 // 2), d0)
        p = jnp.dot(tt, p_sub, preferred_element_type=jnp.float32)
        return p.reshape(n, d1 // 2, d0 // 2), (d1 // 2, d0 // 2)
    pl_b = jnp.broadcast_to(p_lane[None], (n, d1, d1 // 2))
    t = jnp.einsum('nhw,nwv->nhv', s, pl_b, preferred_element_type=jnp.float32)
    ps_b = jnp.broadcast_to(p_sub.T[None], (n, d0 // 2, d0))
    p = jnp.einsum('nih,nhw->niw', ps_b, t, preferred_element_type=jnp.float32)
    return p, (d0 // 2, d1 // 2)


def _make_msssim_kernel(n_tile, levels, dims0, band_sizes, pool_sizes):
    nb, npo = len(band_sizes), len(pool_sizes)

    def kernel(xy_ref, *refs):
        band = dict(zip(band_sizes, refs[:nb]))
        pool = dict(zip(pool_sizes, refs[nb:nb + npo]))
        out_ref = refs[nb + npo]

        t = n_tile
        d0, d1 = dims0
        # (2, T, h, w) block -> (2T, h, w): leading-dim merge, no data movement.
        xy = xy_ref[...].reshape(2 * t, d0, d1)

        lane = jax.lax.broadcasted_iota(jnp.int32, (1, 1, OUT_LANES), 2)
        row = jnp.zeros((1, 1, OUT_LANES), jnp.float32)

        for lvl in range(levels):
            b1 = band[d1][...]
            b0 = band[d0][...] if d0 != d1 else b1
            x = xy[:t]
            y = xy[t:]

            # mu filter in bf16 (MXU native); 2nd moments in f32 so that
            # sigma = E[x^2] - mu^2 stays cancellation-safe.
            mus = _sep_conv(xy, b1, b0, 2 * t, d0, d1, jnp.bfloat16)
            moms = _sep_conv(xy * xy, b1, b0, 2 * t, d0, d1, jnp.float32)
            e12 = _sep_conv(x * y, b1, b0, t, d0, d1, jnp.float32)

            mu1, mu2 = mus[:t], mus[t:]
            e11, e22 = moms[:t], moms[t:]

            mu1_sq = mu1 * mu1
            mu2_sq = mu2 * mu2
            mu1_mu2 = mu1 * mu2
            sigma1_sq = e11 - mu1_sq
            sigma2_sq = e22 - mu2_sq
            sigma12 = e12 - mu1_mu2

            v1 = 2.0 * sigma12 + C2
            v2 = sigma1_sq + sigma2_sq + C2
            mcs_map = v1 * _fast_recip(v2)
            ssim_map = (mcs_map * (2.0 * mu1_mu2 + C1)
                        * _fast_recip(mu1_sq + mu2_sq + C1))

            ssim_sum = jnp.sum(ssim_map)
            mcs_sum = jnp.sum(mcs_map)
            # Packed lane-dense output row (one store, no per-level (1,1,1) stores).
            row = row + jnp.where(lane == lvl, ssim_sum, 0.0)
            row = row + jnp.where(lane == levels + lvl, mcs_sum, 0.0)

            if lvl < levels - 1:
                p1 = pool[d1][...]
                p0 = pool[d0][...] if d0 != d1 else p1
                xy, (d0, d1) = _avg_pool2(xy, p1, p0, 2 * t, d0, d1)

        out_ref[...] = row

    return kernel


def _tpu_vmem_capacity_bytes() -> int:
    try:
        return int(pltpu.get_tpu_info().vmem_capacity_bytes)
    except Exception:
        return 64 * 1024 * 1024  # conservative (v7x-sized) fallback


def _choose_n_tile(n: int, h: int, w: int, vmem_cap: int):
    """Largest divisor of n whose level-0 working set fits a generation-aware budget."""
    dual_core = vmem_cap <= 64 * 1024 * 1024          # v7x: 2 TensorCores share 64 MiB
    vmem_limit = max(min(int(vmem_cap * 0.85), vmem_cap - (16 << 20)), 16 << 20)
    budget = int(vmem_limit * 0.6)
    # Level-0 working set per plane: double-buffered input block + live f32 temps.
    per_plane = h * w * 4 * 28
    cap = max(1, min(n, budget // max(per_plane, 1)))
    if dual_core and n >= 2:
        cap = min(cap, max(1, n // 2))                # give both TensorCores a block
    divisors = [d for d in range(cap, 0, -1) if n % d == 0]
    if dual_core:
        for d in divisors:
            if (n // d) % 2 == 0:                     # even #blocks -> balanced cores
                return d, vmem_limit
    return divisors[0], vmem_limit


@partial(jax.jit, static_argnames=("levels",))
def ms_ssim(img1, img2, levels=LEVELS):
    """MS_SSIM.forward.  img1, img2: (B, C, H, W) float32 (NCHW)."""
    b, c, h, w = img1.shape
    assert h % (1 << (levels - 1)) == 0 and w % (1 << (levels - 1)) == 0, (
        "spatial dims must be divisible by 2**(levels-1)")

    n = b * c
    x = img1.astype(jnp.float32).reshape(n, h, w)
    y = img2.astype(jnp.float32).reshape(n, h, w)
    xy = jnp.stack([x, y], axis=0)                    # (2, n, h, w): no in-kernel concat

    vmem_cap = _tpu_vmem_capacity_bytes()
    n_tile, vmem_limit = _choose_n_tile(n, h, w, vmem_cap)
    num_blocks = n // n_tile

    level_dims = [(h >> l, w >> l) for l in range(levels)]
    band_sizes = tuple(sorted({d for hw in level_dims for d in hw}, reverse=True))
    pool_sizes = tuple(sorted({d for hw in level_dims[:-1] for d in hw}, reverse=True))
    band_mats = [jnp.asarray(_band_matrix(s)) for s in band_sizes]
    pool_mats = [jnp.asarray(_pool_matrix(s)) for s in pool_sizes]

    kernel = _make_msssim_kernel(n_tile, levels, level_dims[0], band_sizes, pool_sizes)

    in_specs = [pl.BlockSpec((2, n_tile, h, w), lambda i: (0, i, 0, 0))]
    in_specs += [pl.BlockSpec(m.shape, lambda i: (0, 0)) for m in band_mats + pool_mats]
    out_spec = pl.BlockSpec((1, 1, OUT_LANES), lambda i: (i, 0, 0))

    out = pl.pallas_call(
        kernel,
        out_shape=jax.ShapeDtypeStruct((num_blocks, 1, OUT_LANES), jnp.float32),
        grid_spec=pltpu.PrefetchScalarGridSpec(
            num_scalar_prefetch=0,
            grid=(num_blocks,),
            in_specs=in_specs,
            out_specs=out_spec,
        ),
        compiler_params=pltpu.CompilerParams(
            dimension_semantics=("parallel",),
            vmem_limit_bytes=int(vmem_limit),
        ),
    )(xy, *band_mats, *pool_mats)

    sums = jnp.sum(out, axis=(0, 1))                  # (OUT_LANES,)
    counts = jnp.asarray([n * hh * ww for hh, ww in level_dims], dtype=jnp.float32)
    msssim_arr = sums[:levels] / counts
    mcs_arr = sums[levels:2 * levels] / counts

    # Final combine kept bug-for-bug identical to the reference module:
    # torch.prod(msssim[L-1] ** w[L-1] * mcs[0:L-1] ** w[0:L-1]) -- the scalar
    # msssim term broadcasts over the L-1 mcs entries before the product.
    weight = jnp.asarray(MS_WEIGHTS[:levels])
    return jnp.prod(
        msssim_arr[levels - 1] ** weight[levels - 1]
        * mcs_arr[0:levels - 1] ** weight[0:levels - 1]
    )


if __name__ == "__main__":
    key = jax.random.PRNGKey(0)
    k1, k2 = jax.random.split(key)
    # 32x32 spatial so 5 levels of 2x2 pooling stay valid (32->16->8->4->2).
    img1 = jax.random.uniform(k1, (2, 4, 32, 32), dtype=jnp.float32)
    noise = 0.05 * jax.random.normal(k2, (2, 4, 32, 32), dtype=jnp.float32)
    img2 = jnp.clip(img1 + noise, 0.0, 1.0)

    out = ms_ssim(img1, img2)
    jax.block_until_ready(out)
    print("KERNEL_OK")
</pallas_src>

<mosaic_0001>
module attributes {stable_mosaic.version = 11 : i64} {
  func.func @kernel(%arg0: i32, %arg1: memref<2x4x32x32xf32, #tpu.memory_space<vmem>>, %arg2: memref<32x32xf32, #tpu.memory_space<vmem>>, %arg3: memref<16x16xf32, #tpu.memory_space<vmem>>, %arg4: memref<8x8xf32, #tpu.memory_space<vmem>>, %arg5: memref<4x4xf32, #tpu.memory_space<vmem>>, %arg6: memref<2x2xf32, #tpu.memory_space<vmem>>, %arg7: memref<32x16xf32, #tpu.memory_space<vmem>>, %arg8: memref<16x8xf32, #tpu.memory_space<vmem>>, %arg9: memref<8x4xf32, #tpu.memory_space<vmem>>, %arg10: memref<4x2xf32, #tpu.memory_space<vmem>>, %arg11: memref<1x1x128xf32, #tpu.memory_space<vmem>>) attributes {dimension_semantics = [#tpu.dimension_semantics<parallel>], iteration_bounds = array<i64: 2>, scalar_prefetch = 0 : i64, scratch_operands = 0 : i64, tpu.core_type = #tpu.core_type<tc>, window_params = [{transform_indices = @transform_0, window_bounds = array<i64: 2, 4, 32, 32>}, {pipeline_mode = #tpu.pipeline_mode<synchronous>, transform_indices = @transform_1, window_bounds = array<i64: 32, 32>}, {pipeline_mode = #tpu.pipeline_mode<synchronous>, transform_indices = @transform_2, window_bounds = array<i64: 16, 16>}, {pipeline_mode = #tpu.pipeline_mode<synchronous>, transform_indices = @transform_3, window_bounds = array<i64: 8, 8>}, {pipeline_mode = #tpu.pipeline_mode<synchronous>, transform_indices = @transform_4, window_bounds = array<i64: 4, 4>}, {pipeline_mode = #tpu.pipeline_mode<synchronous>, transform_indices = @transform_5, window_bounds = array<i64: 2, 2>}, {pipeline_mode = #tpu.pipeline_mode<synchronous>, transform_indices = @transform_6, window_bounds = array<i64: 32, 16>}, {pipeline_mode = #tpu.pipeline_mode<synchronous>, transform_indices = @transform_7, window_bounds = array<i64: 16, 8>}, {pipeline_mode = #tpu.pipeline_mode<synchronous>, transform_indices = @transform_8, window_bounds = array<i64: 8, 4>}, {pipeline_mode = #tpu.pipeline_mode<synchronous>, transform_indices = @transform_9, window_bounds = array<i64: 4, 2>}, {transform_indices = @transform_10, window_bounds = array<i64: 1, 1, 128>}]} {
    %c0 = arith.constant 0 : index
    %c0_0 = arith.constant 0 : index
    %c0_1 = arith.constant 0 : index
    %c0_2 = arith.constant 0 : index
    %0 = vector.load %arg1[%c0, %c0_0, %c0_1, %c0_2] : memref<2x4x32x32xf32, #tpu.memory_space<vmem>>, vector<2x4x32x32xf32>
    %1 = vector.shape_cast %0 : vector<2x4x32x32xf32> to vector<8x32x32xf32>
    %2 = tpu.iota {dimensions = array<i32: 2>} : vector<1x1x128xi32>
    %cst = arith.constant 0.000000e+00 : f32
    %3 = vector.broadcast %cst : f32 to vector<1x1x128xf32>
    %c0_3 = arith.constant 0 : index
    %c0_4 = arith.constant 0 : index
    %4 = vector.load %arg2[%c0_3, %c0_4] : memref<32x32xf32, #tpu.memory_space<vmem>>, vector<32x32xf32>
    %5 = vector.extract_strided_slice %1 {offsets = [0, 0, 0], sizes = [4, 32, 32], strides = [1, 1, 1]} : vector<8x32x32xf32> to vector<4x32x32xf32>
    %6 = vector.extract_strided_slice %1 {offsets = [4, 0, 0], sizes = [4, 32, 32], strides = [1, 1, 1]} : vector<8x32x32xf32> to vector<4x32x32xf32>
    %7 = vector.shape_cast %1 : vector<8x32x32xf32> to vector<256x32xf32>
    %8 = arith.truncf %7 : vector<256x32xf32> to vector<256x32xbf16>
    %9 = arith.truncf %4 : vector<32x32xf32> to vector<32x32xbf16>
    %cst_5 = arith.constant dense<0.000000e+00> : vector<256x32xf32>
    %10 = tpu.matmul %8, %9, %cst_5 {dimension_numbers = #tpu.dot_dimension_numbers<[1], [0], [0], [1], [0, 0, 1, 1], [], []>} : vector<256x32xbf16>, vector<32x32xbf16>, vector<256x32xf32> -> vector<256x32xf32>
    %11 = vector.shape_cast %10 : vector<256x32xf32> to vector<8x32x32xf32>
    %12 = tpu.transpose %11, [0, 2, 1] : vector<8x32x32xf32> -> vector<8x32x32xf32>
    %13 = vector.shape_cast %12 : vector<8x32x32xf32> to vector<256x32xf32>
    %14 = arith.truncf %13 : vector<256x32xf32> to vector<256x32xbf16>
    %15 = arith.truncf %4 : vector<32x32xf32> to vector<32x32xbf16>
    %cst_6 = arith.constant dense<0.000000e+00> : vector<256x32xf32>
    %16 = tpu.matmul %14, %15, %cst_6 {dimension_numbers = #tpu.dot_dimension_numbers<[1], [0], [0], [1], [0, 0, 1, 1], [], []>} : vector<256x32xbf16>, vector<32x32xbf16>, vector<256x32xf32> -> vector<256x32xf32>
    %17 = vector.shape_cast %16 : vector<256x32xf32> to vector<8x32x32xf32>
    %18 = arith.mulf %1, %1 : vector<8x32x32xf32>
    %19 = vector.shape_cast %18 : vector<8x32x32xf32> to vector<256x32xf32>
    %cst_7 = arith.constant dense<0.000000e+00> : vector<256x32xf32>
    %20 = tpu.matmul %19, %4, %cst_7 {dimension_numbers = #tpu.dot_dimension_numbers<[1], [0], [0], [1], [0, 0, 1, 1], [], []>} : vector<256x32xf32>, vector<32x32xf32>, vector<256x32xf32> -> vector<256x32xf32>
    %21 = vector.shape_cast %20 : vector<256x32xf32> to vector<8x32x32xf32>
    %22 = tpu.transpose %21, [0, 2, 1] : vector<8x32x32xf32> -> vector<8x32x32xf32>
    %23 = vector.shape_cast %22 : vector<8x32x32xf32> to vector<256x32xf32>
    %cst_8 = arith.constant dense<0.000000e+00> : vector<256x32xf32>
    %24 = tpu.matmul %23, %4, %cst_8 {dimension_numbers = #tpu.dot_dimension_numbers<[1], [0], [0], [1], [0, 0, 1, 1], [], []>} : vector<256x32xf32>, vector<32x32xf32>, vector<256x32xf32> -> vector<256x32xf32>
    %25 = vector.shape_cast %24 : vector<256x32xf32> to vector<8x32x32xf32>
    %26 = arith.mulf %5, %6 : vector<4x32x32xf32>
    %27 = vector.shape_cast %26 : vector<4x32x32xf32> to vector<128x32xf32>
    %cst_9 = arith.constant dense<0.000000e+00> : vector<128x32xf32>
    %28 = tpu.matmul %27, %4, %cst_9 {dimension_numbers = #tpu.dot_dimension_numbers<[1], [0], [0], [1], [0, 0, 1, 1], [], []>} : vector<128x32xf32>, vector<32x32xf32>, vector<128x32xf32> -> vector<128x32xf32>
    %29 = vector.shape_cast %28 : vector<128x32xf32> to vector<4x32x32xf32>
    %30 = tpu.transpose %29, [0, 2, 1] : vector<4x32x32xf32> -> vector<4x32x32xf32>
    %31 = vector.shape_cast %30 : vector<4x32x32xf32> to vector<128x32xf32>
    %cst_10 = arith.constant dense<0.000000e+00> : vector<128x32xf32>
    %32 = tpu.matmul %31, %4, %cst_10 {dimension_numbers = #tpu.dot_dimension_numbers<[1], [0], [0], [1], [0, 0, 1, 1], [], []>} : vector<128x32xf32>, vector<32x32xf32>, vector<128x32xf32> -> vector<128x32xf32>
    %33 = vector.shape_cast %32 : vector<128x32xf32> to vector<4x32x32xf32>
    %34 = vector.extract_strided_slice %17 {offsets = [0, 0, 0], sizes = [4, 32, 32], strides = [1, 1, 1]} : vector<8x32x32xf32> to vector<4x32x32xf32>
    %35 = vector.extract_strided_slice %17 {offsets = [4, 0, 0], sizes = [4, 32, 32], strides = [1, 1, 1]} : vector<8x32x32xf32> to vector<4x32x32xf32>
    %36 = vector.extract_strided_slice %25 {offsets = [0, 0, 0], sizes = [4, 32, 32], strides = [1, 1, 1]} : vector<8x32x32xf32> to vector<4x32x32xf32>
    %37 = vector.extract_strided_slice %25 {offsets = [4, 0, 0], sizes = [4, 32, 32], strides = [1, 1, 1]} : vector<8x32x32xf32> to vector<4x32x32xf32>
    %38 = arith.mulf %34, %34 : vector<4x32x32xf32>
    %39 = arith.mulf %35, %35 : vector<4x32x32xf32>
    %40 = arith.mulf %34, %35 : vector<4x32x32xf32>
    %41 = arith.subf %36, %38 : vector<4x32x32xf32>
    %42 = arith.subf %37, %39 : vector<4x32x32xf32>
    %43 = arith.subf %33, %40 : vector<4x32x32xf32>
    %cst_11 = arith.constant 2.000000e+00 : f32
    %44 = vector.broadcast %cst_11 : f32 to vector<4x32x32xf32>
    %45 = arith.mulf %44, %43 : vector<4x32x32xf32>
    %cst_12 = arith.constant 8.99999984E-4 : f32
    %46 = vector.broadcast %cst_12 : f32 to vector<4x32x32xf32>
    %47 = arith.addf %45, %46 : vector<4x32x32xf32>
    %48 = arith.addf %41, %42 : vector<4x32x32xf32>
    %cst_13 = arith.constant 8.99999984E-4 : f32
    %49 = vector.broadcast %cst_13 : f32 to vector<4x32x32xf32>
    %50 = arith.addf %48, %49 : vector<4x32x32xf32>
    %51 = tpu.reciprocal %50 {approx = true} : vector<4x32x32xf32> -> vector<4x32x32xf32>
    %52 = arith.mulf %50, %51 : vector<4x32x32xf32>
    %cst_14 = arith.constant 2.000000e+00 : f32
    %53 = vector.broadcast %cst_14 : f32 to vector<4x32x32xf32>
    %54 = arith.subf %53, %52 : vector<4x32x32xf32>
    %55 = arith.mulf %51, %54 : vector<4x32x32xf32>
    %56 = arith.mulf %47, %55 : vector<4x32x32xf32>
    %cst_15 = arith.constant 2.000000e+00 : f32
    %57 = vector.broadcast %cst_15 : f32 to vector<4x32x32xf32>
    %58 = arith.mulf %57, %40 : vector<4x32x32xf32>
    %cst_16 = arith.constant 9.99999974E-5 : f32
    %59 = vector.broadcast %cst_16 : f32 to vector<4x32x32xf32>
    %60 = arith.addf %58, %59 : vector<4x32x32xf32>
    %61 = arith.mulf %56, %60 : vector<4x32x32xf32>
    %62 = arith.addf %38, %39 : vector<4x32x32xf32>
    %cst_17 = arith.constant 9.99999974E-5 : f32
    %63 = vector.broadcast %cst_17 : f32 to vector<4x32x32xf32>
    %64 = arith.addf %62, %63 : vector<4x32x32xf32>
    %65 = tpu.reciprocal %64 {approx = true} : vector<4x32x32xf32> -> vector<4x32x32xf32>
    %66 = arith.mulf %64, %65 : vector<4x32x32xf32>
    %cst_18 = arith.constant 2.000000e+00 : f32
    %67 = vector.broadcast %cst_18 : f32 to vector<4x32x32xf32>
    %68 = arith.subf %67, %66 : vector<4x32x32xf32>
    %69 = arith.mulf %65, %68 : vector<4x32x32xf32>
    %70 = arith.mulf %61, %69 : vector<4x32x32xf32>
    %71 = vector.shape_cast %70 : vector<4x32x32xf32> to vector<1x4x32x32xf32>
    %cst_19 = arith.constant dense<0.000000e+00> : vector<1xf32>
    %72 = vector.multi_reduction <add>, %71, %cst_19 [1, 2, 3] : vector<1x4x32x32xf32> to vector<1xf32>
    %73 = vector.shape_cast %72 : vector<1xf32> to vector<1x1x1x1xf32>
    %74 = vector.extract %73[0, 0, 0, 0] : f32 from vector<1x1x1x1xf32>
    %75 = vector.shape_cast %56 : vector<4x32x32xf32> to vector<1x4x32x32xf32>
    %cst_20 = arith.constant dense<0.000000e+00> : vector<1xf32>
    %76 = vector.multi_reduction <add>, %75, %cst_20 [1, 2, 3] : vector<1x4x32x32xf32> to vector<1xf32>
    %77 = vector.shape_cast %76 : vector<1xf32> to vector<1x1x1x1xf32>
    %78 = vector.extract %77[0, 0, 0, 0] : f32 from vector<1x1x1x1xf32>
    %c0_i32 = arith.constant 0 : i32
    %79 = vector.broadcast %c0_i32 : i32 to vector<1x1x128xi32>
    %80 = arith.cmpi eq, %2, %79 : vector<1x1x128xi32>
    %cst_21 = arith.constant 0.000000e+00 : f32
    %81 = vector.broadcast %74 : f32 to vector<1x1x128xf32>
    %82 = vector.broadcast %cst_21 : f32 to vector<1x1x128xf32>
    %83 = arith.select %80, %81, %82 : vector<1x1x128xi1>, vector<1x1x128xf32>
    %84 = arith.addf %3, %83 : vector<1x1x128xf32>
    %c5_i32 = arith.constant 5 : i32
    %85 = vector.broadcast %c5_i32 : i32 to vector<1x1x128xi32>
    %86 = arith.cmpi eq, %2, %85 : vector<1x1x128xi32>
    %cst_22 = arith.constant 0.000000e+00 : f32
    %87 = vector.broadcast %78 : f32 to vector<1x1x128xf32>
    %88 = vector.broadcast %cst_22 : f32 to vector<1x1x128xf32>
    %89 = arith.select %86, %87, %88 : vector<1x1x128xi1>, vector<1x1x128xf32>
    %90 = arith.addf %84, %89 : vector<1x1x128xf32>
    %c0_23 = arith.constant 0 : index
    %c0_24 = arith.constant 0 : index
    %91 = vector.load %arg7[%c0_23, %c0_24] : memref<32x16xf32, #tpu.memory_space<vmem>>, vector<32x16xf32>
    %92 = vector.shape_cast %1 : vector<8x32x32xf32> to vector<256x32xf32>
    %cst_25 = arith.constant dense<0.000000e+00> : vector<256x16xf32>
    %93 = tpu.matmul %92, %91, %cst_25 {dimension_numbers = #tpu.dot_dimension_numbers<[1], [0], [0], [1], [0, 0, 1, 1], [], []>} : vector<256x32xf32>, vector<32x16xf32>, vector<256x16xf32> -> vector<256x16xf32>
    %94 = vector.shape_cast %93 : vector<256x16xf32> to vector<8x32x16xf32>
    %95 = tpu.transpose %94, [0, 2, 1] : vector<8x32x16xf32> -> vector<8x16x32xf32>
    %96 = vector.shape_cast %95 : vector<8x16x32xf32> to vector<128x32xf32>
    %cst_26 = arith.constant dense<0.000000e+00> : vector<128x16xf32>
    %97 = tpu.matmul %96, %91, %cst_26 {dimension_numbers = #tpu.dot_dimension_numbers<[1], [0], [0], [1], [0, 0, 1, 1], [], []>} : vector<128x32xf32>, vector<32x16xf32>, vector<128x16xf32> -> vector<128x16xf32>
    %98 = vector.shape_cast %97 : vector<128x16xf32> to vector<8x16x16xf32>
    %c0_27 = arith.constant 0 : index
    %c0_28 = arith.constant 0 : index
    %99 = vector.load %arg3[%c0_27, %c0_28] : memref<16x16xf32, #tpu.memory_space<vmem>>, vector<16x16xf32>
    %100 = vector.extract_strided_slice %98 {offsets = [0, 0, 0], sizes = [4, 16, 16], strides = [1, 1, 1]} : vector<8x16x16xf32> to vector<4x16x16xf32>
    %101 = vector.extract_strided_slice %98 {offsets = [4, 0, 0], sizes = [4, 16, 16], strides = [1, 1, 1]} : vector<8x16x16xf32> to vector<4x16x16xf32>
    %102 = vector.shape_cast %98 : vector<8x16x16xf32> to vector<128x16xf32>
    %103 = arith.truncf %102 : vector<128x16xf32> to vector<128x16xbf16>
    %104 = arith.truncf %99 : vector<16x16xf32> to vector<16x16xbf16>
    %cst_29 = arith.constant dense<0.000000e+00> : vector<128x16xf32>
    %105 = tpu.matmul %103, %104, %cst_29 {dimension_numbers = #tpu.dot_dimension_numbers<[1], [0], [0], [1], [0, 0, 1, 1], [], []>} : vector<128x16xbf16>, vector<16x16xbf16>, vector<128x16xf32> -> vector<128x16xf32>
    %106 = vector.shape_cast %105 : vector<128x16xf32> to vector<8x16x16xf32>
    %107 = tpu.transpose %106, [0, 2, 1] : vector<8x16x16xf32> -> vector<8x16x16xf32>
    %108 = vector.shape_cast %107 : vector<8x16x16xf32> to vector<128x16xf32>
    %109 = arith.truncf %108 : vector<128x16xf32> to vector<128x16xbf16>
    %110 = arith.truncf %99 : vector<16x16xf32> to vector<16x16xbf16>
    %cst_30 = arith.constant dense<0.000000e+00> : vector<128x16xf32>
    %111 = tpu.matmul %109, %110, %cst_30 {dimension_numbers = #tpu.dot_dimension_numbers<[1], [0], [0], [1], [0, 0, 1, 1], [], []>} : vector<128x16xbf16>, vector<16x16xbf16>, vector<128x16xf32> -> vector<128x16xf32>
    %112 = vector.shape_cast %111 : vector<128x16xf32> to vector<8x16x16xf32>
    %113 = arith.mulf %98, %98 : vector<8x16x16xf32>
    %114 = vector.shape_cast %113 : vector<8x16x16xf32> to vector<128x16xf32>
    %cst_31 = arith.constant dense<0.000000e+00> : vector<128x16xf32>
    %115 = tpu.matmul %114, %99, %cst_31 {dimension_numbers = #tpu.dot_dimension_numbers<[1], [0], [0], [1], [0, 0, 1, 1], [], []>} : vector<128x16xf32>, vector<16x16xf32>, vector<128x16xf32> -> vector<128x16xf32>
    %116 = vector.shape_cast %115 : vector<128x16xf32> to vector<8x16x16xf32>
    %117 = tpu.transpose %116, [0, 2, 1] : vector<8x16x16xf32> -> vector<8x16x16xf32>
    %118 = vector.shape_cast %117 : vector<8x16x16xf32> to vector<128x16xf32>
    %cst_32 = arith.constant dense<0.000000e+00> : vector<128x16xf32>
    %119 = tpu.matmul %118, %99, %cst_32 {dimension_numbers = #tpu.dot_dimension_numbers<[1], [0], [0], [1], [0, 0, 1, 1], [], []>} : vector<128x16xf32>, vector<16x16xf32>, vector<128x16xf32> -> vector<128x16xf32>
    %120 = vector.shape_cast %119 : vector<128x16xf32> to vector<8x16x16xf32>
    %121 = arith.mulf %100, %101 : vector<4x16x16xf32>
    %122 = vector.shape_cast %121 : vector<4x16x16xf32> to vector<64x16xf32>
    %cst_33 = arith.constant dense<0.000000e+00> : vector<64x16xf32>
    %123 = tpu.matmul %122, %99, %cst_33 {dimension_numbers = #tpu.dot_dimension_numbers<[1], [0], [0], [1], [0, 0, 1, 1], [], []>} : vector<64x16xf32>, vector<16x16xf32>, vector<64x16xf32> -> vector<64x16xf32>
    %124 = vector.shape_cast %123 : vector<64x16xf32> to vector<4x16x16xf32>
    %125 = tpu.transpose %124, [0, 2, 1] : vector<4x16x16xf32> -> vector<4x16x16xf32>
    %126 = vector.shape_cast %125 : vector<4x16x16xf32> to vector<64x16xf32>
    %cst_34 = arith.constant dense<0.000000e+00> : vector<64x16xf32>
    %127 = tpu.matmul %126, %99, %cst_34 {dimension_numbers = #tpu.dot_dimension_numbers<[1], [0], [0], [1], [0, 0, 1, 1], [], []>} : vector<64x16xf32>, vector<16x16xf32>, vector<64x16xf32> -> vector<64x16xf32>
    %128 = vector.shape_cast %127 : vector<64x16xf32> to vector<4x16x16xf32>
    %129 = vector.extract_strided_slice %112 {offsets = [0, 0, 0], sizes = [4, 16, 16], strides = [1, 1, 1]} : vector<8x16x16xf32> to vector<4x16x16xf32>
    %130 = vector.extract_strided_slice %112 {offsets = [4, 0, 0], sizes = [4, 16, 16], strides = [1, 1, 1]} : vector<8x16x16xf32> to vector<4x16x16xf32>
    %131 = vector.extract_strided_slice %120 {offsets = [0, 0, 0], sizes = [4, 16, 16], strides = [1, 1, 1]} : vector<8x16x16xf32> to vector<4x16x16xf32>
    %132 = vector.extract_strided_slice %120 {offsets = [4, 0, 0], sizes = [4, 16, 16], strides = [1, 1, 1]} : vector<8x16x16xf32> to vector<4x16x16xf32>
    %133 = arith.mulf %129, %129 : vector<4x16x16xf32>
    %134 = arith.mulf %130, %130 : vector<4x16x16xf32>
    %135 = arith.mulf %129, %130 : vector<4x16x16xf32>
    %136 = arith.subf %131, %133 : vector<4x16x16xf32>
    %137 = arith.subf %132, %134 : vector<4x16x16xf32>
    %138 = arith.subf %128, %135 : vector<4x16x16xf32>
    %cst_35 = arith.constant 2.000000e+00 : f32
    %139 = vector.broadcast %cst_35 : f32 to vector<4x16x16xf32>
    %140 = arith.mulf %139, %138 : vector<4x16x16xf32>
    %cst_36 = arith.constant 8.99999984E-4 : f32
    %141 = vector.broadcast %cst_36 : f32 to vector<4x16x16xf32>
    %142 = arith.addf %140, %141 : vector<4x16x16xf32>
    %143 = arith.addf %136, %137 : vector<4x16x16xf32>
    %cst_37 = arith.constant 8.99999984E-4 : f32
    %144 = vector.broadcast %cst_37 : f32 to vector<4x16x16xf32>
    %145 = arith.addf %143, %144 : vector<4x16x16xf32>
    %146 = tpu.reciprocal %145 {approx = true} : vector<4x16x16xf32> -> vector<4x16x16xf32>
    %147 = arith.mulf %145, %146 : vector<4x16x16xf32>
    %cst_38 = arith.constant 2.000000e+00 : f32
    %148 = vector.broadcast %cst_38 : f32 to vector<4x16x16xf32>
    %149 = arith.subf %148, %147 : vector<4x16x16xf32>
    %150 = arith.mulf %146, %149 : vector<4x16x16xf32>
    %151 = arith.mulf %142, %150 : vector<4x16x16xf32>
    %cst_39 = arith.constant 2.000000e+00 : f32
    %152 = vector.broadcast %cst_39 : f32 to vector<4x16x16xf32>
    %153 = arith.mulf %152, %135 : vector<4x16x16xf32>
    %cst_40 = arith.constant 9.99999974E-5 : f32
    %154 = vector.broadcast %cst_40 : f32 to vector<4x16x16xf32>
    %155 = arith.addf %153, %154 : vector<4x16x16xf32>
    %156 = arith.mulf %151, %155 : vector<4x16x16xf32>
    %157 = arith.addf %133, %134 : vector<4x16x16xf32>
    %cst_41 = arith.constant 9.99999974E-5 : f32
    %158 = vector.broadcast %cst_41 : f32 to vector<4x16x16xf32>
    %159 = arith.addf %157, %158 : vector<4x16x16xf32>
    %160 = tpu.reciprocal %159 {approx = true} : vector<4x16x16xf32> -> vector<4x16x16xf32>
    %161 = arith.mulf %159, %160 : vector<4x16x16xf32>
    %cst_42 = arith.constant 2.000000e+00 : f32
    %162 = vector.broadcast %cst_42 : f32 to vector<4x16x16xf32>
    %163 = arith.subf %162, %161 : vector<4x16x16xf32>
    %164 = arith.mulf %160, %163 : vector<4x16x16xf32>
    %165 = arith.mulf %156, %164 : vector<4x16x16xf32>
    %166 = vector.shape_cast %165 : vector<4x16x16xf32> to vector<1x4x16x16xf32>
    %cst_43 = arith.constant dense<0.000000e+00> : vector<1xf32>
    %167 = vector.multi_reduction <add>, %166, %cst_43 [1, 2, 3] : vector<1x4x16x16xf32> to vector<1xf32>
    %168 = vector.shape_cast %167 : vector<1xf32> to vector<1x1x1x1xf32>
    %169 = vector.extract %168[0, 0, 0, 0] : f32 from vector<1x1x1x1xf32>
    %170 = vector.shape_cast %151 : vector<4x16x16xf32> to vector<1x4x16x16xf32>
    %cst_44 = arith.constant dense<0.000000e+00> : vector<1xf32>
    %171 = vector.multi_reduction <add>, %170, %cst_44 [1, 2, 3] : vector<1x4x16x16xf32> to vector<1xf32>
    %172 = vector.shape_cast %171 : vector<1xf32> to vector<1x1x1x1xf32>
    %173 = vector.extract %172[0, 0, 0, 0] : f32 from vector<1x1x1x1xf32>
    %c1_i32 = arith.constant 1 : i32
    %174 = vector.broadcast %c1_i32 : i32 to vector<1x1x128xi32>
    %175 = arith.cmpi eq, %2, %174 : vector<1x1x128xi32>
    %cst_45 = arith.constant 0.000000e+00 : f32
    %176 = vector.broadcast %169 : f32 to vector<1x1x128xf32>
    %177 = vector.broadcast %cst_45 : f32 to vector<1x1x128xf32>
    %178 = arith.select %175, %176, %177 : vector<1x1x128xi1>, vector<1x1x128xf32>
    %179 = arith.addf %90, %178 : vector<1x1x128xf32>
    %c6_i32 = arith.constant 6 : i32
    %180 = vector.broadcast %c6_i32 : i32 to vector<1x1x128xi32>
    %181 = arith.cmpi eq, %2, %180 : vector<1x1x128xi32>
    %cst_46 = arith.constant 0.000000e+00 : f32
    %182 = vector.broadcast %173 : f32 to vector<1x1x128xf32>
    %183 = vector.broadcast %cst_46 : f32 to vector<1x1x128xf32>
    %184 = arith.select %181, %182, %183 : vector<1x1x128xi1>, vector<1x1x128xf32>
    %185 = arith.addf %179, %184 : vector<1x1x128xf32>
    %c0_47 = arith.constant 0 : index
    %c0_48 = arith.constant 0 : index
    %186 = vector.load %arg8[%c0_47, %c0_48] : memref<16x8xf32, #tpu.memory_space<vmem>>, vector<16x8xf32>
    %187 = vector.shape_cast %98 : vector<8x16x16xf32> to vector<128x16xf32>
    %cst_49 = arith.constant dense<0.000000e+00> : vector<128x8xf32>
    %188 = tpu.matmul %187, %186, %cst_49 {dimension_numbers = #tpu.dot_dimension_numbers<[1], [0], [0], [1], [0, 0, 1, 1], [], []>} : vector<128x16xf32>, vector<16x8xf32>, vector<128x8xf32> -> vector<128x8xf32>
    %189 = vector.shape_cast %188 : vector<128x8xf32> to vector<8x16x8xf32>
    %190 = tpu.transpose %189, [0, 2, 1] : vector<8x16x8xf32> -> vector<8x8x16xf32>
    %191 = vector.shape_cast %190 : vector<8x8x16xf32> to vector<64x16xf32>
    %cst_50 = arith.constant dense<0.000000e+00> : vector<64x8xf32>
    %192 = tpu.matmul %191, %186, %cst_50 {dimension_numbers = #tpu.dot_dimension_numbers<[1], [0], [0], [1], [0, 0, 1, 1], [], []>} : vector<64x16xf32>, vector<16x8xf32>, vector<64x8xf32> -> vector<64x8xf32>
    %193 = vector.shape_cast %192 : vector<64x8xf32> to vector<8x8x8xf32>
    %c0_51 = arith.constant 0 : index
    %c0_52 = arith.constant 0 : index
    %194 = vector.load %arg4[%c0_51, %c0_52] : memref<8x8xf32, #tpu.memory_space<vmem>>, vector<8x8xf32>
    %195 = vector.extract_strided_slice %193 {offsets = [0, 0, 0], sizes = [4, 8, 8], strides = [1, 1, 1]} : vector<8x8x8xf32> to vector<4x8x8xf32>
    %196 = vector.extract_strided_slice %193 {offsets = [4, 0, 0], sizes = [4, 8, 8], strides = [1, 1, 1]} : vector<8x8x8xf32> to vector<4x8x8xf32>
    %197 = vector.shape_cast %193 : vector<8x8x8xf32> to vector<64x8xf32>
    %198 = arith.truncf %197 : vector<64x8xf32> to vector<64x8xbf16>
    %199 = arith.truncf %194 : vector<8x8xf32> to vector<8x8xbf16>
    %cst_53 = arith.constant dense<0.000000e+00> : vector<64x8xf32>
    %200 = tpu.matmul %198, %199, %cst_53 {dimension_numbers = #tpu.dot_dimension_numbers<[1], [0], [0], [1], [0, 0, 1, 1], [], []>} : vector<64x8xbf16>, vector<8x8xbf16>, vector<64x8xf32> -> vector<64x8xf32>
    %201 = vector.shape_cast %200 : vector<64x8xf32> to vector<8x8x8xf32>
    %202 = tpu.transpose %201, [0, 2, 1] : vector<8x8x8xf32> -> vector<8x8x8xf32>
    %203 = vector.shape_cast %202 : vector<8x8x8xf32> to vector<64x8xf32>
    %204 = arith.truncf %203 : vector<64x8xf32> to vector<64x8xbf16>
    %205 = arith.truncf %194 : vector<8x8xf32> to vector<8x8xbf16>
    %cst_54 = arith.constant dense<0.000000e+00> : vector<64x8xf32>
    %206 = tpu.matmul %204, %205, %cst_54 {dimension_numbers = #tpu.dot_dimension_numbers<[1], [0], [0], [1], [0, 0, 1, 1], [], []>} : vector<64x8xbf16>, vector<8x8xbf16>, vector<64x8xf32> -> vector<64x8xf32>
    %207 = vector.shape_cast %206 : vector<64x8xf32> to vector<8x8x8xf32>
    %208 = arith.mulf %193, %193 : vector<8x8x8xf32>
    %209 = vector.shape_cast %208 : vector<8x8x8xf32> to vector<64x8xf32>
    %cst_55 = arith.constant dense<0.000000e+00> : vector<64x8xf32>
    %210 = tpu.matmul %209, %194, %cst_55 {dimension_numbers = #tpu.dot_dimension_numbers<[1], [0], [0], [1], [0, 0, 1, 1], [], []>} : vector<64x8xf32>, vector<8x8xf32>, vector<64x8xf32> -> vector<64x8xf32>
    %211 = vector.shape_cast %210 : vector<64x8xf32> to vector<8x8x8xf32>
    %212 = tpu.transpose %211, [0, 2, 1] : vector<8x8x8xf32> -> vector<8x8x8xf32>
    %213 = vector.shape_cast %212 : vector<8x8x8xf32> to vector<64x8xf32>
    %cst_56 = arith.constant dense<0.000000e+00> : vector<64x8xf32>
    %214 = tpu.matmul %213, %194, %cst_56 {dimension_numbers = #tpu.dot_dimension_numbers<[1], [0], [0], [1], [0, 0, 1, 1], [], []>} : vector<64x8xf32>, vector<8x8xf32>, vector<64x8xf32> -> vector<64x8xf32>
    %215 = vector.shape_cast %214 : vector<64x8xf32> to vector<8x8x8xf32>
    %216 = arith.mulf %195, %196 : vector<4x8x8xf32>
    %217 = vector.shape_cast %216 : vector<4x8x8xf32> to vector<32x8xf32>
    %cst_57 = arith.constant dense<0.000000e+00> : vector<32x8xf32>
    %218 = tpu.matmul %217, %194, %cst_57 {dimension_numbers = #tpu.dot_dimension_numbers<[1], [0], [0], [1], [0, 0, 1, 1], [], []>} : vector<32x8xf32>, vector<8x8xf32>, vector<32x8xf32> -> vector<32x8xf32>
    %219 = vector.shape_cast %218 : vector<32x8xf32> to vector<4x8x8xf32>
    %220 = tpu.transpose %219, [0, 2, 1] : vector<4x8x8xf32> -> vector<4x8x8xf32>
    %221 = vector.shape_cast %220 : vector<4x8x8xf32> to vector<32x8xf32>
    %cst_58 = arith.constant dense<0.000000e+00> : vector<32x8xf32>
    %222 = tpu.matmul %221, %194, %cst_58 {dimension_numbers = #tpu.dot_dimension_numbers<[1], [0], [0], [1], [0, 0, 1, 1], [], []>} : vector<32x8xf32>, vector<8x8xf32>, vector<32x8xf32> -> vector<32x8xf32>
    %223 = vector.shape_cast %222 : vector<32x8xf32> to vector<4x8x8xf32>
    %224 = vector.extract_strided_slice %207 {offsets = [0, 0, 0], sizes = [4, 8, 8], strides = [1, 1, 1]} : vector<8x8x8xf32> to vector<4x8x8xf32>
    %225 = vector.extract_strided_slice %207 {offsets = [4, 0, 0], sizes = [4, 8, 8], strides = [1, 1, 1]} : vector<8x8x8xf32> to vector<4x8x8xf32>
    %226 = vector.extract_strided_slice %215 {offsets = [0, 0, 0], sizes = [4, 8, 8], strides = [1, 1, 1]} : vector<8x8x8xf32> to vector<4x8x8xf32>
    %227 = vector.extract_strided_slice %215 {offsets = [4, 0, 0], sizes = [4, 8, 8], strides = [1, 1, 1]} : vector<8x8x8xf32> to vector<4x8x8xf32>
    %228 = arith.mulf %224, %224 : vector<4x8x8xf32>
    %229 = arith.mulf %225, %225 : vector<4x8x8xf32>
    %230 = arith.mulf %224, %225 : vector<4x8x8xf32>
    %231 = arith.subf %226, %228 : vector<4x8x8xf32>
    %232 = arith.subf %227, %229 : vector<4x8x8xf32>
    %233 = arith.subf %223, %230 : vector<4x8x8xf32>
    %cst_59 = arith.constant 2.000000e+00 : f32
    %234 = vector.broadcast %cst_59 : f32 to vector<4x8x8xf32>
    %235 = arith.mulf %234, %233 : vector<4x8x8xf32>
    %cst_60 = arith.constant 8.99999984E-4 : f32
    %236 = vector.broadcast %cst_60 : f32 to vector<4x8x8xf32>
    %237 = arith.addf %235, %236 : vector<4x8x8xf32>
    %238 = arith.addf %231, %232 : vector<4x8x8xf32>
    %cst_61 = arith.constant 8.99999984E-4 : f32
    %239 = vector.broadcast %cst_61 : f32 to vector<4x8x8xf32>
    %240 = arith.addf %238, %239 : vector<4x8x8xf32>
    %241 = tpu.reciprocal %240 {approx = true} : vector<4x8x8xf32> -> vector<4x8x8xf32>
    %242 = arith.mulf %240, %241 : vector<4x8x8xf32>
    %cst_62 = arith.constant 2.000000e+00 : f32
    %243 = vector.broadcast %cst_62 : f32 to vector<4x8x8xf32>
    %244 = arith.subf %243, %242 : vector<4x8x8xf32>
    %245 = arith.mulf %241, %244 : vector<4x8x8xf32>
    %246 = arith.mulf %237, %245 : vector<4x8x8xf32>
    %cst_63 = arith.constant 2.000000e+00 : f32
    %247 = vector.broadcast %cst_63 : f32 to vector<4x8x8xf32>
    %248 = arith.mulf %247, %230 : vector<4x8x8xf32>
    %cst_64 = arith.constant 9.99999974E-5 : f32
    %249 = vector.broadcast %cst_64 : f32 to vector<4x8x8xf32>
    %250 = arith.addf %248, %249 : vector<4x8x8xf32>
    %251 = arith.mulf %246, %250 : vector<4x8x8xf32>
    %252 = arith.addf %228, %229 : vector<4x8x8xf32>
    %cst_65 = arith.constant 9.99999974E-5 : f32
    %253 = vector.broadcast %cst_65 : f32 to vector<4x8x8xf32>
    %254 = arith.addf %252, %253 : vector<4x8x8xf32>
    %255 = tpu.reciprocal %254 {approx = true} : vector<4x8x8xf32> -> vector<4x8x8xf32>
    %256 = arith.mulf %254, %255 : vector<4x8x8xf32>
    %cst_66 = arith.constant 2.000000e+00 : f32
    %257 = vector.broadcast %cst_66 : f32 to vector<4x8x8xf32>
    %258 = arith.subf %257, %256 : vector<4x8x8xf32>
    %259 = arith.mulf %255, %258 : vector<4x8x8xf32>
    %260 = arith.mulf %251, %259 : vector<4x8x8xf32>
    %261 = vector.shape_cast %260 : vector<4x8x8xf32> to vector<1x4x8x8xf32>
    %cst_67 = arith.constant dense<0.000000e+00> : vector<1xf32>
    %262 = vector.multi_reduction <add>, %261, %cst_67 [1, 2, 3] : vector<1x4x8x8xf32> to vector<1xf32>
    %263 = vector.shape_cast %262 : vector<1xf32> to vector<1x1x1x1xf32>
    %264 = vector.extract %263[0, 0, 0, 0] : f32 from vector<1x1x1x1xf32>
    %265 = vector.shape_cast %246 : vector<4x8x8xf32> to vector<1x4x8x8xf32>
    %cst_68 = arith.constant dense<0.000000e+00> : vector<1xf32>
    %266 = vector.multi_reduction <add>, %265, %cst_68 [1, 2, 3] : vector<1x4x8x8xf32> to vector<1xf32>
    %267 = vector.shape_cast %266 : vector<1xf32> to vector<1x1x1x1xf32>
    %268 = vector.extract %267[0, 0, 0, 0] : f32 from vector<1x1x1x1xf32>
    %c2_i32 = arith.constant 2 : i32
    %269 = vector.broadcast %c2_i32 : i32 to vector<1x1x128xi32>
    %270 = arith.cmpi eq, %2, %269 : vector<1x1x128xi32>
    %cst_69 = arith.constant 0.000000e+00 : f32
    %271 = vector.broadcast %264 : f32 to vector<1x1x128xf32>
    %272 = vector.broadcast %cst_69 : f32 to vector<1x1x128xf32>
    %273 = arith.select %270, %271, %272 : vector<1x1x128xi1>, vector<1x1x128xf32>
    %274 = arith.addf %185, %273 : vector<1x1x128xf32>
    %c7_i32 = arith.constant 7 : i32
    %275 = vector.broadcast %c7_i32 : i32 to vector<1x1x128xi32>
    %276 = arith.cmpi eq, %2, %275 : vector<1x1x128xi32>
    %cst_70 = arith.constant 0.000000e+00 : f32
    %277 = vector.broadcast %268 : f32 to vector<1x1x128xf32>
    %278 = vector.broadcast %cst_70 : f32 to vector<1x1x128xf32>
    %279 = arith.select %276, %277, %278 : vector<1x1x128xi1>, vector<1x1x128xf32>
    %280 = arith.addf %274, %279 : vector<1x1x128xf32>
    %c0_71 = arith.constant 0 : index
    %c0_72 = arith.constant 0 : index
    %281 = vector.load %arg9[%c0_71, %c0_72] : memref<8x4xf32, #tpu.memory_space<vmem>>, vector<8x4xf32>
    %282 = vector.shape_cast %281 : vector<8x4xf32> to vector<1x8x4xf32>
    %283 = vector.shape_cast %282 : vector<1x8x4xf32> to vector<1x8x4xf32>
    %284 = vector.broadcast %283 : vector<1x8x4xf32> to vector<8x8x4xf32>
    "tpu.trace_start"() <{level = 10 : i32, message = "nhw,nwv->nhv"}> : () -> ()
    %cst_73 = arith.constant dense<0.000000e+00> : vector<8x8x4xf32>
    %285 = tpu.matmul %193, %284, %cst_73 {dimension_numbers = #tpu.dot_dimension_numbers<[2], [1], [1], [2], [0, 0, 0, 1, 1, 2], [0], [0]>} : vector<8x8x8xf32>, vector<8x8x4xf32>, vector<8x8x4xf32> -> vector<8x8x4xf32>
    "tpu.trace_stop"() : () -> ()
    %286 = tpu.transpose %281, [1, 0] : vector<8x4xf32> -> vector<4x8xf32>
    %287 = vector.shape_cast %286 : vector<4x8xf32> to vector<1x4x8xf32>
    %288 = vector.shape_cast %287 : vector<1x4x8xf32> to vector<1x4x8xf32>
    %289 = vector.broadcast %288 : vector<1x4x8xf32> to vector<8x4x8xf32>
    "tpu.trace_start"() <{level = 10 : i32, message = "nih,nhw->niw"}> : () -> ()
    %cst_74 = arith.constant dense<0.000000e+00> : vector<8x4x4xf32>
    %290 = tpu.matmul %289, %285, %cst_74 {dimension_numbers = #tpu.dot_dimension_numbers<[2], [1], [1], [2], [0, 0, 0, 1, 1, 2], [0], [0]>} : vector<8x4x8xf32>, vector<8x8x4xf32>, vector<8x4x4xf32> -> vector<8x4x4xf32>
    "tpu.trace_stop"() : () -> ()
    %c0_75 = arith.constant 0 : index
    %c0_76 = arith.constant 0 : index
    %291 = vector.load %arg5[%c0_75, %c0_76] : memref<4x4xf32, #tpu.memory_space<vmem>>, vector<4x4xf32>
    %292 = vector.extract_strided_slice %290 {offsets = [0, 0, 0], sizes = [4, 4, 4], strides = [1, 1, 1]} : vector<8x4x4xf32> to vector<4x4x4xf32>
    %293 = vector.extract_strided_slice %290 {offsets = [4, 0, 0], sizes = [4, 4, 4], strides = [1, 1, 1]} : vector<8x4x4xf32> to vector<4x4x4xf32>
    %294 = vector.shape_cast %291 : vector<4x4xf32> to vector<1x4x4xf32>
    %295 = vector.shape_cast %294 : vector<1x4x4xf32> to vector<1x4x4xf32>
    %296 = vector.broadcast %295 : vector<1x4x4xf32> to vector<8x4x4xf32>
    "tpu.trace_start"() <{level = 10 : i32, message = "nhw,nwv->nhv"}> : () -> ()
    %cst_77 = arith.constant dense<0.000000e+00> : vector<8x4x4xf32>
    %297 = tpu.matmul %290, %296, %cst_77 {dimension_numbers = #tpu.dot_dimension_numbers<[2], [1], [1], [2], [0, 0, 0, 1, 1, 2], [0], [0]>} : vector<8x4x4xf32>, vector<8x4x4xf32>, vector<8x4x4xf32> -> vector<8x4x4xf32>
    "tpu.trace_stop"() : () -> ()
    %298 = vector.shape_cast %291 : vector<4x4xf32> to vector<1x4x4xf32>
    %299 = vector.shape_cast %298 : vector<1x4x4xf32> to vector<1x4x4xf32>
    %300 = vector.broadcast %299 : vector<1x4x4xf32> to vector<8x4x4xf32>
    "tpu.trace_start"() <{level = 10 : i32, message = "nih,nhw->niw"}> : () -> ()
    %cst_78 = arith.constant dense<0.000000e+00> : vector<8x4x4xf32>
    %301 = tpu.matmul %300, %297, %cst_78 {dimension_numbers = #tpu.dot_dimension_numbers<[2], [1], [1], [2], [0, 0, 0, 1, 1, 2], [0], [0]>} : vector<8x4x4xf32>, vector<8x4x4xf32>, vector<8x4x4xf32> -> vector<8x4x4xf32>
    "tpu.trace_stop"() : () -> ()
    %302 = arith.mulf %290, %290 : vector<8x4x4xf32>
    %303 = vector.shape_cast %291 : vector<4x4xf32> to vector<1x4x4xf32>
    %304 = vector.shape_cast %303 : vector<1x4x4xf32> to vector<1x4x4xf32>
    %305 = vector.broadcast %304 : vector<1x4x4xf32> to vector<8x4x4xf32>
    "tpu.trace_start"() <{level = 10 : i32, message = "nhw,nwv->nhv"}> : () -> ()
    %cst_79 = arith.constant dense<0.000000e+00> : vector<8x4x4xf32>
    %306 = tpu.matmul %302, %305, %cst_79 {dimension_numbers = #tpu.dot_dimension_numbers<[2], [1], [1], [2], [0, 0, 0, 1, 1, 2], [0], [0]>} : vector<8x4x4xf32>, vector<8x4x4xf32>, vector<8x4x4xf32> -> vector<8x4x4xf32>
    "tpu.trace_stop"() : () -> ()
    %307 = vector.shape_cast %291 : vector<4x4xf32> to vector<1x4x4xf32>
    %308 = vector.shape_cast %307 : vector<1x4x4xf32> to vector<1x4x4xf32>
    %309 = vector.broadcast %308 : vector<1x4x4xf32> to vector<8x4x4xf32>
    "tpu.trace_start"() <{level = 10 : i32, message = "nih,nhw->niw"}> : () -> ()
    %cst_80 = arith.constant dense<0.000000e+00> : vector<8x4x4xf32>
    %310 = tpu.matmul %309, %306, %cst_80 {dimension_numbers = #tpu.dot_dimension_numbers<[2], [1], [1], [2], [0, 0, 0, 1, 1, 2], [0], [0]>} : vector<8x4x4xf32>, vector<8x4x4xf32>, vector<8x4x4xf32> -> vector<8x4x4xf32>
    "tpu.trace_stop"() : () -> ()
    %311 = arith.mulf %292, %293 : vector<4x4x4xf32>
    %312 = vector.shape_cast %291 : vector<4x4xf32> to vector<1x4x4xf32>
    %313 = vector.shape_cast %312 : vector<1x4x4xf32> to vector<1x4x4xf32>
    %314 = vector.broadcast %313 : vector<1x4x4xf32> to vector<4x4x4xf32>
    "tpu.trace_start"() <{level = 10 : i32, message = "nhw,nwv->nhv"}> : () -> ()
    %cst_81 = arith.constant dense<0.000000e+00> : vector<4x4x4xf32>
    %315 = tpu.matmul %311, %314, %cst_81 {dimension_numbers = #tpu.dot_dimension_numbers<[2], [1], [1], [2], [0, 0, 0, 1, 1, 2], [0], [0]>} : vector<4x4x4xf32>, vector<4x4x4xf32>, vector<4x4x4xf32> -> vector<4x4x4xf32>
    "tpu.trace_stop"() : () -> ()
    %316 = vector.shape_cast %291 : vector<4x4xf32> to vector<1x4x4xf32>
    %317 = vector.shape_cast %316 : vector<1x4x4xf32> to vector<1x4x4xf32>
    %318 = vector.broadcast %317 : vector<1x4x4xf32> to vector<4x4x4xf32>
    "tpu.trace_start"() <{level = 10 : i32, message = "nih,nhw->niw"}> : () -> ()
    %cst_82 = arith.constant dense<0.000000e+00> : vector<4x4x4xf32>
    %319 = tpu.matmul %318, %315, %cst_82 {dimension_numbers = #tpu.dot_dimension_numbers<[2], [1], [1], [2], [0, 0, 0, 1, 1, 2], [0], [0]>} : vector<4x4x4xf32>, vector<4x4x4xf32>, vector<4x4x4xf32> -> vector<4x4x4xf32>
    "tpu.trace_stop"() : () -> ()
    %320 = vector.extract_strided_slice %301 {offsets = [0, 0, 0], sizes = [4, 4, 4], strides = [1, 1, 1]} : vector<8x4x4xf32> to vector<4x4x4xf32>
    %321 = vector.extract_strided_slice %301 {offsets = [4, 0, 0], sizes = [4, 4, 4], strides = [1, 1, 1]} : vector<8x4x4xf32> to vector<4x4x4xf32>
    %322 = vector.extract_strided_slice %310 {offsets = [0, 0, 0], sizes = [4, 4, 4], strides = [1, 1, 1]} : vector<8x4x4xf32> to vector<4x4x4xf32>
    %323 = vector.extract_strided_slice %310 {offsets = [4, 0, 0], sizes = [4, 4, 4], strides = [1, 1, 1]} : vector<8x4x4xf32> to vector<4x4x4xf32>
    %324 = arith.mulf %320, %320 : vector<4x4x4xf32>
    %325 = arith.mulf %321, %321 : vector<4x4x4xf32>
    %326 = arith.mulf %320, %321 : vector<4x4x4xf32>
    %327 = arith.subf %322, %324 : vector<4x4x4xf32>
    %328 = arith.subf %323, %325 : vector<4x4x4xf32>
    %329 = arith.subf %319, %326 : vector<4x4x4xf32>
    %cst_83 = arith.constant 2.000000e+00 : f32
    %330 = vector.broadcast %cst_83 : f32 to vector<4x4x4xf32>
    %331 = arith.mulf %330, %329 : vector<4x4x4xf32>
    %cst_84 = arith.constant 8.99999984E-4 : f32
    %332 = vector.broadcast %cst_84 : f32 to vector<4x4x4xf32>
    %333 = arith.addf %331, %332 : vector<4x4x4xf32>
    %334 = arith.addf %327, %328 : vector<4x4x4xf32>
    %cst_85 = arith.constant 8.99999984E-4 : f32
    %335 = vector.broadcast %cst_85 : f32 to vector<4x4x4xf32>
    %336 = arith.addf %334, %335 : vector<4x4x4xf32>
    %337 = tpu.reciprocal %336 {approx = true} : vector<4x4x4xf32> -> vector<4x4x4xf32>
    %338 = arith.mulf %336, %337 : vector<4x4x4xf32>
    %cst_86 = arith.constant 2.000000e+00 : f32
    %339 = vector.broadcast %cst_86 : f32 to vector<4x4x4xf32>
    %340 = arith.subf %339, %338 : vector<4x4x4xf32>
    %341 = arith.mulf %337, %340 : vector<4x4x4xf32>
    %342 = arith.mulf %333, %341 : vector<4x4x4xf32>
    %cst_87 = arith.constant 2.000000e+00 : f32
    %343 = vector.broadcast %cst_87 : f32 to vector<4x4x4xf32>
    %344 = arith.mulf %343, %326 : vector<4x4x4xf32>
    %cst_88 = arith.constant 9.99999974E-5 : f32
    %345 = vector.broadcast %cst_88 : f32 to vector<4x4x4xf32>
    %346 = arith.addf %344, %345 : vector<4x4x4xf32>
    %347 = arith.mulf %342, %346 : vector<4x4x4xf32>
    %348 = arith.addf %324, %325 : vector<4x4x4xf32>
    %cst_89 = arith.constant 9.99999974E-5 : f32
    %349 = vector.broadcast %cst_89 : f32 to vector<4x4x4xf32>
    %350 = arith.addf %348, %349 : vector<4x4x4xf32>
    %351 = tpu.reciprocal %350 {approx = true} : vector<4x4x4xf32> -> vector<4x4x4xf32>
    %352 = arith.mulf %350, %351 : vector<4x4x4xf32>
    %cst_90 = arith.constant 2.000000e+00 : f32
    %353 = vector.broadcast %cst_90 : f32 to vector<4x4x4xf32>
    %354 = arith.subf %353, %352 : vector<4x4x4xf32>
    %355 = arith.mulf %351, %354 : vector<4x4x4xf32>
    %356 = arith.mulf %347, %355 : vector<4x4x4xf32>
    %357 = vector.shape_cast %356 : vector<4x4x4xf32> to vector<1x4x4x4xf32>
    %cst_91 = arith.constant dense<0.000000e+00> : vector<1xf32>
    %358 = vector.multi_reduction <add>, %357, %cst_91 [1, 2, 3] : vector<1x4x4x4xf32> to vector<1xf32>
    %359 = vector.shape_cast %358 : vector<1xf32> to vector<1x1x1x1xf32>
    %360 = vector.extract %359[0, 0, 0, 0] : f32 from vector<1x1x1x1xf32>
    %361 = vector.shape_cast %342 : vector<4x4x4xf32> to vector<1x4x4x4xf32>
    %cst_92 = arith.constant dense<0.000000e+00> : vector<1xf32>
    %362 = vector.multi_reduction <add>, %361, %cst_92 [1, 2, 3] : vector<1x4x4x4xf32> to vector<1xf32>
    %363 = vector.shape_cast %362 : vector<1xf32> to vector<1x1x1x1xf32>
    %364 = vector.extract %363[0, 0, 0, 0] : f32 from vector<1x1x1x1xf32>
    %c3_i32 = arith.constant 3 : i32
    %365 = vector.broadcast %c3_i32 : i32 to vector<1x1x128xi32>
    %366 = arith.cmpi eq, %2, %365 : vector<1x1x128xi32>
    %cst_93 = arith.constant 0.000000e+00 : f32
    %367 = vector.broadcast %360 : f32 to vector<1x1x128xf32>
    %368 = vector.broadcast %cst_93 : f32 to vector<1x1x128xf32>
    %369 = arith.select %366, %367, %368 : vector<1x1x128xi1>, vector<1x1x128xf32>
    %370 = arith.addf %280, %369 : vector<1x1x128xf32>
    %c8_i32 = arith.constant 8 : i32
    %371 = vector.broadcast %c8_i32 : i32 to vector<1x1x128xi32>
    %372 = arith.cmpi eq, %2, %371 : vector<1x1x128xi32>
    %cst_94 = arith.constant 0.000000e+00 : f32
    %373 = vector.broadcast %364 : f32 to vector<1x1x128xf32>
    %374 = vector.broadcast %cst_94 : f32 to vector<1x1x128xf32>
    %375 = arith.select %372, %373, %374 : vector<1x1x128xi1>, vector<1x1x128xf32>
    %376 = arith.addf %370, %375 : vector<1x1x128xf32>
    %c0_95 = arith.constant 0 : index
    %c0_96 = arith.constant 0 : index
    %377 = vector.load %arg10[%c0_95, %c0_96] : memref<4x2xf32, #tpu.memory_space<vmem>>, vector<4x2xf32>
    %378 = vector.shape_cast %377 : vector<4x2xf32> to vector<1x4x2xf32>
    %379 = vector.shape_cast %378 : vector<1x4x2xf32> to vector<1x4x2xf32>
    %380 = vector.broadcast %379 : vector<1x4x2xf32> to vector<8x4x2xf32>
    "tpu.trace_start"() <{level = 10 : i32, message = "nhw,nwv->nhv"}> : () -> ()
    %cst_97 = arith.constant dense<0.000000e+00> : vector<8x4x2xf32>
    %381 = tpu.matmul %290, %380, %cst_97 {dimension_numbers = #tpu.dot_dimension_numbers<[2], [1], [1], [2], [0, 0, 0, 1, 1, 2], [0], [0]>} : vector<8x4x4xf32>, vector<8x4x2xf32>, vector<8x4x2xf32> -> vector<8x4x2xf32>
    "tpu.trace_stop"() : () -> ()
    %382 = tpu.transpose %377, [1, 0] : vector<4x2xf32> -> vector<2x4xf32>
    %383 = vector.shape_cast %382 : vector<2x4xf32> to vector<1x2x4xf32>
    %384 = vector.shape_cast %383 : vector<1x2x4xf32> to vector<1x2x4xf32>
    %385 = vector.broadcast %384 : vector<1x2x4xf32> to vector<8x2x4xf32>
    "tpu.trace_start"() <{level = 10 : i32, message = "nih,nhw->niw"}> : () -> ()
    %cst_98 = arith.constant dense<0.000000e+00> : vector<8x2x2xf32>
    %386 = tpu.matmul %385, %381, %cst_98 {dimension_numbers = #tpu.dot_dimension_numbers<[2], [1], [1], [2], [0, 0, 0, 1, 1, 2], [0], [0]>} : vector<8x2x4xf32>, vector<8x4x2xf32>, vector<8x2x2xf32> -> vector<8x2x2xf32>
    "tpu.trace_stop"() : () -> ()
    %c0_99 = arith.constant 0 : index
    %c0_100 = arith.constant 0 : index
    %387 = vector.load %arg6[%c0_99, %c0_100] : memref<2x2xf32, #tpu.memory_space<vmem>>, vector<2x2xf32>
    %388 = vector.extract_strided_slice %386 {offsets = [0, 0, 0], sizes = [4, 2, 2], strides = [1, 1, 1]} : vector<8x2x2xf32> to vector<4x2x2xf32>
    %389 = vector.extract_strided_slice %386 {offsets = [4, 0, 0], sizes = [4, 2, 2], strides = [1, 1, 1]} : vector<8x2x2xf32> to vector<4x2x2xf32>
    %390 = vector.shape_cast %387 : vector<2x2xf32> to vector<1x2x2xf32>
    %391 = vector.shape_cast %390 : vector<1x2x2xf32> to vector<1x2x2xf32>
    %392 = vector.broadcast %391 : vector<1x2x2xf32> to vector<8x2x2xf32>
    "tpu.trace_start"() <{level = 10 : i32, message = "nhw,nwv->nhv"}> : () -> ()
    %cst_101 = arith.constant dense<0.000000e+00> : vector<8x2x2xf32>
    %393 = tpu.matmul %386, %392, %cst_101 {dimension_numbers = #tpu.dot_dimension_numbers<[2], [1], [1], [2], [0, 0, 0, 1, 1, 2], [0], [0]>} : vector<8x2x2xf32>, vector<8x2x2xf32>, vector<8x2x2xf32> -> vector<8x2x2xf32>
    "tpu.trace_stop"() : () -> ()
    %394 = vector.shape_cast %387 : vector<2x2xf32> to vector<1x2x2xf32>
    %395 = vector.shape_cast %394 : vector<1x2x2xf32> to vector<1x2x2xf32>
    %396 = vector.broadcast %395 : vector<1x2x2xf32> to vector<8x2x2xf32>
    "tpu.trace_start"() <{level = 10 : i32, message = "nih,nhw->niw"}> : () -> ()
    %cst_102 = arith.constant dense<0.000000e+00> : vector<8x2x2xf32>
    %397 = tpu.matmul %396, %393, %cst_102 {dimension_numbers = #tpu.dot_dimension_numbers<[2], [1], [1], [2], [0, 0, 0, 1, 1, 2], [0], [0]>} : vector<8x2x2xf32>, vector<8x2x2xf32>, vector<8x2x2xf32> -> vector<8x2x2xf32>
    "tpu.trace_stop"() : () -> ()
    %398 = arith.mulf %386, %386 : vector<8x2x2xf32>
    %399 = vector.shape_cast %387 : vector<2x2xf32> to vector<1x2x2xf32>
    %400 = vector.shape_cast %399 : vector<1x2x2xf32> to vector<1x2x2xf32>
    %401 = vector.broadcast %400 : vector<1x2x2xf32> to vector<8x2x2xf32>
    "tpu.trace_start"() <{level = 10 : i32, message = "nhw,nwv->nhv"}> : () -> ()
    %cst_103 = arith.constant dense<0.000000e+00> : vector<8x2x2xf32>
    %402 = tpu.matmul %398, %401, %cst_103 {dimension_numbers = #tpu.dot_dimension_numbers<[2], [1], [1], [2], [0, 0, 0, 1, 1, 2], [0], [0]>} : vector<8x2x2xf32>, vector<8x2x2xf32>, vector<8x2x2xf32> -> vector<8x2x2xf32>
    "tpu.trace_stop"() : () -> ()
    %403 = vector.shape_cast %387 : vector<2x2xf32> to vector<1x2x2xf32>
    %404 = vector.shape_cast %403 : vector<1x2x2xf32> to vector<1x2x2xf32>
    %405 = vector.broadcast %404 : vector<1x2x2xf32> to vector<8x2x2xf32>
    "tpu.trace_start"() <{level = 10 : i32, message = "nih,nhw->niw"}> : () -> ()
    %cst_104 = arith.constant dense<0.000000e+00> : vector<8x2x2xf32>
    %406 = tpu.matmul %405, %402, %cst_104 {dimension_numbers = #tpu.dot_dimension_numbers<[2], [1], [1], [2], [0, 0, 0, 1, 1, 2], [0], [0]>} : vector<8x2x2xf32>, vector<8x2x2xf32>, vector<8x2x2xf32> -> vector<8x2x2xf32>
    "tpu.trace_stop"() : () -> ()
    %407 = arith.mulf %388, %389 : vector<4x2x2xf32>
    %408 = vector.shape_cast %387 : vector<2x2xf32> to vector<1x2x2xf32>
    %409 = vector.shape_cast %408 : vector<1x2x2xf32> to vector<1x2x2xf32>
    %410 = vector.broadcast %409 : vector<1x2x2xf32> to vector<4x2x2xf32>
    "tpu.trace_start"() <{level = 10 : i32, message = "nhw,nwv->nhv"}> : () -> ()
    %cst_105 = arith.constant dense<0.000000e+00> : vector<4x2x2xf32>
    %411 = tpu.matmul %407, %410, %cst_105 {dimension_numbers = #tpu.dot_dimension_numbers<[2], [1], [1], [2], [0, 0, 0, 1, 1, 2], [0], [0]>} : vector<4x2x2xf32>, vector<4x2x2xf32>, vector<4x2x2xf32> -> vector<4x2x2xf32>
    "tpu.trace_stop"() : () -> ()
    %412 = vector.shape_cast %387 : vector<2x2xf32> to vector<1x2x2xf32>
    %413 = vector.shape_cast %412 : vector<1x2x2xf32> to vector<1x2x2xf32>
    %414 = vector.broadcast %413 : vector<1x2x2xf32> to vector<4x2x2xf32>
    "tpu.trace_start"() <{level = 10 : i32, message = "nih,nhw->niw"}> : () -> ()
    %cst_106 = arith.constant dense<0.000000e+00> : vector<4x2x2xf32>
    %415 = tpu.matmul %414, %411, %cst_106 {dimension_numbers = #tpu.dot_dimension_numbers<[2], [1], [1], [2], [0, 0, 0, 1, 1, 2], [0], [0]>} : vector<4x2x2xf32>, vector<4x2x2xf32>, vector<4x2x2xf32> -> vector<4x2x2xf32>
    "tpu.trace_stop"() : () -> ()
    %416 = vector.extract_strided_slice %397 {offsets = [0, 0, 0], sizes = [4, 2, 2], strides = [1, 1, 1]} : vector<8x2x2xf32> to vector<4x2x2xf32>
    %417 = vector.extract_strided_slice %397 {offsets = [4, 0, 0], sizes = [4, 2, 2], strides = [1, 1, 1]} : vector<8x2x2xf32> to vector<4x2x2xf32>
    %418 = vector.extract_strided_slice %406 {offsets = [0, 0, 0], sizes = [4, 2, 2], strides = [1, 1, 1]} : vector<8x2x2xf32> to vector<4x2x2xf32>
    %419 = vector.extract_strided_slice %406 {offsets = [4, 0, 0], sizes = [4, 2, 2], strides = [1, 1, 1]} : vector<8x2x2xf32> to vector<4x2x2xf32>
    %420 = arith.mulf %416, %416 : vector<4x2x2xf32>
    %421 = arith.mulf %417, %417 : vector<4x2x2xf32>
    %422 = arith.mulf %416, %417 : vector<4x2x2xf32>
    %423 = arith.subf %418, %420 : vector<4x2x2xf32>
    %424 = arith.subf %419, %421 : vector<4x2x2xf32>
    %425 = arith.subf %415, %422 : vector<4x2x2xf32>
    %cst_107 = arith.constant 2.000000e+00 : f32
    %426 = vector.broadcast %cst_107 : f32 to vector<4x2x2xf32>
    %427 = arith.mulf %426, %425 : vector<4x2x2xf32>
    %cst_108 = arith.constant 8.99999984E-4 : f32
    %428 = vector.broadcast %cst_108 : f32 to vector<4x2x2xf32>
    %429 = arith.addf %427, %428 : vector<4x2x2xf32>
    %430 = arith.addf %423, %424 : vector<4x2x2xf32>
    %cst_109 = arith.constant 8.99999984E-4 : f32
    %431 = vector.broadcast %cst_109 : f32 to vector<4x2x2xf32>
    %432 = arith.addf %430, %431 : vector<4x2x2xf32>
    %433 = tpu.reciprocal %432 {approx = true} : vector<4x2x2xf32> -> vector<4x2x2xf32>
    %434 = arith.mulf %432, %433 : vector<4x2x2xf32>
    %cst_110 = arith.constant 2.000000e+00 : f32
    %435 = vector.broadcast %cst_110 : f32 to vector<4x2x2xf32>
    %436 = arith.subf %435, %434 : vector<4x2x2xf32>
    %437 = arith.mulf %433, %436 : vector<4x2x2xf32>
    %438 = arith.mulf %429, %437 : vector<4x2x2xf32>
    %cst_111 = arith.constant 2.000000e+00 : f32
    %439 = vector.broadcast %cst_111 : f32 to vector<4x2x2xf32>
    %440 = arith.mulf %439, %422 : vector<4x2x2xf32>
    %cst_112 = arith.constant 9.99999974E-5 : f32
    %441 = vector.broadcast %cst_112 : f32 to vector<4x2x2xf32>
    %442 = arith.addf %440, %441 : vector<4x2x2xf32>
    %443 = arith.mulf %438, %442 : vector<4x2x2xf32>
    %444 = arith.addf %420, %421 : vector<4x2x2xf32>
    %cst_113 = arith.constant 9.99999974E-5 : f32
    %445 = vector.broadcast %cst_113 : f32 to vector<4x2x2xf32>
    %446 = arith.addf %444, %445 : vector<4x2x2xf32>
    %447 = tpu.reciprocal %446 {approx = true} : vector<4x2x2xf32> -> vector<4x2x2xf32>
    %448 = arith.mulf %446, %447 : vector<4x2x2xf32>
    %cst_114 = arith.constant 2.000000e+00 : f32
    %449 = vector.broadcast %cst_114 : f32 to vector<4x2x2xf32>
    %450 = arith.subf %449, %448 : vector<4x2x2xf32>
    %451 = arith.mulf %447, %450 : vector<4x2x2xf32>
    %452 = arith.mulf %443, %451 : vector<4x2x2xf32>
    %453 = vector.shape_cast %452 : vector<4x2x2xf32> to vector<1x4x2x2xf32>
    %cst_115 = arith.constant dense<0.000000e+00> : vector<1xf32>
    %454 = vector.multi_reduction <add>, %453, %cst_115 [1, 2, 3] : vector<1x4x2x2xf32> to vector<1xf32>
    %455 = vector.shape_cast %454 : vector<1xf32> to vector<1x1x1x1xf32>
    %456 = vector.extract %455[0, 0, 0, 0] : f32 from vector<1x1x1x1xf32>
    %457 = vector.shape_cast %438 : vector<4x2x2xf32> to vector<1x4x2x2xf32>
    %cst_116 = arith.constant dense<0.000000e+00> : vector<1xf32>
    %458 = vector.multi_reduction <add>, %457, %cst_116 [1, 2, 3] : vector<1x4x2x2xf32> to vector<1xf32>
    %459 = vector.shape_cast %458 : vector<1xf32> to vector<1x1x1x1xf32>
    %460 = vector.extract %459[0, 0, 0, 0] : f32 from vector<1x1x1x1xf32>
    %c4_i32 = arith.constant 4 : i32
    %461 = vector.broadcast %c4_i32 : i32 to vector<1x1x128xi32>
    %462 = arith.cmpi eq, %2, %461 : vector<1x1x128xi32>
    %cst_117 = arith.constant 0.000000e+00 : f32
    %463 = vector.broadcast %456 : f32 to vector<1x1x128xf32>
    %464 = vector.broadcast %cst_117 : f32 to vector<1x1x128xf32>
    %465 = arith.select %462, %463, %464 : vector<1x1x128xi1>, vector<1x1x128xf32>
    %466 = arith.addf %376, %465 : vector<1x1x128xf32>
    %c9_i32 = arith.constant 9 : i32
    %467 = vector.broadcast %c9_i32 : i32 to vector<1x1x128xi32>
    %468 = arith.cmpi eq, %2, %467 : vector<1x1x128xi32>
    %cst_118 = arith.constant 0.000000e+00 : f32
    %469 = vector.broadcast %460 : f32 to vector<1x1x128xf32>
    %470 = vector.broadcast %cst_118 : f32 to vector<1x1x128xf32>
    %471 = arith.select %468, %469, %470 : vector<1x1x128xi1>, vector<1x1x128xf32>
    %472 = arith.addf %466, %471 : vector<1x1x128xf32>
    %c0_119 = arith.constant 0 : index
    %c0_120 = arith.constant 0 : index
    %c0_121 = arith.constant 0 : index
    %473 = vector.load %arg11[%c0_119, %c0_120, %c0_121] : memref<1x1x128xf32, #tpu.memory_space<vmem>>, vector<1x1x128xf32>
    tpu.vector_store %arg11[%c0_119, %c0_120, %c0_121], %472 {strides = array<i32>} : memref<1x1x128xf32, #tpu.memory_space<vmem>>, vector<1x1x128xf32>,
    return
  }
  func.func @transform_0(%arg0: i32) -> (i32, i32, i32, i32) {
    %c0_i32 = arith.constant 0 : i32
    %c0_i32_0 = arith.constant 0 : i32
    %c0_i32_1 = arith.constant 0 : i32
    %c0_i32_2 = arith.constant 0 : i32
    return %c0_i32, %arg0, %c0_i32_0, %c0_i32_1 : i32, i32, i32, i32
  }
  func.func @transform_1(%arg0: i32) -> (i32, i32) {
    %c0_i32 = arith.constant 0 : i32
    %c0_i32_0 = arith.constant 0 : i32
    %c0_i32_1 = arith.constant 0 : i32
    return %c0_i32, %c0_i32_0 : i32, i32
  }
  func.func @transform_2(%arg0: i32) -> (i32, i32) {
    %c0_i32 = arith.constant 0 : i32
    %c0_i32_0 = arith.constant 0 : i32
    %c0_i32_1 = arith.constant 0 : i32
    return %c0_i32, %c0_i32_0 : i32, i32
  }
  func.func @transform_3(%arg0: i32) -> (i32, i32) {
    %c0_i32 = arith.constant 0 : i32
    %c0_i32_0 = arith.constant 0 : i32
    %c0_i32_1 = arith.constant 0 : i32
    return %c0_i32, %c0_i32_0 : i32, i32
  }
  func.func @transform_4(%arg0: i32) -> (i32, i32) {
    %c0_i32 = arith.constant 0 : i32
    %c0_i32_0 = arith.constant 0 : i32
    %c0_i32_1 = arith.constant 0 : i32
    return %c0_i32, %c0_i32_0 : i32, i32
  }
  func.func @transform_5(%arg0: i32) -> (i32, i32) {
    %c0_i32 = arith.constant 0 : i32
    %c0_i32_0 = arith.constant 0 : i32
    %c0_i32_1 = arith.constant 0 : i32
    return %c0_i32, %c0_i32_0 : i32, i32
  }
  func.func @transform_6(%arg0: i32) -> (i32, i32) {
    %c0_i32 = arith.constant 0 : i32
    %c0_i32_0 = arith.constant 0 : i32
    %c0_i32_1 = arith.constant 0 : i32
    return %c0_i32, %c0_i32_0 : i32, i32
  }
  func.func @transform_7(%arg0: i32) -> (i32, i32) {
    %c0_i32 = arith.constant 0 : i32
    %c0_i32_0 = arith.constant 0 : i32
    %c0_i32_1 = arith.constant 0 : i32
    return %c0_i32, %c0_i32_0 : i32, i32
  }
  func.func @transform_8(%arg0: i32) -> (i32, i32) {
    %c0_i32 = arith.constant 0 : i32
    %c0_i32_0 = arith.constant 0 : i32
    %c0_i32_1 = arith.constant 0 : i32
    return %c0_i32, %c0_i32_0 : i32, i32
  }
  func.func @transform_9(%arg0: i32) -> (i32, i32) {
    %c0_i32 = arith.constant 0 : i32
    %c0_i32_0 = arith.constant 0 : i32
    %c0_i32_1 = arith.constant 0 : i32
    return %c0_i32, %c0_i32_0 : i32, i32
  }
  func.func @transform_10(%arg0: i32) -> (i32, i32, i32) {
    %c0_i32 = arith.constant 0 : i32
    %c0_i32_0 = arith.constant 0 : i32
    %c0_i32_1 = arith.constant 0 : i32
    return %arg0, %c0_i32, %c0_i32_0 : i32, i32, i32
  }
}

</mosaic_0001>

<bundles_post_ra>
// kernel: ms_ssim.1
= control target key start
LH: loop header
LB: loop body
LE: loop exit
PB: predicated region body
PF: predicated region fallthrough
CT: control target
= control target key end

     0   :  { %s19140_s13 = smov 0   ;;  %s19142_s14 = smov 0   ;;  %s22145_s0 = inlined_call_operand.vmem [shape: f32[2,8,32,32], index: 0, kind: input, shape index: {}]   ;;  %s22146_s1 = inlined_call_operand.vmem [shape: f32[32,32], index: 1, kind: input, shape index: {}]   ;;  %s22147_s2 = inlined_call_operand.vmem [shape: f32[16,16], index: 2, kind: input, shape index: {}]   ;;  %s22148_s3 = inlined_call_operand.vmem [shape: f32[8,8], index: 3, kind: input, shape index: {}]   ;;  %s22149_s4 = inlined_call_operand.vmem [shape: f32[4,4], index: 4, kind: input, shape index: {}]   ;;  %s22150_s5 = inlined_call_operand.vmem [shape: f32[2,2], index: 5, kind: input, shape index: {}]   ;;  %s22151_s6 = inlined_call_operand.vmem [shape: f32[32,16], index: 6, kind: input, shape index: {}]   ;;  %s22152_s7 = inlined_call_operand.vmem [shape: f32[16,8], index: 7, kind: input, shape index: {}]   ;;  %s22153_s8 = inlined_call_operand.vmem [shape: f32[8,4], index: 8, kind: input, shape index: {}]   ;;  %s22154_s9 = inlined_call_operand.vmem [shape: f32[4,2], index: 9, kind: input, shape index: {}]   ;;  %s22155_s10 = inlined_call_operand.vmem [shape: f32[2,1,128], index: 10, kind: output, shape index: {}]  }
   0x1   :  { %s19144_s15 = smov 0  }
   0x2 LB: > { %s16384_s16 = sadd.s32 4294967295, %s19081_s15   ;;  %s19157_s17 = sadd.s32 1, %s19081_s15   ;;  %s19081_s15 = sphi %s19144_s15, %s22338_s15   ;;  %s19077_s14 = sphi %s19142_s14, %s22337_s14   ;;  %s19073_s13 = sphi %s19140_s13, %s22336_s13  }
   0x3   : > { %s24_s18 = ssub.s32 %s19081_s15, %s19157_s17  ;;  %s27_s19 = sadd.s32 1, %s19077_s14 }
   0x4   : > { %p25_p0 = scmp.eq.s32.totalorder %s24_s18, 0  ;;  %p34_p1 = scmp.ne.s32.totalorder %s19077_s14, %s19073_s13 }
   0x5   : > { %p35_p2 = scmp.eq.s32.totalorder %s19081_s15, 0  ;;  %p16387_p4 = scmp.ge.s32.totalorder %s19081_s15, 2 }
   0x6   : > { %s19166_s20 = scalar_select %p25_p0, %s19077_s14, %s27_s19  }
   0x7   : > { %p36_p3 = por %p35_p2, %p34_p1  ;;  %302 = sbr.rel (%p16387_p4) target bundleno = 34 (0x22), region = 52 }
   0xe   : > { %305 = sbr.rel (!%p36_p3) target bundleno = 34 (0x22), region = 56  ;;  %s307_s21 = sand.u32 (%p36_p3), 1, %s19077_s14  }
   0xf   : > { %s16901_s22 = sshll.u32 (%p36_p3), %s19081_s15, 7  ;;  %s16388_s23 = sshll.u32 (%p36_p3), %s307_s21, 8 }
  0x10   : > { %s19174_s26 = scalar_lea.vmem (%p36_p3), %s22145_s0, %s16901_s22  ;;  %s19179_s27 = scalar_lea.vmem (%p36_p3), [#allocation2], %s16388_s23 }
  0x11   : > { %v403_v0 = vld [vmem:[%s19174_s26] sm:$0xff] (%p36_p3)  ;;  %v405_v1 = vld [vmem:[%s19174_s26 + $0x8] sm:$0xff] (%p36_p3)  ;;  %v407_v2 = vld [vmem:[%s19174_s26 + $0x10] sm:$0xff] (%p36_p3) }
  0x12   : > { %404 = vst [vmem:[%s19179_s27] sm:$0xff] (%p36_p3), %v403_v0  ;;  %406 = vst [vmem:[%s19179_s27 + $0x8] sm:$0xff] (%p36_p3), %v405_v1  ;;  %v409_v3 = vld [vmem:[%s19174_s26 + $0x18] sm:$0xff] (%p36_p3)  ;;  %v411_v4 = vld [vmem:[%s19174_s26 + $0x20] sm:$0xff] (%p36_p3) }
  0x13   : > { %408 = vst [vmem:[%s19179_s27 + $0x10] sm:$0xff] (%p36_p3), %v407_v2  ;;  %v413_v5 = vld [vmem:[%s19174_s26 + $0x28] sm:$0xff] (%p36_p3)  ;;  %410 = vst [vmem:[%s19179_s27 + $0x18] sm:$0xff] (%p36_p3), %v409_v3  ;;  %v415_v6 = vld [vmem:[%s19174_s26 + $0x30] sm:$0xff] (%p36_p3) }
  0x14   : > { %412 = vst [vmem:[%s19179_s27 + $0x20] sm:$0xff] (%p36_p3), %v411_v4  ;;  %414 = vst [vmem:[%s19179_s27 + $0x28] sm:$0xff] (%p36_p3), %v413_v5  ;;  %v417_v7 = vld [vmem:[%s19174_s26 + $0x38] sm:$0xff] (%p36_p3)  ;;  %v419_v8 = vld [vmem:[%s19174_s26 + $0x40] sm:$0xff] (%p36_p3) }
  0x15   : > { %416 = vst [vmem:[%s19179_s27 + $0x30] sm:$0xff] %v415_v6  ;;  %418 = vst [vmem:[%s19179_s27 + $0x38] sm:$0xff] %v417_v7  ;;  %v421_v9 = vld [vmem:[%s19174_s26 + $0x48] sm:$0xff]  ;;  %v423_v10 = vld [vmem:[%s19174_s26 + $0x50] sm:$0xff] }
  0x16   : > { %420 = vst [vmem:[%s19179_s27 + $0x40] sm:$0xff] %v419_v8  ;;  %v425_v11 = vld [vmem:[%s19174_s26 + $0x58] sm:$0xff]  ;;  %422 = vst [vmem:[%s19179_s27 + $0x48] sm:$0xff] %v421_v9  ;;  %v427_v12 = vld [vmem:[%s19174_s26 + $0x60] sm:$0xff] }
  0x17   : > { %424 = vst [vmem:[%s19179_s27 + $0x50] sm:$0xff] %v423_v10  ;;  %426 = vst [vmem:[%s19179_s27 + $0x58] sm:$0xff] %v425_v11  ;;  %v429_v13 = vld [vmem:[%s19174_s26 + $0x68] sm:$0xff]  ;;  %v431_v14 = vld [vmem:[%s19174_s26 + $0x70] sm:$0xff] }
  0x18   : > { %428 = vst [vmem:[%s19179_s27 + $0x60] sm:$0xff] %v427_v12  ;;  %430 = vst [vmem:[%s19179_s27 + $0x68] sm:$0xff] %v429_v13  ;;  %v433_v15 = vld [vmem:[%s19174_s26 + $0x78] sm:$0xff]  ;;  %v435_v16 = vld [vmem:[%s19174_s26 + $0x100] sm:$0xff] }
  0x19   : > { %432 = vst [vmem:[%s19179_s27 + $0x70] sm:$0xff] %v431_v14  ;;  %v437_v17 = vld [vmem:[%s19174_s26 + $0x108] sm:$0xff]  ;;  %434 = vst [vmem:[%s19179_s27 + $0x78] sm:$0xff] %v433_v15  ;;  %v439_v18 = vld [vmem:[%s19174_s26 + $0x110] sm:$0xff] }
  0x1a   : > { %436 = vst [vmem:[%s19179_s27 + $0x80] sm:$0xff] %v435_v16  ;;  %438 = vst [vmem:[%s19179_s27 + $0x88] sm:$0xff] %v437_v17  ;;  %v441_v19 = vld [vmem:[%s19174_s26 + $0x118] sm:$0xff]  ;;  %v443_v20 = vld [vmem:[%s19174_s26 + $0x120] sm:$0xff] }
  0x1b   : > { %440 = vst [vmem:[%s19179_s27 + $0x90] sm:$0xff] %v439_v18  ;;  %442 = vst [vmem:[%s19179_s27 + $0x98] sm:$0xff] %v441_v19  ;;  %v445_v21 = vld [vmem:[%s19174_s26 + $0x128] sm:$0xff]  ;;  %v447_v22 = vld [vmem:[%s19174_s26 + $0x130] sm:$0xff] }
  0x1c   : > { %444 = vst [vmem:[%s19179_s27 + $0xa0] sm:$0xff] %v443_v20  ;;  %v449_v23 = vld [vmem:[%s19174_s26 + $0x138] sm:$0xff]  ;;  %446 = vst [vmem:[%s19179_s27 + $0xa8] sm:$0xff] %v445_v21  ;;  %v451_v24 = vld [vmem:[%s19174_s26 + $0x140] sm:$0xff] }
  0x1d   : > { %448 = vst [vmem:[%s19179_s27 + $0xb0] sm:$0xff] %v447_v22  ;;  %450 = vst [vmem:[%s19179_s27 + $0xb8] sm:$0xff] %v449_v23  ;;  %v453_v25 = vld [vmem:[%s19174_s26 + $0x148] sm:$0xff]  ;;  %v455_v26 = vld [vmem:[%s19174_s26 + $0x150] sm:$0xff] }
  0x1e   : > { %452 = vst [vmem:[%s19179_s27 + $0xc0] sm:$0xff] %v451_v24  ;;  %454 = vst [vmem:[%s19179_s27 + $0xc8] sm:$0xff] %v453_v25  ;;  %v457_v27 = vld [vmem:[%s19174_s26 + $0x158] sm:$0xff]  ;;  %v459_v28 = vld [vmem:[%s19174_s26 + $0x160] sm:$0xff] }
  0x1f   : > { %456 = vst [vmem:[%s19179_s27 + $0xd0] sm:$0xff] %v455_v26  ;;  %v461_v29 = vld [vmem:[%s19174_s26 + $0x168] sm:$0xff]  ;;  %458 = vst [vmem:[%s19179_s27 + $0xd8] sm:$0xff] %v457_v27  ;;  %v463_v30 = vld [vmem:[%s19174_s26 + $0x170] sm:$0xff] }
  0x20   : > { %460 = vst [vmem:[%s19179_s27 + $0xe0] sm:$0xff] %v459_v28  ;;  %462 = vst [vmem:[%s19179_s27 + $0xe8] sm:$0xff] %v461_v29  ;;  %v465_v31 = vld [vmem:[%s19174_s26 + $0x178] sm:$0xff] }
  0x21   : > { %464 = vst [vmem:[%s19179_s27 + $0xf0] sm:$0xff] %v463_v30  ;;  %466 = vst [vmem:[%s19179_s27 + $0xf8] sm:$0xff] %v465_v31 }
  0x22 PF: > { %p16392_p5 = scmp.ge.s32.totalorder %s19081_s15, 1  ;;  %p471_p6 = scmp.lt.s32.totalorder %s19081_s15, 3 }
  0x24   : > { %p472_p7 = pnand %p16392_p5, %p471_p6 }
  0x26   : > { %475 = sbr.rel (%p472_p7) target bundleno = 4835 (0x12e3), region = 94 }
  0x2d   : > { %v552_v32 = vld [vmem:[%s22146_s1] sm:$0xff]  ;;  %v553_v33 = vld [vmem:[%s22146_s1 + $0x8] sm:$0xff]  ;;  %v554_v34 = vld [vmem:[%s22146_s1 + $0x10] sm:$0xff]  ;;  %s478_s19 = sand.u32 1, %s19073_s13   ;;  %vm574_vm0 = vcmask 261120   ;;  %vm3998_vm1 = vcmask 130048  }
  0x2e   : > { %v19254_v35 = vpack.c.bf16 %v553_v33, %v552_v32  ;;  %v555_v36 = vld [vmem:[%s22146_s1 + $0x18] sm:$0xff]  ;;  %s16393_s23 = sshll.u32 %s478_s19, 8  ;;  %v3213_v25 = vld [vmem:[%s22151_s6] sm:$0xff]  ;;  %v3214_v26 = vld [vmem:[%s22151_s6 + $0x8] sm:$0xff]  ;;  %vm6412_vm2 = vcmask 1043456   ;;  %vm6399_vm3 = vcmask 64512  }
  0x2f   : > { %v19259_v37 = vpack.c.bf16 %v555_v36, %v554_v34  ;;  %s19262_s24 = scalar_lea.vmem [#allocation2], %s16393_s23  ;;  %v19442_v29 = vpack.c.bf16 %v3214_v26, %v3213_v25  ;;  %vm19084_vm4 = vmmov 0   ;;  %vm8987_vm5 = vcmask 31744   ;;  %p514_p8 = scmp.lt.s32.totalorder %s16384_s16, 1 }
  0x30   : > { %17470 = vmatprep.subr.bf16.mxu0 %v19254_v35  ;;  %v19265_v38 = vld [vmem:[%s19262_s24] sm:$0xff]  ;;  %v19268_v39 = vld [vmem:[%s19262_s24 + $0x8] sm:$0xff]  ;;  %17506 = vmatprep.subr.bf16.mxu1 %v19254_v35  ;;  %v19275_v41 = vld [vmem:[%s19262_s24 + $0x10] sm:$0xff]  ;;  %vm12025_vm6 = vcmask 27648   ;;  %vm13254_vm7 = vcmask 1041408   ;;  %vm13250_vm8 = vcmask 15360  }
  0x31   : > { %17471 = vmatpush3.bf16.msra.mxu0 %v19254_v35  ;;  %v556_v40 = vpack.c.bf16 %v19268_v39, %v19265_v38  ;;  %v19278_v42 = vld [vmem:[%s19262_s24 + $0x18] sm:$0xff]  ;;  %v19282_v43 = vld [vmem:[%s19262_s24 + $0x20] sm:$0xff]  ;;  %v19285_v44 = vld [vmem:[%s19262_s24 + $0x28] sm:$0xff]  ;;  %17507 = vmatpush3.bf16.msra.mxu1 %v19254_v35  ;;  %v1265_v22 = vmul.f32 %v19265_v38, %v19265_v38  ;;  %v1266_v23 = vmul.f32 %v19268_v39, %v19268_v39  ;;  %vm16289_vm9 = vcmask 9216   ;;  %s22340_s16 = smov (!%p514_p8, %s16384_s16), 1 }
  0x32   : > { %17472 = vmatprep.subr.bf16.mxu0 %v19259_v37  ;;  %v557_v45 = vpack.c.bf16 %v19278_v42, %v19275_v41  ;;  %v558_v46 = vpack.c.bf16 %v19285_v44, %v19282_v43  ;;  %17508 = vmatprep.subr.bf16.mxu1 %v19259_v37  ;;  %v19300_v47 = vld [vmem:[%s19262_s24 + $0x30] sm:$0xff]  ;;  %v19303_v48 = vld [vmem:[%s19262_s24 + $0x38] sm:$0xff]  ;;  %v19306_v49 = vld [vmem:[%s19262_s24 + $0x40] sm:$0xff]  ;;  %v1267_v24 = vmul.f32 %v19275_v41, %v19275_v41  ;;  %s516_s19 = scalar_lea.vmem %s22155_s10, %s22340_s16 }
  0x33   : > { %17474 = vmatprep.mubr.msk.bf16.mxu0 %vm574_vm0, %v556_v40  ;;  %v19309_v50 = vld [vmem:[%s19262_s24 + $0x48] sm:$0xff]  ;;  %v559_v51 = vpack.c.bf16 %v19303_v48, %v19300_v47  ;;  %v19323_v53 = vld [vmem:[%s19262_s24 + $0x50] sm:$0xff]  ;;  %v19326_v54 = vld [vmem:[%s19262_s24 + $0x58] sm:$0xff]  ;;  %v1268_v27 = vmul.f32 %v19278_v42, %v19278_v42  ;;  %v1269_v28 = vmul.f32 %v19282_v43, %v19282_v43  ;;  %v1270_v30 = vmul.f32 %v19285_v44, %v19285_v44 }
  0x34   : > { %v560_v52 = vpack.c.bf16 %v19309_v50, %v19306_v49  ;;  %v19329_v55 = vld [vmem:[%s19262_s24 + $0x60] sm:$0xff]  ;;  %v19332_v56 = vld [vmem:[%s19262_s24 + $0x68] sm:$0xff]  ;;  %v561_v57 = vpack.c.bf16 %v19326_v54, %v19323_v53  ;;  %v19341_v59 = vld [vmem:[%s19262_s24 + $0x70] sm:$0xff]  ;;  %v1271_v31 = vmul.f32 %v19300_v47, %v19300_v47  ;;  %v1272_v32 = vmul.f32 %v19303_v48, %v19303_v48 }
  0x35   : > { %17473 = vmatpush3.bf16.msra.mxu0 %v19259_v37  ;;  %17509 = vmatpush3.bf16.msra.mxu1 %v19259_v37  ;;  %v562_v58 = vpack.c.bf16 %v19332_v56, %v19329_v55  ;;  %v19344_v60 = vld [vmem:[%s19262_s24 + $0x78] sm:$0xff]  ;;  %v19347_v61 = vld [vmem:[%s19262_s24 + $0x88] sm:$0xff]  ;;  %v19350_v62 = vld [vmem:[%s19262_s24 + $0x80] sm:$0xff]  ;;  %v1273_v33 = vmul.f32 %v19306_v49, %v19306_v49  ;;  %v1274_v34 = vmul.f32 %v19309_v50, %v19309_v50 }
  0x36   : > { %18599 = vmatprep.subr.bf16.mxu0 %v19254_v35  ;;  %18607 = vmatprep.subr.bf16.mxu1 %v19254_v35  ;;  %v563_v63 = vpack.c.bf16 %v19344_v60, %v19341_v59  ;;  %v564_v0 = vpack.c.bf16 %v19347_v61, %v19350_v62  ;;  %v19359_v1 = vld [vmem:[%s19262_s24 + $0x90] sm:$0xff]  ;;  %v19362_v2 = vld [vmem:[%s19262_s24 + $0x98] sm:$0xff]  ;;  %v19365_v3 = vld [vmem:[%s19262_s24 + $0xa0] sm:$0xff]  ;;  %v1275_v36 = vmul.f32 %v19323_v53, %v19323_v53 }
  0x37   : > { %v19368_v4 = vld [vmem:[%s19262_s24 + $0xa8] sm:$0xff]  ;;  %v565_v5 = vpack.c.bf16 %v19362_v2, %v19359_v1  ;;  %v19377_v7 = vld [vmem:[%s19262_s24 + $0xb0] sm:$0xff]  ;;  %v19380_v8 = vld [vmem:[%s19262_s24 + $0xb8] sm:$0xff]  ;;  %v1276_v40 = vmul.f32 %v19326_v54, %v19326_v54 }
  0x38   : > { %17475 = vmatmul.mubr.msk.bf16.vlgmr.msra.gmra.mrb[0].mxu0 %vm574_vm0, %v557_v45  ;;  %v566_v6 = vpack.c.bf16 %v19368_v4, %v19365_v3  ;;  %v19383_v9 = vld [vmem:[%s19262_s24 + $0xc0] sm:$0xff]  ;;  %v19386_v10 = vld [vmem:[%s19262_s24 + $0xc8] sm:$0xff]  ;;  %v567_v11 = vpack.c.bf16 %v19380_v8, %v19377_v7  ;;  %v19395_v13 = vld [vmem:[%s19262_s24 + $0xd0] sm:$0xff]  ;;  %v1277_v45 = vmul.f32 %v19329_v55, %v19329_v55 }
  0x39   : > { %18601 = vmatpush3.bf16.msra.mxu0 %v19254_v35  ;;  %17478 = vmatprep.mubr.msk.bf16.mxu0 %vm574_vm0, %v558_v46  ;;  %v568_v12 = vpack.c.bf16 %v19386_v10, %v19383_v9  ;;  %v19398_v14 = vld [vmem:[%s19262_s24 + $0xd8] sm:$0xff]  ;;  %v19401_v15 = vld [vmem:[%s19262_s24 + $0xe0] sm:$0xff]  ;;  %v19404_v16 = vld [vmem:[%s19262_s24 + $0xe8] sm:$0xff]  ;;  %v1278_v46 = vmul.f32 %v19332_v56, %v19332_v56 }
  0x3a   : > { %18603 = vmatprep.subr.bf16.mxu0 %v19259_v37  ;;  %v569_v17 = vpack.c.bf16 %v19398_v14, %v19395_v13  ;;  %v570_v18 = vpack.c.bf16 %v19404_v16, %v19401_v15  ;;  %v19413_v19 = vld [vmem:[%s19262_s24 + $0xf0] sm:$0xff]  ;;  %v19416_v20 = vld [vmem:[%s19262_s24 + $0xf8] sm:$0xff] }
  0x3b   : > { %v571_v21 = vpack.c.bf16 %v19416_v20, %v19413_v19  ;;  %v1295_v25 = vmul.f32 %v19413_v19, %v19413_v19  ;;  %v1296_v26 = vmul.f32 %v19416_v20, %v19416_v20 }
  0x3d   : > { %18605 = vmatpush3.bf16.msra.mxu0 %v19259_v37 }
  0x3e   : > { %18615 = vmatprep.subr.bf16.mxu0 %v19254_v35 }
  0x40   : > { %17479 = vmatmul.mubr.msk.bf16.gmra.mrb[4].mxu0 %vm574_vm0, %v559_v51  ;;  %v1279_v51 = vmul.f32 %v19341_v59, %v19341_v59 }
  0x41   : > { %17482 = vmatprep.mubr.msk.bf16.mxu0 %vm574_vm0, %v560_v52  ;;  %v1280_v52 = vmul.f32 %v19344_v60, %v19344_v60 }
  0x48   : > { %17483 = vmatmul.mubr.msk.bf16.gmra.mrb[8].mxu0 %vm574_vm0, %v561_v57  ;;  %v1281_v57 = vmul.f32 %v19350_v62, %v19350_v62 }
  0x49   : > { %17486 = vmatprep.mubr.msk.bf16.mxu0 %vm574_vm0, %v562_v58  ;;  %v1282_v58 = vmul.f32 %v19347_v61, %v19347_v61 }
  0x50   : > { %17487 = vmatmul.mubr.msk.bf16.gmra.mrb[12].mxu0 %vm574_vm0, %v563_v63  ;;  %v1283_v63 = vmul.f32 %v19359_v1, %v19359_v1 }
  0x51   : > { %17490 = vmatprep.mubr.msk.bf16.mxu0 %vm574_vm0, %v564_v0  ;;  %v1284_v0 = vmul.f32 %v19362_v2, %v19362_v2 }
  0x58   : > { %17491 = vmatmul.mubr.msk.bf16.gmra.mrb[16].mxu0 %vm574_vm0, %v565_v5  ;;  %v1285_v5 = vmul.f32 %v19365_v3, %v19365_v3 }
  0x59   : > { %17494 = vmatprep.mubr.msk.bf16.mxu0 %vm574_vm0, %v566_v6  ;;  %v1286_v6 = vmul.f32 %v19368_v4, %v19368_v4 }
  0x60   : > { %17495 = vmatmul.mubr.msk.bf16.gmra.mrb[20].mxu0 %vm574_vm0, %v567_v11  ;;  %v1287_v11 = vmul.f32 %v19377_v7, %v19377_v7 }
  0x61   : > { %17498 = vmatprep.mubr.msk.bf16.mxu0 %vm574_vm0, %v568_v12  ;;  %v1288_v12 = vmul.f32 %v19380_v8, %v19380_v8 }
  0x68   : > { %17499 = vmatmul.mubr.msk.bf16.gmra.mrb[24].mxu0 %vm574_vm0, %v569_v17  ;;  %v1289_v17 = vmul.f32 %v19383_v9, %v19383_v9 }
  0x69   : > { %17502 = vmatprep.mubr.msk.bf16.mxu0 %vm574_vm0, %v570_v18  ;;  %v1290_v18 = vmul.f32 %v19386_v10, %v19386_v10 }
  0x70   : > { %17503 = vmatmul.mubr.msk.bf16.gmra.mrb[28].mxu0 %vm574_vm0, %v571_v21  ;;  %v1291_v21 = vmul.f32 %v19395_v13, %v19395_v13 }
  0x71   : > { %17550 = vmatprep.mubr.msk.f32.mxu0 %vm574_vm0, %v1265_v22  ;;  %v1292_v22 = vmul.f32 %v19398_v14, %v19398_v14 }
  0x78   : > { %17551 = vmatmul.mubr.msk.f32.vlgmr.msra.gmra.mrb[32].mxu0 %vm574_vm0, %v1266_v23  ;;  %v1293_v23 = vmul.f32 %v19401_v15, %v19401_v15 }
  0x79   : > { %17553 = vmatprep.mubr.msk.f32.mxu0 %vm574_vm0, %v1267_v24  ;;  %18617 = vmatpush3.bf16.msra.mxu0 %v19254_v35  ;;  %v1294_v24 = vmul.f32 %v19404_v16, %v19404_v16 }
  0x7a   : > { %18619 = vmatprep.subr.bf16.mxu0 %v19259_v37 }
  0x7c   : > { %17554 = vmatmul.mubr.msk.f32.gmra.mrb[34].mxu0 %vm574_vm0, %v1268_v27  ;;  %v2195_v27 = vmul.f32 %v19350_v62, %v19265_v38 }
  0x7d   : > { %17556 = vmatprep.mubr.msk.f32.mxu0 %vm574_vm0, %v1269_v28  ;;  %18621 = vmatpush3.bf16.msra.mxu0 %v19259_v37  ;;  %v3215_v28 = vld [vmem:[%s22151_s6 + $0x10] sm:$0xff] }
  0x7e   : > { %18631 = vmatprep.subr.bf16.mxu0 %v19442_v29 }
  0x80   : > { %17557 = vmatmul.mubr.msk.f32.gmra.mrb[36].mxu0 %vm574_vm0, %v1270_v30  ;;  %v3216_v30 = vld [vmem:[%s22151_s6 + $0x18] sm:$0xff] }
  0x81   : > { %17559 = vmatprep.mubr.msk.f32.mxu0 %vm574_vm0, %v1271_v31  ;;  %v2196_v31 = vmul.f32 %v19347_v61, %v19268_v39 }
  0x84   : > { %17560 = vmatmul.mubr.msk.f32.gmra.mrb[38].mxu0 %vm574_vm0, %v1272_v32  ;;  %v2197_v32 = vmul.f32 %v19359_v1, %v19275_v41 }
  0x85   : > { %17562 = vmatprep.mubr.msk.f32.mxu0 %vm574_vm0, %v1273_v33  ;;  %v19542_v33 = vpack.c.bf16 %v3216_v30, %v3215_v28 }
  0x88   : > { %17563 = vmatmul.mubr.msk.f32.gmra.mrb[40].mxu0 %vm574_vm0, %v1274_v34  ;;  %v2198_v34 = vmul.f32 %v19362_v2, %v19278_v42 }
  0x89   : > { %17565 = vmatprep.mubr.msk.f32.mxu0 %vm574_vm0, %v1275_v36  ;;  %v2199_v36 = vmul.f32 %v19365_v3, %v19282_v43 }
  0x8c   : > { %17566 = vmatmul.mubr.msk.f32.gmra.mrb[42].mxu0 %vm574_vm0, %v1276_v40  ;;  %v2200_v40 = vmul.f32 %v19368_v4, %v19285_v44 }
  0x8d   : > { %17568 = vmatprep.mubr.msk.f32.mxu0 %vm574_vm0, %v1277_v45  ;;  %v2201_v45 = vmul.f32 %v19377_v7, %v19300_v47 }
  0x90   : > { %17569 = vmatmul.mubr.msk.f32.gmra.mrb[44].mxu0 %vm574_vm0, %v1278_v46  ;;  %v2202_v46 = vmul.f32 %v19380_v8, %v19303_v48 }
  0x91   : > { %17571 = vmatprep.mubr.msk.f32.mxu0 %vm574_vm0, %v1279_v51  ;;  %v2203_v51 = vmul.f32 %v19383_v9, %v19306_v49 }
  0x94   : > { %17572 = vmatmul.mubr.msk.f32.gmra.mrb[46].mxu0 %vm574_vm0, %v1280_v52  ;;  %v2204_v52 = vmul.f32 %v19386_v10, %v19309_v50 }
  0x95   : > { %17574 = vmatprep.mubr.msk.f32.mxu0 %vm574_vm0, %v1281_v57  ;;  %v2205_v57 = vmul.f32 %v19395_v13, %v19323_v53 }
  0x98   : > { %17575 = vmatmul.mubr.msk.f32.gmra.mrb[48].mxu0 %vm574_vm0, %v1282_v58  ;;  %v2206_v58 = vmul.f32 %v19398_v14, %v19326_v54 }
  0x99   : > { %17577 = vmatprep.mubr.msk.f32.mxu0 %vm574_vm0, %v1283_v63  ;;  %v2207_v63 = vmul.f32 %v19401_v15, %v19329_v55 }
  0x9c   : > { %17578 = vmatmul.mubr.msk.f32.gmra.mrb[50].mxu0 %vm574_vm0, %v1284_v0  ;;  %v2208_v0 = vmul.f32 %v19404_v16, %v19332_v56 }
  0x9d   : > { %17580 = vmatprep.mubr.msk.f32.mxu0 %vm574_vm0, %v1285_v5  ;;  %v2209_v5 = vmul.f32 %v19413_v19, %v19341_v59 }
  0xa0   : > { %17581 = vmatmul.mubr.msk.f32.gmra.mrb[52].mxu0 %vm574_vm0, %v1286_v6  ;;  %v2210_v6 = vmul.f32 %v19416_v20, %v19344_v60 }
  0xa1   : > { %17583 = vmatprep.mubr.msk.f32.mxu0 %vm574_vm0, %v1287_v11 }
  0xa4   : > { %17584 = vmatmul.mubr.msk.f32.gmra.mrb[54].mxu0 %vm574_vm0, %v1288_v12 }
  0xa5   : > { %17586 = vmatprep.mubr.msk.f32.mxu0 %vm574_vm0, %v1289_v17 }
  0xa8   : > { %17587 = vmatmul.mubr.msk.f32.gmra.mrb[56].mxu0 %vm574_vm0, %v1290_v18 }
  0xa9   : > { %17589 = vmatprep.mubr.msk.f32.mxu0 %vm574_vm0, %v1291_v21 }
  0xac   : > { %17590 = vmatmul.mubr.msk.f32.gmra.mrb[58].mxu0 %vm574_vm0, %v1292_v22 }
  0xad   : > { %17592 = vmatprep.mubr.msk.f32.mxu0 %vm574_vm0, %v1293_v23 }
  0xb0   : > { %17593 = vmatmul.mubr.msk.f32.gmra.mrb[60].mxu0 %vm574_vm0, %v1294_v24 }
  0xb1   : > { %17595 = vmatprep.mubr.msk.f32.mxu0 %vm574_vm0, %v1295_v25 }
  0xb4   : > { %17596 = vmatmul.mubr.msk.f32.gmra.mrb[62].mxu0 %vm574_vm0, %v1296_v26 }
  0xb5   : > { %17662 = vmatprep.mubr.msk.f32.mxu0 %vm574_vm0, %v2195_v27 }
  0xb8   : > { %17663 = vmatmul.mubr.msk.f32.vlgmr.msra.gmra.mrb[64].mxu0 %vm574_vm0, %v2196_v31 }
  0xb9   : > { %17665 = vmatprep.mubr.msk.f32.mxu0 %vm574_vm0, %v2197_v32  ;;  %18633 = vmatpush3.bf16.msra.mxu0 %v19442_v29 }
  0xba   : > { %18635 = vmatprep.subr.bf16.mxu0 %v19542_v33 }
  0xbc   : > { %17666 = vmatmul.mubr.msk.f32.gmra.mrb[66].mxu0 %vm574_vm0, %v2198_v34 }
  0xbd   : > { %17668 = vmatprep.mubr.msk.f32.mxu0 %vm574_vm0, %v2199_v36  ;;  %18637 = vmatpush3.bf16.msra.mxu0 %v19542_v33 }
  0xc0   : > { %17669 = vmatmul.mubr.msk.f32.gmra.mrb[68].mxu0 %vm574_vm0, %v2200_v40 }
  0xc1   : > { %17671 = vmatprep.mubr.msk.f32.mxu0 %vm574_vm0, %v2201_v45 }
  0xc4   : > { %17672 = vmatmul.mubr.msk.f32.gmra.mrb[70].mxu0 %vm574_vm0, %v2202_v46 }
  0xc5   : > { %17674 = vmatprep.mubr.msk.f32.mxu0 %vm574_vm0, %v2203_v51 }
  0xc8   : > { %17675 = vmatmul.mubr.msk.f32.gmra.mrb[72].mxu0 %vm574_vm0, %v2204_v52 }
  0xc9   : > { %17677 = vmatprep.mubr.msk.f32.mxu0 %vm574_vm0, %v2205_v57 }
  0xcc   : > { %17678 = vmatmul.mubr.msk.f32.gmra.mrb[74].mxu0 %vm574_vm0, %v2206_v58 }
  0xcd   : > { %17680 = vmatprep.mubr.msk.f32.mxu0 %vm574_vm0, %v2207_v63 }
  0xd0   : > { %17681 = vmatmul.mubr.msk.f32.gmra.mrb[76].mxu0 %vm574_vm0, %v2208_v0 }
  0xd1   : > { %17683 = vmatprep.mubr.msk.f32.mxu0 %vm574_vm0, %v2209_v5 }
  0xd4   : > { %17684 = vmatmul.mubr.msk.f32.gmra.mrb[78].mxu0 %vm574_vm0, %v2210_v6 }
  0xd5   : > { %17726 = vmatprep.mubr.msk.f32.mxu0 %vm574_vm0, %v19265_v38 }
  0xd8   : > { %17727 = vmatmul.mubr.msk.f32.vlgmr.msra.gmra.mrb[80].mxu0 %vm574_vm0, %v19268_v39 }
  0xd9   : > { %17729 = vmatprep.mubr.msk.f32.mxu0 %vm574_vm0, %v19275_v41 }
  0xdc   : > { %17730 = vmatmul.mubr.msk.f32.gmra.mrb[82].mxu0 %vm574_vm0, %v19278_v42 }
  0xdd   : > { %17732 = vmatprep.mubr.msk.f32.mxu0 %vm574_vm0, %v19282_v43 }
  0xe0   : > { %17733 = vmatmul.mubr.msk.f32.gmra.mrb[84].mxu0 %vm574_vm0, %v19285_v44 }
  0xe1   : > { %17735 = vmatprep.mubr.msk.f32.mxu0 %vm574_vm0, %v19300_v47 }
  0xe4   : > { %17736 = vmatmul.mubr.msk.f32.gmra.mrb[86].mxu0 %vm574_vm0, %v19303_v48 }
  0xe5   : > { %17738 = vmatprep.mubr.msk.f32.mxu0 %vm574_vm0, %v19306_v49 }
  0xe8   : > { %17739 = vmatmul.mubr.msk.f32.gmra.mrb[88].mxu0 %vm574_vm0, %v19309_v50 }
  0xe9   : > { %17741 = vmatprep.mubr.msk.f32.mxu0 %vm574_vm0, %v19323_v53 }
  0xec   : > { %17742 = vmatmul.mubr.msk.f32.gmra.mrb[90].mxu0 %vm574_vm0, %v19326_v54 }
  0xed   : > { %17744 = vmatprep.mubr.msk.f32.mxu0 %vm574_vm0, %v19329_v55 }
  0xf0   : > { %17745 = vmatmul.mubr.msk.f32.gmra.mrb[92].mxu0 %vm574_vm0, %v19332_v56 }
  0xf1   : > { %17747 = vmatprep.mubr.msk.f32.mxu0 %vm574_vm0, %v19341_v59 }
  0xf4   : > { %17748 = vmatmul.mubr.msk.f32.gmra.mrb[94].mxu0 %vm574_vm0, %v19344_v60 }
  0xf5   : > { %17750 = vmatprep.mubr.msk.f32.mxu0 %vm574_vm0, %v19350_v62 }
  0xf8   : > { %17751 = vmatmul.mubr.msk.f32.gmra.mrb[96].mxu0 %vm574_vm0, %v19347_v61 }
  0xf9   : > { %17753 = vmatprep.mubr.msk.f32.mxu0 %vm574_vm0, %v19359_v1 }
  0xfc   : > { %17754 = vmatmul.mubr.msk.f32.gmra.mrb[98].mxu0 %vm574_vm0, %v19362_v2 }
  0xfd   : > { %17756 = vmatprep.mubr.msk.f32.mxu0 %vm574_vm0, %v19365_v3 }
 0x100   : > { %17757 = vmatmul.mubr.msk.f32.gmra.mrb[100].mxu0 %vm574_vm0, %v19368_v4 }
 0x101   : > { %17759 = vmatprep.mubr.msk.f32.mxu0 %vm574_vm0, %v19377_v7 }
 0x104   : > { %17760 = vmatmul.mubr.msk.f32.gmra.mrb[102].mxu0 %vm574_vm0, %v19380_v8 }
 0x105   : > { %17762 = vmatprep.mubr.msk.f32.mxu0 %vm574_vm0, %v19383_v9 }
 0x108   : > { %17763 = vmatmul.mubr.msk.f32.gmra.mrb[104].mxu0 %vm574_vm0, %v19386_v10 }
 0x109   : > { %17765 = vmatprep.mubr.msk.f32.mxu0 %vm574_vm0, %v19395_v13 }
 0x10b   : > { %v17476_v38 = vpop.f32.mrb[0].mxu0 }
 0x10c   : > { %v657_v39 = vpop.f32.mrb[1].mxu0  ;;  %17766 = vmatmul.mubr.msk.f32.gmra.mrb[106].mxu0 %vm574_vm0, %v19398_v14 }
 0x10d   : > { %v17477_v41 = vpop.f32.mrb[2].mxu0  ;;  %17768 = vmatprep.mubr.msk.f32.mxu0 %vm574_vm0, %v19401_v15 }
 0x10e   : > { %v660_v42 = vpop.f32.mrb[3].mxu0 }
 0x110   : > { %17769 = vmatmul.mubr.msk.f32.gmra.mrb[108].mxu0 %vm574_vm0, %v19404_v16 }
 0x111   : > { %17771 = vmatprep.mubr.msk.f32.mxu0 %vm574_vm0, %v19413_v19 }
 0x113   : > { %v17480_v43 = vpop.f32.mrb[4].mxu0 }
 0x114   : > { %v673_v44 = vpop.f32.mrb[5].mxu0  ;;  %17772 = vmatmul.mubr.msk.f32.gmra.mrb[110].mxu0 %vm574_vm0, %v19416_v20  ;;  %v18722_v47 = vpack.i.bf16 %v17480_v43, %v17476_v38 }
 0x115   : > { %v17481_v48 = vpop.f32.mrb[6].mxu0  ;;  %v18718_v49 = vpack.i.bf16 %v673_v44, %v657_v39 }
 0x116   : > { %v676_v50 = vpop.f32.mrb[7].mxu0  ;;  %v18724_v53 = vpack.i.bf16 %v17481_v48, %v17477_v41 }
 0x117   : > { %18719 = vxpose.xlu0.b32.start [1/4] (short) (narrow) %v18718_v49, 32  ;;  %v18720_v54 = vpack.i.bf16 %v676_v50, %v660_v42 }
 0x11b   : > { %18721 = vxpose.xlu0.b32.cont [2/4] (short) (narrow) %v18720_v54, 32  ;;  %v17484_v55 = vpop.f32.mrb[8].mxu0 }
 0x11c   : > { %v689_v56 = vpop.f32.mrb[9].mxu0 }
 0x11d   : > { %v17485_v59 = vpop.f32.mrb[10].mxu0 }
 0x11e   : > { %v692_v60 = vpop.f32.mrb[11].mxu0 }
 0x11f   : > { %18723 = vxpose.xlu0.b32.cont [3/4] (short) (narrow) %v18722_v47, 32 }
 0x123   : > { %18725 = vxpose.xlu0.b32.end [4/4] (short) (narrow) %v18724_v53, 32  ;;  %v17488_v61 = vpop.f32.mrb[12].mxu0 }
 0x124   : > { %v705_v62 = vpop.f32.mrb[13].mxu0  ;;  %v18750_v1 = vpack.i.bf16 %v17488_v61, %v17484_v55 }
 0x125   : > { %v17489_v2 = vpop.f32.mrb[14].mxu0  ;;  %v18746_v3 = vpack.i.bf16 %v705_v62, %v689_v56 }
 0x126   : > { %v708_v4 = vpop.f32.mrb[15].mxu0  ;;  %v18752_v7 = vpack.i.bf16 %v17489_v2, %v17485_v59 }
 0x127   : > { %18747 = vxpose.xlu1.b32.start [1/4] (short) (narrow) %v18746_v3, 32  ;;  %v18748_v8 = vpack.i.bf16 %v708_v4, %v692_v60 }
 0x12b   : > { %18749 = vxpose.xlu1.b32.cont [2/4] (short) (narrow) %v18748_v8, 32  ;;  %v17492_v9 = vpop.f32.mrb[16].mxu0 }
 0x12c   : > { %v721_v10 = vpop.f32.mrb[17].mxu0 }
 0x12d   : > { %v17493_v13 = vpop.f32.mrb[18].mxu0 }
 0x12e   : > { %v724_v14 = vpop.f32.mrb[19].mxu0 }
 0x12f   : > { %18751 = vxpose.xlu1.b32.cont [3/4] (short) (narrow) %v18750_v1, 32 }
 0x133   : > { %18753 = vxpose.xlu1.b32.end [4/4] (short) (narrow) %v18752_v7, 32  ;;  %v17496_v15 = vpop.f32.mrb[20].mxu0 }
 0x134   : > { %v18778_v16 = vpack.i.bf16 %v17496_v15, %v17492_v9  ;;  %v737_v19 = vpop.f32.mrb[21].mxu0 }
 0x135   : > { %v17497_v20 = vpop.f32.mrb[22].mxu0  ;;  %v18774_v11 = vpack.i.bf16 %v737_v19, %v721_v10 }
 0x136   : > { %v18780_v12 = vpack.i.bf16 %v17497_v20, %v17493_v13  ;;  %v740_v17 = vpop.f32.mrb[23].mxu0 }
 0x137   : > { %v18776_v18 = vpack.i.bf16 %v740_v17, %v724_v14  ;;  %18775 = vxpose.xlu0.b32.start [1/4] (short) (narrow) %v18774_v11, 32 }
 0x13b   : > { %18777 = vxpose.xlu0.b32.cont [2/4] (short) (narrow) %v18776_v18, 32  ;;  %v17500_v21 = vpop.f32.mrb[24].mxu0 }
 0x13c   : > { %v753_v22 = vpop.f32.mrb[25].mxu0 }
 0x13d   : > { %v17501_v23 = vpop.f32.mrb[26].mxu0 }
 0x13e   : > { %v756_v24 = vpop.f32.mrb[27].mxu0 }
 0x13f   : > { %18779 = vxpose.xlu0.b32.cont [3/4] (short) (narrow) %v18778_v16, 32 }
 0x143   : > { %18781 = vxpose.xlu0.b32.end [4/4] (short) (narrow) %v18780_v12, 32  ;;  %v17504_v25 = vpop.f32.mrb[28].mxu0 }
 0x144   : > { %v18806_v26 = vpack.i.bf16 %v17504_v25, %v17500_v21  ;;  %v769_v27 = vpop.f32.mrb[29].mxu0 }
 0x145   : > { %v17505_v28 = vpop.f32.mrb[30].mxu0  ;;  %v18802_v30 = vpack.i.bf16 %v769_v27, %v753_v22 }
 0x146   : > { %v18808_v31 = vpack.i.bf16 %v17505_v28, %v17501_v23  ;;  %v772_v32 = vpop.f32.mrb[31].mxu0 }
 0x147   : > { %v18804_v34 = vpack.i.bf16 %v772_v32, %v756_v24  ;;  %18803 = vxpose.xlu1.b32.start [1/4] (short) (narrow) %v18802_v30, 32 }
 0x14b   : > { %18805 = vxpose.xlu1.b32.cont [2/4] (short) (narrow) %v18804_v34, 32  ;;  %v17552_v36 = vpop.f32.mrb[32].mxu0 }
 0x14c   : > { %v1459_v40 = vpop.f32.mrb[33].mxu0 }
 0x14d   : > { %1618 = vxpose.xlu0.b32.start [1/4] (short) (narrow) %v1459_v40, 32 }
 0x14f   : > { %18807 = vxpose.xlu1.b32.cont [3/4] (short) (narrow) %v18806_v26, 32  ;;  %v17555_v45 = vpop.f32.mrb[34].mxu0 }
 0x150   : > { %v1469_v46 = vpop.f32.mrb[35].mxu0 }
 0x151   : > { %1619 = vxpose.xlu0.b32.cont [2/4] (short) (narrow) %v17552_v36, 32 }
 0x153   : > { %18809 = vxpose.xlu1.b32.end [4/4] (short) (narrow) %v18808_v31, 32  ;;  %v17558_v51 = vpop.f32.mrb[36].mxu0 }
 0x154   : > { %v1479_v52 = vpop.f32.mrb[37].mxu0 }
 0x155   : > { %1620 = vxpose.xlu0.b32.cont [3/4] (short) (narrow) %v1469_v46, 32 }
 0x157   : > { %1650 = vxpose.xlu1.b32.start [1/4] (short) (narrow) %v1479_v52, 32  ;;  %v17561_v57 = vpop.f32.mrb[38].mxu0 }
 0x158   : > { %v1489_v58 = vpop.f32.mrb[39].mxu0 }
 0x159   : > { %1621 = vxpose.xlu0.b32.end [4/4] (short) (narrow) %v17555_v45, 32 }
 0x15b   : > { %1651 = vxpose.xlu1.b32.cont [2/4] (short) (narrow) %v17558_v51, 32  ;;  %v17564_v63 = vpop.f32.mrb[40].mxu0 }
 0x15c   : > { %v1499_v0 = vpop.f32.mrb[41].mxu0 }
 0x15d   : > { %1682 = vxpose.xlu0.b32.start [1/4] (short) (narrow) %v1499_v0, 32 }
 0x15f   : > { %1652 = vxpose.xlu1.b32.cont [3/4] (short) (narrow) %v1489_v58, 32  ;;  %v17567_v5 = vpop.f32.mrb[42].mxu0 }
 0x160   : > { %v1509_v6 = vpop.f32.mrb[43].mxu0 }
 0x161   : > { %1683 = vxpose.xlu0.b32.cont [2/4] (short) (narrow) %v17564_v63, 32 }
 0x163   : > { %1653 = vxpose.xlu1.b32.end [4/4] (short) (narrow) %v17561_v57, 32  ;;  %v17570_v38 = vpop.f32.mrb[44].mxu0 }
 0x164   : > { %v1519_v39 = vpop.f32.mrb[45].mxu0 }
 0x165   : > { %1684 = vxpose.xlu0.b32.cont [3/4] (short) (narrow) %v1509_v6, 32 }
 0x167   : > { %1714 = vxpose.xlu1.b32.start [1/4] (short) (narrow) %v1519_v39, 32  ;;  %v17573_v41 = vpop.f32.mrb[46].mxu0 }
 0x168   : > { %v1529_v42 = vpop.f32.mrb[47].mxu0 }
 0x169   : > { %1685 = vxpose.xlu0.b32.end [4/4] (short) (narrow) %v17567_v5, 32 }
 0x16b   : > { %1715 = vxpose.xlu1.b32.cont [2/4] (short) (narrow) %v17570_v38, 32  ;;  %v17576_v43 = vpop.f32.mrb[48].mxu0 }
 0x16c   : > { %v1539_v44 = vpop.f32.mrb[49].mxu0 }
 0x16d   : > { %1746 = vxpose.xlu0.b32.start [1/4] (short) (narrow) %v1539_v44, 32 }
 0x16f   : > { %1716 = vxpose.xlu1.b32.cont [3/4] (short) (narrow) %v1529_v42, 32  ;;  %v17579_v47 = vpop.f32.mrb[50].mxu0 }
 0x170   : > { %v1549_v48 = vpop.f32.mrb[51].mxu0 }
 0x171   : > { %1747 = vxpose.xlu0.b32.cont [2/4] (short) (narrow) %v17576_v43, 32 }
 0x173   : > { %1717 = vxpose.xlu1.b32.end [4/4] (short) (narrow) %v17573_v41, 32  ;;  %v17582_v49 = vpop.f32.mrb[52].mxu0 }
 0x174   : > { %v1559_v50 = vpop.f32.mrb[53].mxu0 }
 0x175   : > { %1748 = vxpose.xlu0.b32.cont [3/4] (short) (narrow) %v1549_v48, 32 }
 0x177   : > { %1778 = vxpose.xlu1.b32.start [1/4] (short) (narrow) %v1559_v50, 32  ;;  %v17585_v53 = vpop.f32.mrb[54].mxu0 }
 0x178   : > { %v1569_v54 = vpop.f32.mrb[55].mxu0 }
 0x179   : > { %1749 = vxpose.xlu0.b32.end [4/4] (short) (narrow) %v17579_v47, 32 }
 0x17b   : > { %1779 = vxpose.xlu1.b32.cont [2/4] (short) (narrow) %v17582_v49, 32  ;;  %v17588_v55 = vpop.f32.mrb[56].mxu0 }
 0x17c   : > { %v1579_v56 = vpop.f32.mrb[57].mxu0 }
 0x17d   : > { %1810 = vxpose.xlu0.b32.start [1/4] (short) (narrow) %v1579_v56, 32 }
 0x17f   : > { %1780 = vxpose.xlu1.b32.cont [3/4] (short) (narrow) %v1569_v54, 32  ;;  %v17591_v59 = vpop.f32.mrb[58].mxu0 }
 0x180   : > { %v1589_v60 = vpop.f32.mrb[59].mxu0 }
 0x181   : > { %1811 = vxpose.xlu0.b32.cont [2/4] (short) (narrow) %v17588_v55, 32 }
 0x183   : > { %1781 = vxpose.xlu1.b32.end [4/4] (short) (narrow) %v17585_v53, 32  ;;  %v17594_v61 = vpop.f32.mrb[60].mxu0 }
 0x184   : > { %v1599_v62 = vpop.f32.mrb[61].mxu0 }
 0x185   : > { %1812 = vxpose.xlu0.b32.cont [3/4] (short) (narrow) %v1589_v60, 32 }
 0x187   : > { %1842 = vxpose.xlu1.b32.start [1/4] (short) (narrow) %v1599_v62, 32  ;;  %v17597_v1 = vpop.f32.mrb[62].mxu0 }
 0x188   : > { %v1609_v2 = vpop.f32.mrb[63].mxu0 }
 0x189   : > { %1813 = vxpose.xlu0.b32.end [4/4] (short) (narrow) %v17591_v59, 32 }
 0x18b   : > { %1843 = vxpose.xlu1.b32.cont [2/4] (short) (narrow) %v17594_v61, 32  ;;  %v17664_v3 = vpop.f32.mrb[64].mxu0 }
 0x18c   : > { %v2325_v4 = vpop.f32.mrb[65].mxu0 }
 0x18d   : > { %2404 = vxpose.xlu0.b32.start [1/4] (short) (narrow) %v2325_v4, 32 }
 0x18f   : > { %1844 = vxpose.xlu1.b32.cont [3/4] (short) (narrow) %v1609_v2, 32  ;;  %v17667_v7 = vpop.f32.mrb[66].mxu0 }
 0x190   : > { %v2335_v8 = vpop.f32.mrb[67].mxu0 }
 0x191   : > { %2405 = vxpose.xlu0.b32.cont [2/4] (short) (narrow) %v17664_v3, 32 }
 0x193   : > { %1845 = vxpose.xlu1.b32.end [4/4] (short) (narrow) %v17597_v1, 32  ;;  %v17670_v9 = vpop.f32.mrb[68].mxu0 }
 0x194   : > { %v2345_v10 = vpop.f32.mrb[69].mxu0 }
 0x195   : > { %2406 = vxpose.xlu0.b32.cont [3/4] (short) (narrow) %v2335_v8, 32 }
 0x197   : > { %v18726_v13 = vpop.trf.xlu0  ;;  %2436 = vxpose.xlu1.b32.start [1/4] (short) (narrow) %v2345_v10, 32  ;;  %v17673_v14 = vpop.f32.mrb[70].mxu0 }
 0x198   : > { %v2355_v15 = vpop.f32.mrb[71].mxu0  ;;  %v18727_v16 = vunpack.i.l.bf16 %v18726_v13  ;;  %v18730_v24 = vunpack.i.h.bf16 %v18726_v13 }
 0x199   : > { %2407 = vxpose.xlu0.b32.end [4/4] (short) (narrow) %v17667_v7, 32 }
 0x19b   : > { %v18731_v19 = vpop.trf.xlu0  ;;  %2437 = vxpose.xlu1.b32.cont [2/4] (short) (narrow) %v17670_v9, 32  ;;  %v17676_v20 = vpop.f32.mrb[72].mxu0 }
 0x19c   : > { %v2365_v11 = vpop.f32.mrb[73].mxu0  ;;  %v18732_v12 = vunpack.i.l.bf16 %v18731_v19  ;;  %v18735_v25 = vunpack.i.h.bf16 %v18731_v19 }
 0x19d   : > { %2468 = vxpose.xlu0.b32.start [1/4] (short) (narrow) %v2365_v11, 32 }
 0x19e   : > { %v1040_v17 = vpack.c.bf16 %v18732_v12, %v18727_v16  ;;  %v1042_v36 = vpack.c.bf16 %v18735_v25, %v18730_v24 }
 0x19f   : > { %v18736_v18 = vpop.trf.xlu0  ;;  %2438 = vxpose.xlu1.b32.cont [3/4] (short) (narrow) %v2355_v15, 32  ;;  %v17679_v21 = vpop.f32.mrb[74].mxu0 }
 0x1a0   : > { %v2375_v22 = vpop.f32.mrb[75].mxu0  ;;  %17510 = vmatprep.mubr.msk.bf16.mxu1 %vm574_vm0, %v1040_v17  ;;  %v18737_v23 = vunpack.i.l.bf16 %v18736_v18  ;;  %v18740_v45 = vunpack.i.h.bf16 %v18736_v18 }
 0x1a1   : > { %2469 = vxpose.xlu0.b32.cont [2/4] (short) (narrow) %v17676_v20, 32 }
 0x1a3   : > { %v18741_v26 = vpop.trf.xlu0  ;;  %2439 = vxpose.xlu1.b32.end [4/4] (short) (narrow) %v17673_v14, 32  ;;  %v17682_v27 = vpop.f32.mrb[76].mxu0 }
 0x1a4   : > { %v18742_v28 = vunpack.i.l.bf16 %v18741_v26  ;;  %v2385_v30 = vpop.f32.mrb[77].mxu0  ;;  %v18745_v46 = vunpack.i.h.bf16 %v18741_v26 }
 0x1a5   : > { %2470 = vxpose.xlu0.b32.cont [3/4] (short) (narrow) %v2375_v22, 32 }
 0x1a6   : > { %v1041_v31 = vpack.c.bf16 %v18742_v28, %v18737_v23  ;;  %v1043_v0 = vpack.c.bf16 %v18745_v46, %v18740_v45 }
 0x1a7   : > { %v18754_v32 = vpop.trf.xlu1  ;;  %2500 = vxpose.xlu1.b32.start [1/4] (short) (narrow) %v2385_v30, 32  ;;  %v17685_v34 = vpop.f32.mrb[78].mxu0 }
 0x1a8   : > { %17511 = vmatmul.mubr.msk.bf16.vlgmr.msra.gmra.mrb[0].mxu1 %vm574_vm0, %v1041_v31  ;;  %v2395_v40 = vpop.f32.mrb[79].mxu0  ;;  %v18755_v51 = vunpack.i.l.bf16 %v18754_v32  ;;  %v18758_v42 = vunpack.i.h.bf16 %v18754_v32 }
 0x1a9   : > { %17514 = vmatprep.mubr.msk.bf16.mxu1 %vm574_vm0, %v1042_v36  ;;  %2471 = vxpose.xlu0.b32.end [4/4] (short) (narrow) %v17679_v21, 32 }
 0x1aa   : > { %18609 = vmatpush3.bf16.msra.mxu1 %v19254_v35 }
 0x1ab   : > { %v18759_v52 = vpop.trf.xlu1  ;;  %2501 = vxpose.xlu1.b32.cont [2/4] (short) (narrow) %v17682_v27, 32  ;;  %v17728_v57 = vpop.f32.mrb[80].mxu0  ;;  %18611 = vmatprep.subr.bf16.mxu1 %v19259_v37 }
 0x1ac   : > { %v18760_v58 = vunpack.i.l.bf16 %v18759_v52  ;;  %v3379_v63 = vpop.f32.mrb[81].mxu0  ;;  %v18763_v43 = vunpack.i.h.bf16 %v18759_v52 }
 0x1ad   : > { %3538 = vxpose.xlu0.b32.start [1/4] (short) (narrow) %v3379_v63, 16 }
 0x1ae   : > { %v1044_v5 = vpack.c.bf16 %v18760_v58, %v18755_v51  ;;  %18613 = vmatpush3.bf16.msra.mxu1 %v19259_v37  ;;  %v1046_v55 = vpack.c.bf16 %v18763_v43, %v18758_v42 }
 0x1af   : > { %v18764_v6 = vpop.trf.xlu1  ;;  %2502 = vxpose.xlu1.b32.cont [3/4] (short) (narrow) %v2395_v40, 32  ;;  %v17731_v38 = vpop.f32.mrb[82].mxu0  ;;  %18623 = vmatprep.subr.bf16.mxu1 %v19254_v35 }
 0x1b0   : > { %17515 = vmatmul.mubr.msk.bf16.gmra.mrb[4].mxu1 %vm574_vm0, %v1043_v0  ;;  %v3389_v39 = vpop.f32.mrb[83].mxu0  ;;  %v18765_v41 = vunpack.i.l.bf16 %v18764_v6  ;;  %v18768_v59 = vunpack.i.h.bf16 %v18764_v6 }
 0x1b1   : > { %3539 = vxpose.xlu0.b32.cont [2/4] (short) (narrow) %v17728_v57, 16  ;;  %17518 = vmatprep.mubr.msk.bf16.mxu1 %vm574_vm0, %v1044_v5 }
 0x1b3   : > { %v18769_v44 = vpop.trf.xlu1  ;;  %2503 = vxpose.xlu1.b32.end [4/4] (short) (narrow) %v17685_v34, 32  ;;  %v17734_v47 = vpop.f32.mrb[84].mxu0 }
 0x1b4   : > { %v18770_v48 = vunpack.i.l.bf16 %v18769_v44  ;;  %v3399_v49 = vpop.f32.mrb[85].mxu0  ;;  %v18773_v60 = vunpack.i.h.bf16 %v18769_v44 }
 0x1b5   : > { %3540 = vxpose.xlu0.b32.cont [3/4] (short) (narrow) %v3389_v39, 16 }
 0x1b6   : > { %v1045_v50 = vpack.c.bf16 %v18770_v48, %v18765_v41  ;;  %v1047_v4 = vpack.c.bf16 %v18773_v60, %v18768_v59 }
 0x1b7   : > { %v18782_v53 = vpop.trf.xlu0  ;;  %3570 = vxpose.xlu1.b32.start [1/4] (short) (narrow) %v3399_v49, 16  ;;  %v17737_v54 = vpop.f32.mrb[86].mxu0 }
 0x1b8   : > { %17519 = vmatmul.mubr.msk.bf16.gmra.mrb[8].mxu1 %vm574_vm0, %v1045_v50  ;;  %v3409_v56 = vpop.f32.mrb[87].mxu0  ;;  %v18783_v61 = vunpack.i.l.bf16 %v18782_v53  ;;  %v18786_v14 = vunpack.i.h.bf16 %v18782_v53 }
 0x1b9   : > { %17522 = vmatprep.mubr.msk.bf16.mxu1 %vm574_vm0, %v1046_v55  ;;  %3541 = vxpose.xlu0.b32.end [4/4] (short) (narrow) %v17731_v38, 16 }
 0x1bb   : > { %v18787_v62 = vpop.trf.xlu0  ;;  %3571 = vxpose.xlu1.b32.cont [2/4] (short) (narrow) %v17734_v47, 16  ;;  %v17740_v1 = vpop.f32.mrb[88].mxu0 }
 0x1bc   : > { %v18788_v2 = vunpack.i.l.bf16 %v18787_v62  ;;  %v3419_v3 = vpop.f32.mrb[89].mxu0  ;;  %v18791_v15 = vunpack.i.h.bf16 %v18787_v62 }
 0x1bd   : > { %3602 = vxpose.xlu0.b32.start [1/4] (short) (narrow) %v3419_v3, 16 }
 0x1be   : > { %v1048_v7 = vpack.c.bf16 %v18788_v2, %v18783_v61  ;;  %v1050_v21 = vpack.c.bf16 %v18791_v15, %v18786_v14 }
 0x1bf   : > { %v18792_v8 = vpop.trf.xlu0  ;;  %3572 = vxpose.xlu1.b32.cont [3/4] (short) (narrow) %v3409_v56, 16  ;;  %v17743_v9 = vpop.f32.mrb[90].mxu0 }
 0x1c0   : > { %17523 = vmatmul.mubr.msk.bf16.gmra.mrb[12].mxu1 %vm574_vm0, %v1047_v4  ;;  %v3429_v10 = vpop.f32.mrb[91].mxu0  ;;  %v18793_v13 = vunpack.i.l.bf16 %v18792_v8  ;;  %v18796_v23 = vunpack.i.h.bf16 %v18792_v8 }
 0x1c1   : > { %3603 = vxpose.xlu0.b32.cont [2/4] (short) (narrow) %v17740_v1, 16  ;;  %17526 = vmatprep.mubr.msk.bf16.mxu1 %vm574_vm0, %v1048_v7 }
 0x1c3   : > { %v18797_v16 = vpop.trf.xlu0  ;;  %3573 = vxpose.xlu1.b32.end [4/4] (short) (narrow) %v17737_v54, 16  ;;  %v17746_v19 = vpop.f32.mrb[92].mxu0 }
 0x1c4   : > { %v18798_v20 = vunpack.i.l.bf16 %v18797_v16  ;;  %v3439_v11 = vpop.f32.mrb[93].mxu0  ;;  %v18801_v24 = vunpack.i.h.bf16 %v18797_v16 }
 0x1c5   : > { %3604 = vxpose.xlu0.b32.cont [3/4] (short) (narrow) %v3429_v10, 16 }
 0x1c6   : > { %v1049_v12 = vpack.c.bf16 %v18798_v20, %v18793_v13  ;;  %v1051_v32 = vpack.c.bf16 %v18801_v24, %v18796_v23 }
 0x1c7   : > { %v18810_v17 = vpop.trf.xlu1  ;;  %3634 = vxpose.xlu1.b32.start [1/4] (short) (narrow) %v3439_v11, 16  ;;  %v17749_v18 = vpop.f32.mrb[94].mxu0 }
 0x1c8   : > { %17527 = vmatmul.mubr.msk.bf16.gmra.mrb[16].mxu1 %vm574_vm0, %v1049_v12  ;;  %v3449_v22 = vpop.f32.mrb[95].mxu0  ;;  %v18811_v25 = vunpack.i.l.bf16 %v18810_v17  ;;  %v18814_v52 = vunpack.i.h.bf16 %v18810_v17 }
 0x1c9   : > { %17530 = vmatprep.mubr.msk.bf16.mxu1 %vm574_vm0, %v1050_v21  ;;  %3605 = vxpose.xlu0.b32.end [4/4] (short) (narrow) %v17743_v9, 16 }
 0x1cb   : > { %v18815_v26 = vpop.trf.xlu1  ;;  %3635 = vxpose.xlu1.b32.cont [2/4] (short) (narrow) %v17746_v19, 16  ;;  %v17752_v27 = vpop.f32.mrb[96].mxu0 }
 0x1cc   : > { %v18816_v28 = vunpack.i.l.bf16 %v18815_v26  ;;  %v3459_v30 = vpop.f32.mrb[97].mxu0  ;;  %v18819_v57 = vunpack.i.h.bf16 %v18815_v26 }
 0x1cd   : > { %3666 = vxpose.xlu0.b32.start [1/4] (short) (narrow) %v3459_v30, 16  ;;  %v1634_v31 = vpop.trf.xlu0 }
 0x1ce   : > { %v1052_v34 = vpack.c.bf16 %v18816_v28, %v18811_v25  ;;  %v1054_v41 = vpack.c.bf16 %v18819_v57, %v18814_v52 }
 0x1cf   : > { %v18820_v36 = vpop.trf.xlu1  ;;  %3636 = vxpose.xlu1.b32.cont [3/4] (short) (narrow) %v3449_v22, 16  ;;  %v17755_v40 = vpop.f32.mrb[98].mxu0 }
 0x1d0   : > { %17531 = vmatmul.mubr.msk.bf16.gmra.mrb[20].mxu1 %vm574_vm0, %v1051_v32  ;;  %v3469_v45 = vpop.f32.mrb[99].mxu0  ;;  %v18821_v51 = vunpack.i.l.bf16 %v18820_v36  ;;  %v18824_v47 = vunpack.i.h.bf16 %v18820_v36 }
 0x1d1   : > { %3667 = vxpose.xlu0.b32.cont [2/4] (short) (narrow) %v17752_v27, 16  ;;  %17534 = vmatprep.mubr.msk.bf16.mxu1 %vm574_vm0, %v1052_v34  ;;  %v1635_v46 = vpop.trf.xlu0 }
 0x1d3   : > { %v18825_v58 = vpop.trf.xlu1  ;;  %3637 = vxpose.xlu1.b32.end [4/4] (short) (narrow) %v17749_v18, 16  ;;  %v17758_v63 = vpop.f32.mrb[100].mxu0 }
 0x1d4   : > { %v18826_v0 = vunpack.i.l.bf16 %v18825_v58  ;;  %v3479_v5 = vpop.f32.mrb[101].mxu0  ;;  %v18829_v48 = vunpack.i.h.bf16 %v18825_v58 }
 0x1d5   : > { %3668 = vxpose.xlu0.b32.cont [3/4] (short) (narrow) %v3469_v45, 16  ;;  %v1636_v6 = vpop.trf.xlu0 }
 0x1d6   : > { %v1053_v38 = vpack.c.bf16 %v18826_v0, %v18821_v51  ;;  %v1055_v55 = vpack.c.bf16 %v18829_v48, %v18824_v47 }
 0x1d7   : > { %3698 = vxpose.xlu1.b32.start [1/4] (short) (narrow) %v3479_v5, 16  ;;  %v17761_v39 = vpop.f32.mrb[102].mxu0  ;;  %v1666_v42 = vpop.trf.xlu1 }
 0x1d8   : > { %17535 = vmatmul.mubr.msk.bf16.gmra.mrb[24].mxu1 %vm574_vm0, %v1053_v38  ;;  %v3489_v43 = vpop.f32.mrb[103].mxu0 }
 0x1d9   : > { %17538 = vmatprep.mubr.msk.bf16.mxu1 %vm574_vm0, %v1054_v41  ;;  %3669 = vxpose.xlu0.b32.end [4/4] (short) (narrow) %v17755_v40, 16  ;;  %v1637_v44 = vpop.trf.xlu0 }
 0x1db   : > { %3699 = vxpose.xlu1.b32.cont [2/4] (short) (narrow) %v17758_v63, 16  ;;  %v17764_v49 = vpop.f32.mrb[104].mxu0  ;;  %v1667_v50 = vpop.trf.xlu1 }
 0x1dc   : > { %v3499_v53 = vpop.f32.mrb[105].mxu0 }
 0x1dd   : > { %3730 = vxpose.xlu0.b32.start [1/4] (short) (narrow) %v3499_v53, 16  ;;  %v1698_v54 = vpop.trf.xlu0 }
 0x1df   : > { %3700 = vxpose.xlu1.b32.cont [3/4] (short) (narrow) %v3489_v43, 16  ;;  %v17767_v56 = vpop.f32.mrb[106].mxu0  ;;  %v1668_v59 = vpop.trf.xlu1 }
 0x1e0   : > { %17539 = vmatmul.mubr.msk.bf16.gmra.mrb[28].mxu1 %vm574_vm0, %v1055_v55  ;;  %v3509_v60 = vpop.f32.mrb[107].mxu0 }
 0x1e1   : > { %3731 = vxpose.xlu0.b32.cont [2/4] (short) (narrow) %v17764_v49, 16  ;;  %17606 = vmatprep.mubr.msk.f32.mxu1 %vm574_vm0, %v1634_v31  ;;  %v1699_v61 = vpop.trf.xlu0 }
 0x1e3   : > { %3701 = vxpose.xlu1.b32.end [4/4] (short) (narrow) %v17761_v39, 16  ;;  %v17770_v62 = vpop.f32.mrb[108].mxu0  ;;  %v1669_v1 = vpop.trf.xlu1 }
 0x1e4   : > { %v3519_v2 = vpop.f32.mrb[109].mxu0 }
 0x1e5   : > { %3732 = vxpose.xlu0.b32.cont [3/4] (short) (narrow) %v3509_v60, 16  ;;  %v1700_v3 = vpop.trf.xlu0 }
 0x1e7   : > { %3762 = vxpose.xlu1.b32.start [1/4] (short) (narrow) %v3519_v2, 16  ;;  %v17773_v4 = vpop.f32.mrb[110].mxu0  ;;  %v1730_v7 = vpop.trf.xlu1 }
 0x1e8   : > { %17607 = vmatmul.mubr.msk.f32.vlgmr.msra.gmra.mrb[32].mxu1 %vm574_vm0, %v1635_v46  ;;  %v3529_v8 = vpop.f32.mrb[111].mxu0 }
 0x1e9   : > { %3733 = vxpose.xlu0.b32.end [4/4] (short) (narrow) %v17767_v56, 16  ;;  %17609 = vmatprep.mubr.msk.f32.mxu1 %vm574_vm0, %v1636_v6  ;;  %v1701_v9 = vpop.trf.xlu0 }
 0x1ea   : > { %18625 = vmatpush3.bf16.msra.mxu1 %v19254_v35 }
 0x1eb   : > { %3763 = vxpose.xlu1.b32.cont [2/4] (short) (narrow) %v17770_v62, 16  ;;  %v1731_v10 = vpop.trf.xlu1  ;;  %18627 = vmatprep.subr.bf16.mxu1 %v19259_v37 }
 0x1ec   : > { %17610 = vmatmul.mubr.msk.f32.gmra.mrb[34].mxu1 %vm574_vm0, %v1637_v44 }
 0x1ed   : > { %17612 = vmatprep.mubr.msk.f32.mxu1 %vm574_vm0, %v1666_v42  ;;  %v1762_v13 = vpop.trf.xlu0 }
 0x1ee   : > { %18629 = vmatpush3.bf16.msra.mxu1 %v19259_v37 }
 0x1ef   : > { %3764 = vxpose.xlu1.b32.cont [3/4] (short) (narrow) %v3529_v8, 16  ;;  %v1732_v14 = vpop.trf.xlu1  ;;  %18639 = vmatprep.subr.bf16.mxu1 %v19442_v29 }
 0x1f0   : > { %17613 = vmatmul.mubr.msk.f32.gmra.mrb[36].mxu1 %vm574_vm0, %v1667_v50 }
 0x1f1   : > { %17615 = vmatprep.mubr.msk.f32.mxu1 %vm574_vm0, %v1668_v59  ;;  %v1763_v35 = vpop.trf.xlu0 }
 0x1f3   : > { %3765 = vxpose.xlu1.b32.end [4/4] (short) (narrow) %v17773_v4, 16  ;;  %v1733_v15 = vpop.trf.xlu1 }
 0x1f4   : > { %17616 = vmatmul.mubr.msk.f32.gmra.mrb[38].mxu1 %vm574_vm0, %v1669_v1 }
 0x1f5   : > { %17618 = vmatprep.mubr.msk.f32.mxu1 %vm574_vm0, %v1698_v54  ;;  %v1764_v16 = vpop.trf.xlu0 }
 0x1f7   : > { %v1794_v19 = vpop.trf.xlu1 }
 0x1f8   : > { %17619 = vmatmul.mubr.msk.f32.gmra.mrb[40].mxu1 %vm574_vm0, %v1699_v61 }
 0x1f9   : > { %17621 = vmatprep.mubr.msk.f32.mxu1 %vm574_vm0, %v1700_v3  ;;  %v1765_v37 = vpop.trf.xlu0 }
 0x1fb   : > { %v1795_v20 = vpop.trf.xlu1 }
 0x1fc   : > { %17622 = vmatmul.mubr.msk.f32.gmra.mrb[42].mxu1 %vm574_vm0, %v1701_v9 }
 0x1fd   : > { %17624 = vmatprep.mubr.msk.f32.mxu1 %vm574_vm0, %v1730_v7  ;;  %v1826_v11 = vpop.trf.xlu0 }
 0x1ff   : > { %v1796_v12 = vpop.trf.xlu1 }
 0x200   : > { %17625 = vmatmul.mubr.msk.f32.gmra.mrb[44].mxu1 %vm574_vm0, %v1731_v10 }
 0x201   : > { %17627 = vmatprep.mubr.msk.f32.mxu1 %vm574_vm0, %v1732_v14  ;;  %v1827_v17 = vpop.trf.xlu0 }
 0x203   : > { %v1797_v18 = vpop.trf.xlu1 }
 0x204   : > { %17628 = vmatmul.mubr.msk.f32.gmra.mrb[46].mxu1 %vm574_vm0, %v1733_v15 }
 0x205   : > { %17630 = vmatprep.mubr.msk.f32.mxu1 %vm574_vm0, %v1762_v13  ;;  %v1828_v21 = vpop.trf.xlu0 }
 0x207   : > { %v1858_v22 = vpop.trf.xlu1 }
 0x208   : > { %17631 = vmatmul.mubr.msk.f32.gmra.mrb[48].mxu1 %vm574_vm0, %v1763_v35 }
 0x209   : > { %17633 = vmatprep.mubr.msk.f32.mxu1 %vm574_vm0, %v1764_v16  ;;  %v1829_v23 = vpop.trf.xlu0 }
 0x20b   : > { %v1859_v24 = vpop.trf.xlu1 }
 0x20c   : > { %17634 = vmatmul.mubr.msk.f32.gmra.mrb[50].mxu1 %vm574_vm0, %v1765_v37 }
 0x20d   : > { %17636 = vmatprep.mubr.msk.f32.mxu1 %vm574_vm0, %v1794_v19  ;;  %v2420_v25 = vpop.trf.xlu0 }
 0x20f   : > { %v1860_v26 = vpop.trf.xlu1 }
 0x210   : > { %17637 = vmatmul.mubr.msk.f32.gmra.mrb[52].mxu1 %vm574_vm0, %v1795_v20 }
 0x211   : > { %17639 = vmatprep.mubr.msk.f32.mxu1 %vm574_vm0, %v1796_v12  ;;  %v2421_v27 = vpop.trf.xlu0 }
 0x213   : > { %v1861_v28 = vpop.trf.xlu1 }
 0x214   : > { %17640 = vmatmul.mubr.msk.f32.gmra.mrb[54].mxu1 %vm574_vm0, %v1797_v18 }
 0x215   : > { %17642 = vmatprep.mubr.msk.f32.mxu1 %vm574_vm0, %v1826_v11  ;;  %v2422_v30 = vpop.trf.xlu0 }
 0x217   : > { %v2452_v31 = vpop.trf.xlu1 }
 0x218   : > { %17643 = vmatmul.mubr.msk.f32.gmra.mrb[56].mxu1 %vm574_vm0, %v1827_v17 }
 0x219   : > { %17645 = vmatprep.mubr.msk.f32.mxu1 %vm574_vm0, %v1828_v21  ;;  %v2423_v32 = vpop.trf.xlu0 }
 0x21b   : > { %v2453_v34 = vpop.trf.xlu1 }
 0x21c   : > { %17646 = vmatmul.mubr.msk.f32.gmra.mrb[58].mxu1 %vm574_vm0, %v1829_v23 }
 0x21d   : > { %17648 = vmatprep.mubr.msk.f32.mxu1 %vm574_vm0, %v1858_v22  ;;  %v2484_v40 = vpop.trf.xlu0 }
 0x21f   : > { %v2454_v36 = vpop.trf.xlu1 }
 0x220   : > { %17649 = vmatmul.mubr.msk.f32.gmra.mrb[60].mxu1 %vm574_vm0, %v1859_v24 }
 0x221   : > { %17651 = vmatprep.mubr.msk.f32.mxu1 %vm574_vm0, %v1860_v26  ;;  %v2485_v46 = vpop.trf.xlu0 }
 0x223   : > { %v2455_v45 = vpop.trf.xlu1 }
 0x224   : > { %17652 = vmatmul.mubr.msk.f32.gmra.mrb[62].mxu1 %vm574_vm0, %v1861_v28 }
 0x225   : > { %17694 = vmatprep.mubr.msk.f32.mxu1 %vm574_vm0, %v2420_v25  ;;  %v2486_v52 = vpop.trf.xlu0 }
 0x227   : > { %v2516_v51 = vpop.trf.xlu1 }
 0x228   : > { %17695 = vmatmul.mubr.msk.f32.vlgmr.msra.gmra.mrb[64].mxu1 %vm574_vm0, %v2421_v27 }
 0x229   : > { %17697 = vmatprep.mubr.msk.f32.mxu1 %vm574_vm0, %v2422_v30  ;;  %18641 = vmatpush3.bf16.msra.mxu1 %v19442_v29  ;;  %v2487_v58 = vpop.trf.xlu0 }
 0x22a   : > { %18643 = vmatprep.subr.bf16.mxu1 %v19542_v33 }
 0x22b   : > { %v2517_v57 = vpop.trf.xlu1 }
 0x22c   : > { %17698 = vmatmul.mubr.msk.f32.gmra.mrb[66].mxu1 %vm574_vm0, %v2423_v32 }
 0x22d   : > { %17700 = vmatprep.mubr.msk.f32.mxu1 %vm574_vm0, %v2452_v31  ;;  %18645 = vmatpush3.bf16.msra.mxu1 %v19542_v33  ;;  %v3554_v29 = vpop.trf.xlu0  ;;  %v3987_v31 = vld [vmem:[%s22147_s2] sm:$0xff] }
 0x22f   : > { %v2518_v63 = vpop.trf.xlu1 }
 0x230   : > { %17701 = vmatmul.mubr.msk.f32.gmra.mrb[68].mxu1 %vm574_vm0, %v2453_v34  ;;  %v3988_v34 = vld [vmem:[%s22147_s2 + $0x8] sm:$0xff] }
 0x231   : > { %17703 = vmatprep.mubr.msk.f32.mxu1 %vm574_vm0, %v2454_v36  ;;  %v3555_v33 = vpop.trf.xlu0  ;;  %v19803_v36 = vpack.c.bf16 %v3988_v34, %v3987_v31 }
 0x233   : > { %v2519_v0 = vpop.trf.xlu1  ;;  %22203 = vst [vmem:[#allocation7_spill] sm:$0xff] %v19803_v36  ;;  %17806 = vmatprep.subr.bf16.mxu1 %v19803_v36  ;;  %17824 = vmatprep.subr.bf16.mxu0 %v19803_v36 }
 0x234   : > { %17704 = vmatmul.mubr.msk.f32.gmra.mrb[70].mxu1 %vm574_vm0, %v2455_v45  ;;  %17825 = vmatpush3.bf16.msra.mxu0 %v19803_v36 }
 0x235   : > { %17706 = vmatprep.mubr.msk.f32.mxu1 %vm574_vm0, %v2484_v40  ;;  %18651 = vmatprep.subr.bf16.mxu0 %v19803_v36 }
 0x237   : > { %v3586_v5 = vpop.trf.xlu1 }
 0x238   : > { %17707 = vmatmul.mubr.msk.f32.gmra.mrb[72].mxu1 %vm574_vm0, %v2485_v46 }
 0x239   : > { %17709 = vmatprep.mubr.msk.f32.mxu1 %vm574_vm0, %v2486_v52 }
 0x23b   : > { %v3587_v38 = vpop.trf.xlu1 }
 0x23c   : > { %17710 = vmatmul.mubr.msk.f32.gmra.mrb[74].mxu1 %vm574_vm0, %v2487_v58 }
 0x23d   : > { %17712 = vmatprep.mubr.msk.f32.mxu1 %vm574_vm0, %v2516_v51  ;;  %v3618_v6 = vpop.trf.xlu0 }
 0x240   : > { %17713 = vmatmul.mubr.msk.f32.gmra.mrb[76].mxu1 %vm574_vm0, %v2517_v57 }
 0x241   : > { %17715 = vmatprep.mubr.msk.f32.mxu1 %vm574_vm0, %v2518_v63  ;;  %v3619_v39 = vpop.trf.xlu0 }
 0x244   : > { %17716 = vmatmul.mubr.msk.f32.gmra.mrb[78].mxu1 %vm574_vm0, %v2519_v0 }
 0x245   : > { %17782 = vmatprep.mubr.msk.f32.mxu1 %vm574_vm0, %v3554_v29 }
 0x247   : > { %v3650_v41 = vpop.trf.xlu1 }
 0x248   : > { %17783 = vmatmul.mubr.msk.f32.vlgmr.msra.gmra.mrb[80].mxu1 %vm574_vm0, %v3555_v33 }
 0x249   : > { %17785 = vmatprep.mubr.msk.f32.mxu1 %vm574_vm0, %v3586_v5  ;;  %17807 = vmatpush3.bf16.msra.mxu1 %v19803_v36 }
 0x24a   : > { %18647 = vmatprep.subr.bf16.mxu1 %v19803_v36 }
 0x24b   : > { %v3651_v43 = vpop.trf.xlu1 }
 0x24c   : > { %17786 = vmatmul.mubr.msk.f32.gmra.mrb[82].mxu1 %vm574_vm0, %v3587_v38 }
 0x24d   : > { %17788 = vmatprep.mubr.msk.f32.mxu1 %vm574_vm0, %v3618_v6  ;;  %v3682_v42 = vpop.trf.xlu0 }
 0x250   : > { %17789 = vmatmul.mubr.msk.f32.gmra.mrb[84].mxu1 %vm574_vm0, %v3619_v39 }
 0x251   : > { %17791 = vmatprep.mubr.msk.f32.mxu1 %vm574_vm0, %v3650_v41  ;;  %v3683_v44 = vpop.trf.xlu0 }
 0x254   : > { %17792 = vmatmul.mubr.msk.f32.gmra.mrb[86].mxu1 %vm574_vm0, %v3651_v43 }
 0x255   : > { %17794 = vmatprep.mubr.msk.f32.mxu1 %vm574_vm0, %v3682_v42 }
 0x257   : > { %v3714_v47 = vpop.trf.xlu1 }
 0x258   : > { %17795 = vmatmul.mubr.msk.f32.gmra.mrb[88].mxu1 %vm574_vm0, %v3683_v44 }
 0x259   : > { %17797 = vmatprep.mubr.msk.f32.mxu1 %vm574_vm0, %v3714_v47 }
 0x25b   : > { %v3715_v48 = vpop.trf.xlu1 }
 0x25c   : > { %17798 = vmatmul.mubr.msk.f32.gmra.mrb[90].mxu1 %vm574_vm0, %v3715_v48 }
 0x25d   : > { %v3746_v49 = vpop.trf.xlu0 }
 0x25e   : > { %17800 = vmatprep.mubr.msk.f32.mxu1 %vm574_vm0, %v3746_v49 }
 0x261   : > { %v3747_v50 = vpop.trf.xlu0 }
 0x262   : > { %17801 = vmatmul.mubr.msk.f32.gmra.mrb[92].mxu1 %vm574_vm0, %v3747_v50 }
 0x267   : > { %v3778_v53 = vpop.trf.xlu1 }
 0x268   : > { %17803 = vmatprep.mubr.msk.f32.mxu1 %vm574_vm0, %v3778_v53 }
 0x26b   : > { %v3779_v54 = vpop.trf.xlu1 }
 0x26c   : > { %17804 = vmatmul.mubr.msk.f32.gmra.mrb[94].mxu1 %vm574_vm0, %v3779_v54 }
 0x27b   : > { %v17512_v55 = vpop.f32.mrb[0].mxu1 }
 0x27c   : > { %v1138_v56 = vpop.f32.mrb[1].mxu1  ;;  %v19757_v16 = vmul.f32 %v17512_v55, %v17512_v55 }
 0x27d   : > { %v17513_v59 = vpop.f32.mrb[2].mxu1  ;;  %v19763_v11 = vmul.f32 %v1138_v56, %v1138_v56 }
 0x27e   : > { %v1141_v60 = vpop.f32.mrb[3].mxu1  ;;  %v19769_v21 = vmul.f32 %v17513_v59, %v17513_v59 }
 0x27f   : > { %v19779_v25 = vmul.f32 %v1141_v60, %v1141_v60 }
 0x283   : > { %v17516_v61 = vpop.f32.mrb[4].mxu1 }
 0x284   : > { %v1154_v62 = vpop.f32.mrb[5].mxu1  ;;  %v19805_v45 = vmul.f32 %v17516_v61, %v17516_v61 }
 0x285   : > { %v17517_v1 = vpop.f32.mrb[6].mxu1  ;;  %v19807_v51 = vmul.f32 %v1154_v62, %v1154_v62 }
 0x286   : > { %v1157_v2 = vpop.f32.mrb[7].mxu1  ;;  %22204 = vst [vmem:[#allocation8_spill] sm:$0xff] %v19805_v45  ;;  %v19815_v63 = vmul.f32 %v17517_v1, %v17517_v1 }
 0x287   : > { %v19833_v39 = vmul.f32 %v1157_v2, %v1157_v2 }
 0x28b   : > { %v17520_v3 = vpop.f32.mrb[8].mxu1 }
 0x28c   : > { %v19743_v4 = vpop.f32.mrb[9].mxu1  ;;  %v19851_v50 = vmul.f32 %v17520_v3, %v17520_v3 }
 0x28d   : > { %v19745_v7 = vpop.f32.mrb[10].mxu1 }
 0x28e   : > { %v19747_v8 = vpop.f32.mrb[11].mxu1  ;;  %22213 = vst [vmem:[#allocation17_spill] sm:$0xff] %v19851_v50 }
 0x293   : > { %v19749_v9 = vpop.f32.mrb[12].mxu1 }
 0x294   : > { %v19751_v10 = vpop.f32.mrb[13].mxu1 }
 0x295   : > { %v19753_v13 = vpop.f32.mrb[14].mxu1 }
 0x296   : > { %v19755_v14 = vpop.f32.mrb[15].mxu1 }
 0x297   : > { %v19924_v36 = vmul.f32 %v19755_v14, %v19755_v14 }
 0x29b   : > { %v17528_v35 = vpop.f32.mrb[16].mxu1 }
 0x29c   : > { %v1202_v15 = vpop.f32.mrb[17].mxu1  ;;  %v19759_v19 = vmul.f32 %v17528_v35, %v17528_v35  ;;  %v19761_v37 = vmul.f32 %v17528_v35, %v17512_v55  ;;  %v19881_v35 = vmul.f32 %v19747_v8, %v19747_v8 }
 0x29d   : > { %v17529_v20 = vpop.f32.mrb[18].mxu1  ;;  %v19765_v12 = vmul.f32 %v1202_v15, %v1202_v15  ;;  %v19767_v17 = vmul.f32 %v1202_v15, %v1138_v56  ;;  %v19859_v56 = vmul.f32 %v19743_v4, %v19743_v4 }
 0x29e   : > { %22199 = vst [vmem:[#allocation3_spill] sm:$0xff] %v19761_v37  ;;  %v1205_v18 = vpop.f32.mrb[19].mxu1  ;;  %v19771_v22 = vmul.f32 %v17529_v20, %v17529_v20  ;;  %v19775_v23 = vadd.f32 %v19759_v19, %v19757_v16  ;;  %v19777_v24 = vmul.f32 %v17529_v20, %v17513_v59  ;;  %22221 = vst [vmem:[#allocation25_spill] sm:$0xff] %v19881_v35 }
 0x29f   : > { %22200 = vst [vmem:[#allocation4_spill] sm:$0xff] %v19767_v17  ;;  %v19781_v26 = vmul.f32 %v1205_v18, %v1205_v18  ;;  %v19785_v27 = vadd.f32 %v19765_v12, %v19763_v11  ;;  %v19787_v28 = vmul.f32 %v1205_v18, %v1141_v60  ;;  %22216 = vst [vmem:[#allocation20_spill] sm:$0xff] %v19859_v56 }
 0x2a0   : > { %22201 = vst [vmem:[#allocation5_spill] sm:$0xff] %v19777_v24  ;;  %v19791_v30 = vadd.f32 %v19771_v22, %v19769_v21 }
 0x2a1   : > { %22202 = vst [vmem:[#allocation6_spill] sm:$0xff] %v19787_v28  ;;  %v19798_v32 = vadd.f32 %v19781_v26, %v19779_v25 }
 0x2a3   : > { %v17532_v40 = vpop.f32.mrb[20].mxu1 }
 0x2a4   : > { %v1218_v46 = vpop.f32.mrb[21].mxu1  ;;  %v19809_v52 = vmul.f32 %v17532_v40, %v17532_v40  ;;  %v19811_v57 = vmul.f32 %v17532_v40, %v17516_v61  ;;  %v19902_v40 = vmul.f32 %v19749_v9, %v19749_v9 }
 0x2a5   : > { %v17533_v58 = vpop.f32.mrb[22].mxu1  ;;  %v19817_v29 = vmul.f32 %v1218_v46, %v1218_v46  ;;  %v19819_v0 = vmul.f32 %v1218_v46, %v1154_v62  ;;  %v19868_v62 = vmul.f32 %v19745_v7, %v19745_v7 }
 0x2a6   : > { %22205 = vst [vmem:[#allocation9_spill] sm:$0xff] %v19809_v52  ;;  %22206 = vst [vmem:[#allocation10_spill] sm:$0xff] %v19811_v57  ;;  %v1221_v33 = vpop.f32.mrb[23].mxu1  ;;  %v19823_v5 = vmul.f32 %v17533_v58, %v17533_v58  ;;  %v19827_v6 = vadd.f32 %v19809_v52, %v19805_v45  ;;  %v19829_v38 = vmul.f32 %v17533_v58, %v17517_v1 }
 0x2a7   : > { %22207 = vst [vmem:[#allocation11_spill] sm:$0xff] %v19817_v29  ;;  %22208 = vst [vmem:[#allocation12_spill] sm:$0xff] %v19819_v0  ;;  %v19835_v41 = vmul.f32 %v1221_v33, %v1221_v33  ;;  %v19839_v42 = vadd.f32 %v19817_v29, %v19807_v51  ;;  %v19841_v43 = vmul.f32 %v1221_v33, %v1157_v2 }
 0x2a8   : > { %22209 = vst [vmem:[#allocation13_spill] sm:$0xff] %v19823_v5  ;;  %22210 = vst [vmem:[#allocation14_spill] sm:$0xff] %v19829_v38  ;;  %v19845_v44 = vadd.f32 %v19823_v5, %v19815_v63  ;;  %v19908_v33 = vmul.f32 %v19751_v10, %v19751_v10 }
 0x2a9   : > { %22211 = vst [vmem:[#allocation15_spill] sm:$0xff] %v19835_v41  ;;  %22212 = vst [vmem:[#allocation16_spill] sm:$0xff] %v19841_v43  ;;  %v19849_v47 = vadd.f32 %v19835_v41, %v19833_v39  ;;  %v3030_v41 = vadd.f32 0.0001, %v19798_v32  ;;  %v2967_v32 = vmul.f32 2.0, %v19761_v37 }
 0x2aa   : > { %22218 = vst [vmem:[#allocation22_spill] sm:$0xff] %v19868_v62  ;;  %22224 = vst [vmem:[#allocation28_spill] sm:$0xff] %v19908_v33 }
 0x2ab   : > { %v17536_v48 = vpop.f32.mrb[24].mxu1 }
 0x2ac   : > { %v1234_v49 = vpop.f32.mrb[25].mxu1  ;;  %v19853_v53 = vmul.f32 %v17536_v48, %v17536_v48  ;;  %v19855_v54 = vmul.f32 %v17536_v48, %v17520_v3 }
 0x2ad   : > { %v17537_v55 = vpop.f32.mrb[26].mxu1  ;;  %v19861_v59 = vmul.f32 %v1234_v49, %v1234_v49  ;;  %v19864_v60 = vmul.f32 %v1234_v49, %v19743_v4 }
 0x2ae   : > { %22214 = vst [vmem:[#allocation18_spill] sm:$0xff] %v19853_v53  ;;  %22215 = vst [vmem:[#allocation19_spill] sm:$0xff] %v19855_v54  ;;  %v1237_v61 = vpop.f32.mrb[27].mxu1  ;;  %v19870_v1 = vmul.f32 %v17537_v55, %v17537_v55  ;;  %v19874_v2 = vadd.f32 %v19853_v53, %v19851_v50  ;;  %v19877_v3 = vmul.f32 %v17537_v55, %v19745_v7  ;;  %v3031_v54 = vadd.f32 0.0001, %v19775_v23 }
 0x2af   : > { %22217 = vst [vmem:[#allocation21_spill] sm:$0xff] %v19861_v59  ;;  %v19883_v4 = vmul.f32 %v1237_v61, %v1237_v61  ;;  %v19887_v15 = vadd.f32 %v19861_v59, %v19859_v56  ;;  %v19898_v31 = vmul.f32 %v1237_v61, %v19747_v8  ;;  %v19914_v55 = vmul.f32 %v19753_v13, %v19753_v13 }
 0x2b0   : > { %22219 = vst [vmem:[#allocation23_spill] sm:$0xff] %v19870_v1  ;;  %22220 = vst [vmem:[#allocation24_spill] sm:$0xff] %v19877_v3  ;;  %v19891_v20 = vadd.f32 %v19870_v1, %v19868_v62  ;;  %18914 = vrcp.f32 %v3031_v54  ;;  %v3036_v3 = vadd.f32 0.0001, %v19845_v44  ;;  %v20015_v56 = vadd.f32 0.0001, %v19874_v2 }
 0x2b1   : > { %22222 = vst [vmem:[#allocation26_spill] sm:$0xff] %v19883_v4  ;;  %v19895_v18 = vadd.f32 %v19883_v4, %v19881_v35  ;;  %22226 = vst [vmem:[#allocation30_spill] sm:$0xff] %v19914_v55 }
 0x2b3   : > { %v17540_v7 = vpop.f32.mrb[28].mxu1 }
 0x2b4   : > { %v1250_v34 = vpop.f32.mrb[29].mxu1  ;;  %v19904_v46 = vmul.f32 %v17540_v7, %v17540_v7 }
 0x2b5   : > { %v17541_v58 = vpop.f32.mrb[30].mxu1  ;;  %v19910_v48 = vmul.f32 %v1250_v34, %v1250_v34 }
 0x2b6   : > { %22223 = vst [vmem:[#allocation27_spill] sm:$0xff] %v19904_v46  ;;  %v1253_v49 = vpop.f32.mrb[31].mxu1  ;;  %v19916_v8 = vmul.f32 %v17541_v58, %v17541_v58  ;;  %v19920_v61 = vadd.f32 %v19904_v46, %v19902_v40 }
 0x2b7   : > { %22225 = vst [vmem:[#allocation29_spill] sm:$0xff] %v19910_v48  ;;  %v19926_v53 = vmul.f32 %v1253_v49, %v1253_v49  ;;  %v19930_v1 = vadd.f32 %v19910_v48, %v19908_v33  ;;  %v19949_v48 = vmul.f32 %v1253_v49, %v19755_v14  ;;  %v3029_v14 = vadd.f32 0.0001, %v19785_v27 }
 0x2b8   : > { %22227 = vst [vmem:[#allocation31_spill] sm:$0xff] %v19916_v8  ;;  %v19934_v59 = vadd.f32 %v19916_v8, %v19914_v55  ;;  %v19952_v8 = vmul.f32 %v1250_v34, %v19751_v10  ;;  %v3032_v10 = vadd.f32 0.0001, %v19791_v30  ;;  %v19971_v34 = vmul.f32 %v17540_v7, %v19749_v9 }
 0x2b9   : > { %22228 = vst [vmem:[#allocation32_spill] sm:$0xff] %v19926_v53  ;;  %v19938_v4 = vadd.f32 %v19926_v53, %v19924_v36  ;;  %v19957_v53 = vmul.f32 %v17541_v58, %v19753_v13  ;;  %18916 = vrcp.f32 %v3029_v14  ;;  %v3035_v27 = vadd.f32 0.0001, %v19827_v6 }
 0x2ba   : > { %22229 = vst [vmem:[#allocation33_spill] sm:$0xff] %v19952_v8  ;;  %22231 = vst [vmem:[#allocation35_spill] sm:$0xff] %v19971_v34  ;;  %18918 = vrcp.f32 %v3032_v10  ;;  %v3033_v7 = vadd.f32 0.0001, %v19839_v42  ;;  %v19998_v9 = vadd.f32 0.0001, %v19849_v47 }
 0x2bb   : > { %v19940_v46 = vpop.f32.mrb[32].mxu1  ;;  %22230 = vst [vmem:[#allocation34_spill] sm:$0xff] %v19957_v53  ;;  %18920 = vrcp.f32 %v3030_v41  ;;  %v18915_v53 = vpop.eup %18914  ;;  %v2965_v8 = vmul.f32 2.0, %v19767_v17  ;;  %v2968_v47 = vmul.f32 2.0, %v19777_v24  ;;  %v2966_v17 = vmul.f32 2.0, %v19787_v28 }
 0x2bc   : > { %v19944_v5 = vpop.f32.mrb[33].mxu1  ;;  %18922 = vrcp.f32 %v3035_v27  ;;  %v3063_v62 = vmul.f32 %v18915_v53, %v3031_v54  ;;  %v20041_v42 = vadd.f32 0.0001, %v19895_v18 }
 0x2bd   : > { %18924 = vrcp.f32 %v3033_v7  ;;  %v20025_v24 = vadd.f32 0.0001, %v2965_v8  ;;  %v2969_v8 = vmul.f32 2.0, %v19819_v0 }
 0x2be   : > { %18926 = vrcp.f32 %v3036_v3 }
 0x2bf   : > { %v19954_v29 = vpop.f32.mrb[34].mxu1  ;;  %18928 = vrcp.f32 %v19998_v9  ;;  %22238 = vst [vmem:[#allocation42_spill] sm:$0xff] %v20025_v24 }
 0x2c0   : > { %v19961_v52 = vpop.f32.mrb[35].mxu1  ;;  %18930 = vrcp.f32 %v20015_v56 }
 0x2c3   : > { %v19967_v49 = vpop.f32.mrb[36].mxu1  ;;  %v18917_v45 = vpop.eup %18916 }
 0x2c4   : > { %v19975_v58 = vpop.f32.mrb[37].mxu1  ;;  %v3061_v34 = vmul.f32 %v18917_v45, %v3029_v14 }
 0x2c6   : > { %v3077_v14 = vsub.f32 2.0, %v3061_v34 }
 0x2c7   : > { %v19980_v23 = vpop.f32.mrb[38].mxu1 }
 0x2c8   : > { %v19985_v30 = vpop.f32.mrb[39].mxu1 }
 0x2c9   : > { %22232 = vst [vmem:[#allocation36_spill] sm:$0xff] %v19985_v30 }
 0x2cb   : > { %v19991_v13 = vpop.f32.mrb[40].mxu1 }
 0x2cc   : > { %22233 = vst [vmem:[#allocation37_spill] sm:$0xff] %v19991_v13  ;;  %v19995_v6 = vpop.f32.mrb[41].mxu1  ;;  %v18919_v13 = vpop.eup %18918 }
 0x2cd   : > { %22234 = vst [vmem:[#allocation38_spill] sm:$0xff] %v19995_v6  ;;  %v18921_v37 = vpop.eup %18920  ;;  %v20018_v6 = vadd.f32 0.0001, %v2967_v32  ;;  %v3064_v2 = vmul.f32 %v18919_v13, %v3032_v10  ;;  %v2971_v32 = vmul.f32 2.0, %v19811_v57  ;;  %v20044_v10 = vadd.f32 0.0001, %v2966_v17 }
 0x2ce   : > { %v3062_v54 = vmul.f32 %v18921_v37, %v3030_v41  ;;  %v3079_v41 = vsub.f32 2.0, %v3063_v62  ;;  %v20060_v62 = vadd.f32 0.0001, %v2969_v8 }
 0x2cf   : > { %v20003_v44 = vpop.f32.mrb[42].mxu1  ;;  %22237 = vst [vmem:[#allocation41_spill] sm:$0xff] %v20018_v6  ;;  %v18923_v6 = vpop.eup %18922  ;;  %22241 = vst [vmem:[#allocation45_spill] sm:$0xff] %v20044_v10  ;;  %v3080_v28 = vsub.f32 2.0, %v3064_v2  ;;  %v20055_v17 = vadd.f32 0.0001, %v2971_v32  ;;  %v20065_v2 = vmul.f32 %v18917_v45, %v3077_v14 }
 0x2d0   : > { %22235 = vst [vmem:[#allocation39_spill] sm:$0xff] %v20003_v44  ;;  %v20008_v35 = vpop.f32.mrb[43].mxu1  ;;  %v20023_v44 = vadd.f32 0.0001, %v19887_v15  ;;  %v20037_v15 = vadd.f32 0.0001, %v19891_v20  ;;  %v18925_v24 = vpop.eup %18924  ;;  %v3067_v33 = vmul.f32 %v18923_v6, %v3035_v27  ;;  %v20067_v27 = vmul.f32 %v18915_v53, %v3079_v41 }
 0x2d1   : > { %22236 = vst [vmem:[#allocation40_spill] sm:$0xff] %v20008_v35  ;;  %v20031_v35 = vadd.f32 0.0001, %v2968_v47  ;;  %v2972_v47 = vmul.f32 2.0, %v19829_v38  ;;  %v18927_v57 = vpop.eup %18926  ;;  %v2970_v20 = vmul.f32 2.0, %v19841_v43  ;;  %22242 = vst [vmem:[#allocation46_spill] sm:$0xff] %v20055_v17  ;;  %v22243_v41 = vsub.f32 %v19940_v46, %v19779_v25 }
 0x2d2   : > { %18932 = vrcp.f32 %v20023_v44  ;;  %v3078_v10 = vsub.f32 2.0, %v3062_v54  ;;  %v18929_v34 = vpop.eup %18928  ;;  %v3068_v43 = vmul.f32 %v18927_v57, %v3036_v3  ;;  %v2973_v54 = vmul.f32 2.0, %v19864_v60 }
 0x2d3   : > { %v20020_v30 = vpop.f32.mrb[44].mxu1  ;;  %22240 = vst [vmem:[#allocation44_spill] sm:$0xff] %v20031_v35  ;;  %18934 = vrcp.f32 %v20037_v15  ;;  %v20063_v0 = vadd.f32 0.0001, %v2972_v47  ;;  %v20069_v32 = vadd.f32 0.0001, %v2970_v20  ;;  %v20076_v3 = vmul.f32 %v18919_v13, %v3080_v28 }
 0x2d4   : > { %v20029_v50 = vpop.f32.mrb[45].mxu1  ;;  %18936 = vrcp.f32 %v20041_v42  ;;  %v3083_v17 = vsub.f32 2.0, %v3067_v33  ;;  %v3066_v45 = vmul.f32 %v18929_v34, %v19998_v9  ;;  %v20081_v53 = vadd.f32 0.0001, %v19938_v4 }
 0x2d5   : > { %22239 = vst [vmem:[#allocation43_spill] sm:$0xff] %v20029_v50  ;;  %v3065_v50 = vmul.f32 %v18925_v24, %v3033_v7  ;;  %v20074_v7 = vadd.f32 0.0001, %v19930_v1  ;;  %v20083_v14 = vmul.f32 %v18921_v37, %v3078_v10  ;;  %v3084_v33 = vsub.f32 2.0, %v3068_v43  ;;  %v18931_v10 = vpop.eup %18930 }
 0x2d6   : > { %v20089_v1 = vadd.f32 0.0001, %v19920_v61  ;;  %v22244_v28 = vsub.f32 %v19944_v5, %v19763_v11  ;;  %v20095_v9 = vadd.f32 0.0001, %v19934_v59  ;;  %v2974_v37 = vmul.f32 2.0, %v19898_v31 }
 0x2d7   : > { %v20047_v35 = vpop.f32.mrb[46].mxu1  ;;  %v20098_v4 = vadd.f32 0.0001, %v2973_v54  ;;  %18938 = vrcp.f32 %v20074_v7  ;;  %v3082_v46 = vsub.f32 2.0, %v3066_v45  ;;  %v22245_v61 = vsub.f32 %v19954_v29, %v19769_v21  ;;  %v22247_v45 = vld [vmem:[#allocation24_spill] sm:$0xff] }
 0x2d8   : > { %v20053_v18 = vpop.f32.mrb[47].mxu1  ;;  %18940 = vrcp.f32 %v20081_v53  ;;  %v20116_v54 = vmul.f32 %v18927_v57, %v3084_v33  ;;  %v2976_v21 = vmul.f32 2.0, %v22247_v45  ;;  %v22248_v57 = vld [vmem:[#allocation15_spill] sm:$0xff]  ;;  %v20137_v33 = vadd.f32 0.0001, %v2974_v37 }
 0x2d9   : > { %18942 = vrcp.f32 %v20089_v1 }
 0x2da   : > { %18944 = vrcp.f32 %v20095_v9 }
 0x2db   : > { %v17632_v55 = vpop.f32.mrb[48].mxu1 }
 0x2dc   : > { %v2790_v38 = vsub.f32 %v17632_v55, %v19781_v26  ;;  %v2116_v8 = vpop.f32.mrb[49].mxu1  ;;  %v3081_v55 = vsub.f32 2.0, %v3065_v50  ;;  %v20104_v50 = vmul.f32 %v18923_v6, %v3083_v17  ;;  %v18933_v11 = vpop.eup %18932  ;;  %v22246_v17 = vsub.f32 %v19961_v52, %v19757_v16  ;;  %v22249_v52 = vld [vmem:[#allocation11_spill] sm:$0xff] }
 0x2dd   : > { %v2789_v47 = vsub.f32 %v2116_v8, %v19765_v12  ;;  %v20118_v6 = vpop.eup %18934 }
 0x2de   : > { %v2854_v26 = vadd.f32 %v2790_v38, %v22243_v41  ;;  %v20126_v29 = vpop.eup %18936 }
 0x2df   : > { %v2853_v12 = vadd.f32 %v2789_v47, %v22244_v28  ;;  %v17635_v13 = vpop.f32.mrb[50].mxu1  ;;  %v3071_v47 = vmul.f32 %v18931_v10, %v20015_v56  ;;  %v22250_v28 = vsub.f32 %v19967_v49, %v19833_v39  ;;  %v3070_v37 = vmul.f32 %v20126_v29, %v20041_v42  ;;  %v22254_v49 = vld [vmem:[#allocation13_spill] sm:$0xff] }
 0x2e0   : > { %v20100_v25 = vadd.f32 0.0009, %v2854_v26  ;;  %v2792_v38 = vsub.f32 %v17635_v13, %v19771_v22  ;;  %v2126_v43 = vpop.f32.mrb[51].mxu1  ;;  %v20114_v22 = vmul.f32 %v18925_v24, %v3081_v55  ;;  %v3069_v55 = vmul.f32 %v18933_v11, %v20023_v44 }
 0x2e1   : > { %v20106_v5 = vadd.f32 0.0009, %v2853_v12  ;;  %v2791_v59 = vsub.f32 %v2126_v43, %v19759_v19  ;;  %v3072_v13 = vmul.f32 %v20118_v6, %v20037_v15  ;;  %v22251_v43 = vld [vmem:[#allocation19_spill] sm:$0xff]  ;;  %v22252_v44 = vsub.f32 %v19975_v58, %v19807_v51  ;;  %v22255_v51 = vld [vmem:[#allocation9_spill] sm:$0xff]  ;;  %v20163_v42 = vpop.eup %18938 }
 0x2e2   : > { %v2856_v20 = vadd.f32 %v2792_v38, %v22245_v61  ;;  %18946 = vrcp.f32 %v20100_v25  ;;  %v20144_v38 = vmul.f32 %v18929_v34, %v3082_v46  ;;  %v3085_v46 = vsub.f32 2.0, %v3069_v55  ;;  %v18941_v55 = vpop.eup %18940 }
 0x2e3   : > { %v2855_v8 = vadd.f32 %v2791_v59, %v22246_v17  ;;  %v17638_v19 = vpop.f32.mrb[52].mxu1  ;;  %18948 = vrcp.f32 %v20106_v5  ;;  %v2975_v59 = vmul.f32 2.0, %v22251_v43  ;;  %v3087_v17 = vsub.f32 2.0, %v3071_v47 }
 0x2e4   : > { %v20129_v24 = vadd.f32 0.0009, %v2856_v20  ;;  %v2794_v41 = vsub.f32 %v17638_v19, %v22248_v57  ;;  %v2136_v26 = vpop.f32.mrb[53].mxu1  ;;  %v2978_v57 = vmul.f32 2.0, %v19949_v48  ;;  %v22256_v47 = vsub.f32 %v19980_v23, %v19815_v63  ;;  %v22264_v63 = vld [vmem:[#allocation26_spill] sm:$0xff] }
 0x2e5   : > { %v20134_v16 = vadd.f32 0.0009, %v2855_v8  ;;  %v2793_v56 = vsub.f32 %v2136_v26, %v22249_v52  ;;  %v20152_v8 = vadd.f32 0.0001, %v2976_v21  ;;  %v20169_v26 = vadd.f32 0.0001, %v2975_v59 }
 0x2e6   : > { %v2858_v12 = vadd.f32 %v2794_v41, %v22250_v28  ;;  %18950 = vrcp.f32 %v20129_v24  ;;  %v3088_v41 = vsub.f32 2.0, %v3072_v13  ;;  %v22258_v52 = vld [vmem:[#allocation36_spill] sm:$0xff]  ;;  %v3086_v13 = vsub.f32 2.0, %v3070_v37 }
 0x2e7   : > { %v2857_v61 = vadd.f32 %v2793_v56, %v22252_v44  ;;  %v17641_v20 = vpop.f32.mrb[54].mxu1  ;;  %22253 = vst [vmem:[#allocation24_spill] sm:$0xff] %v20152_v8  ;;  %18952 = vrcp.f32 %v20134_v16  ;;  %22257 = vst [vmem:[#allocation15_spill] sm:$0xff] %v20169_v26  ;;  %v22259_v56 = vld [vmem:[#allocation8_spill] sm:$0xff] }
 0x2e8   : > { %v20155_v39 = vadd.f32 0.0009, %v2858_v12  ;;  %v2796_v15 = vsub.f32 %v17641_v20, %v22254_v49  ;;  %v2146_v34 = vpop.f32.mrb[55].mxu1  ;;  %v22260_v28 = vsub.f32 %v22258_v52, %v22259_v56  ;;  %v22262_v20 = vld [vmem:[#allocation33_spill] sm:$0xff] }
 0x2e9   : > { %v20159_v19 = vadd.f32 0.0009, %v2857_v61  ;;  %v2795_v58 = vsub.f32 %v2146_v34, %v22255_v51  ;;  %v20175_v61 = vmul.f32 %v18931_v10, %v3087_v17  ;;  %v2977_v49 = vmul.f32 2.0, %v22262_v20  ;;  %v20178_v34 = vpop.eup %18942 }
 0x2ea   : > { %18954 = vrcp.f32 %v20155_v39  ;;  %v2860_v21 = vadd.f32 %v2796_v15, %v22256_v47  ;;  %22263 = vst [vmem:[#allocation19_spill] sm:$0xff] %v20178_v34  ;;  %v20183_v15 = vmul.f32 %v18933_v11, %v3085_v46  ;;  %v20185_v47 = vpop.eup %18944  ;;  %v3073_v10 = vmul.f32 %v20163_v42, %v20074_v7  ;;  %v22271_v46 = vld [vmem:[#allocation34_spill] sm:$0xff] }
 0x2eb   : > { %18956 = vrcp.f32 %v20159_v19  ;;  %v2859_v12 = vadd.f32 %v2795_v58, %v22260_v28  ;;  %v17644_v44 = vpop.f32.mrb[56].mxu1  ;;  %22261 = vst [vmem:[#allocation11_spill] sm:$0xff] %v20175_v61  ;;  %22265 = vst [vmem:[#allocation13_spill] sm:$0xff] %v20185_v47  ;;  %v22266_v58 = vld [vmem:[#allocation21_spill] sm:$0xff]  ;;  %v20192_v17 = vadd.f32 0.0001, %v2978_v57  ;;  %v3074_v11 = vmul.f32 %v18941_v55, %v20081_v53 }
 0x2ec   : > { %v20180_v51 = vadd.f32 0.0009, %v2860_v21  ;;  %v2798_v23 = vsub.f32 %v17644_v44, %v22264_v63  ;;  %v2156_v59 = vpop.f32.mrb[57].mxu1  ;;  %v18947_v56 = vpop.eup %18946  ;;  %v22268_v21 = vld [vmem:[#allocation37_spill] sm:$0xff]  ;;  %v2980_v63 = vmul.f32 2.0, %v22271_v46 }
 0x2ed   : > { %v20187_v26 = vadd.f32 0.0009, %v2859_v12  ;;  %v2797_v52 = vsub.f32 %v2156_v59, %v22266_v58  ;;  %22267 = vst [vmem:[#allocation9_spill] sm:$0xff] %v20192_v17  ;;  %v22269_v28 = vld [vmem:[#allocation25_spill] sm:$0xff]  ;;  %v18949_v12 = vpop.eup %18948  ;;  %v22272_v59 = vld [vmem:[#allocation38_spill] sm:$0xff]  ;;  %v22273_v58 = vld [vmem:[#allocation20_spill] sm:$0xff]  ;;  %v20205_v17 = vmul.f32 %v20118_v6, %v3088_v41 }
 0x2ee   : > { %18958 = vrcp.f32 %v20180_v51  ;;  %v22270_v37 = vsub.f32 %v22268_v21, %v22269_v28  ;;  %v22274_v61 = vsub.f32 %v22272_v59, %v22273_v58  ;;  %v20207_v20 = vadd.f32 0.0001, %v2977_v49  ;;  %v22279_v6 = vld [vmem:[#allocation18_spill] sm:$0xff]  ;;  %v22280_v58 = vld [vmem:[#allocation39_spill] sm:$0xff] }
 0x2ef   : > { %18960 = vrcp.f32 %v20187_v26  ;;  %v17647_v57 = vpop.f32.mrb[58].mxu1  ;;  %22275 = vst [vmem:[#allocation36_spill] sm:$0xff] %v20205_v17  ;;  %v20214_v28 = vmul.f32 %v20178_v34, %v20089_v1  ;;  %v3089_v49 = vsub.f32 2.0, %v3073_v10  ;;  %v3090_v34 = vsub.f32 2.0, %v3074_v11 }
 0x2f0   : > { %v2862_v44 = vadd.f32 %v2798_v23, %v22270_v37  ;;  %v2861_v7 = vadd.f32 %v2797_v52, %v22274_v61  ;;  %22276 = vst [vmem:[#allocation8_spill] sm:$0xff] %v20207_v20  ;;  %v22277_v23 = vld [vmem:[#allocation23_spill] sm:$0xff]  ;;  %v2166_v53 = vpop.f32.mrb[59].mxu1  ;;  %v20217_v37 = vmul.f32 %v20126_v29, %v3086_v13  ;;  %v2902_v61 = vmul.f32 %v18947_v56, %v20100_v25  ;;  %v20223_v59 = vpop.eup %18950  ;;  %v22283_v25 = vld [vmem:[#allocation40_spill] sm:$0xff]  ;;  %v22284_v13 = vld [vmem:[#allocation17_spill] sm:$0xff] }
 0x2f1   : > { %v2800_v21 = vsub.f32 %v17647_v57, %v22277_v23  ;;  %22278 = vst [vmem:[#allocation26_spill] sm:$0xff] %v20214_v28  ;;  %v2799_v41 = vsub.f32 %v2166_v53, %v22279_v6  ;;  %v22281_v57 = vld [vmem:[#allocation22_spill] sm:$0xff]  ;;  %v20230_v29 = vpop.eup %18952  ;;  %v20236_v6 = vadd.f32 0.0001, %v2980_v63  ;;  %v22287_v20 = vld [vmem:[#allocation35_spill] sm:$0xff] }
 0x2f2   : > { %v20209_v8 = vadd.f32 0.0009, %v2862_v44  ;;  %v20220_v52 = vadd.f32 0.0009, %v2861_v7  ;;  %v2901_v44 = vmul.f32 %v18949_v12, %v20106_v5  ;;  %v22282_v1 = vsub.f32 %v22280_v58, %v22281_v57 }
 0x2f3   : > { %v22285_v7 = vsub.f32 %v22283_v25, %v22284_v13  ;;  %v17650_v10 = vpop.f32.mrb[60].mxu1  ;;  %22286 = vst [vmem:[#allocation21_spill] sm:$0xff] %v20236_v6  ;;  %v20239_v5 = vmul.f32 2.0, %v22287_v20  ;;  %v20248_v57 = vmul.f32 %v20185_v47, %v20095_v9  ;;  %v2918_v63 = vsub.f32 2.0, %v2902_v61  ;;  %v22291_v13 = vld [vmem:[#allocation29_spill] sm:$0xff] }
 0x2f4   : > { %18962 = vrcp.f32 %v20209_v8  ;;  %v2864_v23 = vadd.f32 %v2800_v21, %v22282_v1  ;;  %v20241_v46 = vpop.eup %18954  ;;  %v22289_v21 = vld [vmem:[#allocation32_spill] sm:$0xff]  ;;  %v2176_v58 = vpop.f32.mrb[61].mxu1  ;;  %v2904_v1 = vmul.f32 %v20223_v59, %v20129_v24  ;;  %v2903_v61 = vmul.f32 %v20230_v29, %v20134_v16  ;;  %v22297_v24 = vld [vmem:[#allocation31_spill] sm:$0xff] }
 0x2f5   : > { %18964 = vrcp.f32 %v20220_v52  ;;  %v2863_v53 = vadd.f32 %v2799_v41, %v22285_v7  ;;  %22288 = vst [vmem:[#allocation37_spill] sm:$0xff] %v20239_v5  ;;  %v2802_v11 = vsub.f32 %v17650_v10, %v22289_v21  ;;  %22290 = vst [vmem:[#allocation25_spill] sm:$0xff] %v20248_v57  ;;  %v20251_v41 = vpop.eup %18956  ;;  %v2801_v7 = vsub.f32 %v2176_v58, %v22291_v13 }
 0x2f6   : > { %v20243_v17 = vadd.f32 0.0009, %v2864_v23  ;;  %v20257_v5 = vmul.f32 %v20163_v42, %v3089_v49  ;;  %v2917_v23 = vsub.f32 2.0, %v2901_v44  ;;  %v22293_v10 = vsub.f32 %v20020_v30, %v19924_v36  ;;  %v22295_v42 = vld [vmem:[#allocation28_spill] sm:$0xff] }
 0x2f7   : > { %v20253_v25 = vadd.f32 0.0009, %v2863_v53  ;;  %v20263_v21 = vmul.f32 %v18941_v55, %v3090_v34  ;;  %v22294_v53 = vld [vmem:[#allocation43_spill] sm:$0xff]  ;;  %v17653_v58 = vpop.f32.mrb[62].mxu1  ;;  %v2906_v36 = vmul.f32 %v20241_v46, %v20155_v39  ;;  %v2905_v30 = vmul.f32 %v20251_v41, %v20159_v19  ;;  %v22299_v39 = vld [vmem:[#allocation30_spill] sm:$0xff] }
 0x2f8   : > { %22292 = vst [vmem:[#allocation38_spill] sm:$0xff] %v20257_v5  ;;  %18966 = vrcp.f32 %v20243_v17  ;;  %v2866_v9 = vadd.f32 %v2802_v11, %v22293_v10  ;;  %v22296_v49 = vsub.f32 %v22294_v53, %v22295_v42  ;;  %v18959_v13 = vpop.eup %18958  ;;  %v2804_v34 = vsub.f32 %v17653_v58, %v22297_v24  ;;  %v2186_v11 = vpop.f32.mrb[63].mxu1  ;;  %v22298_v53 = vld [vmem:[#allocation27_spill] sm:$0xff] }
 0x2f9   : > { %18968 = vrcp.f32 %v20253_v25  ;;  %v18961_v16 = vpop.eup %18960  ;;  %v2908_v10 = vmul.f32 %v18959_v13, %v20180_v51  ;;  %v2934_v42 = vmul.f32 %v18947_v56, %v2918_v63  ;;  %v22300_v19 = vsub.f32 %v20047_v35, %v22299_v39 }
 0x2fa   : > { %v2865_v44 = vadd.f32 %v2801_v7, %v22296_v49  ;;  %v20277_v55 = vadd.f32 0.0009, %v2866_v9  ;;  %v2803_v7 = vsub.f32 %v2186_v11, %v22298_v53  ;;  %v2907_v49 = vmul.f32 %v18961_v16, %v20187_v26  ;;  %v22302_v53 = vld [vmem:[#allocation6_spill] sm:$0xff] }
 0x2fb   : > { %v2868_v9 = vadd.f32 %v2804_v34, %v22300_v19  ;;  %v2933_v28 = vmul.f32 %v18949_v12, %v2917_v23  ;;  %v2920_v5 = vsub.f32 2.0, %v2904_v1  ;;  %v2919_v58 = vsub.f32 2.0, %v2903_v61  ;;  %v17696_v24 = vpop.f32.mrb[64].mxu1  ;;  %v22303_v23 = vld [vmem:[#allocation4_spill] sm:$0xff] }
 0x2fc   : > { %v20281_v47 = vadd.f32 0.0009, %v2865_v44  ;;  %18970 = vrcp.f32 %v20277_v55  ;;  %v22301_v51 = vsub.f32 %v20053_v18, %v19902_v40  ;;  %v2922_v56 = vsub.f32 2.0, %v2906_v36  ;;  %v2646_v6 = vpop.f32.mrb[65].mxu1 }
 0x2fd   : > { %v2921_v63 = vsub.f32 2.0, %v2905_v30  ;;  %v20293_v26 = vadd.f32 0.0009, %v2868_v9  ;;  %v2806_v57 = vsub.f32 %v17696_v24, %v22302_v53  ;;  %v2924_v34 = vsub.f32 2.0, %v2908_v10  ;;  %v22304_v9 = vld [vmem:[#allocation5_spill] sm:$0xff]  ;;  %v22305_v24 = vld [vmem:[#allocation3_spill] sm:$0xff] }
 0x2fe   : > { %18972 = vrcp.f32 %v20281_v47  ;;  %v2867_v44 = vadd.f32 %v2803_v7, %v22301_v51  ;;  %v18963_v11 = vpop.eup %18962  ;;  %v2805_v61 = vsub.f32 %v2646_v6, %v22303_v23  ;;  %v2923_v39 = vsub.f32 2.0, %v2907_v49 }
 0x2ff   : > { %v18965_v35 = vpop.eup %18964  ;;  %v2910_v12 = vmul.f32 %v18963_v11, %v20209_v8  ;;  %18974 = vrcp.f32 %v20293_v26  ;;  %v2822_v18 = vmul.f32 2.0, %v2806_v57  ;;  %v17699_v7 = vpop.f32.mrb[66].mxu1  ;;  %v2936_v19 = vmul.f32 %v20223_v59, %v2920_v5 }
 0x300   : > { %v20297_v1 = vadd.f32 0.0009, %v2867_v44  ;;  %v2909_v40 = vmul.f32 %v18965_v35, %v20220_v52  ;;  %v2821_v30 = vmul.f32 2.0, %v2805_v61  ;;  %v2808_v51 = vsub.f32 %v17699_v7, %v22304_v9  ;;  %v2656_v44 = vpop.f32.mrb[67].mxu1 }
 0x301   : > { %v2926_v36 = vsub.f32 2.0, %v2910_v12  ;;  %v2838_v8 = vadd.f32 0.0009, %v2822_v18  ;;  %v2935_v6 = vmul.f32 %v20230_v29, %v2919_v58  ;;  %v20309_v52 = vmul.f32 %v20241_v46, %v2922_v56 }
 0x302   : > { %18976 = vrcp.f32 %v20297_v1  ;;  %v20304_v10 = vpop.eup %18966  ;;  %v2837_v57 = vadd.f32 0.0009, %v2821_v30  ;;  %v2807_v53 = vsub.f32 %v2656_v44, %v22305_v24  ;;  %v20315_v12 = vmul.f32 %v20251_v41, %v2921_v63  ;;  %v22308_v24 = vld [vmem:[#allocation16_spill] sm:$0xff] }
 0x303   : > { %v20311_v49 = vpop.eup %18968  ;;  %v20317_v59 = vmul.f32 %v18959_v13, %v2924_v34  ;;  %v2925_v5 = vsub.f32 2.0, %v2909_v40  ;;  %v2950_v23 = vmul.f32 %v2934_v42, %v2838_v8  ;;  %v2824_v61 = vmul.f32 2.0, %v2808_v51  ;;  %v17702_v56 = vpop.f32.mrb[68].mxu1  ;;  %v22306_v13 = vld [vmem:[#allocation45_spill] sm:$0xff] }
 0x304   : > { %v20319_v18 = vmul.f32 %v18961_v16, %v2923_v39  ;;  %v20323_v29 = vmul.f32 %v20304_v10, %v20243_v17  ;;  %v2949_v46 = vmul.f32 %v2933_v28, %v2837_v57  ;;  %v2823_v58 = vmul.f32 2.0, %v2807_v53  ;;  %v2666_v34 = vpop.f32.mrb[69].mxu1  ;;  %v22307_v28 = vld [vmem:[#allocation42_spill] sm:$0xff] }
 0x305   : > { %v20325_v30 = vmul.f32 %v18963_v11, %v2926_v36  ;;  %v20331_v41 = vmul.f32 %v20311_v49, %v20253_v25  ;;  %v2998_v42 = vmul.f32 %v22306_v13, %v2950_v23  ;;  %v3166_v16 = vsel %vm574_vm0, %v2950_v23, 0.0  ;;  %v22309_v13 = vld [vmem:[#allocation44_spill] sm:$0xff] }
 0x306   : > { %v20327_v7 = vpop.eup %18970  ;;  %v2840_v63 = vadd.f32 0.0009, %v2824_v61  ;;  %v2997_v11 = vmul.f32 %v22307_v28, %v2949_v46  ;;  %v3165_v40 = vsel %vm574_vm0, %v2949_v46, 0.0  ;;  %v2839_v36 = vadd.f32 0.0009, %v2823_v58 }
 0x307   : > { %v20339_v17 = vmul.f32 %v20327_v7, %v20277_v55  ;;  %v3110_v8 = vmul.f32 %v20083_v14, %v2998_v42  ;;  %v3167_v9 = vadd.f32 %v3166_v16, %v3165_v40  ;;  %v2810_v53 = vsub.f32 %v17702_v56, %v22308_v24  ;;  %v17705_v55 = vpop.f32.mrb[70].mxu1  ;;  %v22310_v56 = vld [vmem:[#allocation41_spill] sm:$0xff] }
 0x308   : > { %v20335_v39 = vpop.eup %18972  ;;  %v2952_v51 = vmul.f32 %v2936_v19, %v2840_v63  ;;  %v3109_v44 = vmul.f32 %v20065_v2, %v2997_v11  ;;  %v2951_v57 = vmul.f32 %v2935_v6, %v2839_v36  ;;  %v20350_v23 = vmul.f32 %v18965_v35, %v2925_v5  ;;  %v2676_v42 = vpop.f32.mrb[71].mxu1 }
 0x309   : > { %v20345_v25 = vmul.f32 %v20335_v39, %v20281_v47  ;;  %v20352_v61 = vpop.eup %18974  ;;  %v2928_v46 = vsub.f32 2.0, %v20323_v29  ;;  %v2927_v58 = vsub.f32 2.0, %v20331_v41  ;;  %v3126_v47 = vsel %vm574_vm0, %v3110_v8, 0.0  ;;  %v22311_v8 = vld [vmem:[#allocation12_spill] sm:$0xff] }
 0x30a   : > { %v3000_v14 = vmul.f32 %v22309_v13, %v2952_v51  ;;  %v2930_v2 = vsub.f32 2.0, %v20339_v17  ;;  %v3125_v6 = vsel %vm574_vm0, %v3109_v44, 0.0  ;;  %v2999_v35 = vmul.f32 %v22310_v56, %v2951_v57 }
 0x30b   : > { %v3168_v5 = vsel %vm574_vm0, %v2951_v57, 0.0  ;;  %v3127_v29 = vadd.f32 %v3126_v47, %v3125_v6  ;;  %v3170_v11 = vsel %vm574_vm0, %v2952_v51, 0.0  ;;  %v2826_v36 = vmul.f32 2.0, %v2810_v53  ;;  %v17708_v13 = vpop.f32.mrb[72].mxu1  ;;  %v22312_v6 = vld [vmem:[#allocation14_spill] sm:$0xff] }
 0x30c   : > { %v20358_v19 = vpop.eup %18976  ;;  %v3112_v63 = vmul.f32 %v20076_v3, %v3000_v14  ;;  %v3169_v28 = vadd.f32 %v3168_v5, %v3167_v9  ;;  %v3111_v40 = vmul.f32 %v20067_v27, %v2999_v35  ;;  %v2809_v24 = vsub.f32 %v2666_v34, %v22311_v8  ;;  %v2686_v9 = vpop.f32.mrb[73].mxu1  ;;  %v22313_v53 = vld [vmem:[#allocation10_spill] sm:$0xff] }
 0x30d   : > { %v20371_v44 = vmul.f32 %v20352_v61, %v20293_v26  ;;  %v20375_v57 = vmul.f32 %v20358_v19, %v20297_v1  ;;  %v2812_v3 = vsub.f32 %v17705_v55, %v22312_v6  ;;  %v2842_v14 = vadd.f32 0.0009, %v2826_v36 }
 0x30e   : > { %v3171_v47 = vadd.f32 %v3170_v11, %v3169_v28  ;;  %v3128_v51 = vsel %vm574_vm0, %v3111_v40, 0.0  ;;  %v2825_v27 = vmul.f32 2.0, %v2809_v24  ;;  %v2811_v56 = vsub.f32 %v2676_v42, %v22313_v53 }
 0x30f   : > { %v3129_v34 = vadd.f32 %v3128_v51, %v3127_v29  ;;  %v2828_v35 = vmul.f32 2.0, %v2812_v3  ;;  %v2814_v5 = vsub.f32 %v17708_v13, %v19898_v31  ;;  %v2813_v26 = vsub.f32 %v2686_v9, %v19864_v60  ;;  %v17711_v55 = vpop.f32.mrb[74].mxu1 }
 0x310   : > { %v3130_v8 = vsel %vm574_vm0, %v3112_v63, 0.0  ;;  %v2954_v1 = vmul.f32 %v20309_v52, %v2842_v14  ;;  %v2841_v28 = vadd.f32 0.0009, %v2825_v27  ;;  %v2827_v11 = vmul.f32 2.0, %v2811_v56  ;;  %v2696_v24 = vpop.f32.mrb[75].mxu1 }
 0x311   : > { %v3131_v6 = vadd.f32 %v3130_v8, %v3129_v34  ;;  %v2844_v16 = vadd.f32 0.0009, %v2828_v35  ;;  %v2830_v40 = vmul.f32 2.0, %v2814_v5  ;;  %v2829_v36 = vmul.f32 2.0, %v2813_v26 }
 0x312   : > { %v2932_v42 = vsub.f32 2.0, %v20371_v44  ;;  %v3002_v29 = vmul.f32 %v20069_v32, %v2954_v1  ;;  %v2953_v31 = vmul.f32 %v20315_v12, %v2841_v28  ;;  %v2843_v13 = vadd.f32 0.0009, %v2827_v11 }
 0x313   : > { %v2956_v60 = vmul.f32 %v20317_v59, %v2844_v16  ;;  %v2846_v63 = vadd.f32 0.0009, %v2830_v40  ;;  %v2845_v3 = vadd.f32 0.0009, %v2829_v36  ;;  %v2816_v52 = vsub.f32 %v17711_v55, %v22247_v45  ;;  %v17714_v53 = vpop.f32.mrb[76].mxu1 }
 0x314   : > { %v3114_v9 = vmul.f32 %v20144_v38, %v3002_v29  ;;  %v3001_v51 = vmul.f32 %v20060_v62, %v2953_v31  ;;  %v3172_v14 = vsel %vm574_vm0, %v2953_v31, 0.0  ;;  %v2955_v27 = vmul.f32 %v20319_v18, %v2843_v13  ;;  %v2706_v16 = vpop.f32.mrb[77].mxu1  ;;  %v22314_v38 = vld [vmem:[#allocation46_spill] sm:$0xff] }
 0x315   : > { %v3173_v56 = vadd.f32 %v3172_v14, %v3171_v47  ;;  %v3004_v32 = vmul.f32 %v20063_v0, %v2956_v60  ;;  %v2958_v12 = vmul.f32 %v20325_v30, %v2846_v63  ;;  %v2944_v59 = vmul.f32 %v20304_v10, %v2928_v46  ;;  %v22315_v14 = vld [vmem:[#allocation24_spill] sm:$0xff] }
 0x316   : > { %v3174_v34 = vsel %vm574_vm0, %v2954_v1, 0.0  ;;  %v3113_v45 = vmul.f32 %v20114_v22, %v3001_v51  ;;  %v3003_v35 = vmul.f32 %v22314_v38, %v2955_v27  ;;  %v3176_v62 = vsel %vm574_vm0, %v2955_v27, 0.0  ;;  %v22318_v38 = vld [vmem:[#allocation34_spill] sm:$0xff] }
 0x317   : > { %v3116_v5 = vmul.f32 %v20116_v54, %v3004_v32  ;;  %v3178_v18 = vsel %vm574_vm0, %v2956_v60, 0.0  ;;  %v3175_v47 = vadd.f32 %v3174_v34, %v3173_v56  ;;  %v3006_v0 = vmul.f32 %v20137_v33, %v2958_v12  ;;  %v17717_v8 = vpop.f32.mrb[78].mxu1  ;;  %v22316_v56 = vld [vmem:[#allocation33_spill] sm:$0xff] }
 0x318   : > { %v3132_v30 = vsel %vm574_vm0, %v3113_v45, 0.0  ;;  %v3115_v10 = vmul.f32 %v20104_v50, %v3003_v35  ;;  %v2957_v46 = vmul.f32 %v20350_v23, %v2845_v3  ;;  %v2832_v26 = vmul.f32 2.0, %v2816_v52  ;;  %v2716_v54 = vpop.f32.mrb[79].mxu1 }
 0x319   : > { %v3134_v22 = vsel %vm574_vm0, %v3114_v9, 0.0  ;;  %v3133_v1 = vadd.f32 %v3132_v30, %v3131_v6  ;;  %v3177_v28 = vadd.f32 %v3176_v62, %v3175_v47  ;;  %v3118_v11 = vmul.f32 %v20217_v37, %v3006_v0 }
 0x31a   : > { %v3136_v55 = vsel %vm574_vm0, %v3115_v10, 0.0  ;;  %v3005_v40 = vmul.f32 %v20098_v4, %v2957_v46  ;;  %v3180_v33 = vsel %vm574_vm0, %v2957_v46, 0.0  ;;  %v2848_v36 = vadd.f32 0.0009, %v2832_v26 }
 0x31b   : > { %v2931_v50 = vsub.f32 2.0, %v20375_v57  ;;  %v3135_v29 = vadd.f32 %v3134_v22, %v3133_v1  ;;  %v3179_v23 = vadd.f32 %v3178_v18, %v3177_v28  ;;  %v2815_v31 = vsub.f32 %v2696_v24, %v22251_v43  ;;  %v20416_v63 = vpop.f32.mrb[80].mxu1  ;;  %v22321_v22 = vld [vmem:[#allocation9_spill] sm:$0xff] }
 0x31c   : > { %v3182_v13 = vsel %vm574_vm0, %v2958_v12, 0.0  ;;  %v3117_v6 = vmul.f32 %v20183_v15, %v3005_v40  ;;  %v2960_v60 = vmul.f32 %v2944_v59, %v2848_v36  ;;  %v2818_v37 = vsub.f32 %v17714_v53, %v19949_v48  ;;  %v20419_v51 = vpop.f32.mrb[81].mxu1  ;;  %v22317_v12 = vld [vmem:[#allocation36_spill] sm:$0xff] }
 0x31d   : > { %v3138_v4 = vsel %vm574_vm0, %v3116_v5, 0.0  ;;  %v3137_v3 = vadd.f32 %v3136_v55, %v3135_v29  ;;  %v3181_v52 = vadd.f32 %v3180_v33, %v3179_v23  ;;  %v2831_v9 = vmul.f32 2.0, %v2815_v31  ;;  %v22322_v55 = vld [vmem:[#allocation11_spill] sm:$0xff] }
 0x31e   : > { %v3140_v57 = vsel %vm574_vm0, %v3117_v6, 0.0  ;;  %v3008_v43 = vmul.f32 %v22315_v14, %v2960_v60  ;;  %v2943_v15 = vmul.f32 %v20311_v49, %v2927_v58  ;;  %v2834_v24 = vmul.f32 2.0, %v2818_v37  ;;  %v22326_v14 = vld [vmem:[#allocation38_spill] sm:$0xff] }
 0x31f   : > { %v3139_v27 = vadd.f32 %v3138_v4, %v3137_v3  ;;  %v2847_v48 = vadd.f32 0.0009, %v2831_v9  ;;  %v3183_v53 = vadd.f32 %v3182_v13, %v3181_v52  ;;  %v2817_v32 = vsub.f32 %v2706_v16, %v22316_v56  ;;  %v20432_v62 = vpop.f32.mrb[82].mxu1  ;;  %v22323_v13 = vld [vmem:[#allocation8_spill] sm:$0xff]  ;;  %v22324_v4 = vld [vmem:[#allocation21_spill] sm:$0xff] }
 0x320   : > { %v3120_v59 = vmul.f32 %v22317_v12, %v3008_v43  ;;  %v2850_v34 = vadd.f32 0.0009, %v2834_v24  ;;  %v2946_v45 = vmul.f32 %v20327_v7, %v2930_v2  ;;  %v2820_v35 = vsub.f32 %v17717_v8, %v22318_v38  ;;  %v20435_v18 = vpop.f32.mrb[83].mxu1  ;;  %v22320_v7 = vld [vmem:[#allocation15_spill] sm:$0xff]  ;;  %v22327_v43 = vld [vmem:[#allocation37_spill] sm:$0xff] }
 0x321   : > { %v3142_v49 = vsel %vm574_vm0, %v3118_v11, 0.0  ;;  %v3141_v41 = vadd.f32 %v3140_v57, %v3139_v27  ;;  %v2959_v58 = vmul.f32 %v2943_v15, %v2847_v48  ;;  %v2833_v5 = vmul.f32 2.0, %v2817_v32  ;;  %v22328_v32 = vld [vmem:[#allocation26_spill] sm:$0xff] }
 0x322   : > { %v2962_v16 = vmul.f32 %v2946_v45, %v2850_v34  ;;  %v22319_v47 = vsub.f32 2.0, %v20345_v25  ;;  %v2836_v30 = vmul.f32 2.0, %v2820_v35  ;;  %v2819_v17 = vsub.f32 %v2716_v54, %v22287_v20  ;;  %v22330_v34 = vld [vmem:[#allocation19_spill] sm:$0xff] }
 0x323   : > { %v3007_v2 = vmul.f32 %v22320_v7, %v2959_v58  ;;  %v3143_v10 = vadd.f32 %v3142_v49, %v3141_v41  ;;  %v3184_v46 = vsel %vm574_vm0, %v2959_v58, 0.0  ;;  %v2849_v26 = vadd.f32 0.0009, %v2833_v5  ;;  %v20447_v25 = vpop.f32.mrb[84].mxu1 }
 0x324   : > { %v2945_v0 = vmul.f32 %v20335_v39, %v22319_v47  ;;  %v3185_v8 = vadd.f32 %v3184_v46, %v3183_v53  ;;  %v3010_v1 = vmul.f32 %v22321_v22, %v2962_v16  ;;  %v2852_v28 = vadd.f32 0.0009, %v2836_v30  ;;  %v20451_v33 = vpop.f32.mrb[85].mxu1  ;;  %v22332_v30 = vld [vmem:[#allocation13_spill] sm:$0xff] }
 0x325   : > { %v2948_v11 = vmul.f32 %v20352_v61, %v2932_v42  ;;  %v3186_v39 = vsel %vm574_vm0, %v2960_v60, 0.0  ;;  %v3119_v20 = vmul.f32 %v22322_v55, %v3007_v2  ;;  %v2835_v40 = vmul.f32 2.0, %v2819_v17 }
 0x326   : > { %v2961_v54 = vmul.f32 %v2945_v0, %v2849_v26  ;;  %v3122_v36 = vmul.f32 %v20263_v21, %v3010_v1  ;;  %v3187_v29 = vadd.f32 %v3186_v39, %v3185_v8  ;;  %v2947_v31 = vmul.f32 %v20358_v19, %v2931_v50  ;;  %v22325_v21 = vld [vmem:[#allocation25_spill] sm:$0xff]  ;;  %v22331_v0 = vld [vmem:[#allocation7_spill] sm:$0xff] }
 0x327   : > { %v2964_v23 = vmul.f32 %v2948_v11, %v2852_v28  ;;  %v3144_v44 = vsel %vm574_vm0, %v3119_v20, 0.0  ;;  %v2851_v6 = vadd.f32 0.0009, %v2835_v40  ;;  %v3989_v52 = vpack.c.bf16 %v20416_v63, %v20419_v51  ;;  %v20461_v9 = vpop.f32.mrb[86].mxu1 }
 0x328   : > { %v3009_v61 = vmul.f32 %v22323_v13, %v2961_v54  ;;  %v3188_v42 = vsel %vm574_vm0, %v2961_v54, 0.0  ;;  %v3145_v60 = vadd.f32 %v3144_v44, %v3143_v10  ;;  %v3092_v57 = vsub.f32 2.0, %v22325_v21  ;;  %v20466_v24 = vpop.f32.mrb[87].mxu1 }
 0x329   : > { %v3189_v37 = vadd.f32 %v3188_v42, %v3187_v29  ;;  %v3012_v3 = vmul.f32 %v22324_v4, %v2964_v23  ;;  %v2963_v50 = vmul.f32 %v2947_v31, %v2851_v6  ;;  %v2995_v15 = vadd.f32 0.0001, %v22327_v43  ;;  %17808 = vmatprep.mubr.msk.bf16.mxu1 %vm3998_vm1, %v3989_v52 }
 0x32a   : > { %v3121_v19 = vmul.f32 %v22326_v14, %v3009_v61  ;;  %v3990_v27 = vpack.c.bf16 %v20432_v62, %v20435_v18  ;;  %v3991_v48 = vpack.c.bf16 %v20447_v25, %v20451_v33  ;;  %v3190_v53 = vsel %vm574_vm0, %v2962_v16, 0.0 }
 0x32b   : > { %v3011_v56 = vmul.f32 %v2995_v15, %v2963_v50  ;;  %v22329_v12 = vsub.f32 2.0, %v22328_v32  ;;  %v3192_v38 = vsel %vm574_vm0, %v2963_v50, 0.0  ;;  %v3992_v35 = vpack.c.bf16 %v20461_v9, %v20466_v24  ;;  %v20481_v49 = vpop.f32.mrb[88].mxu1 }
 0x32c   : > { %17809 = vmatmul.mubr.msk.bf16.vlgmr.msra.gmra.mrb[96].mxu1 %vm3998_vm1, %v3990_v27  ;;  %v3191_v41 = vadd.f32 %v3190_v53, %v3189_v37  ;;  %v3146_v58 = vsel %vm574_vm0, %v3120_v59, 0.0  ;;  %v20487_v16 = vmul.f32 %v20481_v49, %v20416_v63  ;;  %v20489_v47 = vpop.f32.mrb[89].mxu1  ;;  %v3108_v17 = vmul.f32 %v22332_v30, %v3092_v57 }
 0x32d   : > { %v3107_v45 = vmul.f32 %v22330_v34, %v22329_v12  ;;  %17812 = vmatprep.mubr.msk.bf16.mxu1 %vm3998_vm1, %v3991_v48  ;;  %18649 = vmatpush3.bf16.msra.mxu1 %v22331_v0  ;;  %v3148_v7 = vsel %vm574_vm0, %v3121_v19, 0.0  ;;  %v3993_v2 = vpack.c.bf16 %v20481_v49, %v20489_v47  ;;  %v20498_v59 = vmul.f32 %v20489_v47, %v20419_v51 }
 0x32e   : > { %18655 = vmatprep.subr.bf16.mxu1 %v22331_v0  ;;  %v3193_v10 = vadd.f32 %v3192_v38, %v3191_v41  ;;  %v3194_v46 = vsel %vm574_vm0, %v2964_v23, 0.0  ;;  %v3124_v26 = vmul.f32 %v3108_v17, %v3012_v3  ;;  %v3147_v8 = vadd.f32 %v3146_v58, %v3145_v60 }
 0x32f   : > { %v3123_v5 = vmul.f32 %v3107_v45, %v3011_v56  ;;  %v20502_v22 = vpop.f32.mrb[90].mxu1  ;;  %v3150_v54 = vsel %vm574_vm0, %v3122_v36, 0.0  ;;  %v4505_v21 = vmul.f32 %v20419_v51, %v20419_v51  ;;  %v4506_v57 = vmul.f32 %v20416_v63, %v20416_v63 }
 0x330   : > { %v20504_v1 = vadd.f32 %v3194_v46, %v3193_v10  ;;  %v20508_v28 = vmul.f32 %v20502_v22, %v20432_v62  ;;  %v20510_v11 = vpop.f32.mrb[91].mxu1  ;;  %v3149_v39 = vadd.f32 %v3148_v7, %v3147_v8  ;;  %v3154_v44 = vsel %vm574_vm0, %v3124_v26, 0.0 }
 0x331   : > { %v3994_v55 = vpack.c.bf16 %v20502_v22, %v20510_v11  ;;  %v5165_v20 = vmul.f32 %v20510_v11, %v20435_v18  ;;  %v3152_v40 = vsel %vm574_vm0, %v3123_v5, 0.0  ;;  %v4507_v14 = vmul.f32 %v20435_v18, %v20435_v18 }
 0x332   : > { %v3151_v29 = vadd.f32 %v3150_v54, %v3149_v39  ;;  %v4508_v19 = vmul.f32 %v20432_v62, %v20432_v62  ;;  %v4509_v50 = vmul.f32 %v20451_v33, %v20451_v33  ;;  %v4510_v43 = vmul.f32 %v20447_v25, %v20447_v25 }
 0x333   : > { %v4511_v15 = vmul.f32 %v20466_v24, %v20466_v24  ;;  %v4512_v27 = vmul.f32 %v20461_v9, %v20461_v9  ;;  %v4513_v48 = vmul.f32 %v20489_v47, %v20489_v47  ;;  %v4514_v53 = vmul.f32 %v20481_v49, %v20481_v49 }
 0x334   : > { %17813 = vmatmul.mubr.msk.bf16.gmra.mrb[100].mxu1 %vm3998_vm1, %v3992_v35  ;;  %v3153_v23 = vadd.f32 %v3152_v40, %v3151_v29  ;;  %v4515_v56 = vmul.f32 %v20510_v11, %v20510_v11  ;;  %v4516_v32 = vmul.f32 %v20502_v22, %v20502_v22 }
 0x335   : > { %17816 = vmatprep.mubr.msk.bf16.mxu1 %vm3998_vm1, %v3993_v2  ;;  %v20520_v31 = vpop.f32.mrb[92].mxu1 }
 0x336   : > { %v5168_v13 = vmul.f32 %v20520_v31, %v20447_v25  ;;  %v20525_v61 = vpop.f32.mrb[93].mxu1  ;;  %v20527_v42 = vadd.f32 %v3154_v44, %v3153_v23  ;;  %v4518_v34 = vmul.f32 %v20520_v31, %v20520_v31 }
 0x337   : > { %v3995_v36 = vpack.c.bf16 %v20520_v31, %v20525_v61  ;;  %v5167_v6 = vmul.f32 %v20525_v61, %v20451_v33  ;;  %v4517_v12 = vmul.f32 %v20525_v61, %v20525_v61 }
 0x33c   : > { %17817 = vmatmul.mubr.msk.bf16.gmra.mrb[104].mxu1 %vm3998_vm1, %v3994_v55 }
 0x33d   : > { %17820 = vmatprep.mubr.msk.bf16.mxu1 %vm3998_vm1, %v3995_v36 }
 0x33f   : > { %v20535_v60 = vpop.f32.mrb[94].mxu1 }
 0x340   : > { %v5170_v37 = vmul.f32 %v20535_v60, %v20461_v9  ;;  %v20539_v4 = vpop.f32.mrb[95].mxu1  ;;  %v4520_v38 = vmul.f32 %v20535_v60, %v20535_v60 }
 0x341   : > { %v3996_v3 = vpack.c.bf16 %v20535_v60, %v20539_v4  ;;  %v5169_v52 = vmul.f32 %v20539_v4, %v20466_v24  ;;  %v4519_v45 = vmul.f32 %v20539_v4, %v20539_v4 }
 0x344   : > { %17821 = vmatmul.mubr.msk.bf16.gmra.mrb[108].mxu1 %vm3998_vm1, %v3996_v3 }
 0x345   : > { %17846 = vmatprep.mubr.msk.f32.mxu1 %vm3998_vm1, %v4505_v21 }
 0x34c   : > { %17847 = vmatmul.mubr.msk.f32.vlgmr.msra.gmra.mrb[112].mxu1 %vm3998_vm1, %v4506_v57 }
 0x34d   : > { %17849 = vmatprep.mubr.msk.f32.mxu1 %vm3998_vm1, %v4507_v14  ;;  %18657 = vmatpush3.bf16.msra.mxu1 %v22331_v0 }
 0x34e   : > { %18659 = vmatprep.subr.bf16.mxu1 %v22331_v0 }
 0x350   : > { %17850 = vmatmul.mubr.msk.f32.gmra.mrb[114].mxu1 %vm3998_vm1, %v4508_v19  ;;  %v5813_v19 = vld [vmem:[%s22152_s7] sm:$0xff] }
 0x351   : > { %17852 = vmatprep.mubr.msk.f32.mxu1 %vm3998_vm1, %v4509_v50  ;;  %v5814_v50 = vld [vmem:[%s22152_s7 + $0x8] sm:$0xff] }
 0x354   : > { %17853 = vmatmul.mubr.msk.f32.gmra.mrb[116].mxu1 %vm3998_vm1, %v4510_v43 }
 0x355   : > { %17855 = vmatprep.mubr.msk.f32.mxu1 %vm3998_vm1, %v4511_v15 }
 0x358   : > { %17856 = vmatmul.mubr.msk.f32.gmra.mrb[118].mxu1 %vm3998_vm1, %v4512_v27  ;;  %v20614_v27 = vpack.c.bf16 %v5814_v50, %v5813_v19 }
 0x359   : > { %17858 = vmatprep.mubr.msk.f32.mxu1 %vm3998_vm1, %v4513_v48 }
 0x35c   : > { %17859 = vmatmul.mubr.msk.f32.gmra.mrb[120].mxu1 %vm3998_vm1, %v4514_v53 }
 0x35d   : > { %17861 = vmatprep.mubr.msk.f32.mxu1 %vm3998_vm1, %v4515_v56 }
 0x360   : > { %17862 = vmatmul.mubr.msk.f32.gmra.mrb[122].mxu1 %vm3998_vm1, %v4516_v32 }
 0x361   : > { %17864 = vmatprep.mubr.msk.f32.mxu1 %vm3998_vm1, %v4517_v12 }
 0x364   : > { %17865 = vmatmul.mubr.msk.f32.gmra.mrb[124].mxu1 %vm3998_vm1, %v4518_v34 }
 0x365   : > { %17867 = vmatprep.mubr.msk.f32.mxu1 %vm3998_vm1, %v4519_v45 }
 0x368   : > { %17868 = vmatmul.mubr.msk.f32.gmra.mrb[126].mxu1 %vm3998_vm1, %v4520_v38 }
 0x369   : > { %17902 = vmatprep.mubr.msk.f32.mxu1 %vm3998_vm1, %v20498_v59 }
 0x36c   : > { %17903 = vmatmul.mubr.msk.f32.vlgmr.msra.gmra.mrb[128].mxu1 %vm3998_vm1, %v20487_v16 }
 0x36d   : > { %17905 = vmatprep.mubr.msk.f32.mxu1 %vm3998_vm1, %v5165_v20  ;;  %18661 = vmatpush3.bf16.msra.mxu1 %v22331_v0 }
 0x36e   : > { %18667 = vmatprep.subr.bf16.mxu1 %v20614_v27 }
 0x370   : > { %17906 = vmatmul.mubr.msk.f32.gmra.mrb[130].mxu1 %vm3998_vm1, %v20508_v28 }
 0x371   : > { %17908 = vmatprep.mubr.msk.f32.mxu1 %vm3998_vm1, %v5167_v6 }
 0x374   : > { %17909 = vmatmul.mubr.msk.f32.gmra.mrb[132].mxu1 %vm3998_vm1, %v5168_v13 }
 0x375   : > { %17911 = vmatprep.mubr.msk.f32.mxu1 %vm3998_vm1, %v5169_v52 }
 0x378   : > { %17912 = vmatmul.mubr.msk.f32.gmra.mrb[134].mxu1 %vm3998_vm1, %v5170_v37 }
 0x3ff   : > { %v17810_v35 = vpop.f32.mrb[96].mxu1 }
 0x400   : > { %v4057_v41 = vpop.f32.mrb[97].mxu1 }
 0x401   : > { %v18830_v58 = vpack.i.bf16 %v17810_v35, %v4057_v41  ;;  %v17811_v5 = vpop.f32.mrb[98].mxu1 }
 0x402   : > { %v4060_v16 = vpop.f32.mrb[99].mxu1 }
 0x403   : > { %18831 = vxpose.xlu0.b32.start [1/2] (short) (narrow) %v18830_v58, 16  ;;  %v18832_v30 = vpack.i.bf16 %v17811_v5, %v4060_v16 }
 0x407   : > { %18833 = vxpose.xlu0.b32.end [2/2] (short) (narrow) %v18832_v30, 16  ;;  %v17814_v17 = vpop.f32.mrb[100].mxu1 }
 0x408   : > { %v4073_v7 = vpop.f32.mrb[101].mxu1 }
 0x409   : > { %v18844_v2 = vpack.i.bf16 %v17814_v17, %v4073_v7  ;;  %v17815_v59 = vpop.f32.mrb[102].mxu1 }
 0x40a   : > { %v4076_v10 = vpop.f32.mrb[103].mxu1 }
 0x40b   : > { %18845 = vxpose.xlu1.b32.start [1/2] (short) (narrow) %v18844_v2, 16  ;;  %v18846_v46 = vpack.i.bf16 %v17815_v59, %v4076_v10 }
 0x40f   : > { %18847 = vxpose.xlu1.b32.end [2/2] (short) (narrow) %v18846_v46, 16  ;;  %v17818_v26 = vpop.f32.mrb[104].mxu1 }
 0x410   : > { %v4089_v8 = vpop.f32.mrb[105].mxu1 }
 0x411   : > { %v18858_v28 = vpack.i.bf16 %v17818_v26, %v4089_v8  ;;  %v17819_v39 = vpop.f32.mrb[106].mxu1 }
 0x412   : > { %v4092_v55 = vpop.f32.mrb[107].mxu1 }
 0x413   : > { %18859 = vxpose.xlu0.b32.start [1/2] (short) (narrow) %v18858_v28, 16  ;;  %v18860_v20 = vpack.i.bf16 %v17819_v39, %v4092_v55 }
 0x417   : > { %18861 = vxpose.xlu0.b32.end [2/2] (short) (narrow) %v18860_v20, 16  ;;  %v17822_v54 = vpop.f32.mrb[108].mxu1 }
 0x418   : > { %v4105_v40 = vpop.f32.mrb[109].mxu1 }
 0x419   : > { %v18872_v29 = vpack.i.bf16 %v17822_v54, %v4105_v40  ;;  %v17823_v23 = vpop.f32.mrb[110].mxu1 }
 0x41a   : > { %v4108_v44 = vpop.f32.mrb[111].mxu1 }
 0x41b   : > { %v18874_v13 = vpack.i.bf16 %v17823_v23, %v4108_v44  ;;  %18873 = vxpose.xlu1.b32.start [1/2] (short) (narrow) %v18872_v29, 16 }
 0x41f   : > { %18875 = vxpose.xlu1.b32.end [2/2] (short) (narrow) %v18874_v13, 16  ;;  %v17848_v36 = vpop.f32.mrb[112].mxu1 }
 0x420   : > { %v4635_v6 = vpop.f32.mrb[113].mxu1 }
 0x421   : > { %4714 = vxpose.xlu0.b32.start [1/2] (short) (narrow) %v4635_v6, 16 }
 0x423   : > { %v17851_v37 = vpop.f32.mrb[114].mxu1 }
 0x424   : > { %v4645_v3 = vpop.f32.mrb[115].mxu1 }
 0x425   : > { %4715 = vxpose.xlu0.b32.end [2/2] (short) (narrow) %v17848_v36, 16  ;;  %4746 = vxpose.xlu1.b32.start [1/2] (short) (narrow) %v4645_v3, 16 }
 0x427   : > { %v17854_v52 = vpop.f32.mrb[116].mxu1 }
 0x428   : > { %v4655_v21 = vpop.f32.mrb[117].mxu1 }
 0x429   : > { %4747 = vxpose.xlu1.b32.end [2/2] (short) (narrow) %v17851_v37, 16  ;;  %4778 = vxpose.xlu0.b32.start [1/2] (short) (narrow) %v4655_v21, 16 }
 0x42b   : > { %v17857_v57 = vpop.f32.mrb[118].mxu1 }
 0x42c   : > { %v4665_v14 = vpop.f32.mrb[119].mxu1 }
 0x42d   : > { %4779 = vxpose.xlu0.b32.end [2/2] (short) (narrow) %v17854_v52, 16  ;;  %4810 = vxpose.xlu1.b32.start [1/2] (short) (narrow) %v4665_v14, 16 }
 0x42f   : > { %v17860_v43 = vpop.f32.mrb[120].mxu1 }
 0x430   : > { %v4675_v15 = vpop.f32.mrb[121].mxu1 }
 0x431   : > { %4811 = vxpose.xlu1.b32.end [2/2] (short) (narrow) %v17857_v57, 16  ;;  %4842 = vxpose.xlu0.b32.start [1/2] (short) (narrow) %v4675_v15, 16 }
 0x433   : > { %v17863_v48 = vpop.f32.mrb[122].mxu1 }
 0x434   : > { %v4685_v53 = vpop.f32.mrb[123].mxu1 }
 0x435   : > { %4843 = vxpose.xlu0.b32.end [2/2] (short) (narrow) %v17860_v43, 16  ;;  %4874 = vxpose.xlu1.b32.start [1/2] (short) (narrow) %v4685_v53, 16 }
 0x437   : > { %v17866_v56 = vpop.f32.mrb[124].mxu1 }
 0x438   : > { %v4695_v32 = vpop.f32.mrb[125].mxu1 }
 0x439   : > { %4875 = vxpose.xlu1.b32.end [2/2] (short) (narrow) %v17863_v48, 16  ;;  %4906 = vxpose.xlu0.b32.start [1/2] (short) (narrow) %v4695_v32, 16 }
 0x43b   : > { %v17869_v12 = vpop.f32.mrb[126].mxu1 }
 0x43c   : > { %v4705_v34 = vpop.f32.mrb[127].mxu1 }
 0x43d   : > { %4907 = vxpose.xlu0.b32.end [2/2] (short) (narrow) %v17866_v56, 16  ;;  %4938 = vxpose.xlu1.b32.start [1/2] (short) (narrow) %v4705_v34, 16 }
 0x43f   : > { %v17904_v45 = vpop.f32.mrb[128].mxu1 }
 0x440   : > { %v5261_v38 = vpop.f32.mrb[129].mxu1 }
 0x441   : > { %4939 = vxpose.xlu1.b32.end [2/2] (short) (narrow) %v17869_v12, 16  ;;  %5300 = vxpose.xlu0.b32.start [1/2] (short) (narrow) %v5261_v38, 16 }
 0x443   : > { %v17907_v35 = vpop.f32.mrb[130].mxu1 }
 0x444   : > { %v5271_v41 = vpop.f32.mrb[131].mxu1 }
 0x445   : > { %5301 = vxpose.xlu0.b32.end [2/2] (short) (narrow) %v17904_v45, 16  ;;  %5332 = vxpose.xlu1.b32.start [1/2] (short) (narrow) %v5271_v41, 16 }
 0x447   : > { %v17910_v58 = vpop.f32.mrb[132].mxu1 }
 0x448   : > { %v5281_v5 = vpop.f32.mrb[133].mxu1 }
 0x449   : > { %5333 = vxpose.xlu1.b32.end [2/2] (short) (narrow) %v17907_v35, 16  ;;  %5364 = vxpose.xlu0.b32.start [1/2] (short) (narrow) %v5281_v5, 16 }
 0x44b   : > { %v17913_v16 = vpop.f32.mrb[134].mxu1 }
 0x44c   : > { %v5291_v30 = vpop.f32.mrb[135].mxu1 }
 0x44d   : > { %5365 = vxpose.xlu0.b32.end [2/2] (short) (narrow) %v17910_v58, 16  ;;  %5396 = vxpose.xlu1.b32.start [1/2] (short) (narrow) %v5291_v30, 16 }
 0x451   : > { %5397 = vxpose.xlu1.b32.end [2/2] (short) (narrow) %v17913_v16, 16 }
 0x483   : > { %v18834_v17 = vpop.trf.xlu0 }
 0x484   : > { %v18838_v7 = vunpack.i.h.bf16 %v18834_v17  ;;  %v18835_v2 = vunpack.i.l.bf16 %v18834_v17 }
 0x487   : > { %v18839_v59 = vpop.trf.xlu0 }
 0x488   : > { %v18843_v10 = vunpack.i.h.bf16 %v18839_v59  ;;  %v18840_v46 = vunpack.i.l.bf16 %v18839_v59 }
 0x48a   : > { %v4377_v26 = vpack.c.bf16 %v18843_v10, %v18838_v7  ;;  %v4376_v8 = vpack.c.bf16 %v18840_v46, %v18835_v2 }
 0x48b   : > { %v18848_v28 = vpop.trf.xlu1 }
 0x48c   : > { %17826 = vmatprep.mubr.msk.bf16.mxu0 %vm3998_vm1, %v4376_v8  ;;  %v18852_v39 = vunpack.i.h.bf16 %v18848_v28  ;;  %v18849_v55 = vunpack.i.l.bf16 %v18848_v28 }
 0x48d   : > { %17827 = vmatmul.mubr.msk.bf16.vlgmr.msra.gmra.mrb[112].mxu0 %vm3998_vm1, %v4377_v26 }
 0x48e   : > { %18653 = vmatpush3.bf16.msra.mxu0 %v22331_v0 }
 0x48f   : > { %v18853_v20 = vpop.trf.xlu1  ;;  %18663 = vmatprep.subr.bf16.mxu0 %v20614_v27 }
 0x490   : > { %v18857_v54 = vunpack.i.h.bf16 %v18853_v20  ;;  %v18854_v40 = vunpack.i.l.bf16 %v18853_v20 }
 0x492   : > { %v4378_v29 = vpack.c.bf16 %v18854_v40, %v18849_v55  ;;  %v4379_v23 = vpack.c.bf16 %v18857_v54, %v18852_v39 }
 0x493   : > { %v18862_v44 = vpop.trf.xlu0 }
 0x494   : > { %17830 = vmatprep.mubr.msk.bf16.mxu0 %vm3998_vm1, %v4378_v29  ;;  %v18866_v13 = vunpack.i.h.bf16 %v18862_v44  ;;  %v18863_v36 = vunpack.i.l.bf16 %v18862_v44 }
 0x495   : > { %17831 = vmatmul.mubr.msk.bf16.gmra.mrb[116].mxu0 %vm3998_vm1, %v4379_v23 }
 0x497   : > { %v18867_v6 = vpop.trf.xlu0 }
 0x498   : > { %v18871_v37 = vunpack.i.h.bf16 %v18867_v6  ;;  %v18868_v3 = vunpack.i.l.bf16 %v18867_v6 }
 0x49a   : > { %v4380_v52 = vpack.c.bf16 %v18868_v3, %v18863_v36  ;;  %v4381_v21 = vpack.c.bf16 %v18871_v37, %v18866_v13 }
 0x49b   : > { %v18876_v0 = vpop.trf.xlu1 }
 0x49c   : > { %17834 = vmatprep.mubr.msk.bf16.mxu0 %vm3998_vm1, %v4380_v52  ;;  %v18880_v57 = vunpack.i.h.bf16 %v18876_v0  ;;  %v18877_v14 = vunpack.i.l.bf16 %v18876_v0 }
 0x49d   : > { %17835 = vmatmul.mubr.msk.bf16.gmra.mrb[120].mxu0 %vm3998_vm1, %v4381_v21 }
 0x49f   : > { %v18881_v19 = vpop.trf.xlu1 }
 0x4a0   : > { %v18885_v50 = vunpack.i.h.bf16 %v18881_v19  ;;  %v18882_v43 = vunpack.i.l.bf16 %v18881_v19 }
 0x4a1   : > { %v4730_v15 = vpop.trf.xlu0 }
 0x4a2   : > { %v4382_v48 = vpack.c.bf16 %v18882_v43, %v18877_v14  ;;  %v4383_v53 = vpack.c.bf16 %v18885_v50, %v18880_v57 }
 0x4a4   : > { %17838 = vmatprep.mubr.msk.bf16.mxu0 %vm3998_vm1, %v4382_v48 }
 0x4a5   : > { %17839 = vmatmul.mubr.msk.bf16.gmra.mrb[124].mxu0 %vm3998_vm1, %v4383_v53  ;;  %v4731_v56 = vpop.trf.xlu0  ;;  %v4762_v32 = vpop.trf.xlu1 }
 0x4a6   : > { %17874 = vmatprep.mubr.msk.f32.mxu0 %vm3998_vm1, %v4730_v15 }
 0x4a9   : > { %v4763_v12 = vpop.trf.xlu1  ;;  %v4794_v34 = vpop.trf.xlu0 }
 0x4ad   : > { %17875 = vmatmul.mubr.msk.f32.vlgmr.msra.gmra.mrb[128].mxu0 %vm3998_vm1, %v4731_v56  ;;  %v4795_v45 = vpop.trf.xlu0  ;;  %v4826_v38 = vpop.trf.xlu1 }
 0x4ae   : > { %17877 = vmatprep.mubr.msk.f32.mxu0 %vm3998_vm1, %v4762_v32  ;;  %18665 = vmatpush3.bf16.msra.mxu0 %v20614_v27 }
 0x4b1   : > { %17878 = vmatmul.mubr.msk.f32.gmra.mrb[130].mxu0 %vm3998_vm1, %v4763_v12  ;;  %v4827_v35 = vpop.trf.xlu1  ;;  %v4858_v41 = vpop.trf.xlu0 }
 0x4b2   : > { %17880 = vmatprep.mubr.msk.f32.mxu0 %vm3998_vm1, %v4794_v34 }
 0x4b5   : > { %17881 = vmatmul.mubr.msk.f32.gmra.mrb[132].mxu0 %vm3998_vm1, %v4795_v45  ;;  %v4859_v58 = vpop.trf.xlu0  ;;  %v4890_v5 = vpop.trf.xlu1 }
 0x4b6   : > { %17883 = vmatprep.mubr.msk.f32.mxu0 %vm3998_vm1, %v4826_v38 }
 0x4b9   : > { %17884 = vmatmul.mubr.msk.f32.gmra.mrb[134].mxu0 %vm3998_vm1, %v4827_v35  ;;  %v4891_v16 = vpop.trf.xlu1  ;;  %v4922_v30 = vpop.trf.xlu0 }
 0x4ba   : > { %17886 = vmatprep.mubr.msk.f32.mxu0 %vm3998_vm1, %v4858_v41 }
 0x4bd   : > { %17887 = vmatmul.mubr.msk.f32.gmra.mrb[136].mxu0 %vm3998_vm1, %v4859_v58  ;;  %v4923_v17 = vpop.trf.xlu0  ;;  %v4954_v7 = vpop.trf.xlu1 }
 0x4be   : > { %17889 = vmatprep.mubr.msk.f32.mxu0 %vm3998_vm1, %v4890_v5 }
 0x4c1   : > { %17890 = vmatmul.mubr.msk.f32.gmra.mrb[138].mxu0 %vm3998_vm1, %v4891_v16  ;;  %v4955_v2 = vpop.trf.xlu1  ;;  %v5316_v59 = vpop.trf.xlu0 }
 0x4c2   : > { %17892 = vmatprep.mubr.msk.f32.mxu0 %vm3998_vm1, %v4922_v30  ;;  %17918 = vmatprep.mubr.msk.f32.mxu1 %vm3998_vm1, %v5316_v59 }
 0x4c5   : > { %17893 = vmatmul.mubr.msk.f32.gmra.mrb[140].mxu0 %vm3998_vm1, %v4923_v17  ;;  %v5317_v10 = vpop.trf.xlu0  ;;  %v5348_v46 = vpop.trf.xlu1 }
 0x4c6   : > { %17895 = vmatprep.mubr.msk.f32.mxu0 %vm3998_vm1, %v4954_v7  ;;  %17919 = vmatmul.mubr.msk.f32.vlgmr.msra.gmra.mrb[136].mxu1 %vm3998_vm1, %v5317_v10 }
 0x4c7   : > { %17921 = vmatprep.mubr.msk.f32.mxu1 %vm3998_vm1, %v5348_v46  ;;  %18669 = vmatpush3.bf16.msra.mxu1 %v20614_v27 }
 0x4c9   : > { %17896 = vmatmul.mubr.msk.f32.gmra.mrb[142].mxu0 %vm3998_vm1, %v4955_v2  ;;  %v5349_v26 = vpop.trf.xlu1  ;;  %v5380_v8 = vpop.trf.xlu0 }
 0x4ca   : > { %17922 = vmatmul.mubr.msk.f32.gmra.mrb[138].mxu1 %vm3998_vm1, %v5349_v26  ;;  %17934 = vmatprep.mubr.msk.f32.mxu0 %vm3998_vm1, %v20419_v51 }
 0x4cb   : > { %17924 = vmatprep.mubr.msk.f32.mxu1 %vm3998_vm1, %v5380_v8 }
 0x4cd   : > { %17935 = vmatmul.mubr.msk.f32.vlgmr.msra.gmra.mrb[144].mxu0 %vm3998_vm1, %v20416_v63  ;;  %v5381_v28 = vpop.trf.xlu0  ;;  %v5412_v39 = vpop.trf.xlu1 }
 0x4ce   : > { %17925 = vmatmul.mubr.msk.f32.gmra.mrb[140].mxu1 %vm3998_vm1, %v5381_v28  ;;  %17937 = vmatprep.mubr.msk.f32.mxu0 %vm3998_vm1, %v20435_v18 }
 0x4cf   : > { %17927 = vmatprep.mubr.msk.f32.mxu1 %vm3998_vm1, %v5412_v39 }
 0x4d1   : > { %17938 = vmatmul.mubr.msk.f32.gmra.mrb[146].mxu0 %vm3998_vm1, %v20432_v62  ;;  %v5413_v27 = vpop.trf.xlu1 }
 0x4d2   : > { %17928 = vmatmul.mubr.msk.f32.gmra.mrb[142].mxu1 %vm3998_vm1, %v5413_v27  ;;  %17940 = vmatprep.mubr.msk.f32.mxu0 %vm3998_vm1, %v20451_v33 }
 0x4d5   : > { %17941 = vmatmul.mubr.msk.f32.gmra.mrb[148].mxu0 %vm3998_vm1, %v20447_v25 }
 0x4d6   : > { %17943 = vmatprep.mubr.msk.f32.mxu0 %vm3998_vm1, %v20466_v24 }
 0x4d9   : > { %17944 = vmatmul.mubr.msk.f32.gmra.mrb[150].mxu0 %vm3998_vm1, %v20461_v9 }
 0x4da   : > { %17946 = vmatprep.mubr.msk.f32.mxu0 %vm3998_vm1, %v20489_v47 }
 0x4dd   : > { %17947 = vmatmul.mubr.msk.f32.gmra.mrb[152].mxu0 %vm3998_vm1, %v20481_v49 }
 0x4de   : > { %17949 = vmatprep.mubr.msk.f32.mxu0 %vm3998_vm1, %v20510_v11 }
 0x4e1   : > { %17950 = vmatmul.mubr.msk.f32.gmra.mrb[154].mxu0 %vm3998_vm1, %v20502_v22 }
 0x4e2   : > { %17952 = vmatprep.mubr.msk.f32.mxu0 %vm3998_vm1, %v20525_v61 }
 0x4e5   : > { %17953 = vmatmul.mubr.msk.f32.gmra.mrb[156].mxu0 %vm3998_vm1, %v20520_v31 }
 0x4e6   : > { %17955 = vmatprep.mubr.msk.f32.mxu0 %vm3998_vm1, %v20539_v4 }
 0x4e9   : > { %17956 = vmatmul.mubr.msk.f32.gmra.mrb[158].mxu0 %vm3998_vm1, %v20535_v60 }
 0x560   : > { %v17828_v63 = vpop.f32.mrb[112].mxu0 }
 0x561   : > { %v4442_v51 = vpop.f32.mrb[113].mxu0  ;;  %v20685_v47 = vmul.f32 %v17828_v63, %v17828_v63 }
 0x562   : > { %v17829_v62 = vpop.f32.mrb[114].mxu0  ;;  %v20691_v61 = vmul.f32 %v4442_v51, %v4442_v51 }
 0x563   : > { %v4445_v18 = vpop.f32.mrb[115].mxu0  ;;  %v20697_v20 = vmul.f32 %v17829_v62, %v17829_v62 }
 0x564   : > { %v20705_v44 = vmul.f32 %v4445_v18, %v4445_v18 }
 0x568   : > { %v17832_v25 = vpop.f32.mrb[116].mxu0 }
 0x569   : > { %v4458_v33 = vpop.f32.mrb[117].mxu0  ;;  %v20717_v21 = vmul.f32 %v17832_v25, %v17832_v25 }
 0x56a   : > { %v17833_v9 = vpop.f32.mrb[118].mxu0  ;;  %v20723_v19 = vmul.f32 %v4458_v33, %v4458_v33 }
 0x56b   : > { %v4461_v24 = vpop.f32.mrb[119].mxu0  ;;  %v20729_v48 = vmul.f32 %v17833_v9, %v17833_v9 }
 0x56c   : > { %v20737_v34 = vmul.f32 %v4461_v24, %v4461_v24 }
 0x570   : > { %v17836_v49 = vpop.f32.mrb[120].mxu0 }
 0x571   : > { %v20687_v22 = vmul.f32 %v17836_v49, %v17836_v49  ;;  %v20689_v11 = vmul.f32 %v17836_v49, %v17828_v63  ;;  %v4474_v31 = vpop.f32.mrb[121].mxu0 }
 0x572   : > { %v20693_v4 = vmul.f32 %v4474_v31, %v4474_v31  ;;  %v20695_v60 = vmul.f32 %v4474_v31, %v4442_v51  ;;  %v17837_v55 = vpop.f32.mrb[122].mxu0 }
 0x573   : > { %v5703_v54 = vadd.f32 %v20687_v22, %v20685_v47  ;;  %v20701_v40 = vmul.f32 %v17837_v55, %v17837_v55  ;;  %v20703_v29 = vmul.f32 %v17837_v55, %v17829_v62  ;;  %v4477_v23 = vpop.f32.mrb[123].mxu0 }
 0x574   : > { %v5701_v13 = vadd.f32 %v20693_v4, %v20691_v61  ;;  %v20709_v36 = vmul.f32 %v4477_v23, %v4477_v23  ;;  %v20711_v6 = vmul.f32 %v4477_v23, %v4445_v18 }
 0x575   : > { %v5704_v37 = vadd.f32 %v20701_v40, %v20697_v20  ;;  %v5711_v5 = vadd.f32 0.0001, %v5703_v54  ;;  %v5677_v54 = vmul.f32 2.0, %v20695_v60  ;;  %v5680_v23 = vmul.f32 2.0, %v20703_v29 }
 0x576   : > { %v5702_v3 = vadd.f32 %v20709_v36, %v20705_v44  ;;  %v5709_v30 = vadd.f32 0.0001, %v5701_v13 }
 0x577   : > { %18978 = vrcp.f32 %v5711_v5  ;;  %v5712_v59 = vadd.f32 0.0001, %v5704_v37 }
 0x578   : > { %v17840_v52 = vpop.f32.mrb[124].mxu0  ;;  %18980 = vrcp.f32 %v5709_v30  ;;  %v5710_v28 = vadd.f32 0.0001, %v5702_v3 }
 0x579   : > { %v20719_v0 = vmul.f32 %v17840_v52, %v17840_v52  ;;  %v20721_v57 = vmul.f32 %v17840_v52, %v17832_v25  ;;  %v4490_v14 = vpop.f32.mrb[125].mxu0  ;;  %18982 = vrcp.f32 %v5712_v59 }
 0x57a   : > { %v20725_v50 = vmul.f32 %v4490_v14, %v4490_v14  ;;  %v20727_v43 = vmul.f32 %v4490_v14, %v4458_v33  ;;  %v17841_v15 = vpop.f32.mrb[126].mxu0  ;;  %18984 = vrcp.f32 %v5710_v28 }
 0x57b   : > { %v5707_v53 = vadd.f32 %v20719_v0, %v20717_v21  ;;  %v20733_v56 = vmul.f32 %v17841_v15, %v17841_v15  ;;  %v20735_v32 = vmul.f32 %v17841_v15, %v17833_v9  ;;  %v4493_v12 = vpop.f32.mrb[127].mxu0 }
 0x57c   : > { %v5705_v45 = vadd.f32 %v20725_v50, %v20723_v19  ;;  %v20741_v38 = vmul.f32 %v4493_v12, %v4493_v12  ;;  %v20743_v35 = vmul.f32 %v4493_v12, %v4461_v24  ;;  %v5683_v12 = vmul.f32 2.0, %v20721_v57 }
 0x57d   : > { %v5708_v41 = vadd.f32 %v20733_v56, %v20729_v48  ;;  %v20761_v27 = vadd.f32 0.0001, %v5707_v53 }
 0x57e   : > { %v5706_v58 = vadd.f32 %v20741_v38, %v20737_v34  ;;  %v20767_v62 = vadd.f32 0.0001, %v5705_v45 }
 0x57f   : > { %v20771_v25 = vadd.f32 0.0001, %v5708_v41  ;;  %18986 = vrcp.f32 %v20761_v27  ;;  %v20798_v41 = vadd.f32 0.0001, %v5677_v54 }
 0x580   : > { %v17876_v16 = vpop.f32.mrb[128].mxu0  ;;  %v20773_v33 = vadd.f32 0.0001, %v5706_v58  ;;  %18988 = vrcp.f32 %v20767_v62  ;;  %v5681_v58 = vmul.f32 2.0, %v20727_v43 }
 0x581   : > { %v5582_v17 = vsub.f32 %v17876_v16, %v20705_v44  ;;  %v5084_v7 = vpop.f32.mrb[129].mxu0  ;;  %v18979_v31 = vpop.eup %18978  ;;  %18990 = vrcp.f32 %v20771_v25  ;;  %v5678_v44 = vmul.f32 2.0, %v20711_v6  ;;  %v5684_v16 = vmul.f32 2.0, %v20735_v32 }
 0x582   : > { %v5581_v2 = vsub.f32 %v5084_v7, %v20691_v61  ;;  %v5679_v61 = vmul.f32 2.0, %v20689_v11  ;;  %18992 = vrcp.f32 %v20773_v33  ;;  %v5727_v37 = vmul.f32 %v18979_v31, %v5711_v5 }
 0x583   : > { %v20802_v5 = vadd.f32 0.0001, %v5680_v23 }
 0x584   : > { %v20751_v10 = vpop.f32.mrb[130].mxu0  ;;  %v20794_v15 = vadd.f32 0.0001, %v5679_v61  ;;  %v5735_v55 = vsub.f32 2.0, %v5727_v37 }
 0x585   : > { %v5584_v46 = vsub.f32 %v20751_v10, %v20697_v20  ;;  %v20755_v26 = vpop.f32.mrb[131].mxu0  ;;  %v18981_v20 = vpop.eup %18980  ;;  %v5682_v10 = vmul.f32 2.0, %v20743_v35 }
 0x586   : > { %v5583_v8 = vsub.f32 %v20755_v26, %v20685_v47  ;;  %v20792_v14 = vpop.eup %18982  ;;  %v5725_v53 = vmul.f32 %v18981_v20, %v5709_v30 }
 0x587   : > { %v20807_v30 = vpop.eup %18984 }
 0x588   : > { %v20759_v39 = vpop.f32.mrb[132].mxu0  ;;  %v5733_v18 = vsub.f32 2.0, %v5725_v53  ;;  %v20828_v53 = vadd.f32 0.0001, %v5682_v10 }
 0x589   : > { %v5586_v63 = vsub.f32 %v20759_v39, %v20737_v34  ;;  %v20765_v51 = vpop.f32.mrb[133].mxu0 }
 0x58c   : > { %v20775_v9 = vpop.f32.mrb[134].mxu0 }
 0x58d   : > { %v20780_v49 = vpop.f32.mrb[135].mxu0 }
 0x590   : > { %v17888_v13 = vpop.f32.mrb[136].mxu0 }
 0x591   : > { %v5590_v3 = vsub.f32 %v17888_v13, %v20709_v36  ;;  %v5124_v52 = vpop.f32.mrb[137].mxu0  ;;  %v20804_v36 = vadd.f32 0.0001, %v5678_v44 }
 0x592   : > { %v5589_v45 = vsub.f32 %v5124_v52, %v20693_v4  ;;  %v5728_v4 = vmul.f32 %v20792_v14, %v5712_v59 }
 0x593   : > { %v5622_v7 = vadd.f32 %v5590_v3, %v5582_v17  ;;  %v20813_v17 = vadd.f32 0.0001, %v5683_v12  ;;  %v20818_v3 = vpop.eup %18986 }
 0x594   : > { %v5621_v61 = vadd.f32 %v5589_v45, %v5581_v2  ;;  %v17891_v13 = vpop.f32.mrb[138].mxu0  ;;  %v20820_v2 = vadd.f32 0.0001, %v5681_v58  ;;  %v20822_v45 = vadd.f32 0.0001, %v5684_v16  ;;  %v20825_v37 = vpop.eup %18988  ;;  %v20836_v58 = vmul.f32 %v18979_v31, %v5735_v55 }
 0x595   : > { %v20810_v54 = vadd.f32 0.0009, %v5622_v7  ;;  %v5592_v52 = vsub.f32 %v17891_v13, %v20701_v40  ;;  %v5134_v24 = vpop.f32.mrb[139].mxu0  ;;  %v5726_v40 = vmul.f32 %v20807_v30, %v5710_v28  ;;  %v20834_v12 = vpop.eup %18990  ;;  %v5736_v16 = vsub.f32 2.0, %v5728_v4 }
 0x596   : > { %v20815_v23 = vadd.f32 0.0009, %v5621_v61  ;;  %v5591_v44 = vsub.f32 %v5134_v24, %v20687_v22  ;;  %v20841_v10 = vpop.eup %18992  ;;  %v20843_v13 = vmul.f32 %v18981_v20, %v5733_v18  ;;  %v5731_v31 = vmul.f32 %v20818_v3, %v20761_v27 }
 0x597   : > { %18994 = vrcp.f32 %v20810_v54  ;;  %v5624_v59 = vadd.f32 %v5592_v52, %v5584_v46  ;;  %v20858_v18 = vmul.f32 %v20825_v37, %v20767_v62  ;;  %v5734_v4 = vsub.f32 2.0, %v5726_v40 }
 0x598   : > { %18996 = vrcp.f32 %v20815_v23  ;;  %v5623_v22 = vadd.f32 %v5591_v44, %v5583_v8  ;;  %v17894_v24 = vpop.f32.mrb[140].mxu0  ;;  %v20870_v34 = vmul.f32 %v20841_v10, %v20773_v33  ;;  %v5739_v40 = vsub.f32 2.0, %v5731_v31 }
 0x599   : > { %v20838_v7 = vadd.f32 0.0009, %v5624_v59  ;;  %v5594_v46 = vsub.f32 %v17894_v24, %v20741_v38  ;;  %v5144_v61 = vpop.f32.mrb[141].mxu0  ;;  %v17920_v28 = vpop.f32.mrb[136].mxu1  ;;  %v22334_v33 = vsub.f32 %v20775_v9, %v20729_v48  ;;  %v5737_v24 = vsub.f32 2.0, %v20858_v18 }
 0x59a   : > { %v20845_v52 = vadd.f32 0.0009, %v5623_v22  ;;  %v5593_v47 = vsub.f32 %v5144_v61, %v20725_v50  ;;  %v5598_v26 = vsub.f32 %v17920_v28, %v20711_v6  ;;  %v5518_v8 = vpop.f32.mrb[137].mxu1  ;;  %v20862_v50 = vmul.f32 %v20834_v12, %v20771_v25 }
 0x59b   : > { %18998 = vrcp.f32 %v20838_v7  ;;  %v5626_v38 = vadd.f32 %v5594_v46, %v5586_v63  ;;  %v5597_v55 = vsub.f32 %v5518_v8, %v20695_v60  ;;  %v22333_v6 = vsub.f32 %v20765_v51, %v20723_v19 }
 0x59c   : > { %19000 = vrcp.f32 %v20845_v52  ;;  %v17897_v20 = vpop.f32.mrb[142].mxu0  ;;  %v20876_v25 = vmul.f32 %v20792_v14, %v5736_v16  ;;  %v5740_v14 = vsub.f32 2.0, %v20862_v50  ;;  %v20894_v61 = vmul.f32 %v20807_v30, %v5734_v4 }
 0x59d   : > { %v5625_v27 = vadd.f32 %v5593_v47, %v22333_v6  ;;  %v20872_v60 = vadd.f32 0.0009, %v5626_v38  ;;  %v5596_v39 = vsub.f32 %v17897_v20, %v20733_v56  ;;  %v5154_v63 = vpop.f32.mrb[143].mxu0  ;;  %v17923_v62 = vpop.f32.mrb[138].mxu1  ;;  %v5738_v48 = vsub.f32 2.0, %v20870_v34 }
 0x59e   : > { %v5595_v19 = vsub.f32 %v5154_v63, %v20719_v0  ;;  %v5600_v51 = vsub.f32 %v17923_v62, %v20703_v29  ;;  %v5528_v59 = vpop.f32.mrb[139].mxu1  ;;  %v22335_v0 = vsub.f32 %v20780_v49, %v20717_v21  ;;  %v5606_v9 = vmul.f32 2.0, %v5598_v26 }
 0x59f   : > { %v20878_v44 = vadd.f32 0.0009, %v5625_v27  ;;  %19002 = vrcp.f32 %v20872_v60  ;;  %v5628_v22 = vadd.f32 %v5596_v39, %v22334_v33  ;;  %v5599_v56 = vsub.f32 %v5528_v59, %v20689_v11 }
 0x5a0   : > { %v5627_v29 = vadd.f32 %v5595_v19, %v22335_v0  ;;  %v17936_v16 = vpop.f32.mrb[144].mxu0  ;;  %v5605_v38 = vmul.f32 2.0, %v5597_v55  ;;  %v5608_v27 = vmul.f32 2.0, %v5600_v51  ;;  %v20908_v63 = vmul.f32 %v20818_v3, %v5739_v40 }
 0x5a1   : > { %19004 = vrcp.f32 %v20878_v44  ;;  %v18995_v46 = vpop.eup %18994  ;;  %v20897_v28 = vadd.f32 0.0009, %v5628_v22  ;;  %v17926_v11 = vpop.f32.mrb[140].mxu1  ;;  %v5607_v4 = vmul.f32 2.0, %v5599_v56  ;;  %v5614_v62 = vadd.f32 0.0009, %v5606_v9 }
 0x5a2   : > { %v5929_v47 = vpop.f32.mrb[145].mxu0  ;;  %v18997_v8 = vpop.eup %18996  ;;  %v5646_v31 = vmul.f32 %v18995_v46, %v20810_v54  ;;  %v20900_v6 = vadd.f32 0.0009, %v5627_v29  ;;  %v5602_v21 = vsub.f32 %v17926_v11, %v20743_v35  ;;  %v5616_v3 = vadd.f32 0.0009, %v5608_v27 }
 0x5a3   : > { %6008 = vxpose.xlu0.b32.start [1/2] (short) (narrow) %v5929_v47, 8  ;;  %v5538_v49 = vpop.f32.mrb[141].mxu1  ;;  %v5645_v30 = vmul.f32 %v18997_v8, %v20815_v23  ;;  %19006 = vrcp.f32 %v20897_v28 }
 0x5a4   : > { %v5601_v26 = vsub.f32 %v5538_v49, %v20727_v43  ;;  %v5654_v20 = vsub.f32 2.0, %v5646_v31  ;;  %19008 = vrcp.f32 %v20900_v6  ;;  %v5610_v39 = vmul.f32 2.0, %v5602_v21  ;;  %v17939_v54 = vpop.f32.mrb[146].mxu0 }
 0x5a5   : > { %v18999_v55 = vpop.eup %18998  ;;  %v5653_v35 = vsub.f32 2.0, %v5645_v30  ;;  %v17929_v59 = vpop.f32.mrb[142].mxu1  ;;  %v5613_v43 = vadd.f32 0.0009, %v5605_v38  ;;  %v5615_v31 = vadd.f32 0.0009, %v5607_v4 }
 0x5a6   : > { %v5609_v19 = vmul.f32 2.0, %v5601_v26  ;;  %v5939_v23 = vpop.f32.mrb[147].mxu0  ;;  %v19001_v33 = vpop.eup %19000  ;;  %v5648_v51 = vmul.f32 %v18999_v55, %v20838_v7  ;;  %v5662_v22 = vmul.f32 %v18995_v46, %v5654_v20  ;;  %v5604_v0 = vsub.f32 %v17929_v59, %v20735_v32 }
 0x5a7   : > { %6009 = vxpose.xlu0.b32.end [2/2] (short) (narrow) %v17936_v16, 8  ;;  %6040 = vxpose.xlu1.b32.start [1/2] (short) (narrow) %v5939_v23, 8  ;;  %v5548_v56 = vpop.f32.mrb[143].mxu1  ;;  %v5647_v29 = vmul.f32 %v19001_v33, %v20845_v52  ;;  %v5661_v11 = vmul.f32 %v18997_v8, %v5653_v35  ;;  %v5618_v21 = vadd.f32 0.0009, %v5610_v39 }
 0x5a8   : > { %v5603_v40 = vsub.f32 %v5548_v56, %v20721_v57  ;;  %v5656_v9 = vsub.f32 2.0, %v5648_v51  ;;  %v5670_v47 = vmul.f32 %v5662_v22, %v5614_v62  ;;  %v17942_v49 = vpop.f32.mrb[148].mxu0  ;;  %v5617_v38 = vadd.f32 0.0009, %v5609_v19 }
 0x5a9   : > { %v19003_v30 = vpop.eup %19002  ;;  %v5655_v7 = vsub.f32 2.0, %v5647_v29  ;;  %v5669_v46 = vmul.f32 %v5661_v11, %v5613_v43  ;;  %v5612_v26 = vmul.f32 2.0, %v5604_v0  ;;  %v5949_v32 = vpop.f32.mrb[149].mxu0 }
 0x5aa   : > { %v5650_v20 = vmul.f32 %v19003_v30, %v20872_v60  ;;  %v5694_v52 = vmul.f32 %v20804_v36, %v5670_v47  ;;  %v5782_v8 = vsel %vm3998_vm1, %v5670_v47, 0.0  ;;  %v5664_v27 = vmul.f32 %v18999_v55, %v5656_v9 }
 0x5ab   : > { %v19005_v16 = vpop.eup %19004  ;;  %6072 = vxpose.xlu0.b32.start [1/2] (short) (narrow) %v5949_v32, 8  ;;  %6041 = vxpose.xlu1.b32.end [2/2] (short) (narrow) %v17939_v54, 8  ;;  %v5693_v4 = vmul.f32 %v20798_v41, %v5669_v46  ;;  %v5781_v39 = vsel %vm3998_vm1, %v5669_v46, 0.0  ;;  %v5663_v35 = vmul.f32 %v19001_v33, %v5655_v7  ;;  %v5611_v23 = vmul.f32 2.0, %v5603_v40 }
 0x5ac   : > { %v5649_v57 = vmul.f32 %v19005_v16, %v20878_v44  ;;  %v5750_v62 = vmul.f32 %v20894_v61, %v5694_v52  ;;  %v5783_v19 = vadd.f32 %v5782_v8, %v5781_v39  ;;  %v5672_v59 = vmul.f32 %v5664_v27, %v5616_v3  ;;  %v17945_v60 = vpop.f32.mrb[150].mxu0 }
 0x5ad   : > { %v19007_v51 = vpop.eup %19006  ;;  %v5658_v36 = vsub.f32 2.0, %v5650_v20  ;;  %v5749_v55 = vmul.f32 %v20843_v13, %v5693_v4  ;;  %v5671_v43 = vmul.f32 %v5663_v35, %v5615_v31  ;;  %v5959_v54 = vpop.f32.mrb[151].mxu0 }
 0x5ae   : > { %v5657_v22 = vsub.f32 2.0, %v5649_v57  ;;  %v19009_v0 = vpop.eup %19008  ;;  %v5758_v44 = vsel %vm3998_vm1, %v5750_v62, 0.0  ;;  %v5652_v41 = vmul.f32 %v19007_v51, %v20897_v28  ;;  %v5696_v33 = vmul.f32 %v20802_v5, %v5672_v59 }
 0x5af   : > { %v5786_v61 = vsel %vm3998_vm1, %v5672_v59, 0.0  ;;  %6073 = vxpose.xlu0.b32.end [2/2] (short) (narrow) %v17942_v49, 8  ;;  %6104 = vxpose.xlu1.b32.start [1/2] (short) (narrow) %v5959_v54, 8  ;;  %v5757_v56 = vsel %vm3998_vm1, %v5749_v55, 0.0  ;;  %v5651_v29 = vmul.f32 %v19009_v0, %v20900_v6  ;;  %v5695_v11 = vmul.f32 %v20794_v15, %v5671_v43 }
 0x5b0   : > { %v5784_v13 = vsel %vm3998_vm1, %v5671_v43, 0.0  ;;  %v5759_v3 = vadd.f32 %v5758_v44, %v5757_v56  ;;  %v5660_v40 = vsub.f32 2.0, %v5652_v41  ;;  %v5752_v9 = vmul.f32 %v20876_v25, %v5696_v33  ;;  %v17948_v28 = vpop.f32.mrb[152].mxu0 }
 0x5b1   : > { %v5785_v47 = vadd.f32 %v5784_v13, %v5783_v19  ;;  %v5659_v31 = vsub.f32 2.0, %v5651_v29  ;;  %v5751_v5 = vmul.f32 %v20836_v58, %v5695_v11  ;;  %v5666_v7 = vmul.f32 %v19003_v30, %v5658_v36  ;;  %v5969_v46 = vpop.f32.mrb[153].mxu0 }
 0x5b2   : > { %v5665_v49 = vmul.f32 %v19005_v16, %v5657_v22  ;;  %v5745_v6 = vmul.f32 %v20825_v37, %v5737_v24  ;;  %v5620_v15 = vadd.f32 0.0009, %v5612_v26  ;;  %v5668_v20 = vmul.f32 %v19007_v51, %v5660_v40 }
 0x5b3   : > { %v5787_v32 = vadd.f32 %v5786_v61, %v5785_v47  ;;  %6136 = vxpose.xlu0.b32.start [1/2] (short) (narrow) %v5969_v46, 8  ;;  %6105 = vxpose.xlu1.b32.end [2/2] (short) (narrow) %v17945_v60, 8  ;;  %v5760_v52 = vsel %vm3998_vm1, %v5751_v5, 0.0  ;;  %v5674_v25 = vmul.f32 %v5666_v7, %v5618_v21  ;;  %v5667_v27 = vmul.f32 %v19009_v0, %v5659_v31 }
 0x5b4   : > { %v5673_v8 = vmul.f32 %v5665_v49, %v5617_v38  ;;  %v5748_v58 = vmul.f32 %v20834_v12, %v5740_v14  ;;  %v5761_v30 = vadd.f32 %v5760_v52, %v5759_v3  ;;  %v5676_v16 = vmul.f32 %v5668_v20, %v5620_v15  ;;  %v17951_v18 = vpop.f32.mrb[154].mxu0 }
 0x5b5   : > { %v5619_v57 = vadd.f32 0.0009, %v5611_v23  ;;  %v5746_v37 = vmul.f32 %v20841_v10, %v5738_v48  ;;  %v5698_v24 = vmul.f32 %v20828_v53, %v5674_v25  ;;  %v5979_v38 = vpop.f32.mrb[155].mxu0  ;;  %v5762_v4 = vsel %vm3998_vm1, %v5752_v9, 0.0 }
 0x5b6   : > { %v5697_v26 = vmul.f32 %v20820_v2, %v5673_v8  ;;  %v5788_v21 = vsel %vm3998_vm1, %v5673_v8, 0.0  ;;  %v5700_v12 = vmul.f32 %v20822_v45, %v5676_v16  ;;  %v5790_v34 = vsel %vm3998_vm1, %v5674_v25, 0.0 }
 0x5b7   : > { %v5789_v50 = vadd.f32 %v5788_v21, %v5787_v32  ;;  %v5675_v14 = vmul.f32 %v5667_v27, %v5619_v57  ;;  %6137 = vxpose.xlu0.b32.end [2/2] (short) (narrow) %v17948_v28, 8  ;;  %6168 = vxpose.xlu1.b32.start [1/2] (short) (narrow) %v5979_v38, 8  ;;  %v5754_v39 = vmul.f32 %v5746_v37, %v5698_v24  ;;  %v5794_v22 = vsel %vm3998_vm1, %v5676_v16, 0.0 }
 0x5b8   : > { %v5753_v35 = vmul.f32 %v5745_v6, %v5697_v26  ;;  %v5763_v10 = vadd.f32 %v5762_v4, %v5761_v30  ;;  %v17954_v48 = vpop.f32.mrb[156].mxu0  ;;  %v5756_v62 = vmul.f32 %v5748_v58, %v5700_v12 }
 0x5b9   : > { %v5699_v53 = vmul.f32 %v20813_v17, %v5675_v14  ;;  %v5792_v2 = vsel %vm3998_vm1, %v5675_v14, 0.0  ;;  %v5791_v19 = vadd.f32 %v5790_v34, %v5789_v50  ;;  %v5989_v23 = vpop.f32.mrb[157].mxu0  ;;  %v5766_v36 = vsel %vm3998_vm1, %v5754_v39, 0.0 }
 0x5ba   : > { %v5764_v59 = vsel %vm3998_vm1, %v5753_v35, 0.0  ;;  %v5770_v41 = vsel %vm3998_vm1, %v5756_v62, 0.0 }
 0x5bb   : > { %v5755_v45 = vmul.f32 %v20908_v63, %v5699_v53  ;;  %6200 = vxpose.xlu0.b32.start [1/2] (short) (narrow) %v5989_v23, 8  ;;  %6169 = vxpose.xlu1.b32.end [2/2] (short) (narrow) %v17951_v18, 8  ;;  %v5765_v60 = vadd.f32 %v5764_v59, %v5763_v10  ;;  %v5793_v51 = vadd.f32 %v5792_v2, %v5791_v19  ;;  %v20960_v63 = vld [vmem:[%s22148_s3] sm:$0xff] }
 0x5bc   : > { %v17957_v55 = vpop.f32.mrb[158].mxu0  ;;  %v6398_v33 = vpack.c.bf16 %v20960_v63, %v20960_v63 }
 0x5bd   : > { %v5767_v17 = vadd.f32 %v5766_v36, %v5765_v60  ;;  %v5768_v43 = vsel %vm3998_vm1, %v5755_v45, 0.0  ;;  %v20955_v54 = vadd.f32 %v5794_v22, %v5793_v51  ;;  %v5999_v0 = vpop.f32.mrb[159].mxu0 }
 0x5be   : > { %18670 = vmatprep.subr.msk.bf16.mxu1 %vm6412_vm2, %v6398_v33  ;;  %v6414_v56 = vsel %vm6412_vm2, %v6398_v33, 0  ;;  %18671 = vmatprep.subr.msk.bf16.mxu0 %vm6412_vm2, %v6398_v33  ;;  %v12066_v33 = vld [vmem:[%s22154_s9] sm:$0xf] }
 0x5bf   : > { %6201 = vxpose.xlu0.b32.end [2/2] (short) (narrow) %v17954_v48, 8  ;;  %6232 = vxpose.xlu1.b32.start [1/2] (short) (narrow) %v5999_v0, 8  ;;  %v5769_v44 = vadd.f32 %v5768_v43, %v5767_v17  ;;  %v19083_v17 = vmov 0.0  }
 0x5c0   : > { %17985 = vmatpush3.bf16.msra.mxu0 %v6414_v56 }
 0x5c1   : > { %v20965_v61 = vadd.f32 %v5770_v41, %v5769_v44  ;;  %18008 = vmatprep.subr.mxu0 %v20960_v63 }
 0x5c3   : > { %6233 = vxpose.xlu1.b32.end [2/2] (short) (narrow) %v17957_v55, 8 }
 0x623   : > { %v6024_v29 = vpop.trf.xlu0 }
 0x624   : > { %17962 = vmatprep.mubr.msk.f32.mxu1 %vm3998_vm1, %v6024_v29 }
 0x627   : > { %v6056_v11 = vpop.trf.xlu1 }
 0x628   : > { %17963 = vmatmul.mubr.msk.f32.vlgmr.msra.gmra.mrb[144].mxu1 %vm3998_vm1, %v6056_v11 }
 0x629   : > { %17975 = vmatpush3.bf16.msra.mxu1 %v6414_v56  ;;  %v21056_v56 = vld [vmem:[%s22153_s8] sm:$0xff] }
 0x62a   : > { %17994 = vmatprep.subr.mxu1 %v20960_v63 }
 0x62b   : > { %v6088_v13 = vpop.trf.xlu0 }
 0x62c   : > { %17965 = vmatprep.mubr.msk.f32.mxu1 %vm3998_vm1, %v6088_v13 }
 0x62f   : > { %v6120_v3 = vpop.trf.xlu1 }
 0x630   : > { %17966 = vmatmul.mubr.msk.f32.gmra.mrb[146].mxu1 %vm3998_vm1, %v6120_v3 }
 0x633   : > { %v6152_v40 = vpop.trf.xlu0 }
 0x634   : > { %17968 = vmatprep.mubr.msk.f32.mxu1 %vm3998_vm1, %v6152_v40 }
 0x637   : > { %v6184_v9 = vpop.trf.xlu1 }
 0x638   : > { %17969 = vmatmul.mubr.msk.f32.gmra.mrb[148].mxu1 %vm3998_vm1, %v6184_v9 }
 0x63b   : > { %v6216_v47 = vpop.trf.xlu0 }
 0x63c   : > { %17971 = vmatprep.mubr.msk.f32.mxu1 %vm3998_vm1, %v6216_v47 }
 0x63f   : > { %v6248_v28 = vpop.trf.xlu1 }
 0x640   : > { %17972 = vmatmul.mubr.msk.f32.gmra.mrb[150].mxu1 %vm3998_vm1, %v6248_v28 }
 0x6fb   : > { %v20980_v31 = vpop.f32.mrb[144].mxu1 }
 0x6fc   : > { %v20982_v5 = vpop.f32.mrb[145].mxu1  ;;  %v6819_v18 = vmul.f32 %v20980_v31, %v20980_v31 }
 0x6fd   : > { %v6394_v7 = vpack.c.bf16 %v20980_v31, %v20982_v5  ;;  %v6818_v57 = vmul.f32 %v20982_v5, %v20982_v5 }
 0x6ff   : > { %17976 = vmatprep.mubr.msk.bf16.mxu1 %vm6399_vm3, %v6394_v7 }
 0x703   : > { %v20987_v49 = vpop.f32.mrb[146].mxu1 }
 0x704   : > { %v20989_v46 = vpop.f32.mrb[147].mxu1  ;;  %v6821_v24 = vmul.f32 %v20987_v49, %v20987_v49 }
 0x705   : > { %v6395_v6 = vpack.c.bf16 %v20987_v49, %v20989_v46  ;;  %v6820_v37 = vmul.f32 %v20989_v46, %v20989_v46 }
 0x707   : > { %17977 = vmatmul.mubr.msk.bf16.vlgmr.msra.gmra.mrb[152].mxu1 %vm6399_vm3, %v6395_v6 }
 0x708   : > { %17995 = vmatpush3.msra.mxu1 %v20960_v63 }
 0x709   : > { %18022 = vmatprep.subr.mxu1 %v20960_v63 }
 0x70b   : > { %v20996_v32 = vpop.f32.mrb[148].mxu1 }
 0x70c   : > { %v7341_v15 = vmul.f32 %v20996_v32, %v20980_v31  ;;  %v21000_v20 = vpop.f32.mrb[149].mxu1  ;;  %v6823_v21 = vmul.f32 %v20996_v32, %v20996_v32 }
 0x70d   : > { %v6396_v52 = vpack.c.bf16 %v20996_v32, %v21000_v20  ;;  %v7340_v25 = vmul.f32 %v21000_v20, %v20982_v5  ;;  %v6822_v26 = vmul.f32 %v21000_v20, %v21000_v20 }
 0x70f   : > { %17980 = vmatprep.mubr.msk.bf16.mxu1 %vm6399_vm3, %v6396_v52 }
 0x713   : > { %v21007_v8 = vpop.f32.mrb[150].mxu1 }
 0x714   : > { %v7343_v27 = vmul.f32 %v21007_v8, %v20987_v49  ;;  %v21011_v58 = vpop.f32.mrb[151].mxu1  ;;  %v6825_v4 = vmul.f32 %v21007_v8, %v21007_v8 }
 0x715   : > { %v6397_v30 = vpack.c.bf16 %v21007_v8, %v21011_v58  ;;  %v7342_v16 = vmul.f32 %v21011_v58, %v20989_v46  ;;  %v6824_v38 = vmul.f32 %v21011_v58, %v21011_v58 }
 0x717   : > { %17981 = vmatmul.mubr.msk.bf16.gmra.mrb[156].mxu1 %vm6399_vm3, %v6397_v30 }
 0x718   : > { %17996 = vmatprep.mubr.msk.f32.mxu1 %vm6399_vm3, %v6818_v57 }
 0x71f   : > { %17997 = vmatmul.mubr.msk.f32.vlgmr.msra.gmra.mrb[160].mxu1 %vm6399_vm3, %v6819_v18 }
 0x720   : > { %17999 = vmatprep.mubr.msk.f32.mxu1 %vm6399_vm3, %v6820_v37  ;;  %18023 = vmatpush3.msra.mxu1 %v20960_v63 }
 0x721   : > { %18030 = vmatprep.subr.mxu1 %v20960_v63 }
 0x723   : > { %18000 = vmatmul.mubr.msk.f32.gmra.mrb[162].mxu1 %vm6399_vm3, %v6821_v24 }
 0x724   : > { %18002 = vmatprep.mubr.msk.f32.mxu1 %vm6399_vm3, %v6822_v26 }
 0x727   : > { %18003 = vmatmul.mubr.msk.f32.gmra.mrb[164].mxu1 %vm6399_vm3, %v6823_v21 }
 0x728   : > { %18005 = vmatprep.mubr.msk.f32.mxu1 %vm6399_vm3, %v6824_v38 }
 0x72b   : > { %18006 = vmatmul.mubr.msk.f32.gmra.mrb[166].mxu1 %vm6399_vm3, %v6825_v4 }
 0x72c   : > { %18024 = vmatprep.mubr.msk.f32.mxu1 %vm6399_vm3, %v7340_v25 }
 0x72f   : > { %18025 = vmatmul.mubr.msk.f32.vlgmr.msra.gmra.mrb[168].mxu1 %vm6399_vm3, %v7341_v15 }
 0x730   : > { %18027 = vmatprep.mubr.msk.f32.mxu1 %vm6399_vm3, %v7342_v16  ;;  %18031 = vmatpush3.msra.mxu1 %v20960_v63 }
 0x731   : > { %18043 = vmatprep.subr.mxu1 %v19083_v17 }
 0x733   : > { %18028 = vmatmul.mubr.msk.f32.gmra.mrb[170].mxu1 %vm6399_vm3, %v7343_v27 }
 0x7da   : > { %v17978_v50 = vpop.f32.mrb[152].mxu1 }
 0x7db   : > { %v6450_v12 = vpop.f32.mrb[153].mxu1 }
 0x7dc   : > { %v17979_v14 = vpop.f32.mrb[154].mxu1 }
 0x7dd   : > { %v18893_v39 = vpack.i.bf16 %v17979_v14, %v17978_v50  ;;  %v6453_v34 = vpop.f32.mrb[155].mxu1 }
 0x7de   : > { %v18886_v35 = vpack.i.bf16 %v6453_v34, %v6450_v12 }
 0x7df   : > { %18894 = vxpose.xlu1.b32.start.end [1/1] (short) (narrow) %v18893_v39, 8 }
 0x7e0   : > { %18887 = vxpose.xlu0.b32.start.end [1/1] (short) (narrow) %v18886_v35, 8 }
 0x7ea   : > { %v17982_v10 = vpop.f32.mrb[156].mxu1 }
 0x7eb   : > { %v6466_v53 = vpop.f32.mrb[157].mxu1 }
 0x7ec   : > { %v17983_v2 = vpop.f32.mrb[158].mxu1 }
 0x7ed   : > { %v18900_v48 = vpack.i.bf16 %v17983_v2, %v17982_v10  ;;  %v6469_v62 = vpop.f32.mrb[159].mxu1 }
 0x7ee   : > { %v18907_v19 = vpack.i.bf16 %v6469_v62, %v6466_v53 }
 0x7ef   : > { %18901 = vxpose.xlu1.b32.start.end [1/1] (short) (narrow) %v18900_v48, 8 }
 0x7f0   : > { %18908 = vxpose.xlu0.b32.start.end [1/1] (short) (narrow) %v18907_v19, 8 }
 0x7f2   : > { %v17998_v59 = vpop.f32.mrb[160].mxu1 }
 0x7f3   : > { %6987 = vxpose.xlu1.b32.start.end [1/1] (short) (narrow) %v17998_v59, 8  ;;  %v6916_v23 = vpop.f32.mrb[161].mxu1 }
 0x7f4   : > { %6955 = vxpose.xlu0.b32.start.end [1/1] (short) (narrow) %v6916_v23, 8 }
 0x7f6   : > { %v18001_v45 = vpop.f32.mrb[162].mxu1 }
 0x7f7   : > { %7051 = vxpose.xlu1.b32.start.end [1/1] (short) (narrow) %v18001_v45, 8  ;;  %v6926_v60 = vpop.f32.mrb[163].mxu1 }
 0x7f8   : > { %7019 = vxpose.xlu0.b32.start.end [1/1] (short) (narrow) %v6926_v60, 8 }
 0x7fa   : > { %v18004_v51 = vpop.f32.mrb[164].mxu1 }
 0x7fb   : > { %7115 = vxpose.xlu1.b32.start.end [1/1] (short) (narrow) %v18004_v51, 8  ;;  %v6936_v36 = vpop.f32.mrb[165].mxu1 }
 0x7fc   : > { %7083 = vxpose.xlu0.b32.start.end [1/1] (short) (narrow) %v6936_v36, 8 }
 0x7fe   : > { %v18007_v22 = vpop.f32.mrb[166].mxu1 }
 0x7ff   : > { %7179 = vxpose.xlu1.b32.start.end [1/1] (short) (narrow) %v18007_v22, 8  ;;  %v6946_v55 = vpop.f32.mrb[167].mxu1 }
 0x800   : > { %7147 = vxpose.xlu0.b32.start.end [1/1] (short) (narrow) %v6946_v55, 8 }
 0x802   : > { %v18026_v43 = vpop.f32.mrb[168].mxu1 }
 0x803   : > { %7473 = vxpose.xlu1.b32.start.end [1/1] (short) (narrow) %v18026_v43, 8  ;;  %v7422_v0 = vpop.f32.mrb[169].mxu1 }
 0x804   : > { %7441 = vxpose.xlu0.b32.start.end [1/1] (short) (narrow) %v7422_v0, 8 }
 0x806   : > { %v18029_v44 = vpop.f32.mrb[170].mxu1 }
 0x807   : > { %7537 = vxpose.xlu1.b32.start.end [1/1] (short) (narrow) %v18029_v44, 8  ;;  %v7432_v41 = vpop.f32.mrb[171].mxu1 }
 0x808   : > { %7505 = vxpose.xlu0.b32.start.end [1/1] (short) (narrow) %v7432_v41, 8 }
 0x80b   : > { %12630 = vxpose.xlu1.b32.start.end [1/1] (short) (narrow) %v12066_v33, 8 }
 0x80c   : > { %8391 = vxpose.xlu0.b32.start.end [1/1] (short) (narrow) %v21056_v56, 8 }
 0x832   : > { %3196 = vadd.xlane.f32.xlu1 %v20504_v1 }
 0x836   : > { %5772 = vadd.xlane.f32.xlu1 %v20965_v61 }
 0x839   : > { %3156 = vadd.xlane.f32.xlu0 %v20527_v42 }
 0x83a   : > { %5796 = vadd.xlane.f32.xlu1 %v20955_v54 }
 0x85f   : > { %v18895_v29 = vpop.trf.xlu1 }
 0x860   : > { %v18888_v11 = vpop.trf.xlu0  ;;  %v18899_v13 = vunpack.i.h.bf16 %v18895_v29  ;;  %v18896_v3 = vunpack.i.l.bf16 %v18895_v29 }
 0x861   : > { %v18892_v40 = vunpack.i.h.bf16 %v18888_v11  ;;  %v18889_v9 = vunpack.i.l.bf16 %v18888_v11 }
 0x862   : > { %v6738_v47 = vpack.c.bf16 %v18899_v13, %v18896_v3 }
 0x863   : > { %v6737_v28 = vpack.c.bf16 %v18892_v40, %v18889_v9 }
 0x865   : > { %17986 = vmatprep.mubr.msk.bf16.mxu0 %vm6399_vm3, %v6737_v28 }
 0x866   : > { %17987 = vmatmul.mubr.msk.bf16.vlgmr.msra.gmra.mrb[160].mxu0 %vm6399_vm3, %v6738_v47 }
 0x867   : > { %18009 = vmatpush3.msra.mxu0 %v20960_v63 }
 0x868   : > { %18038 = vmatprep.subr.mxu0 %v19083_v17 }
 0x86f   : > { %v18902_v1 = vpop.trf.xlu1 }
 0x870   : > { %v18909_v42 = vpop.trf.xlu0  ;;  %v18906_v61 = vunpack.i.h.bf16 %v18902_v1  ;;  %v18903_v54 = vunpack.i.l.bf16 %v18902_v1 }
 0x871   : > { %v18913_v7 = vunpack.i.h.bf16 %v18909_v42  ;;  %v18910_v6 = vunpack.i.l.bf16 %v18909_v42 }
 0x872   : > { %v6740_v15 = vpack.c.bf16 %v18906_v61, %v18903_v54 }
 0x873   : > { %v6739_v52 = vpack.c.bf16 %v18913_v7, %v18910_v6  ;;  %v7003_v25 = vpop.trf.xlu1 }
 0x874   : > { %v6971_v27 = vpop.trf.xlu0 }
 0x875   : > { %17990 = vmatprep.mubr.msk.bf16.mxu0 %vm6399_vm3, %v6739_v52 }
 0x876   : > { %17991 = vmatmul.mubr.msk.bf16.gmra.mrb[164].mxu0 %vm6399_vm3, %v6740_v15 }
 0x877   : > { %18010 = vmatprep.mubr.msk.f32.mxu0 %vm6399_vm3, %v6971_v27  ;;  %v7067_v30 = vpop.trf.xlu1 }
 0x878   : > { %v7035_v63 = vpop.trf.xlu0 }
 0x87b   : > { %v7131_v16 = vpop.trf.xlu1 }
 0x87c   : > { %v7099_v57 = vpop.trf.xlu0 }
 0x87e   : > { %18011 = vmatmul.mubr.msk.f32.vlgmr.msra.gmra.mrb[168].mxu0 %vm6399_vm3, %v7003_v25 }
 0x87f   : > { %18013 = vmatprep.mubr.msk.f32.mxu0 %vm6399_vm3, %v7035_v63  ;;  %18039 = vmatpush3.msra.mxu0 %v21056_v56  ;;  %v7195_v18 = vpop.trf.xlu1 }
 0x880   : > { %v7163_v37 = vpop.trf.xlu0  ;;  %18048 = vmatprep.subr.mxu0 %v19083_v17 }
 0x882   : > { %18014 = vmatmul.mubr.msk.f32.gmra.mrb[170].mxu0 %vm6399_vm3, %v7067_v30 }
 0x883   : > { %18016 = vmatprep.mubr.msk.f32.mxu0 %vm6399_vm3, %v7099_v57  ;;  %v7489_v24 = vpop.trf.xlu1 }
 0x884   : > { %v7457_v26 = vpop.trf.xlu0 }
 0x885   : > { %18032 = vmatprep.mubr.msk.f32.mxu1 %vm6399_vm3, %v7457_v26 }
 0x886   : > { %18017 = vmatmul.mubr.msk.f32.gmra.mrb[172].mxu0 %vm6399_vm3, %v7131_v16  ;;  %18033 = vmatmul.mubr.msk.f32.vlgmr.msra.gmra.mrb[172].mxu1 %vm6399_vm3, %v7489_v24 }
 0x887   : > { %18019 = vmatprep.mubr.msk.f32.mxu0 %vm6399_vm3, %v7163_v37  ;;  %v7553_v21 = vpop.trf.xlu1  ;;  %18044 = vmatpush3.msra.mxu1 %v21056_v56 }
 0x888   : > { %v7521_v38 = vpop.trf.xlu0  ;;  %18053 = vmatprep.subr.mxu1 %v19083_v17 }
 0x889   : > { %18035 = vmatprep.mubr.msk.f32.mxu1 %vm6399_vm3, %v7521_v38 }
 0x88a   : > { %18020 = vmatmul.mubr.msk.f32.gmra.mrb[174].mxu0 %vm6399_vm3, %v7195_v18  ;;  %18036 = vmatmul.mubr.msk.f32.gmra.mrb[174].mxu1 %vm6399_vm3, %v7553_v21 }
 0x88b   : > { %18040 = vmatprep.mubr.msk.f32.mxu0 %vm19084_vm4, %v19083_v17  ;;  %18045 = vmatprep.mubr.msk.f32.mxu1 %vm19084_vm4, %v19083_v17 }
 0x88e   : > { %18041 = vmatmul.mubr.msk.f32.vlgmr.msra.gmra.mrb[176].mxu0 %vm6399_vm3, %v20982_v5  ;;  %18046 = vmatmul.mubr.msk.f32.vlgmr.msra.gmra.mrb[176].mxu1 %vm6399_vm3, %v20980_v31  ;;  %v21133_v31 = vpop.trf.xlu1 }
 0x88f   : > { %18049 = vmatpush3.msra.mxu0 %v21056_v56  ;;  %18050 = vmatprep.mubr.msk.f32.mxu0 %vm19084_vm4, %v19083_v17 }
 0x890   : > { %18054 = vmatpush3.msra.mxu1 %v21056_v56  ;;  %18055 = vmatprep.mubr.msk.f32.mxu1 %vm19084_vm4, %v19083_v17 }
 0x891   : > { %18058 = vmatprep.subr.mxu0 %v19083_v17  ;;  %18063 = vmatprep.subr.mxu1 %v19083_v17 }
 0x892   : > { %18051 = vmatmul.mubr.msk.f32.vlgmr.msra.gmra.mrb[178].mxu0 %vm6399_vm3, %v20989_v46  ;;  %18056 = vmatmul.mubr.msk.f32.vlgmr.msra.gmra.mrb[178].mxu1 %vm6399_vm3, %v20987_v49  ;;  %v21135_v46 = vpop.trf.xlu0 }
 0x893   : > { %18059 = vmatpush3.msra.mxu0 %v21056_v56  ;;  %18060 = vmatprep.mubr.msk.f32.mxu0 %vm19084_vm4, %v19083_v17 }
 0x894   : > { %18064 = vmatpush3.msra.mxu1 %v21056_v56  ;;  %18065 = vmatprep.mubr.msk.f32.mxu1 %vm19084_vm4, %v19083_v17 }
 0x895   : > { %18068 = vmatprep.subr.mxu0 %v19083_v17  ;;  %18073 = vmatprep.subr.mxu1 %v19083_v17 }
 0x896   : > { %18061 = vmatmul.mubr.msk.f32.vlgmr.msra.gmra.mrb[180].mxu0 %vm6399_vm3, %v21000_v20  ;;  %18066 = vmatmul.mubr.msk.f32.vlgmr.msra.gmra.mrb[180].mxu1 %vm6399_vm3, %v20996_v32 }
 0x897   : > { %18069 = vmatpush3.msra.mxu0 %v21056_v56  ;;  %18070 = vmatprep.mubr.msk.f32.mxu0 %vm19084_vm4, %v19083_v17 }
 0x898   : > { %18074 = vmatpush3.msra.mxu1 %v21056_v56  ;;  %18075 = vmatprep.mubr.msk.f32.mxu1 %vm19084_vm4, %v19083_v17 }
 0x899   : > { %18078 = vmatprep.subr.mxu0 %v19083_v17  ;;  %18083 = vmatprep.subr.mxu1 %v19083_v17 }
 0x89a   : > { %18071 = vmatmul.mubr.msk.f32.vlgmr.msra.gmra.mrb[182].mxu0 %vm6399_vm3, %v21011_v58  ;;  %18076 = vmatmul.mubr.msk.f32.vlgmr.msra.gmra.mrb[182].mxu1 %vm6399_vm3, %v21007_v8 }
 0x89b   : > { %18080 = vmatprep.mubr.msk.f32.mxu0 %vm19084_vm4, %v19083_v17  ;;  %18085 = vmatprep.mubr.msk.f32.mxu1 %vm19084_vm4, %v19083_v17 }
 0x8bf   : > { %v3197_v5 = vpop.xlane.xlu1 %3196 }
 0x8c0   : > { %v3198_v49 = vrot.slane %v3197_v5, 4 }
 0x8c2   : > { %v3199_v32 = vadd.f32 %v3198_v49, %v3197_v5 }
 0x8c3   : > { %v5773_v20 = vpop.xlane.xlu1 %5772 }
 0x8c4   : > { %v5774_v4 = vrot.slane %v5773_v20, 4  ;;  %v3200_v50 = vrot.slane %v3199_v32, 2 }
 0x8c6   : > { %v5775_v58 = vadd.f32 %v5774_v4, %v5773_v20  ;;  %v3157_v12 = vpop.xlane.xlu0 %3156  ;;  %v3201_v53 = vadd.f32 %v3200_v50, %v3199_v32 }
 0x8c7   : > { %v3158_v14 = vrot.slane %v3157_v12, 4  ;;  %v5797_v8 = vpop.xlane.xlu1 %5796 }
 0x8c8   : > { %v5776_v39 = vrot.slane %v5775_v58, 2  ;;  %v5798_v34 = vrot.slane %v5797_v8, 4  ;;  %v3202_v59 = vrot.slane %v3201_v53, 1 }
 0x8c9   : > { %v3159_v35 = vadd.f32 %v3158_v14, %v3157_v12 }
 0x8ca   : > { %v5799_v10 = vadd.f32 %v5798_v34, %v5797_v8  ;;  %v5777_v48 = vadd.f32 %v5776_v39, %v5775_v58  ;;  %v3203_v22 = vadd.f32 %v3202_v59, %v3201_v53 }
 0x8cb   : > { %v3160_v2 = vrot.slane %v3159_v35, 2 }
 0x8cc   : > { %v5800_v62 = vrot.slane %v5799_v10, 2  ;;  %v5778_v60 = vrot.slane %v5777_v48, 1 }
 0x8cd   : > { %v3161_v19 = vadd.f32 %v3160_v2, %v3159_v35 }
 0x8ce   : > { %v5801_v23 = vadd.f32 %v5800_v62, %v5799_v10  ;;  %v5779_v43 = vadd.f32 %v5778_v60, %v5777_v48 }
 0x8cf   : > { %v3162_v45 = vrot.slane %v3161_v19, 1 }
 0x8d0   : > { %v5802_v51 = vrot.slane %v5801_v23, 1 }
 0x8d1   : > { %v3163_v36 = vadd.f32 %v3162_v45, %v3161_v19 }
 0x8d2   : > { %v5803_v55 = vadd.f32 %v5802_v51, %v5801_v23 }
 0x8d3   : > { %18672 = vpush %v3163_v36 }
 0x8d4   : > { %18674 = vpush %v3203_v22 }
 0x8d5   : > { %18676 = vpush %v5779_v43 }
 0x8d6   : > { %18678 = vpush %v5803_v55 }
 0x904   : > { %s18673_s23 = spop %18672 }
 0x905   : > { %s18675_s24 = spop %18674 }
 0x906   : > { %s18677_s13 = spop %18676 }
 0x907   : > { %s18679_s25 = spop %18678 }
 0x939   : > { %v17988_v0 = vpop.f32.mrb[160].mxu0 }
 0x93a   : > { %v6787_v44 = vpop.f32.mrb[161].mxu0  ;;  %v21137_v29 = vmul.f32 %v17988_v0, %v17988_v0 }
 0x93b   : > { %v17989_v41 = vpop.f32.mrb[162].mxu0  ;;  %v7666_v40 = vmul.f32 %v6787_v44, %v6787_v44 }
 0x93c   : > { %v6790_v33 = vpop.f32.mrb[163].mxu0  ;;  %v7669_v1 = vmul.f32 %v17989_v41, %v17989_v41 }
 0x93d   : > { %v7667_v6 = vmul.f32 %v6790_v33, %v6790_v33 }
 0x949   : > { %v17992_v56 = vpop.f32.mrb[164].mxu0 }
 0x94a   : > { %v21139_v11 = vmul.f32 %v17992_v56, %v17992_v56  ;;  %v21141_v13 = vmul.f32 %v17992_v56, %v17988_v0  ;;  %v6803_v3 = vpop.f32.mrb[165].mxu0 }
 0x94b   : > { %v7670_v9 = vmul.f32 %v6803_v3, %v6803_v3  ;;  %v21143_v47 = vmul.f32 %v6803_v3, %v6787_v44  ;;  %v17993_v28 = vpop.f32.mrb[166].mxu0 }
 0x94c   : > { %v7740_v42 = vadd.f32 %v21139_v11, %v21137_v29  ;;  %v7673_v61 = vmul.f32 %v17993_v28, %v17993_v28  ;;  %v21147_v54 = vmul.f32 %v17993_v28, %v17989_v41  ;;  %v6806_v7 = vpop.f32.mrb[167].mxu0 }
 0x94d   : > { %v7738_v15 = vadd.f32 %v7670_v9, %v7666_v40  ;;  %v7671_v52 = vmul.f32 %v6806_v7, %v6806_v7  ;;  %v21149_v25 = vmul.f32 %v6806_v7, %v6790_v33 }
 0x94e   : > { %v7741_v27 = vadd.f32 %v7673_v61, %v7669_v1  ;;  %v21173_v19 = vadd.f32 0.0001, %v7740_v42 }
 0x94f   : > { %v7739_v30 = vadd.f32 %v7671_v52, %v7667_v6  ;;  %v21152_v38 = vadd.f32 0.0001, %v7738_v15  ;;  %v7726_v15 = vmul.f32 2.0, %v21143_v47 }
 0x950   : > { %v21162_v12 = vadd.f32 0.0001, %v7741_v27 }
 0x951   : > { %v18012_v63 = vpop.f32.mrb[168].mxu0  ;;  %v21156_v32 = vadd.f32 0.0001, %v7739_v30  ;;  %19010 = vrcp.f32 %v21152_v38 }
 0x952   : > { %v7679_v16 = vsub.f32 %v18012_v63, %v7667_v6  ;;  %v7301_v57 = vpop.f32.mrb[169].mxu0 }
 0x953   : > { %v7678_v18 = vsub.f32 %v7301_v57, %v7666_v40  ;;  %19012 = vrcp.f32 %v21156_v32 }
 0x954   : > { %19014 = vrcp.f32 %v21162_v12 }
 0x955   : > { %v18015_v37 = vpop.f32.mrb[170].mxu0 }
 0x956   : > { %v7681_v24 = vsub.f32 %v18015_v37, %v7669_v1  ;;  %v7311_v26 = vpop.f32.mrb[171].mxu0 }
 0x957   : > { %v7680_v21 = vsub.f32 %v7311_v26, %v21137_v29 }
 0x959   : > { %v18018_v5 = vpop.f32.mrb[172].mxu0  ;;  %v21154_v49 = vpop.f32.mrb[172].mxu1 }
 0x95a   : > { %v7683_v20 = vsub.f32 %v18018_v5, %v7671_v52  ;;  %v7687_v4 = vsub.f32 %v21154_v49, %v21149_v25  ;;  %v7321_v50 = vpop.f32.mrb[173].mxu0  ;;  %v21160_v58 = vpop.f32.mrb[173].mxu1 }
 0x95b   : > { %v7682_v14 = vsub.f32 %v7321_v50, %v7670_v9  ;;  %v7686_v8 = vsub.f32 %v21160_v58, %v21143_v47  ;;  %v21196_v3 = vpop.eup %19010 }
 0x95c   : > { %v7699_v39 = vadd.f32 %v7683_v20, %v7679_v16  ;;  %v7691_v30 = vmul.f32 2.0, %v7687_v4  ;;  %v7750_v63 = vmul.f32 %v21196_v3, %v21152_v38  ;;  %v7727_v16 = vmul.f32 2.0, %v21149_v25 }
 0x95d   : > { %v7698_v34 = vadd.f32 %v7682_v14, %v7678_v18  ;;  %v18021_v35 = vpop.f32.mrb[174].mxu0  ;;  %v21167_v10 = vpop.f32.mrb[174].mxu1  ;;  %v7690_v18 = vmul.f32 2.0, %v7686_v8  ;;  %v7728_v25 = vmul.f32 2.0, %v21141_v13  ;;  %v7729_v38 = vmul.f32 2.0, %v21147_v54 }
 0x95e   : > { %v7703_v53 = vadd.f32 0.0009, %v7699_v39  ;;  %v7331_v2 = vpop.f32.mrb[175].mxu0  ;;  %v21171_v62 = vpop.f32.mrb[175].mxu1  ;;  %v7685_v59 = vsub.f32 %v18021_v35, %v7673_v61  ;;  %v7689_v23 = vsub.f32 %v21167_v10, %v21147_v54  ;;  %v7730_v20 = vadd.f32 0.0001, %v7726_v15 }
 0x95f   : > { %v7702_v48 = vadd.f32 0.0009, %v7698_v34  ;;  %v7684_v45 = vsub.f32 %v7331_v2, %v21139_v11  ;;  %v7688_v22 = vsub.f32 %v21171_v62, %v21141_v13  ;;  %v21203_v40 = vpop.eup %19012  ;;  %v7695_v50 = vadd.f32 0.0009, %v7691_v30 }
 0x960   : > { %19016 = vrcp.f32 %v7703_v53  ;;  %v7701_v36 = vadd.f32 %v7685_v59, %v7681_v24  ;;  %v21207_v9 = vpop.eup %19014  ;;  %v7751_v52 = vmul.f32 %v21203_v40, %v21156_v32  ;;  %v7754_v8 = vsub.f32 2.0, %v7750_v63 }
 0x961   : > { %19018 = vrcp.f32 %v7702_v48  ;;  %v7876_v60 = vpop.f32.mrb[176].mxu0  ;;  %v7949_v51 = vpop.f32.mrb[176].mxu1  ;;  %v7700_v0 = vadd.f32 %v7684_v45, %v7680_v21  ;;  %v7753_v47 = vmul.f32 %v21207_v9, %v21162_v12  ;;  %v7731_v39 = vadd.f32 0.0001, %v7727_v16 }
 0x962   : > { %v18042_v55 = vpop.f32.mrb[177].mxu0  ;;  %v18047_v43 = vpop.f32.mrb[177].mxu1  ;;  %18079 = vmatpush3.msra.mxu0 %v7876_v60  ;;  %18084 = vmatpush3.msra.mxu1 %v7949_v51  ;;  %19020 = vrcp.f32 %v21173_v19  ;;  %v21185_v44 = vadd.f32 0.0009, %v7701_v36  ;;  %v7755_v4 = vsub.f32 2.0, %v7751_v52  ;;  %v7693_v59 = vmul.f32 2.0, %v7689_v23 }
 0x963   : > { %18081 = vmatmul.mubr.msk.f32.vlgmr.msra.gmra.mrb[184].mxu0 %vm6399_vm3, %v21135_v46  ;;  %18086 = vmatmul.mubr.msk.f32.vlgmr.msra.gmra.mrb[184].mxu1 %vm6399_vm3, %v21135_v46  ;;  %v21189_v41 = vadd.f32 0.0009, %v7700_v0  ;;  %v7694_v34 = vadd.f32 0.0009, %v7690_v18  ;;  %v7758_v23 = vmul.f32 %v21196_v3, %v7754_v8 }
 0x964   : > { %18088 = vmatprep.subr.mxu0 %v19083_v17  ;;  %18093 = vmatprep.subr.mxu1 %v19083_v17  ;;  %19022 = vrcp.f32 %v21185_v44  ;;  %v7759_v51 = vmul.f32 %v21203_v40, %v7755_v4 }
 0x965   : > { %v8022_v33 = vpop.f32.mrb[178].mxu0  ;;  %v8095_v56 = vpop.f32.mrb[178].mxu1  ;;  %18090 = vmatprep.mubr.msk.f32.mxu0 %vm19084_vm4, %v19083_v17  ;;  %18095 = vmatprep.mubr.msk.f32.mxu1 %vm19084_vm4, %v19083_v17  ;;  %19024 = vrcp.f32 %v21189_v41 }
 0x966   : > { %v18052_v29 = vpop.f32.mrb[179].mxu0  ;;  %v18057_v11 = vpop.f32.mrb[179].mxu1  ;;  %18089 = vmatpush3.msra.mxu0 %v8022_v33  ;;  %18094 = vmatpush3.msra.mxu1 %v8095_v56  ;;  %v7697_v56 = vadd.f32 0.0009, %v7693_v59 }
 0x967   : > { %18091 = vmatmul.mubr.msk.f32.vlgmr.msra.gmra.mrb[186].mxu0 %vm6399_vm3, %v21135_v46  ;;  %18096 = vmatmul.mubr.msk.f32.vlgmr.msra.gmra.mrb[186].mxu1 %vm6399_vm3, %v21135_v46 }
 0x968   : > { %18098 = vmatprep.subr.mxu0 %v19083_v17  ;;  %18103 = vmatprep.subr.mxu1 %v19083_v17 }
 0x969   : > { %v8168_v28 = vpop.f32.mrb[180].mxu0  ;;  %v8241_v1 = vpop.f32.mrb[180].mxu1  ;;  %18100 = vmatprep.mubr.msk.f32.mxu0 %vm19084_vm4, %v19083_v17  ;;  %18105 = vmatprep.mubr.msk.f32.mxu1 %vm19084_vm4, %v19083_v17 }
 0x96a   : > { %v19017_v42 = vpop.eup %19016  ;;  %v18062_v61 = vpop.f32.mrb[181].mxu0  ;;  %18099 = vmatpush3.msra.mxu0 %v8168_v28  ;;  %18104 = vmatpush3.msra.mxu1 %v8241_v1  ;;  %v7732_v1 = vadd.f32 0.0001, %v7728_v25 }
 0x96b   : > { %v18067_v7 = vpop.f32.mrb[181].mxu1  ;;  %v19019_v6 = vpop.eup %19018  ;;  %v7711_v27 = vmul.f32 %v19017_v42, %v7703_v53  ;;  %18101 = vmatmul.mubr.msk.f32.vlgmr.msra.gmra.mrb[188].mxu0 %vm6399_vm3, %v21135_v46  ;;  %18106 = vmatmul.mubr.msk.f32.vlgmr.msra.gmra.mrb[188].mxu1 %vm6399_vm3, %v21135_v46 }
 0x96c   : > { %v7710_v57 = vmul.f32 %v19019_v6, %v7702_v48  ;;  %18108 = vmatprep.subr.mxu0 %v19083_v17  ;;  %18113 = vmatprep.subr.mxu1 %v19083_v17  ;;  %v19021_v21 = vpop.eup %19020 }
 0x96d   : > { %v7715_v37 = vsub.f32 2.0, %v7711_v27  ;;  %v8314_v24 = vpop.f32.mrb[182].mxu0  ;;  %v8387_v26 = vpop.f32.mrb[182].mxu1  ;;  %18110 = vmatprep.mubr.msk.f32.mxu0 %vm19084_vm4, %v19083_v17  ;;  %18115 = vmatprep.mubr.msk.f32.mxu1 %vm19084_vm4, %v19083_v17  ;;  %v7752_v53 = vmul.f32 %v19021_v21, %v21173_v19  ;;  %v7692_v19 = vmul.f32 2.0, %v7688_v22  ;;  %v7733_v22 = vadd.f32 0.0001, %v7729_v38 }
 0x96e   : > { %v7714_v5 = vsub.f32 2.0, %v7710_v57  ;;  %v18072_v49 = vpop.f32.mrb[183].mxu0  ;;  %v18077_v32 = vpop.f32.mrb[183].mxu1  ;;  %18109 = vmatpush3.msra.mxu0 %v8314_v24  ;;  %18114 = vmatpush3.msra.mxu1 %v8387_v26 }
 0x96f   : > { %v7719_v58 = vmul.f32 %v19017_v42, %v7715_v37  ;;  %18111 = vmatmul.mubr.msk.f32.vlgmr.msra.gmra.mrb[190].mxu0 %vm6399_vm3, %v21135_v46  ;;  %18116 = vmatmul.mubr.msk.f32.vlgmr.msra.gmra.mrb[190].mxu1 %vm6399_vm3, %v21135_v46  ;;  %v19023_v14 = vpop.eup %19022  ;;  %v7757_v46 = vsub.f32 2.0, %v7753_v47  ;;  %v7756_v29 = vsub.f32 2.0, %v7752_v53  ;;  %v7696_v13 = vadd.f32 0.0009, %v7692_v19 }
 0x970   : > { %v7718_v12 = vmul.f32 %v19019_v6, %v7714_v5  ;;  %18118 = vmatprep.subr.mxu0 %v19083_v17  ;;  %18123 = vmatprep.subr.mxu1 %v19083_v17  ;;  %v19025_v35 = vpop.eup %19024  ;;  %v7713_v48 = vmul.f32 %v19023_v14, %v21185_v44 }
 0x971   : > { %v7723_v2 = vmul.f32 %v7719_v58, %v7695_v50  ;;  %18120 = vmatprep.mubr.msk.f32.mxu0 %vm19084_vm4, %v19083_v17  ;;  %18125 = vmatprep.mubr.msk.f32.mxu1 %vm19084_vm4, %v19083_v17  ;;  %v7712_v60 = vmul.f32 %v19025_v35, %v21189_v41  ;;  %v7761_v61 = vmul.f32 %v21207_v9, %v7757_v46  ;;  %v21272_v9 = vld [vmem:[%s22149_s4] sm:$0xf] }
 0x972   : > { %v7722_v45 = vmul.f32 %v7718_v12, %v7694_v34  ;;  %v7717_v10 = vsub.f32 2.0, %v7713_v48  ;;  %v7760_v15 = vmul.f32 %v19021_v21, %v7756_v29  ;;  %18119 = vmatpush3.msk.msra.mxu0 %vm6412_vm2, %v21272_v9  ;;  %18124 = vmatpush3.msk.msra.mxu1 %vm6412_vm2, %v21272_v9 }
 0x973   : > { %v7735_v36 = vmul.f32 %v7731_v39, %v7723_v2  ;;  %v7783_v54 = vsel %vm6399_vm3, %v7723_v2, 0.0  ;;  %v7716_v0 = vsub.f32 2.0, %v7712_v60  ;;  %18128 = vmatprep.subr.mxu0 %v19083_v17  ;;  %18133 = vmatprep.subr.mxu1 %v19083_v17 }
 0x974   : > { %v7734_v55 = vmul.f32 %v7730_v20, %v7722_v45  ;;  %v7782_v43 = vsel %vm6399_vm3, %v7722_v45, 0.0  ;;  %v7721_v41 = vmul.f32 %v19023_v14, %v7717_v10 }
 0x975   : > { %v7763_v44 = vmul.f32 %v7759_v51, %v7735_v36  ;;  %v7784_v33 = vadd.f32 %v7783_v54, %v7782_v43  ;;  %v7720_v62 = vmul.f32 %v19025_v35, %v7716_v0 }
 0x976   : > { %v7762_v11 = vmul.f32 %v7758_v23, %v7734_v55  ;;  %v7725_v40 = vmul.f32 %v7721_v41, %v7697_v56 }
 0x977   : > { %v7767_v28 = vsel %vm6399_vm3, %v7763_v44, 0.0  ;;  %v7724_v42 = vmul.f32 %v7720_v62, %v7696_v13 }
 0x978   : > { %v7766_v3 = vsel %vm6399_vm3, %v7762_v11, 0.0  ;;  %v7737_v7 = vmul.f32 %v7733_v22, %v7725_v40  ;;  %v7787_v57 = vsel %vm6399_vm3, %v7725_v40, 0.0 }
 0x979   : > { %v7768_v6 = vadd.f32 %v7767_v28, %v7766_v3  ;;  %v7736_v52 = vmul.f32 %v7732_v1, %v7724_v42  ;;  %v7785_v27 = vsel %vm6399_vm3, %v7724_v42, 0.0 }
 0x97a   : > { %v7786_v30 = vadd.f32 %v7785_v27, %v7784_v33  ;;  %v7765_v63 = vmul.f32 %v7761_v61, %v7737_v7 }
 0x97b   : > { %v7764_v16 = vmul.f32 %v7760_v15, %v7736_v52 }
 0x97c   : > { %v7788_v18 = vadd.f32 %v7787_v57, %v7786_v30  ;;  %v7771_v26 = vsel %vm6399_vm3, %v7765_v63, 0.0 }
 0x97d   : > { %v7769_v37 = vsel %vm6399_vm3, %v7764_v16, 0.0 }
 0x97e   : > { %7789 = vadd.xlane.f32.xlu1 %v7788_v18  ;;  %v7770_v24 = vadd.f32 %v7769_v37, %v7768_v6 }
 0x980   : > { %v7772_v25 = vadd.f32 %v7771_v26, %v7770_v24 }
 0x982   : > { %7773 = vadd.xlane.f32.xlu0 %v7772_v25 }
 0xa0b   : > { %v7790_v21 = vpop.xlane.xlu1 %7789 }
 0xa0c   : > { %v7791_v38 = vrot.slane %v7790_v21, 4 }
 0xa0e   : > { %v7792_v47 = vadd.f32 %v7791_v38, %v7790_v21 }
 0xa0f   : > { %v7774_v5 = vpop.xlane.xlu0 %7773 }
 0xa10   : > { %v7793_v49 = vrot.slane %v7792_v47, 2  ;;  %v7775_v32 = vrot.slane %v7774_v5, 4 }
 0xa12   : > { %v7776_v20 = vadd.f32 %v7775_v32, %v7774_v5  ;;  %v7794_v4 = vadd.f32 %v7793_v49, %v7792_v47 }
 0xa14   : > { %v7777_v50 = vrot.slane %v7776_v20, 2  ;;  %v7795_v14 = vrot.slane %v7794_v4, 1 }
 0xa16   : > { %v7778_v58 = vadd.f32 %v7777_v50, %v7776_v20  ;;  %v7796_v34 = vadd.f32 %v7795_v14, %v7794_v4 }
 0xa18   : > { %v7779_v8 = vrot.slane %v7778_v58, 1 }
 0xa1a   : > { %v7780_v39 = vadd.f32 %v7779_v8, %v7778_v58 }
 0xa1c   : > { %18680 = vpush %v7780_v39 }
 0xa1d   : > { %18682 = vpush %v7796_v34 }
 0xa36   : > { %v21280_v12 = vpop.f32.mrb[184].mxu0  ;;  %v21282_v35 = vpop.f32.mrb[184].mxu1 }
 0xa37   : > { %v18082_v53 = vpop.f32.mrb[185].mxu0  ;;  %v18087_v2 = vpop.f32.mrb[185].mxu1  ;;  %18121 = vmatmul.mubr.msk.f32.vlgmr.msra.gmra.mrb[192].mxu0 %vm8987_vm5, %v21280_v12  ;;  %18126 = vmatmul.mubr.msk.f32.vlgmr.msra.gmra.mrb[192].mxu1 %vm8987_vm5, %v21282_v35  ;;  %v10161_v52 = vmul.f32 %v21280_v12, %v21280_v12  ;;  %v10162_v27 = vmul.f32 %v21282_v35, %v21282_v35 }
 0xa38   : > { %18129 = vmatpush3.msk.msra.mxu0 %vm6412_vm2, %v21272_v9  ;;  %18130 = vmatprep.mubr.msk.f32.mxu0 %vm19084_vm4, %v19083_v17 }
 0xa39   : > { %18134 = vmatpush3.msk.msra.mxu1 %vm6412_vm2, %v21272_v9  ;;  %18135 = vmatprep.mubr.msk.f32.mxu1 %vm19084_vm4, %v19083_v17 }
 0xa3a   : > { %v21296_v48 = vpop.f32.mrb[186].mxu0  ;;  %v21298_v59 = vpop.f32.mrb[186].mxu1  ;;  %18138 = vmatprep.subr.mxu0 %v19083_v17  ;;  %18143 = vmatprep.subr.mxu1 %v19083_v17 }
 0xa3b   : > { %v18092_v46 = vpop.f32.mrb[187].mxu0  ;;  %v18097_v45 = vpop.f32.mrb[187].mxu1  ;;  %18131 = vmatmul.mubr.msk.f32.vlgmr.msra.gmra.mrb[194].mxu0 %vm8987_vm5, %v21296_v48  ;;  %18136 = vmatmul.mubr.msk.f32.vlgmr.msra.gmra.mrb[194].mxu1 %vm8987_vm5, %v21298_v59  ;;  %v10163_v30 = vmul.f32 %v21296_v48, %v21296_v48  ;;  %v10164_v63 = vmul.f32 %v21298_v59, %v21298_v59 }
 0xa3c   : > { %18139 = vmatpush3.msk.msra.mxu0 %vm6412_vm2, %v21272_v9  ;;  %18140 = vmatprep.mubr.msk.f32.mxu0 %vm19084_vm4, %v19083_v17 }
 0xa3d   : > { %18144 = vmatpush3.msk.msra.mxu1 %vm6412_vm2, %v21272_v9  ;;  %18145 = vmatprep.mubr.msk.f32.mxu1 %vm19084_vm4, %v19083_v17 }
 0xa3e   : > { %v21314_v60 = vpop.f32.mrb[188].mxu0  ;;  %v21316_v19 = vpop.f32.mrb[188].mxu1  ;;  %18148 = vmatprep.subr.mxu0 %v19083_v17  ;;  %18153 = vmatprep.subr.mxu1 %v19083_v17 }
 0xa3f   : > { %v21322_v51 = vmul.f32 %v21314_v60, %v21280_v12  ;;  %v21326_v36 = vmul.f32 %v21316_v19, %v21282_v35  ;;  %v18102_v54 = vpop.f32.mrb[189].mxu0  ;;  %v18107_v10 = vpop.f32.mrb[189].mxu1  ;;  %18141 = vmatmul.mubr.msk.f32.vlgmr.msra.gmra.mrb[196].mxu0 %vm8987_vm5, %v21314_v60  ;;  %18146 = vmatmul.mubr.msk.f32.vlgmr.msra.gmra.mrb[196].mxu1 %vm8987_vm5, %v21316_v19  ;;  %v10165_v16 = vmul.f32 %v21314_v60, %v21314_v60 }
 0xa40   : > { %18149 = vmatpush3.msk.msra.mxu0 %vm6412_vm2, %v21272_v9  ;;  %18150 = vmatprep.mubr.msk.f32.mxu0 %vm19084_vm4, %v19083_v17  ;;  %v10166_v57 = vmul.f32 %v21316_v19, %v21316_v19 }
 0xa41   : > { %18154 = vmatpush3.msk.msra.mxu1 %vm6412_vm2, %v21272_v9  ;;  %18155 = vmatprep.mubr.msk.f32.mxu1 %vm19084_vm4, %v19083_v17 }
 0xa42   : > { %v21338_v23 = vpop.f32.mrb[190].mxu0  ;;  %v21340_v55 = vpop.f32.mrb[190].mxu1  ;;  %18158 = vmatprep.subr.mxu0 %v19083_v17  ;;  %18163 = vmatprep.subr.mxu1 %v19083_v17 }
 0xa43   : > { %v21347_v43 = vmul.f32 %v21338_v23, %v21296_v48  ;;  %v21351_v0 = vmul.f32 %v21340_v55, %v21298_v59  ;;  %v18112_v44 = vpop.f32.mrb[191].mxu0  ;;  %v18117_v33 = vpop.f32.mrb[191].mxu1  ;;  %18151 = vmatmul.mubr.msk.f32.vlgmr.msra.gmra.mrb[198].mxu0 %vm8987_vm5, %v21338_v23  ;;  %18156 = vmatmul.mubr.msk.f32.vlgmr.msra.gmra.mrb[198].mxu1 %vm8987_vm5, %v21340_v55  ;;  %v10167_v18 = vmul.f32 %v21338_v23, %v21338_v23 }
 0xa44   : > { %18160 = vmatprep.mubr.msk.f32.mxu0 %vm19084_vm4, %v19083_v17  ;;  %18165 = vmatprep.mubr.msk.f32.mxu1 %vm19084_vm4, %v19083_v17  ;;  %v10168_v37 = vmul.f32 %v21340_v55, %v21340_v55 }
 0xa4d   : > { %s18681_s26 = spop %18680 }
 0xa4e   : > { %s18683_s27 = spop %18682 }
 0xb0a   : > { %v9060_v56 = vpop.f32.mrb[192].mxu0  ;;  %v9133_v41 = vpop.f32.mrb[192].mxu1 }
 0xb0b   : > { %v18122_v29 = vpop.f32.mrb[193].mxu0  ;;  %v18127_v11 = vpop.f32.mrb[193].mxu1  ;;  %18159 = vmatpush3.msk.msra.mxu0 %vm6412_vm2, %v9060_v56  ;;  %18164 = vmatpush3.msk.msra.mxu1 %vm6412_vm2, %v9133_v41 }
 0xb0c   : > { %18161 = vmatmul.mubr.msk.f32.vlgmr.msra.gmra.mrb[200].mxu0 %vm8987_vm5, %v21272_v9  ;;  %18166 = vmatmul.mubr.msk.f32.vlgmr.msra.gmra.mrb[200].mxu1 %vm8987_vm5, %v21272_v9 }
 0xb0d   : > { %18168 = vmatprep.subr.mxu0 %v19083_v17  ;;  %18173 = vmatprep.subr.mxu1 %v19083_v17 }
 0xb0e   : > { %v9206_v13 = vpop.f32.mrb[194].mxu0  ;;  %v9279_v62 = vpop.f32.mrb[194].mxu1  ;;  %18170 = vmatprep.mubr.msk.f32.mxu0 %vm19084_vm4, %v19083_v17  ;;  %18175 = vmatprep.mubr.msk.f32.mxu1 %vm19084_vm4, %v19083_v17 }
 0xb0f   : > { %v18132_v22 = vpop.f32.mrb[195].mxu0  ;;  %v18137_v40 = vpop.f32.mrb[195].mxu1  ;;  %18169 = vmatpush3.msk.msra.mxu0 %vm6412_vm2, %v9206_v13  ;;  %18174 = vmatpush3.msk.msra.mxu1 %vm6412_vm2, %v9279_v62 }
 0xb10   : > { %18171 = vmatmul.mubr.msk.f32.vlgmr.msra.gmra.mrb[202].mxu0 %vm8987_vm5, %v21272_v9  ;;  %18176 = vmatmul.mubr.msk.f32.vlgmr.msra.gmra.mrb[202].mxu1 %vm8987_vm5, %v21272_v9 }
 0xb11   : > { %18178 = vmatprep.subr.mxu0 %v19083_v17  ;;  %18183 = vmatprep.subr.mxu1 %v19083_v17 }
 0xb12   : > { %v9352_v28 = vpop.f32.mrb[196].mxu0  ;;  %18180 = vmatprep.mubr.msk.f32.mxu0 %vm19084_vm4, %v19083_v17  ;;  %18185 = vmatprep.mubr.msk.f32.mxu1 %vm19084_vm4, %v19083_v17  ;;  %v9425_v1 = vpop.f32.mrb[196].mxu1 }
 0xb13   : > { %v18142_v42 = vpop.f32.mrb[197].mxu0  ;;  %18179 = vmatpush3.msk.msra.mxu0 %vm6412_vm2, %v9352_v28  ;;  %v18147_v3 = vpop.f32.mrb[197].mxu1  ;;  %18184 = vmatpush3.msk.msra.mxu1 %vm6412_vm2, %v9425_v1 }
 0xb14   : > { %18181 = vmatmul.mubr.msk.f32.vlgmr.msra.gmra.mrb[204].mxu0 %vm8987_vm5, %v21272_v9  ;;  %18186 = vmatmul.mubr.msk.f32.vlgmr.msra.gmra.mrb[204].mxu1 %vm8987_vm5, %v21272_v9 }
 0xb15   : > { %18188 = vmatprep.subr.mxu0 %v19083_v17  ;;  %18193 = vmatprep.subr.mxu1 %v19083_v17 }
 0xb16   : > { %v9498_v61 = vpop.f32.mrb[198].mxu0  ;;  %18190 = vmatprep.mubr.msk.f32.mxu0 %vm19084_vm4, %v19083_v17  ;;  %v9571_v7 = vpop.f32.mrb[198].mxu1  ;;  %18195 = vmatprep.mubr.msk.f32.mxu1 %vm19084_vm4, %v19083_v17 }
 0xb17   : > { %v18152_v6 = vpop.f32.mrb[199].mxu0  ;;  %18189 = vmatpush3.msk.msra.mxu0 %vm6412_vm2, %v9498_v61  ;;  %v18157_v15 = vpop.f32.mrb[199].mxu1  ;;  %18194 = vmatpush3.msk.msra.mxu1 %vm6412_vm2, %v9571_v7 }
 0xb18   : > { %18191 = vmatmul.mubr.msk.f32.vlgmr.msra.gmra.mrb[206].mxu0 %vm8987_vm5, %v21272_v9  ;;  %18196 = vmatmul.mubr.msk.f32.vlgmr.msra.gmra.mrb[206].mxu1 %vm8987_vm5, %v21272_v9 }
 0xb19   : > { %18198 = vmatprep.subr.mxu0 %v19083_v17  ;;  %18203 = vmatprep.subr.mxu1 %v19083_v17 }
 0xb1a   : > { %18199 = vmatpush3.msk.msra.mxu0 %vm6412_vm2, %v21272_v9  ;;  %18200 = vmatprep.mubr.msk.f32.mxu0 %vm19084_vm4, %v19083_v17 }
 0xb1b   : > { %18204 = vmatpush3.msk.msra.mxu1 %vm6412_vm2, %v21272_v9  ;;  %18205 = vmatprep.mubr.msk.f32.mxu1 %vm19084_vm4, %v19083_v17 }
 0xb1c   : > { %18201 = vmatmul.mubr.msk.f32.vlgmr.msra.gmra.mrb[208].mxu0 %vm8987_vm5, %v10161_v52  ;;  %18206 = vmatmul.mubr.msk.f32.vlgmr.msra.gmra.mrb[208].mxu1 %vm8987_vm5, %v10162_v27 }
 0xb1d   : > { %18208 = vmatprep.subr.mxu0 %v19083_v17  ;;  %18213 = vmatprep.subr.mxu1 %v19083_v17 }
 0xb1e   : > { %18209 = vmatpush3.msk.msra.mxu0 %vm6412_vm2, %v21272_v9  ;;  %18210 = vmatprep.mubr.msk.f32.mxu0 %vm19084_vm4, %v19083_v17 }
 0xb1f   : > { %18214 = vmatpush3.msk.msra.mxu1 %vm6412_vm2, %v21272_v9  ;;  %18215 = vmatprep.mubr.msk.f32.mxu1 %vm19084_vm4, %v19083_v17 }
 0xb20   : > { %18211 = vmatmul.mubr.msk.f32.vlgmr.msra.gmra.mrb[210].mxu0 %vm8987_vm5, %v10163_v30  ;;  %18216 = vmatmul.mubr.msk.f32.vlgmr.msra.gmra.mrb[210].mxu1 %vm8987_vm5, %v10164_v63 }
 0xb21   : > { %18218 = vmatprep.subr.mxu0 %v19083_v17  ;;  %18223 = vmatprep.subr.mxu1 %v19083_v17 }
 0xb22   : > { %18219 = vmatpush3.msk.msra.mxu0 %vm6412_vm2, %v21272_v9  ;;  %18220 = vmatprep.mubr.msk.f32.mxu0 %vm19084_vm4, %v19083_v17 }
 0xb23   : > { %18224 = vmatpush3.msk.msra.mxu1 %vm6412_vm2, %v21272_v9  ;;  %18225 = vmatprep.mubr.msk.f32.mxu1 %vm19084_vm4, %v19083_v17 }
 0xb24   : > { %18221 = vmatmul.mubr.msk.f32.vlgmr.msra.gmra.mrb[212].mxu0 %vm8987_vm5, %v10165_v16  ;;  %18226 = vmatmul.mubr.msk.f32.vlgmr.msra.gmra.mrb[212].mxu1 %vm8987_vm5, %v10166_v57 }
 0xb25   : > { %18228 = vmatprep.subr.mxu0 %v19083_v17  ;;  %18233 = vmatprep.subr.mxu1 %v19083_v17 }
 0xb26   : > { %18229 = vmatpush3.msk.msra.mxu0 %vm6412_vm2, %v21272_v9  ;;  %18230 = vmatprep.mubr.msk.f32.mxu0 %vm19084_vm4, %v19083_v17 }
 0xb27   : > { %18234 = vmatpush3.msk.msra.mxu1 %vm6412_vm2, %v21272_v9  ;;  %18235 = vmatprep.mubr.msk.f32.mxu1 %vm19084_vm4, %v19083_v17 }
 0xb28   : > { %18231 = vmatmul.mubr.msk.f32.vlgmr.msra.gmra.mrb[214].mxu0 %vm8987_vm5, %v10167_v18  ;;  %18236 = vmatmul.mubr.msk.f32.vlgmr.msra.gmra.mrb[214].mxu1 %vm8987_vm5, %v10168_v37 }
 0xb29   : > { %18238 = vmatprep.subr.mxu0 %v19083_v17  ;;  %18243 = vmatprep.subr.mxu1 %v19083_v17 }
 0xb2a   : > { %18240 = vmatprep.mubr.msk.f32.mxu0 %vm19084_vm4, %v19083_v17  ;;  %18245 = vmatprep.mubr.msk.f32.mxu1 %vm19084_vm4, %v19083_v17 }
 0xbdf   : > { %v9646_v24 = vpop.f32.mrb[200].mxu0  ;;  %v9719_v26 = vpop.f32.mrb[200].mxu1 }
 0xbe0   : > { %v18162_v25 = vpop.f32.mrb[201].mxu0  ;;  %v18167_v21 = vpop.f32.mrb[201].mxu1  ;;  %v21474_v20 = vmul.f32 %v9646_v24, %v9646_v24  ;;  %v21480_v8 = vmul.f32 %v9719_v26, %v9719_v26 }
 0xbe3   : > { %v9792_v38 = vpop.f32.mrb[202].mxu0  ;;  %v9865_v47 = vpop.f32.mrb[202].mxu1 }
 0xbe4   : > { %v18172_v5 = vpop.f32.mrb[203].mxu0  ;;  %v18177_v49 = vpop.f32.mrb[203].mxu1  ;;  %v21494_v54 = vmul.f32 %v9792_v38, %v9792_v38  ;;  %v21500_v41 = vmul.f32 %v9865_v47, %v9865_v47 }
 0xbe7   : > { %v9938_v32 = vpop.f32.mrb[204].mxu0  ;;  %v10011_v58 = vpop.f32.mrb[204].mxu1 }
 0xbe8   : > { %v21476_v4 = vmul.f32 %v9938_v32, %v9938_v32  ;;  %v21478_v50 = vmul.f32 %v9938_v32, %v9646_v24  ;;  %v18182_v14 = vpop.f32.mrb[205].mxu0  ;;  %v21482_v39 = vmul.f32 %v10011_v58, %v10011_v58  ;;  %v21484_v34 = vmul.f32 %v10011_v58, %v9719_v26  ;;  %v18187_v53 = vpop.f32.mrb[205].mxu1 }
 0xbea   : > { %v21488_v2 = vadd.f32 %v21476_v4, %v21474_v20  ;;  %v21492_v46 = vadd.f32 %v21482_v39, %v21480_v8 }
 0xbeb   : > { %v10084_v45 = vpop.f32.mrb[206].mxu0  ;;  %v10157_v33 = vpop.f32.mrb[206].mxu1 }
 0xbec   : > { %v21496_v10 = vmul.f32 %v10084_v45, %v10084_v45  ;;  %v21498_v44 = vmul.f32 %v10084_v45, %v9792_v38  ;;  %v18192_v56 = vpop.f32.mrb[207].mxu0  ;;  %v21502_v29 = vmul.f32 %v10157_v33, %v10157_v33  ;;  %v21504_v11 = vmul.f32 %v10157_v33, %v9865_v47  ;;  %v18197_v13 = vpop.f32.mrb[207].mxu1 }
 0xbee   : > { %v21508_v62 = vadd.f32 %v21496_v10, %v21494_v54  ;;  %v21512_v22 = vadd.f32 %v21502_v29, %v21500_v41 }
 0xbef   : > { %v10238_v40 = vpop.f32.mrb[208].mxu0  ;;  %v10311_v28 = vpop.f32.mrb[208].mxu1 }
 0xbf0   : > { %v18202_v1 = vpop.f32.mrb[209].mxu0  ;;  %18239 = vmatpush3.msk.msra.mxu0 %vm6412_vm2, %v10238_v40  ;;  %v18207_v42 = vpop.f32.mrb[209].mxu1  ;;  %18244 = vmatpush3.msk.msra.mxu1 %vm6412_vm2, %v10311_v28 }
 0xbf1   : > { %18241 = vmatmul.mubr.msk.f32.vlgmr.msra.gmra.mrb[216].mxu0 %vm8987_vm5, %v21272_v9  ;;  %18246 = vmatmul.mubr.msk.f32.vlgmr.msra.gmra.mrb[216].mxu1 %vm8987_vm5, %v21272_v9 }
 0xbf2   : > { %18248 = vmatprep.subr.mxu0 %v19083_v17  ;;  %18253 = vmatprep.subr.mxu1 %v19083_v17 }
 0xbf3   : > { %v10384_v3 = vpop.f32.mrb[210].mxu0  ;;  %18250 = vmatprep.mubr.msk.f32.mxu0 %vm19084_vm4, %v19083_v17  ;;  %v10457_v61 = vpop.f32.mrb[210].mxu1  ;;  %18255 = vmatprep.mubr.msk.f32.mxu1 %vm19084_vm4, %v19083_v17 }
 0xbf4   : > { %v18212_v7 = vpop.f32.mrb[211].mxu0  ;;  %18249 = vmatpush3.msk.msra.mxu0 %vm6412_vm2, %v10384_v3  ;;  %v18217_v6 = vpop.f32.mrb[211].mxu1  ;;  %18254 = vmatpush3.msk.msra.mxu1 %vm6412_vm2, %v10457_v61 }
 0xbf5   : > { %18251 = vmatmul.mubr.msk.f32.vlgmr.msra.gmra.mrb[218].mxu0 %vm8987_vm5, %v21272_v9  ;;  %18256 = vmatmul.mubr.msk.f32.vlgmr.msra.gmra.mrb[218].mxu1 %vm8987_vm5, %v21272_v9  ;;  %v19058_v6 = vld [vmem:[%s22154_s9] sm:$0xf] }
 0xbf6   : > { %18258 = vmatprep.subr.mxu0 %v19083_v17  ;;  %18263 = vmatprep.subr.mxu1 %v19083_v17 }
 0xbf7   : > { %v10530_v15 = vpop.f32.mrb[212].mxu0  ;;  %18260 = vmatprep.mubr.msk.f32.mxu0 %vm19084_vm4, %v19083_v17  ;;  %v10603_v52 = vpop.f32.mrb[212].mxu1  ;;  %18265 = vmatprep.mubr.msk.f32.mxu1 %vm19084_vm4, %v19083_v17 }
 0xbf8   : > { %v18222_v27 = vpop.f32.mrb[213].mxu0  ;;  %18259 = vmatpush3.msk.msra.mxu0 %vm6412_vm2, %v10530_v15  ;;  %v18227_v30 = vpop.f32.mrb[213].mxu1  ;;  %18264 = vmatpush3.msk.msra.mxu1 %vm6412_vm2, %v10603_v52 }
 0xbf9   : > { %18261 = vmatmul.mubr.msk.f32.vlgmr.msra.gmra.mrb[220].mxu0 %vm8987_vm5, %v21272_v9  ;;  %18266 = vmatmul.mubr.msk.f32.vlgmr.msra.gmra.mrb[220].mxu1 %vm8987_vm5, %v21272_v9  ;;  %v11985_v27 = vmul.f32 2.0, %v21478_v50 }
 0xbfa   : > { %18268 = vmatprep.subr.mxu0 %v19083_v17  ;;  %18273 = vmatprep.subr.mxu1 %v19083_v17 }
 0xbfb   : > { %v10676_v63 = vpop.f32.mrb[214].mxu0  ;;  %18270 = vmatprep.mubr.msk.f32.mxu0 %vm19084_vm4, %v19083_v17  ;;  %v10749_v16 = vpop.f32.mrb[214].mxu1  ;;  %18275 = vmatprep.mubr.msk.f32.mxu1 %vm19084_vm4, %v19083_v17 }
 0xbfc   : > { %v18232_v57 = vpop.f32.mrb[215].mxu0  ;;  %18269 = vmatpush3.msk.msra.mxu0 %vm6412_vm2, %v10676_v63  ;;  %v18237_v18 = vpop.f32.mrb[215].mxu1  ;;  %18274 = vmatpush3.msk.msra.mxu1 %vm6412_vm2, %v10749_v16  ;;  %v11986_v16 = vmul.f32 2.0, %v21484_v34 }
 0xbfd   : > { %18271 = vmatmul.mubr.msk.f32.vlgmr.msra.gmra.mrb[222].mxu0 %vm8987_vm5, %v21272_v9  ;;  %18276 = vmatmul.mubr.msk.f32.vlgmr.msra.gmra.mrb[222].mxu1 %vm8987_vm5, %v21272_v9 }
 0xbfe   : > { %18278 = vmatprep.subr.mxu0 %v19083_v17  ;;  %18283 = vmatprep.subr.mxu1 %v19083_v17 }
 0xbff   : > { %18279 = vmatpush3.msk.msra.mxu0 %vm6412_vm2, %v21272_v9  ;;  %18280 = vmatprep.mubr.msk.f32.mxu0 %vm19084_vm4, %v19083_v17 }
 0xc00   : > { %18284 = vmatpush3.msk.msra.mxu1 %vm6412_vm2, %v21272_v9  ;;  %18285 = vmatprep.mubr.msk.f32.mxu1 %vm19084_vm4, %v19083_v17 }
 0xc01   : > { %18281 = vmatmul.mubr.msk.f32.vlgmr.msra.gmra.mrb[224].mxu0 %vm8987_vm5, %v21322_v51  ;;  %18286 = vmatmul.mubr.msk.f32.vlgmr.msra.gmra.mrb[224].mxu1 %vm8987_vm5, %v21326_v36 }
 0xc02   : > { %18288 = vmatprep.subr.mxu0 %v19083_v17  ;;  %18293 = vmatprep.subr.mxu1 %v19083_v17 }
 0xc03   : > { %18289 = vmatpush3.msk.msra.mxu0 %vm6412_vm2, %v21272_v9  ;;  %18290 = vmatprep.mubr.msk.f32.mxu0 %vm19084_vm4, %v19083_v17 }
 0xc04   : > { %18294 = vmatpush3.msk.msra.mxu1 %vm6412_vm2, %v21272_v9  ;;  %18295 = vmatprep.mubr.msk.f32.mxu1 %vm19084_vm4, %v19083_v17 }
 0xc05   : > { %18291 = vmatmul.mubr.msk.f32.vlgmr.msra.gmra.mrb[226].mxu0 %vm8987_vm5, %v21347_v43  ;;  %18296 = vmatmul.mubr.msk.f32.vlgmr.msra.gmra.mrb[226].mxu1 %vm8987_vm5, %v21351_v0 }
 0xc06   : > { %18298 = vmatprep.subr.mxu0 %v19083_v17  ;;  %18303 = vmatprep.subr.mxu1 %v19083_v17 }
 0xc07   : > { %18300 = vmatprep.mubr.msk.f32.mxu0 %vm19084_vm4, %v19083_v17  ;;  %18305 = vmatprep.mubr.msk.f32.mxu1 %vm19084_vm4, %v19083_v17 }
 0xcc4   : > { %v10822_v51 = vpop.f32.mrb[216].mxu0  ;;  %v10895_v37 = vpop.f32.mrb[216].mxu1 }
 0xcc5   : > { %v11937_v36 = vsub.f32 %v10822_v51, %v21474_v20  ;;  %v18242_v24 = vpop.f32.mrb[217].mxu0  ;;  %v11938_v43 = vsub.f32 %v10895_v37, %v21480_v8  ;;  %v18247_v26 = vpop.f32.mrb[217].mxu1 }
 0xcc6   : > { %v11989_v24 = vadd.f32 0.0001, %v11985_v27 }
 0xcc8   : > { %v10968_v25 = vpop.f32.mrb[218].mxu0  ;;  %v11041_v21 = vpop.f32.mrb[218].mxu1 }
 0xcc9   : > { %v11939_v0 = vsub.f32 %v10968_v25, %v21494_v54  ;;  %v18252_v38 = vpop.f32.mrb[219].mxu0  ;;  %v11940_v47 = vsub.f32 %v11041_v21, %v21500_v41  ;;  %v18257_v5 = vpop.f32.mrb[219].mxu1 }
 0xcca   : > { %v11990_v38 = vadd.f32 0.0001, %v11986_v16 }
 0xccc   : > { %v11114_v49 = vpop.f32.mrb[220].mxu0  ;;  %v11187_v58 = vpop.f32.mrb[220].mxu1 }
 0xccd   : > { %v11941_v32 = vsub.f32 %v11114_v49, %v21476_v4  ;;  %v18262_v14 = vpop.f32.mrb[221].mxu0  ;;  %v11942_v20 = vsub.f32 %v11187_v58, %v21482_v39  ;;  %v18267_v53 = vpop.f32.mrb[221].mxu1 }
 0xccf   : > { %v21596_v45 = vadd.f32 %v11941_v32, %v11937_v36  ;;  %v21598_v8 = vadd.f32 %v11942_v20, %v11938_v43  ;;  %v11988_v20 = vmul.f32 2.0, %v21504_v11 }
 0xcd0   : > { %v11260_v33 = vpop.f32.mrb[222].mxu0  ;;  %v11333_v56 = vpop.f32.mrb[222].mxu1 }
 0xcd1   : > { %v11943_v54 = vsub.f32 %v11260_v33, %v21496_v10  ;;  %v18272_v13 = vpop.f32.mrb[223].mxu0  ;;  %v11944_v41 = vsub.f32 %v11333_v56, %v21502_v29  ;;  %v18277_v40 = vpop.f32.mrb[223].mxu1 }
 0xcd3   : > { %v21602_v28 = vadd.f32 %v11943_v54, %v11939_v0  ;;  %v21604_v4 = vadd.f32 %v11944_v41, %v11940_v47  ;;  %v11987_v47 = vmul.f32 2.0, %v21498_v44 }
 0xcd4   : > { %v11410_v1 = vpop.f32.mrb[224].mxu0  ;;  %v11483_v42 = vpop.f32.mrb[224].mxu1 }
 0xcd5   : > { %v18282_v39 = vpop.f32.mrb[225].mxu0  ;;  %18299 = vmatpush3.msk.msra.mxu0 %vm6412_vm2, %v11410_v1  ;;  %v18287_v3 = vpop.f32.mrb[225].mxu1  ;;  %18304 = vmatpush3.msk.msra.mxu1 %vm6412_vm2, %v11483_v42 }
 0xcd6   : > { %18301 = vmatmul.mubr.msk.f32.vlgmr.msra.gmra.mrb[228].mxu0 %vm8987_vm5, %v21272_v9  ;;  %18306 = vmatmul.mubr.msk.f32.vlgmr.msra.gmra.mrb[228].mxu1 %vm8987_vm5, %v21272_v9 }
 0xcd7   : > { %18308 = vmatprep.subr.mxu0 %v19083_v17  ;;  %18313 = vmatprep.subr.mxu1 %v19083_v17 }
 0xcd8   : > { %v11556_v10 = vpop.f32.mrb[226].mxu0  ;;  %18310 = vmatprep.mubr.msk.f32.mxu0 %vm19084_vm4, %v19083_v17  ;;  %v11629_v29 = vpop.f32.mrb[226].mxu1  ;;  %18315 = vmatprep.mubr.msk.f32.mxu1 %vm19084_vm4, %v19083_v17 }
 0xcd9   : > { %v18292_v61 = vpop.f32.mrb[227].mxu0  ;;  %18309 = vmatpush3.msk.msra.mxu0 %vm6412_vm2, %v11556_v10  ;;  %v18297_v7 = vpop.f32.mrb[227].mxu1  ;;  %18314 = vmatpush3.msk.msra.mxu1 %vm6412_vm2, %v11629_v29 }
 0xcda   : > { %18311 = vmatmul.mubr.msk.f32.vlgmr.msra.gmra.mrb[230].mxu0 %vm8987_vm5, %v21272_v9  ;;  %18316 = vmatmul.mubr.msk.f32.vlgmr.msra.gmra.mrb[230].mxu1 %vm8987_vm5, %v21272_v9  ;;  %v11961_v9 = vadd.f32 0.0009, %v21596_v45 }
 0xcdb   : > { %18318 = vmatprep.subr.mxu0 %v19083_v17  ;;  %18323 = vmatprep.subr.mxu1 %v19083_v17 }
 0xcdc   : > { %18319 = vmatpush3.msk.msra.mxu0 %vm6412_vm2, %v19058_v6  ;;  %18320 = vmatprep.mubr.msk.f32.mxu0 %vm19084_vm4, %v19083_v17  ;;  %19026 = vrcp.f32 %v11961_v9 }
 0xcdd   : > { %18324 = vmatpush3.msk.msra.mxu1 %vm6412_vm2, %v19058_v6  ;;  %18325 = vmatprep.mubr.msk.f32.mxu1 %vm19084_vm4, %v19083_v17 }
 0xcde   : > { %18321 = vmatmul.mubr.msk.f32.vlgmr.msra.gmra.mrb[232].mxu0 %vm8987_vm5, %v21280_v12  ;;  %18326 = vmatmul.mubr.msk.f32.vlgmr.msra.gmra.mrb[232].mxu1 %vm8987_vm5, %v21282_v35  ;;  %v11962_v12 = vadd.f32 0.0009, %v21598_v8  ;;  %v12001_v35 = vadd.f32 0.0001, %v21488_v2 }
 0xcdf   : > { %18328 = vmatprep.subr.mxu0 %v19083_v17  ;;  %18333 = vmatprep.subr.mxu1 %v19083_v17 }
 0xce0   : > { %18329 = vmatpush3.msk.msra.mxu0 %vm6412_vm2, %v19058_v6  ;;  %18330 = vmatprep.mubr.msk.f32.mxu0 %vm19084_vm4, %v19083_v17  ;;  %19028 = vrcp.f32 %v11962_v12 }
 0xce1   : > { %18334 = vmatpush3.msk.msra.mxu1 %vm6412_vm2, %v19058_v6  ;;  %18335 = vmatprep.mubr.msk.f32.mxu1 %vm19084_vm4, %v19083_v17  ;;  %19030 = vrcp.f32 %v12001_v35 }
 0xce2   : > { %18331 = vmatmul.mubr.msk.f32.vlgmr.msra.gmra.mrb[234].mxu0 %vm8987_vm5, %v21296_v48  ;;  %18336 = vmatmul.mubr.msk.f32.vlgmr.msra.gmra.mrb[234].mxu1 %vm8987_vm5, %v21298_v59  ;;  %v12002_v48 = vadd.f32 0.0001, %v21492_v46  ;;  %v11963_v59 = vadd.f32 0.0009, %v21602_v28 }
 0xce3   : > { %18338 = vmatprep.subr.mxu0 %v19083_v17  ;;  %18343 = vmatprep.subr.mxu1 %v19083_v17 }
 0xce4   : > { %18339 = vmatpush3.msk.msra.mxu0 %vm6412_vm2, %v19058_v6  ;;  %18340 = vmatprep.mubr.msk.f32.mxu0 %vm19084_vm4, %v19083_v17  ;;  %19032 = vrcp.f32 %v12002_v48 }
 0xce5   : > { %18344 = vmatpush3.msk.msra.mxu1 %vm6412_vm2, %v19058_v6  ;;  %18345 = vmatprep.mubr.msk.f32.mxu1 %vm19084_vm4, %v19083_v17  ;;  %19034 = vrcp.f32 %v11963_v59 }
 0xce6   : > { %18341 = vmatmul.mubr.msk.f32.vlgmr.msra.gmra.mrb[236].mxu0 %vm8987_vm5, %v21314_v60  ;;  %18346 = vmatmul.mubr.msk.f32.vlgmr.msra.gmra.mrb[236].mxu1 %vm8987_vm5, %v21316_v19  ;;  %v11964_v60 = vadd.f32 0.0009, %v21604_v4  ;;  %v12003_v19 = vadd.f32 0.0001, %v21508_v62 }
 0xce7   : > { %18348 = vmatprep.subr.mxu0 %v19083_v17  ;;  %18353 = vmatprep.subr.mxu1 %v19083_v17 }
 0xce8   : > { %18349 = vmatpush3.msk.msra.mxu0 %vm6412_vm2, %v19058_v6  ;;  %18350 = vmatprep.mubr.msk.f32.mxu0 %vm19084_vm4, %v19083_v17  ;;  %19036 = vrcp.f32 %v11964_v60 }
 0xce9   : > { %18354 = vmatpush3.msk.msra.mxu1 %vm6412_vm2, %v19058_v6  ;;  %18355 = vmatprep.mubr.msk.f32.mxu1 %vm19084_vm4, %v19083_v17  ;;  %19038 = vrcp.f32 %v12003_v19 }
 0xcea   : > { %18351 = vmatmul.mubr.msk.f32.vlgmr.msra.gmra.mrb[238].mxu0 %vm8987_vm5, %v21338_v23  ;;  %18356 = vmatmul.mubr.msk.f32.vlgmr.msra.gmra.mrb[238].mxu1 %vm8987_vm5, %v21340_v55  ;;  %v12004_v23 = vadd.f32 0.0001, %v21512_v22  ;;  %v19027_v55 = vpop.eup %19026 }
 0xceb   : > { %18358 = vmatprep.subr.mxu0 %v19083_v17  ;;  %18363 = vmatprep.subr.mxu1 %v19083_v17  ;;  %v19029_v2 = vpop.eup %19028  ;;  %v11969_v52 = vmul.f32 %v19027_v55, %v11961_v9 }
 0xcec   : > { %18360 = vmatprep.mubr.msk.f32.mxu0 %vm19084_vm4, %v19083_v17  ;;  %18365 = vmatprep.mubr.msk.f32.mxu1 %vm19084_vm4, %v19083_v17  ;;  %19040 = vrcp.f32 %v12004_v23  ;;  %v19031_v15 = vpop.eup %19030  ;;  %v11970_v30 = vmul.f32 %v19029_v2, %v11962_v12 }
 0xced   : > { %v12009_v18 = vmul.f32 %v19031_v15, %v12001_v35  ;;  %v11973_v22 = vsub.f32 2.0, %v11969_v52  ;;  %v11991_v52 = vadd.f32 0.0001, %v11987_v47 }
 0xcee   : > { %v19033_v46 = vpop.eup %19032  ;;  %v11974_v43 = vsub.f32 2.0, %v11970_v30 }
 0xcef   : > { %v19035_v63 = vpop.eup %19034  ;;  %v12010_v62 = vmul.f32 %v19033_v46, %v12002_v48  ;;  %v12013_v58 = vsub.f32 2.0, %v12009_v18  ;;  %v11977_v33 = vmul.f32 %v19027_v55, %v11973_v22 }
 0xcf0   : > { %v11971_v26 = vmul.f32 %v19035_v63, %v11963_v59  ;;  %v11978_v41 = vmul.f32 %v19029_v2, %v11974_v43 }
 0xcf1   : > { %v12014_v14 = vsub.f32 2.0, %v12010_v62  ;;  %v12017_v3 = vmul.f32 %v19031_v15, %v12013_v58 }
 0xcf2   : > { %v19037_v57 = vpop.eup %19036  ;;  %v11975_v56 = vsub.f32 2.0, %v11971_v26 }
 0xcf3   : > { %v21691_v51 = vpop.eup %19038  ;;  %v11972_v5 = vmul.f32 %v19037_v57, %v11964_v60  ;;  %v12018_v10 = vmul.f32 %v19033_v46, %v12014_v14 }
 0xcf4   : > { %v12011_v45 = vmul.f32 %v21691_v51, %v12003_v19  ;;  %v11979_v60 = vmul.f32 %v19035_v63, %v11975_v56  ;;  %v11992_v63 = vadd.f32 0.0001, %v11988_v20 }
 0xcf5   : > { %v11976_v4 = vsub.f32 2.0, %v11972_v5 }
 0xcf6   : > { %v21693_v37 = vpop.eup %19040  ;;  %v12015_v7 = vsub.f32 2.0, %v12011_v45 }
 0xcf7   : > { %v12012_v8 = vmul.f32 %v21693_v37, %v12004_v23  ;;  %v11980_v15 = vmul.f32 %v19037_v57, %v11976_v4 }
 0xcf8   : > { %v12019_v57 = vmul.f32 %v21691_v51, %v12015_v7 }
 0xcf9   : > { %v12016_v6 = vsub.f32 2.0, %v12012_v8 }
 0xda9   : > { %v11702_v36 = vpop.f32.mrb[228].mxu0  ;;  %v11775_v0 = vpop.f32.mrb[228].mxu1 }
 0xdaa   : > { %v11945_v25 = vsub.f32 %v11702_v36, %v21478_v50  ;;  %v18302_v21 = vpop.f32.mrb[229].mxu0  ;;  %v11946_v49 = vsub.f32 %v11775_v0, %v21484_v34  ;;  %v18307_v32 = vpop.f32.mrb[229].mxu1  ;;  %v12020_v0 = vmul.f32 %v21693_v37, %v12016_v6 }
 0xdac   : > { %v11949_v53 = vmul.f32 2.0, %v11945_v25  ;;  %v11950_v50 = vmul.f32 2.0, %v11946_v49 }
 0xdad   : > { %v11848_v54 = vpop.f32.mrb[230].mxu0  ;;  %v11921_v28 = vpop.f32.mrb[230].mxu1 }
 0xdae   : > { %v11953_v13 = vadd.f32 0.0009, %v11949_v53  ;;  %v11947_v40 = vsub.f32 %v11848_v54, %v21498_v44  ;;  %v18312_v34 = vpop.f32.mrb[231].mxu0  ;;  %v11954_v1 = vadd.f32 0.0009, %v11950_v50  ;;  %v11948_v42 = vsub.f32 %v11921_v28, %v21504_v11  ;;  %v18317_v39 = vpop.f32.mrb[231].mxu1 }
 0xdaf   : > { %v21764_v28 = vld [vmem:[%s22150_s5] sm:$0x3] }
 0xdb0   : > { %v11981_v29 = vmul.f32 %v11977_v33, %v11953_v13  ;;  %v11951_v61 = vmul.f32 2.0, %v11947_v40  ;;  %v11982_v9 = vmul.f32 %v11978_v41, %v11954_v1  ;;  %v11952_v12 = vmul.f32 2.0, %v11948_v42 }
 0xdb1   : > { %v12136_v35 = vpop.f32.mrb[232].mxu0  ;;  %v12206_v19 = vpop.f32.mrb[232].mxu1 }
 0xdb2   : > { %v11993_v48 = vmul.f32 %v11989_v24, %v11981_v29  ;;  %v12042_v44 = vsel %vm12025_vm6, %v11981_v29, 0.0  ;;  %v11955_v59 = vadd.f32 0.0009, %v11951_v61  ;;  %v18322_v23 = vpop.f32.mrb[233].mxu0  ;;  %18359 = vmatpush3.msk.msra.mxu0 %vm6412_vm2, %v12136_v35  ;;  %v11994_v11 = vmul.f32 %v11990_v38, %v11982_v9  ;;  %v18327_v46 = vpop.f32.mrb[233].mxu1  ;;  %18364 = vmatpush3.msk.msra.mxu1 %vm6412_vm2, %v12206_v19 }
 0xdb3   : > { %v12043_v55 = vsel %vm12025_vm6, %v11982_v9, 0.0  ;;  %v11956_v2 = vadd.f32 0.0009, %v11952_v12  ;;  %18361 = vmatmul.mubr.msk.f32.vlgmr.msra.gmra.mrb[240].mxu0 %vm8987_vm5, %v21133_v31  ;;  %18366 = vmatmul.mubr.msk.f32.vlgmr.msra.gmra.mrb[240].mxu1 %vm8987_vm5, %v21133_v31 }
 0xdb4   : > { %v12021_v27 = vmul.f32 %v12017_v3, %v11993_v48  ;;  %v12044_v30 = vadd.f32 %v12043_v55, %v12042_v44  ;;  %v11983_v16 = vmul.f32 %v11979_v60, %v11955_v59  ;;  %18368 = vmatprep.subr.mxu0 %v19083_v17  ;;  %v12022_v18 = vmul.f32 %v12018_v10, %v11994_v11 }
 0xdb5   : > { %v11984_v62 = vmul.f32 %v11980_v15, %v11956_v2  ;;  %v12276_v22 = vpop.f32.mrb[234].mxu0  ;;  %18373 = vmatprep.subr.mxu1 %v19083_v17  ;;  %18370 = vmatprep.mubr.msk.f32.mxu0 %vm19084_vm4, %v19083_v17  ;;  %v12346_v43 = vpop.f32.mrb[234].mxu1 }
 0xdb6   : > { %v11995_v36 = vmul.f32 %v11991_v52, %v11983_v16  ;;  %v12045_v24 = vsel %vm12025_vm6, %v11983_v16, 0.0  ;;  %v18332_v26 = vpop.f32.mrb[235].mxu0  ;;  %18369 = vmatpush3.msk.msra.mxu0 %vm6412_vm2, %v12276_v22  ;;  %18375 = vmatprep.mubr.msk.f32.mxu1 %vm19084_vm4, %v19083_v17  ;;  %v12026_v25 = vsel %vm12025_vm6, %v12021_v27, 0.0  ;;  %v18337_v38 = vpop.f32.mrb[235].mxu1  ;;  %v12027_v47 = vsel %vm12025_vm6, %v12022_v18, 0.0 }
 0xdb7   : > { %v11996_v21 = vmul.f32 %v11992_v63, %v11984_v62  ;;  %18374 = vmatpush3.msk.msra.mxu1 %vm6412_vm2, %v12346_v43  ;;  %18371 = vmatmul.mubr.msk.f32.vlgmr.msra.gmra.mrb[242].mxu0 %vm8987_vm5, %v21133_v31  ;;  %v12046_v51 = vadd.f32 %v12045_v24, %v12044_v30  ;;  %v12047_v49 = vsel %vm12025_vm6, %v11984_v62, 0.0  ;;  %v12028_v32 = vadd.f32 %v12027_v47, %v12026_v25 }
 0xdb8   : > { %v12023_v5 = vmul.f32 %v12019_v57, %v11995_v36  ;;  %18376 = vmatmul.mubr.msk.f32.vlgmr.msra.gmra.mrb[242].mxu1 %vm8987_vm5, %v21133_v31  ;;  %18378 = vmatprep.subr.mxu0 %v19083_v17 }
 0xdb9   : > { %v12416_v37 = vpop.f32.mrb[236].mxu0  ;;  %18383 = vmatprep.subr.mxu1 %v19083_v17  ;;  %18380 = vmatprep.mubr.msk.f32.mxu0 %vm19084_vm4, %v19083_v17  ;;  %v12048_v58 = vadd.f32 %v12047_v49, %v12046_v51  ;;  %v12024_v14 = vmul.f32 %v12020_v0, %v11996_v21  ;;  %v12486_v20 = vpop.f32.mrb[236].mxu1 }
 0xdba   : > { %v18342_v53 = vpop.f32.mrb[237].mxu0  ;;  %18379 = vmatpush3.msk.msra.mxu0 %vm6412_vm2, %v12416_v37  ;;  %18385 = vmatprep.mubr.msk.f32.mxu1 %vm19084_vm4, %v19083_v17  ;;  %v12029_v45 = vsel %vm12025_vm6, %v12023_v5, 0.0  ;;  %v18347_v8 = vpop.f32.mrb[237].mxu1 }
 0xdbb   : > { %18384 = vmatpush3.msk.msra.mxu1 %vm6412_vm2, %v12486_v20  ;;  %18381 = vmatmul.mubr.msk.f32.vlgmr.msra.gmra.mrb[244].mxu0 %vm8987_vm5, %v21133_v31  ;;  %v12030_v33 = vadd.f32 %v12029_v45, %v12028_v32  ;;  %v12031_v50 = vsel %vm12025_vm6, %v12024_v14, 0.0 }
 0xdbc   : > { %18386 = vmatmul.mubr.msk.f32.vlgmr.msra.gmra.mrb[244].mxu1 %vm8987_vm5, %v21133_v31  ;;  %12049 = vadd.xlane.f32.xlu1 %v12048_v58 }
 0xdbd   : > { %v12556_v54 = vpop.f32.mrb[238].mxu0  ;;  %18388 = vmatprep.subr.mxu0 %v19083_v17  ;;  %18393 = vmatprep.subr.mxu1 %v19083_v17  ;;  %v12032_v56 = vadd.f32 %v12031_v50, %v12030_v33  ;;  %v12626_v13 = vpop.f32.mrb[238].mxu1 }
 0xdbe   : > { %v18352_v41 = vpop.f32.mrb[239].mxu0  ;;  %18389 = vmatpush3.msk.msra.mxu0 %vm6412_vm2, %v12556_v54  ;;  %18390 = vmatprep.mubr.msk.f32.mxu0 %vm19084_vm4, %v19083_v17  ;;  %v18357_v40 = vpop.f32.mrb[239].mxu1 }
 0xdbf   : > { %18394 = vmatpush3.msk.msra.mxu1 %vm6412_vm2, %v12626_v13  ;;  %18395 = vmatprep.mubr.msk.f32.mxu1 %vm19084_vm4, %v19083_v17 }
 0xdc0   : > { %18391 = vmatmul.mubr.msk.f32.vlgmr.msra.gmra.mrb[246].mxu0 %vm8987_vm5, %v21133_v31  ;;  %18396 = vmatmul.mubr.msk.f32.vlgmr.msra.gmra.mrb[246].mxu1 %vm8987_vm5, %v21133_v31 }
 0xdc1   : > { %12033 = vadd.xlane.f32.xlu0 %v12032_v56  ;;  %18398 = vmatprep.subr.mxu0 %v19083_v17 }
 0xdc2   : > { %18403 = vmatprep.subr.mxu1 %v19083_v17  ;;  %18400 = vmatprep.mubr.msk.f32.mxu0 %vm19084_vm4, %v19083_v17 }
 0xdc3   : > { %18405 = vmatprep.mubr.msk.f32.mxu1 %vm19084_vm4, %v19083_v17  ;;  %18399 = vmatpush3.msk.msra.mxu0 %vm13254_vm7, %v21764_v28 }
 0xdc4   : > { %18404 = vmatpush3.msk.msra.mxu1 %vm13254_vm7, %v21764_v28  ;;  %18408 = vmatprep.subr.mxu0 %v19083_v17 }
 0xdc5   : > { %18413 = vmatprep.subr.mxu1 %v19083_v17 }
 0xe49   : > { %v12050_v31 = vpop.xlane.xlu1 %12049 }
 0xe4a   : > { %v12051_v34 = vrot.slane %v12050_v31, 4 }
 0xe4c   : > { %v12052_v4 = vadd.f32 %v12051_v34, %v12050_v31 }
 0xe4e   : > { %v12053_v1 = vrot.slane %v12052_v4, 2  ;;  %v12034_v42 = vpop.xlane.xlu0 %12033 }
 0xe4f   : > { %v12035_v39 = vrot.slane %v12034_v42, 4 }
 0xe50   : > { %v12054_v10 = vadd.f32 %v12053_v1, %v12052_v4 }
 0xe51   : > { %v12036_v3 = vadd.f32 %v12035_v39, %v12034_v42 }
 0xe52   : > { %v12055_v7 = vrot.slane %v12054_v10, 1 }
 0xe53   : > { %v12037_v29 = vrot.slane %v12036_v3, 2 }
 0xe54   : > { %v12056_v12 = vadd.f32 %v12055_v7, %v12054_v10 }
 0xe55   : > { %v12038_v61 = vadd.f32 %v12037_v29, %v12036_v3 }
 0xe57   : > { %v12039_v6 = vrot.slane %v12038_v61, 1 }
 0xe59   : > { %v12040_v9 = vadd.f32 %v12039_v6, %v12038_v61 }
 0xe5b   : > { %18684 = vpush %v12040_v9 }
 0xe5c   : > { %18686 = vpush %v12056_v12 }
 0xe86   : > { %v21772_v35 = vpop.f32.mrb[240].mxu0  ;;  %v21774_v48 = vpop.f32.mrb[240].mxu1 }
 0xe87   : > { %v18362_v44 = vpop.f32.mrb[241].mxu0  ;;  %18401 = vmatmul.mubr.msk.f32.vlgmr.msra.gmra.mrb[248].mxu0 %vm13250_vm8, %v21772_v35  ;;  %v18367_v59 = vpop.f32.mrb[241].mxu1  ;;  %18406 = vmatmul.mubr.msk.f32.vlgmr.msra.gmra.mrb[248].mxu1 %vm13250_vm8, %v21774_v48  ;;  %v14425_v14 = vmul.f32 %v21772_v35, %v21772_v35  ;;  %v14426_v20 = vmul.f32 %v21774_v48, %v21774_v48 }
 0xe88   : > { %18409 = vmatpush3.msk.msra.mxu0 %vm13254_vm7, %v21764_v28  ;;  %18410 = vmatprep.mubr.msk.f32.mxu0 %vm19084_vm4, %v19083_v17 }
 0xe89   : > { %18414 = vmatpush3.msk.msra.mxu1 %vm13254_vm7, %v21764_v28  ;;  %18415 = vmatprep.mubr.msk.f32.mxu1 %vm19084_vm4, %v19083_v17 }
 0xe8a   : > { %v21786_v60 = vpop.f32.mrb[242].mxu0  ;;  %18418 = vmatprep.subr.mxu0 %v19083_v17  ;;  %18423 = vmatprep.subr.mxu1 %v19083_v17 }
 0xe8b   : > { %v21791_v19 = vpop.f32.mrb[242].mxu1  ;;  %v18372_v23 = vpop.f32.mrb[243].mxu0  ;;  %18411 = vmatmul.mubr.msk.f32.vlgmr.msra.gmra.mrb[250].mxu0 %vm13250_vm8, %v21786_v60  ;;  %v14427_v53 = vmul.f32 %v21786_v60, %v21786_v60 }
 0xe8c   : > { %v18377_v11 = vpop.f32.mrb[243].mxu1  ;;  %18416 = vmatmul.mubr.msk.f32.vlgmr.msra.gmra.mrb[250].mxu1 %vm13250_vm8, %v21791_v19  ;;  %18419 = vmatpush3.msk.msra.mxu0 %vm13254_vm7, %v21764_v28  ;;  %v14428_v45 = vmul.f32 %v21791_v19, %v21791_v19  ;;  %s18685_s28 = spop %18684 }
 0xe8d   : > { %18420 = vmatprep.mubr.msk.f32.mxu0 %vm19084_vm4, %v19083_v17  ;;  %18424 = vmatpush3.msk.msra.mxu1 %vm13254_vm7, %v21764_v28  ;;  %s18687_s29 = spop %18686 }
 0xe8e   : > { %v21804_v55 = vpop.f32.mrb[244].mxu0  ;;  %18425 = vmatprep.mubr.msk.f32.mxu1 %vm19084_vm4, %v19083_v17  ;;  %18428 = vmatprep.subr.mxu0 %v19083_v17 }
 0xe8f   : > { %v21811_v2 = vmul.f32 %v21804_v55, %v21772_v35  ;;  %v21813_v15 = vpop.f32.mrb[244].mxu1  ;;  %v18382_v46 = vpop.f32.mrb[245].mxu0  ;;  %18421 = vmatmul.mubr.msk.f32.vlgmr.msra.gmra.mrb[252].mxu0 %vm13250_vm8, %v21804_v55  ;;  %18433 = vmatprep.subr.mxu1 %v19083_v17  ;;  %v14429_v8 = vmul.f32 %v21804_v55, %v21804_v55 }
 0xe90   : > { %v21820_v52 = vmul.f32 %v21813_v15, %v21774_v48  ;;  %v18387_v27 = vpop.f32.mrb[245].mxu1  ;;  %18426 = vmatmul.mubr.msk.f32.vlgmr.msra.gmra.mrb[252].mxu1 %vm13250_vm8, %v21813_v15  ;;  %18429 = vmatpush3.msk.msra.mxu0 %vm13254_vm7, %v21764_v28  ;;  %v14430_v33 = vmul.f32 %v21813_v15, %v21813_v15 }
 0xe91   : > { %18430 = vmatprep.mubr.msk.f32.mxu0 %vm19084_vm4, %v19083_v17  ;;  %18434 = vmatpush3.msk.msra.mxu1 %vm13254_vm7, %v21764_v28 }
 0xe92   : > { %18435 = vmatprep.mubr.msk.f32.mxu1 %vm19084_vm4, %v19083_v17  ;;  %18438 = vmatprep.subr.mxu0 %v19083_v17 }
 0xe93   : > { %v21833_v30 = vpop.f32.mrb[246].mxu0  ;;  %v21835_v16 = vpop.f32.mrb[246].mxu1  ;;  %18443 = vmatprep.subr.mxu1 %v19083_v17 }
 0xe94   : > { %v21840_v63 = vmul.f32 %v21833_v30, %v21786_v60  ;;  %v21844_v18 = vmul.f32 %v21835_v16, %v21791_v19  ;;  %v18392_v62 = vpop.f32.mrb[247].mxu0  ;;  %v18397_v22 = vpop.f32.mrb[247].mxu1  ;;  %18431 = vmatmul.mubr.msk.f32.vlgmr.msra.gmra.mrb[254].mxu0 %vm13250_vm8, %v21833_v30  ;;  %18436 = vmatmul.mubr.msk.f32.vlgmr.msra.gmra.mrb[254].mxu1 %vm13250_vm8, %v21835_v16  ;;  %v14431_v50 = vmul.f32 %v21833_v30, %v21833_v30 }
 0xe95   : > { %18440 = vmatprep.mubr.msk.f32.mxu0 %vm19084_vm4, %v19083_v17  ;;  %18445 = vmatprep.mubr.msk.f32.mxu1 %vm19084_vm4, %v19083_v17  ;;  %v14432_v54 = vmul.f32 %v21835_v16, %v21835_v16 }
 0xf5a   : > { %v13324_v57 = vpop.f32.mrb[248].mxu0  ;;  %v13397_v36 = vpop.f32.mrb[248].mxu1 }
 0xf5b   : > { %v18402_v24 = vpop.f32.mrb[249].mxu0  ;;  %18439 = vmatpush3.msk.msra.mxu0 %vm13254_vm7, %v13324_v57  ;;  %v18407_v43 = vpop.f32.mrb[249].mxu1  ;;  %18444 = vmatpush3.msk.msra.mxu1 %vm13254_vm7, %v13397_v36 }
 0xf5c   : > { %18441 = vmatmul.mubr.msk.f32.vlgmr.msra.gmra.mrb[0].mxu0 %vm13250_vm8, %v21764_v28  ;;  %18446 = vmatmul.mubr.msk.f32.vlgmr.msra.gmra.mrb[0].mxu1 %vm13250_vm8, %v21764_v28 }
 0xf5d   : > { %18448 = vmatprep.subr.mxu0 %v19083_v17  ;;  %18453 = vmatprep.subr.mxu1 %v19083_v17 }
 0xf5e   : > { %v13470_v26 = vpop.f32.mrb[250].mxu0  ;;  %18450 = vmatprep.mubr.msk.f32.mxu0 %vm19084_vm4, %v19083_v17  ;;  %18455 = vmatprep.mubr.msk.f32.mxu1 %vm19084_vm4, %v19083_v17 }
 0xf5f   : > { %v13543_v25 = vpop.f32.mrb[250].mxu1  ;;  %v18412_v0 = vpop.f32.mrb[251].mxu0  ;;  %18449 = vmatpush3.msk.msra.mxu0 %vm13254_vm7, %v13470_v26 }
 0xf60   : > { %v18417_v21 = vpop.f32.mrb[251].mxu1  ;;  %18454 = vmatpush3.msk.msra.mxu1 %vm13254_vm7, %v13543_v25  ;;  %18451 = vmatmul.mubr.msk.f32.vlgmr.msra.gmra.mrb[2].mxu0 %vm13250_vm8, %v21764_v28 }
 0xf61   : > { %18456 = vmatmul.mubr.msk.f32.vlgmr.msra.gmra.mrb[2].mxu1 %vm13250_vm8, %v21764_v28  ;;  %18458 = vmatprep.subr.mxu0 %v19083_v17 }
 0xf62   : > { %v13616_v38 = vpop.f32.mrb[252].mxu0  ;;  %18463 = vmatprep.subr.mxu1 %v19083_v17  ;;  %18460 = vmatprep.mubr.msk.f32.mxu0 %vm19084_vm4, %v19083_v17 }
 0xf63   : > { %v13689_v51 = vpop.f32.mrb[252].mxu1  ;;  %v18422_v47 = vpop.f32.mrb[253].mxu0  ;;  %18459 = vmatpush3.msk.msra.mxu0 %vm13254_vm7, %v13616_v38  ;;  %18465 = vmatprep.mubr.msk.f32.mxu1 %vm19084_vm4, %v19083_v17 }
 0xf64   : > { %v18427_v5 = vpop.f32.mrb[253].mxu1  ;;  %18464 = vmatpush3.msk.msra.mxu1 %vm13254_vm7, %v13689_v51  ;;  %18461 = vmatmul.mubr.msk.f32.vlgmr.msra.gmra.mrb[4].mxu0 %vm13250_vm8, %v21764_v28 }
 0xf65   : > { %18466 = vmatmul.mubr.msk.f32.vlgmr.msra.gmra.mrb[4].mxu1 %vm13250_vm8, %v21764_v28  ;;  %18468 = vmatprep.subr.mxu0 %v19083_v17 }
 0xf66   : > { %18473 = vmatprep.subr.mxu1 %v19083_v17  ;;  %18470 = vmatprep.mubr.msk.f32.mxu0 %vm19084_vm4, %v19083_v17 }
 0xf67   : > { %v13762_v49 = vpop.f32.mrb[254].mxu0  ;;  %18475 = vmatprep.mubr.msk.f32.mxu1 %vm19084_vm4, %v19083_v17  ;;  %v13835_v32 = vpop.f32.mrb[254].mxu1 }
 0xf68   : > { %v18432_v37 = vpop.f32.mrb[255].mxu0  ;;  %18469 = vmatpush3.msk.msra.mxu0 %vm13254_vm7, %v13762_v49  ;;  %v18437_v58 = vpop.f32.mrb[255].mxu1  ;;  %18474 = vmatpush3.msk.msra.mxu1 %vm13254_vm7, %v13835_v32 }
 0xf69   : > { %18471 = vmatmul.mubr.msk.f32.vlgmr.msra.gmra.mrb[6].mxu0 %vm13250_vm8, %v21764_v28  ;;  %18476 = vmatmul.mubr.msk.f32.vlgmr.msra.gmra.mrb[6].mxu1 %vm13250_vm8, %v21764_v28 }
 0xf6a   : > { %18478 = vmatprep.subr.mxu0 %v19083_v17  ;;  %18483 = vmatprep.subr.mxu1 %v19083_v17 }
 0xf6b   : > { %18479 = vmatpush3.msk.msra.mxu0 %vm13254_vm7, %v21764_v28  ;;  %18480 = vmatprep.mubr.msk.f32.mxu0 %vm19084_vm4, %v19083_v17 }
 0xf6c   : > { %18484 = vmatpush3.msk.msra.mxu1 %vm13254_vm7, %v21764_v28  ;;  %18485 = vmatprep.mubr.msk.f32.mxu1 %vm19084_vm4, %v19083_v17 }
 0xf6d   : > { %18481 = vmatmul.mubr.msk.f32.vlgmr.msra.gmra.mrb[8].mxu0 %vm13250_vm8, %v14425_v14  ;;  %18486 = vmatmul.mubr.msk.f32.vlgmr.msra.gmra.mrb[8].mxu1 %vm13250_vm8, %v14426_v20 }
 0xf6e   : > { %18488 = vmatprep.subr.mxu0 %v19083_v17  ;;  %18493 = vmatprep.subr.mxu1 %v19083_v17 }
 0xf6f   : > { %18489 = vmatpush3.msk.msra.mxu0 %vm13254_vm7, %v21764_v28  ;;  %18490 = vmatprep.mubr.msk.f32.mxu0 %vm19084_vm4, %v19083_v17 }
 0xf70   : > { %18494 = vmatpush3.msk.msra.mxu1 %vm13254_vm7, %v21764_v28  ;;  %18495 = vmatprep.mubr.msk.f32.mxu1 %vm19084_vm4, %v19083_v17 }
 0xf71   : > { %18491 = vmatmul.mubr.msk.f32.vlgmr.msra.gmra.mrb[10].mxu0 %vm13250_vm8, %v14427_v53  ;;  %18496 = vmatmul.mubr.msk.f32.vlgmr.msra.gmra.mrb[10].mxu1 %vm13250_vm8, %v14428_v45 }
 0xf72   : > { %18498 = vmatprep.subr.mxu0 %v19083_v17  ;;  %18503 = vmatprep.subr.mxu1 %v19083_v17 }
 0xf73   : > { %18499 = vmatpush3.msk.msra.mxu0 %vm13254_vm7, %v21764_v28  ;;  %18500 = vmatprep.mubr.msk.f32.mxu0 %vm19084_vm4, %v19083_v17 }
 0xf74   : > { %18504 = vmatpush3.msk.msra.mxu1 %vm13254_vm7, %v21764_v28  ;;  %18505 = vmatprep.mubr.msk.f32.mxu1 %vm19084_vm4, %v19083_v17 }
 0xf75   : > { %18501 = vmatmul.mubr.msk.f32.vlgmr.msra.gmra.mrb[12].mxu0 %vm13250_vm8, %v14429_v8  ;;  %18506 = vmatmul.mubr.msk.f32.vlgmr.msra.gmra.mrb[12].mxu1 %vm13250_vm8, %v14430_v33 }
 0xf76   : > { %18508 = vmatprep.subr.mxu0 %v19083_v17  ;;  %18513 = vmatprep.subr.mxu1 %v19083_v17 }
 0xf77   : > { %18509 = vmatpush3.msk.msra.mxu0 %vm13254_vm7, %v21764_v28  ;;  %18510 = vmatprep.mubr.msk.f32.mxu0 %vm19084_vm4, %v19083_v17 }
 0xf78   : > { %18514 = vmatpush3.msk.msra.mxu1 %vm13254_vm7, %v21764_v28  ;;  %18515 = vmatprep.mubr.msk.f32.mxu1 %vm19084_vm4, %v19083_v17 }
 0xf79   : > { %18511 = vmatmul.mubr.msk.f32.vlgmr.msra.gmra.mrb[14].mxu0 %vm13250_vm8, %v14431_v50  ;;  %18516 = vmatmul.mubr.msk.f32.vlgmr.msra.gmra.mrb[14].mxu1 %vm13250_vm8, %v14432_v54 }
 0xf7a   : > { %18518 = vmatprep.subr.mxu0 %v19083_v17  ;;  %18523 = vmatprep.subr.mxu1 %v19083_v17 }
 0xf7b   : > { %18520 = vmatprep.mubr.msk.f32.mxu0 %vm19084_vm4, %v19083_v17  ;;  %18525 = vmatprep.mubr.msk.f32.mxu1 %vm19084_vm4, %v19083_v17 }
0x102f   : > { %v13910_v56 = vpop.f32.mrb[0].mxu0  ;;  %v13983_v41 = vpop.f32.mrb[0].mxu1 }
0x1030   : > { %v18442_v13 = vpop.f32.mrb[1].mxu0  ;;  %v18447_v40 = vpop.f32.mrb[1].mxu1  ;;  %v21966_v39 = vmul.f32 %v13910_v56, %v13910_v56  ;;  %v21972_v7 = vmul.f32 %v13983_v41, %v13983_v41 }
0x1033   : > { %v14056_v31 = vpop.f32.mrb[2].mxu0 }
0x1034   : > { %v18452_v34 = vpop.f32.mrb[3].mxu0  ;;  %v14129_v4 = vpop.f32.mrb[2].mxu1  ;;  %v21986_v59 = vmul.f32 %v14056_v31, %v14056_v31 }
0x1035   : > { %v18457_v1 = vpop.f32.mrb[3].mxu1  ;;  %v21992_v55 = vmul.f32 %v14129_v4, %v14129_v4 }
0x1037   : > { %v14202_v42 = vpop.f32.mrb[4].mxu0 }
0x1038   : > { %v21968_v3 = vmul.f32 %v14202_v42, %v14202_v42  ;;  %v21970_v10 = vmul.f32 %v14202_v42, %v13910_v56  ;;  %v14275_v29 = vpop.f32.mrb[4].mxu1  ;;  %v18462_v61 = vpop.f32.mrb[5].mxu0 }
0x1039   : > { %v21974_v6 = vmul.f32 %v14275_v29, %v14275_v29  ;;  %v21976_v9 = vmul.f32 %v14275_v29, %v13983_v41  ;;  %v18467_v12 = vpop.f32.mrb[5].mxu1 }
0x103a   : > { %v21980_v35 = vadd.f32 %v21968_v3, %v21966_v39 }
0x103b   : > { %v21984_v48 = vadd.f32 %v21974_v6, %v21972_v7 }
0x103c   : > { %v14348_v44 = vpop.f32.mrb[6].mxu0  ;;  %v14421_v23 = vpop.f32.mrb[6].mxu1 }
0x103d   : > { %v21988_v60 = vmul.f32 %v14348_v44, %v14348_v44  ;;  %v21990_v19 = vmul.f32 %v14348_v44, %v14056_v31  ;;  %v18472_v11 = vpop.f32.mrb[7].mxu0  ;;  %v21994_v15 = vmul.f32 %v14421_v23, %v14421_v23  ;;  %v21996_v46 = vmul.f32 %v14421_v23, %v14129_v4  ;;  %v18477_v27 = vpop.f32.mrb[7].mxu1 }
0x103f   : > { %v22000_v30 = vadd.f32 %v21988_v60, %v21986_v59  ;;  %v22004_v16 = vadd.f32 %v21994_v15, %v21992_v55 }
0x1040   : > { %v14502_v62 = vpop.f32.mrb[8].mxu0  ;;  %v14575_v22 = vpop.f32.mrb[8].mxu1 }
0x1041   : > { %v18482_v57 = vpop.f32.mrb[9].mxu0  ;;  %18519 = vmatpush3.msk.msra.mxu0 %vm13254_vm7, %v14502_v62  ;;  %v18487_v36 = vpop.f32.mrb[9].mxu1  ;;  %18524 = vmatpush3.msk.msra.mxu1 %vm13254_vm7, %v14575_v22  ;;  %v16265_v62 = vadd.f32 0.0001, %v21980_v35  ;;  %v16266_v22 = vadd.f32 0.0001, %v21984_v48 }
0x1042   : > { %18521 = vmatmul.mubr.msk.f32.vlgmr.msra.gmra.mrb[16].mxu0 %vm13250_vm8, %v21764_v28  ;;  %18526 = vmatmul.mubr.msk.f32.vlgmr.msra.gmra.mrb[16].mxu1 %vm13250_vm8, %v21764_v28  ;;  %v16267_v36 = vadd.f32 0.0001, %v22000_v30  ;;  %v16249_v48 = vmul.f32 2.0, %v21970_v10 }
0x1043   : > { %18528 = vmatprep.subr.mxu0 %v19083_v17  ;;  %18533 = vmatprep.subr.mxu1 %v19083_v17 }
0x1044   : > { %v14648_v24 = vpop.f32.mrb[10].mxu0  ;;  %18530 = vmatprep.mubr.msk.f32.mxu0 %vm19084_vm4, %v19083_v17  ;;  %v14721_v43 = vpop.f32.mrb[10].mxu1  ;;  %18535 = vmatprep.mubr.msk.f32.mxu1 %vm19084_vm4, %v19083_v17 }
0x1045   : > { %v18492_v26 = vpop.f32.mrb[11].mxu0  ;;  %18529 = vmatpush3.msk.msra.mxu0 %vm13254_vm7, %v14648_v24  ;;  %v18497_v25 = vpop.f32.mrb[11].mxu1  ;;  %18534 = vmatpush3.msk.msra.mxu1 %vm13254_vm7, %v14721_v43  ;;  %v16268_v24 = vadd.f32 0.0001, %v22004_v16 }
0x1046   : > { %18531 = vmatmul.mubr.msk.f32.vlgmr.msra.gmra.mrb[18].mxu0 %vm13250_vm8, %v21764_v28  ;;  %18536 = vmatmul.mubr.msk.f32.vlgmr.msra.gmra.mrb[18].mxu1 %vm13250_vm8, %v21764_v28 }
0x1047   : > { %18538 = vmatprep.subr.mxu0 %v19083_v17  ;;  %18543 = vmatprep.subr.mxu1 %v19083_v17 }
0x1048   : > { %v14794_v0 = vpop.f32.mrb[12].mxu0  ;;  %18540 = vmatprep.mubr.msk.f32.mxu0 %vm19084_vm4, %v19083_v17  ;;  %v14867_v21 = vpop.f32.mrb[12].mxu1  ;;  %18545 = vmatprep.mubr.msk.f32.mxu1 %vm19084_vm4, %v19083_v17 }
0x1049   : > { %v18502_v38 = vpop.f32.mrb[13].mxu0  ;;  %18539 = vmatpush3.msk.msra.mxu0 %vm13254_vm7, %v14794_v0  ;;  %v18507_v51 = vpop.f32.mrb[13].mxu1  ;;  %18544 = vmatpush3.msk.msra.mxu1 %vm13254_vm7, %v14867_v21 }
0x104a   : > { %18541 = vmatmul.mubr.msk.f32.vlgmr.msra.gmra.mrb[20].mxu0 %vm13250_vm8, %v21764_v28  ;;  %18546 = vmatmul.mubr.msk.f32.vlgmr.msra.gmra.mrb[20].mxu1 %vm13250_vm8, %v21764_v28  ;;  %v16250_v38 = vmul.f32 2.0, %v21976_v9 }
0x104b   : > { %18548 = vmatprep.subr.mxu0 %v19083_v17  ;;  %18553 = vmatprep.subr.mxu1 %v19083_v17 }
0x104c   : > { %v14940_v47 = vpop.f32.mrb[14].mxu0  ;;  %18550 = vmatprep.mubr.msk.f32.mxu0 %vm19084_vm4, %v19083_v17  ;;  %v15013_v5 = vpop.f32.mrb[14].mxu1  ;;  %18555 = vmatprep.mubr.msk.f32.mxu1 %vm19084_vm4, %v19083_v17 }
0x104d   : > { %v18512_v49 = vpop.f32.mrb[15].mxu0  ;;  %18549 = vmatpush3.msk.msra.mxu0 %vm13254_vm7, %v14940_v47  ;;  %v18517_v32 = vpop.f32.mrb[15].mxu1  ;;  %18554 = vmatpush3.msk.msra.mxu1 %vm13254_vm7, %v15013_v5 }
0x104e   : > { %18551 = vmatmul.mubr.msk.f32.vlgmr.msra.gmra.mrb[22].mxu0 %vm13250_vm8, %v21764_v28  ;;  %18556 = vmatmul.mubr.msk.f32.vlgmr.msra.gmra.mrb[22].mxu1 %vm13250_vm8, %v21764_v28 }
0x104f   : > { %18558 = vmatprep.subr.mxu0 %v19083_v17  ;;  %18563 = vmatprep.subr.mxu1 %v19083_v17 }
0x1050   : > { %18559 = vmatpush3.msk.msra.mxu0 %vm13254_vm7, %v21764_v28  ;;  %18560 = vmatprep.mubr.msk.f32.mxu0 %vm19084_vm4, %v19083_v17 }
0x1051   : > { %18564 = vmatpush3.msk.msra.mxu1 %vm13254_vm7, %v21764_v28  ;;  %18565 = vmatprep.mubr.msk.f32.mxu1 %vm19084_vm4, %v19083_v17 }
0x1052   : > { %18561 = vmatmul.mubr.msk.f32.vlgmr.msra.gmra.mrb[24].mxu0 %vm13250_vm8, %v21811_v2  ;;  %18566 = vmatmul.mubr.msk.f32.vlgmr.msra.gmra.mrb[24].mxu1 %vm13250_vm8, %v21820_v52 }
0x1053   : > { %18568 = vmatprep.subr.mxu0 %v19083_v17  ;;  %18573 = vmatprep.subr.mxu1 %v19083_v17 }
0x1054   : > { %18569 = vmatpush3.msk.msra.mxu0 %vm13254_vm7, %v21764_v28  ;;  %18570 = vmatprep.mubr.msk.f32.mxu0 %vm19084_vm4, %v19083_v17 }
0x1055   : > { %18574 = vmatpush3.msk.msra.mxu1 %vm13254_vm7, %v21764_v28  ;;  %18575 = vmatprep.mubr.msk.f32.mxu1 %vm19084_vm4, %v19083_v17 }
0x1056   : > { %18571 = vmatmul.mubr.msk.f32.vlgmr.msra.gmra.mrb[26].mxu0 %vm13250_vm8, %v21840_v63  ;;  %18576 = vmatmul.mubr.msk.f32.vlgmr.msra.gmra.mrb[26].mxu1 %vm13250_vm8, %v21844_v18 }
0x1057   : > { %18578 = vmatprep.subr.mxu0 %v19083_v17  ;;  %18583 = vmatprep.subr.mxu1 %v19083_v17 }
0x1058   : > { %18580 = vmatprep.mubr.msk.f32.mxu0 %vm19084_vm4, %v19083_v17  ;;  %18585 = vmatprep.mubr.msk.f32.mxu1 %vm19084_vm4, %v19083_v17 }
0x1115   : > { %v15086_v2 = vpop.f32.mrb[16].mxu0  ;;  %v15159_v37 = vpop.f32.mrb[16].mxu1 }
0x1116   : > { %v16201_v52 = vsub.f32 %v15086_v2, %v21966_v39  ;;  %v18522_v58 = vpop.f32.mrb[17].mxu0  ;;  %v16202_v63 = vsub.f32 %v15159_v37, %v21972_v7  ;;  %v18527_v14 = vpop.f32.mrb[17].mxu1  ;;  %v16253_v2 = vadd.f32 0.0001, %v16249_v48 }
0x1119   : > { %v15232_v20 = vpop.f32.mrb[18].mxu0  ;;  %v15305_v53 = vpop.f32.mrb[18].mxu1 }
0x111a   : > { %v16203_v18 = vsub.f32 %v15232_v20, %v21986_v59  ;;  %v18532_v45 = vpop.f32.mrb[19].mxu0  ;;  %v16204_v8 = vsub.f32 %v15305_v53, %v21992_v55  ;;  %v18537_v33 = vpop.f32.mrb[19].mxu1  ;;  %v16254_v20 = vadd.f32 0.0001, %v16250_v38 }
0x111d   : > { %v15378_v50 = vpop.f32.mrb[20].mxu0  ;;  %v15451_v56 = vpop.f32.mrb[20].mxu1 }
0x111e   : > { %v16205_v54 = vsub.f32 %v15378_v50, %v21968_v3  ;;  %v18542_v13 = vpop.f32.mrb[21].mxu0  ;;  %v16206_v41 = vsub.f32 %v15451_v56, %v21974_v6  ;;  %v18547_v40 = vpop.f32.mrb[21].mxu1 }
0x1120   : > { %v16221_v31 = vadd.f32 %v16205_v54, %v16201_v52  ;;  %v16222_v34 = vadd.f32 %v16206_v41, %v16202_v63  ;;  %v16252_v54 = vmul.f32 2.0, %v21996_v46 }
0x1121   : > { %v15524_v4 = vpop.f32.mrb[22].mxu0  ;;  %v15597_v42 = vpop.f32.mrb[22].mxu1 }
0x1122   : > { %v16207_v1 = vsub.f32 %v15524_v4, %v21988_v60  ;;  %v18552_v39 = vpop.f32.mrb[23].mxu0  ;;  %v16208_v29 = vsub.f32 %v15597_v42, %v21994_v15  ;;  %v18557_v61 = vpop.f32.mrb[23].mxu1  ;;  %v16225_v15 = vadd.f32 0.0009, %v16221_v31  ;;  %v16226_v27 = vadd.f32 0.0009, %v16222_v34 }
0x1124   : > { %v16223_v7 = vadd.f32 %v16207_v1, %v16203_v18  ;;  %v16224_v12 = vadd.f32 %v16208_v29, %v16204_v8  ;;  %19042 = vrcp.f32 %v16225_v15  ;;  %v16251_v18 = vmul.f32 2.0, %v21990_v19 }
0x1125   : > { %v15674_v44 = vpop.f32.mrb[24].mxu0  ;;  %v15747_v59 = vpop.f32.mrb[24].mxu1  ;;  %19044 = vrcp.f32 %v16226_v27 }
0x1126   : > { %v18562_v3 = vpop.f32.mrb[25].mxu0  ;;  %18579 = vmatpush3.msk.msra.mxu0 %vm13254_vm7, %v15674_v44  ;;  %v18567_v23 = vpop.f32.mrb[25].mxu1  ;;  %18584 = vmatpush3.msk.msra.mxu1 %vm13254_vm7, %v15747_v59  ;;  %v16227_v57 = vadd.f32 0.0009, %v16223_v7  ;;  %19046 = vrcp.f32 %v16265_v62 }
0x1127   : > { %18581 = vmatmul.mubr.msk.f32.vlgmr.msra.gmra.mrb[28].mxu0 %vm13250_vm8, %v21764_v28  ;;  %18586 = vmatmul.mubr.msk.f32.vlgmr.msra.gmra.mrb[28].mxu1 %vm13250_vm8, %v21764_v28  ;;  %19048 = vrcp.f32 %v16266_v22 }
0x1128   : > { %18588 = vmatprep.subr.mxu0 %v19083_v17  ;;  %18593 = vmatprep.subr.mxu1 %v19083_v17  ;;  %19050 = vrcp.f32 %v16227_v57 }
0x1129   : > { %v15820_v6 = vpop.f32.mrb[26].mxu0  ;;  %18590 = vmatprep.mubr.msk.f32.mxu0 %vm19084_vm4, %v19083_v17  ;;  %v15893_v60 = vpop.f32.mrb[26].mxu1  ;;  %18595 = vmatprep.mubr.msk.f32.mxu1 %vm19084_vm4, %v19083_v17  ;;  %v16228_v17 = vadd.f32 0.0009, %v16224_v12 }
0x112a   : > { %v18572_v11 = vpop.f32.mrb[27].mxu0  ;;  %18589 = vmatpush3.msk.msra.mxu0 %vm13254_vm7, %v15820_v6  ;;  %v18577_v55 = vpop.f32.mrb[27].mxu1  ;;  %18594 = vmatpush3.msk.msra.mxu1 %vm13254_vm7, %v15893_v60 }
0x112b   : > { %18591 = vmatmul.mubr.msk.f32.vlgmr.msra.gmra.mrb[30].mxu0 %vm13250_vm8, %v21764_v28  ;;  %18596 = vmatmul.mubr.msk.f32.vlgmr.msra.gmra.mrb[30].mxu1 %vm13250_vm8, %v21764_v28  ;;  %19052 = vrcp.f32 %v16228_v17 }
0x112c   : > { %19054 = vrcp.f32 %v16267_v36 }
0x112d   : > { %19056 = vrcp.f32 %v16268_v24 }
0x112e   : > { %v19043_v28 = vpop.eup %19042 }
0x112f   : > { %v19045_v43 = vpop.eup %19044  ;;  %v16233_v25 = vmul.f32 %v19043_v28, %v16225_v15 }
0x1130   : > { %v19047_v26 = vpop.eup %19046  ;;  %v16234_v0 = vmul.f32 %v19045_v43, %v16226_v27 }
0x1131   : > { %v19049_v35 = vpop.eup %19048  ;;  %v16273_v47 = vmul.f32 %v19047_v26, %v16265_v62  ;;  %v16237_v16 = vsub.f32 2.0, %v16233_v25 }
0x1132   : > { %v19051_v21 = vpop.eup %19050  ;;  %v16274_v30 = vmul.f32 %v19049_v35, %v16266_v22  ;;  %v16238_v52 = vsub.f32 2.0, %v16234_v0 }
0x1133   : > { %v16235_v37 = vmul.f32 %v19051_v21, %v16227_v57  ;;  %v16277_v33 = vsub.f32 2.0, %v16273_v47  ;;  %v16241_v40 = vmul.f32 %v19043_v28, %v16237_v16 }
0x1134   : > { %v16278_v50 = vsub.f32 2.0, %v16274_v30  ;;  %v16242_v1 = vmul.f32 %v19045_v43, %v16238_v52 }
0x1135   : > { %v19053_v51 = vpop.eup %19052  ;;  %v16281_v44 = vmul.f32 %v19047_v26, %v16277_v33  ;;  %v16256_v26 = vadd.f32 0.0001, %v16252_v54 }
0x1136   : > { %v19055_v5 = vpop.eup %19054  ;;  %v16236_v53 = vmul.f32 %v19053_v51, %v16228_v17  ;;  %v16282_v59 = vmul.f32 %v19049_v35, %v16278_v50 }
0x1137   : > { %v19057_v32 = vpop.eup %19056  ;;  %v16275_v13 = vmul.f32 %v19055_v5, %v16267_v36 }
0x1138   : > { %v16276_v41 = vmul.f32 %v19057_v32, %v16268_v24  ;;  %v16240_v61 = vsub.f32 2.0, %v16236_v53 }
0x1139   : > { %v16279_v6 = vsub.f32 2.0, %v16275_v13 }
0x113a   : > { %v16280_v60 = vsub.f32 2.0, %v16276_v41  ;;  %v16244_v36 = vmul.f32 %v19053_v51, %v16240_v61 }
0x113b   : > { %v16283_v48 = vmul.f32 %v19055_v5, %v16279_v6 }
0x113c   : > { %v16284_v30 = vmul.f32 %v19057_v32, %v16280_v60 }
0x11fa   : > { %v15966_v49 = vpop.f32.mrb[28].mxu0  ;;  %v16039_v63 = vpop.f32.mrb[28].mxu1 }
0x11fb   : > { %v16209_v58 = vsub.f32 %v15966_v49, %v21970_v10  ;;  %v18582_v14 = vpop.f32.mrb[29].mxu0  ;;  %v16210_v45 = vsub.f32 %v16039_v63, %v21976_v9  ;;  %v18587_v8 = vpop.f32.mrb[29].mxu1  ;;  %v16239_v10 = vsub.f32 2.0, %v16235_v37 }
0x11fd   : > { %v16213_v56 = vmul.f32 2.0, %v16209_v58  ;;  %v16214_v31 = vmul.f32 2.0, %v16210_v45  ;;  %v16243_v62 = vmul.f32 %v19051_v21, %v16239_v10  ;;  %v550_v10 = vlaneseq }
0x11fe   : > { %v16112_v34 = vpop.f32.mrb[30].mxu0  ;;  %v16185_v39 = vpop.f32.mrb[30].mxu1 }
0x11ff   : > { %v16217_v4 = vadd.f32 0.0009, %v16213_v56  ;;  %v16211_v42 = vsub.f32 %v16112_v34, %v21990_v19  ;;  %v18592_v29 = vpop.f32.mrb[31].mxu0  ;;  %v16218_v9 = vadd.f32 0.0009, %v16214_v31  ;;  %v16212_v7 = vsub.f32 %v16185_v39, %v21996_v46  ;;  %v18597_v12 = vpop.f32.mrb[31].mxu1 }
0x1200   : > { %v16255_v46 = vadd.f32 0.0001, %v16251_v18 }
0x1201   : > { %v16245_v3 = vmul.f32 %v16241_v40, %v16217_v4  ;;  %v16215_v23 = vmul.f32 2.0, %v16211_v42  ;;  %v16246_v11 = vmul.f32 %v16242_v1, %v16218_v9  ;;  %v16216_v55 = vmul.f32 2.0, %v16212_v7 }
0x1202   : > { %v551_v4 = vand.u32 127, %v550_v10  ;;  %v3206_v1 = vstv %s18673_s23  ;;  %v3210_v42 = vstv %s18675_s24  ;;  %v5806_v9 = vstv %s18677_s13 }
0x1203   : > { %v16257_v15 = vmul.f32 %v16253_v2, %v16245_v3  ;;  %v16306_v27 = vsel %vm16289_vm9, %v16245_v3, 0.0  ;;  %v16219_v19 = vadd.f32 0.0009, %v16215_v23  ;;  %v16258_v22 = vmul.f32 %v16254_v20, %v16246_v11 }
0x1204   : > { %v16307_v57 = vsel %vm16289_vm9, %v16246_v11, 0.0  ;;  %v16220_v17 = vadd.f32 0.0009, %v16216_v55  ;;  %vm3205_vm10 = vcmp.eq.s32.totalorder %v551_v4, 0  ;;  %vm3209_vm11 = vcmp.eq.s32.totalorder %v551_v4, 5 }
0x1205   : > { %v16285_v24 = vmul.f32 %v16281_v44, %v16257_v15  ;;  %v16308_v28 = vadd.f32 %v16307_v57, %v16306_v27  ;;  %v16247_v43 = vmul.f32 %v16243_v62, %v16219_v19  ;;  %v16286_v35 = vmul.f32 %v16282_v59, %v16258_v22 }
0x1206   : > { %v16248_v25 = vmul.f32 %v16244_v36, %v16220_v17  ;;  %v3207_v39 = vsel %vm3205_vm10, %v3206_v1, 0.0  ;;  %v3211_v29 = vsel %vm3209_vm11, %v3210_v42, 0.0  ;;  %vm5805_vm12 = vcmp.eq.s32.totalorder %v551_v4, 1 }
0x1207   : > { %v16259_v0 = vmul.f32 %v16255_v46, %v16247_v43  ;;  %v16309_v38 = vsel %vm16289_vm9, %v16247_v43, 0.0  ;;  %v16290_v47 = vsel %vm16289_vm9, %v16285_v24, 0.0  ;;  %v16291_v49 = vsel %vm16289_vm9, %v16286_v35, 0.0 }
0x1208   : > { %v16260_v21 = vmul.f32 %v16256_v26, %v16248_v25  ;;  %v16310_v16 = vadd.f32 %v16309_v38, %v16308_v28  ;;  %v16311_v51 = vsel %vm16289_vm9, %v16248_v25, 0.0  ;;  %v16292_v52 = vadd.f32 %v16291_v49, %v16290_v47 }
0x1209   : > { %v16287_v2 = vmul.f32 %v16283_v48, %v16259_v0  ;;  %v3212_v61 = vadd.f32 %v3211_v29, %v3207_v39  ;;  %v5807_v7 = vsel %vm5805_vm12, %v5806_v9, 0.0  ;;  %vm5809_vm13 = vcmp.eq.s32.totalorder %v551_v4, 6 }
0x120a   : > { %v16312_v37 = vadd.f32 %v16311_v51, %v16310_v16  ;;  %v16288_v58 = vmul.f32 %v16284_v30, %v16260_v21  ;;  %v5810_v44 = vstv %s18679_s25  ;;  %vm7798_vm14 = vcmp.eq.s32.totalorder %v551_v4, 2 }
0x120b   : > { %v16293_v63 = vsel %vm16289_vm9, %v16287_v2, 0.0  ;;  %v5808_v12 = vadd.f32 %v5807_v7, %v3212_v61  ;;  %v7799_v59 = vstv %s18681_s26  ;;  %v5811_v3 = vsel %vm5809_vm13, %v5810_v44, 0.0 }
0x120c   : > { %16313 = vadd.xlane.f32.xlu1 %v16312_v37  ;;  %v16294_v5 = vadd.f32 %v16293_v63, %v16292_v52  ;;  %v16295_v14 = vsel %vm16289_vm9, %v16288_v58, 0.0  ;;  %v7800_v23 = vsel %vm7798_vm14, %v7799_v59, 0.0  ;;  %vm7802_vm15 = vcmp.eq.s32.totalorder %v551_v4, 7 }
0x120d   : > { %v5812_v6 = vadd.f32 %v5811_v3, %v5808_v12  ;;  %v7803_v11 = vstv %s18683_s27  ;;  %vm12058_vm0 = vcmp.eq.s32.totalorder %v551_v4, 3  ;;  %v12059_v55 = vstv %s18685_s28 }
0x120e   : > { %v16296_v20 = vadd.f32 %v16295_v14, %v16294_v5  ;;  %v7804_v15 = vsel %vm7802_vm15, %v7803_v11, 0.0  ;;  %v12060_v27 = vsel %vm12058_vm0, %v12059_v55, 0.0  ;;  %vm12062_vm1 = vcmp.eq.s32.totalorder %v551_v4, 8 }
0x120f   : > { %v7801_v60 = vadd.f32 %v7800_v23, %v5812_v6  ;;  %v12063_v22 = vstv %s18687_s29  ;;  %vm16322_vm2 = vcmp.eq.s32.totalorder %v551_v4, 4  ;;  %vm16326_vm3 = vcmp.eq.s32.totalorder %v551_v4, 9 }
0x1210   : > { %16297 = vadd.xlane.f32.xlu0 %v16296_v20  ;;  %v12064_v57 = vsel %vm12062_vm1, %v12063_v22, 0.0 }
0x1211   : > { %v7805_v19 = vadd.f32 %v7804_v15, %v7801_v60 }
0x1213   : > { %v12061_v62 = vadd.f32 %v12060_v27, %v7805_v19 }
0x1215   : > { %v12065_v17 = vadd.f32 %v12064_v57, %v12061_v62 }
0x1299   : > { %v16314_v18 = vpop.xlane.xlu1 %16313 }
0x129a   : > { %v16315_v32 = vrot.slane %v16314_v18, 4 }
0x129c   : > { %v16316_v53 = vadd.f32 %v16315_v32, %v16314_v18 }
0x129d   : > { %v16298_v45 = vpop.xlane.xlu0 %16297 }
0x129e   : > { %v16317_v8 = vrot.slane %v16316_v53, 2  ;;  %v16299_v33 = vrot.slane %v16298_v45, 4 }
0x12a0   : > { %v16300_v50 = vadd.f32 %v16299_v33, %v16298_v45  ;;  %v16318_v54 = vadd.f32 %v16317_v8, %v16316_v53 }
0x12a2   : > { %v16301_v56 = vrot.slane %v16300_v50, 2  ;;  %v16319_v41 = vrot.slane %v16318_v54, 1 }
0x12a4   : > { %v16302_v13 = vadd.f32 %v16301_v56, %v16300_v50  ;;  %v16320_v34 = vadd.f32 %v16319_v41, %v16318_v54 }
0x12a6   : > { %v16303_v40 = vrot.slane %v16302_v13, 1 }
0x12a8   : > { %v16304_v31 = vadd.f32 %v16303_v40, %v16302_v13 }
0x12aa   : > { %18688 = vpush %v16304_v31 }
0x12ab   : > { %18690 = vpush %v16320_v34 }
0x12db   : > { %s18689_s30 = spop %18688 }
0x12dc   : > { %v16323_v36 = vstv %s18689_s30  ;;  %s18691_s11 = spop %18690 }
0x12dd   : > { %v16324_v46 = vsel %vm16322_vm2, %v16323_v36, 0.0  ;;  %v16327_v24 = vstv %s18691_s11 }
0x12de   : > { %v16325_v28 = vadd.f32 %v16324_v46, %v12065_v17  ;;  %v16328_v43 = vsel %vm16326_vm3, %v16327_v24, 0.0 }
0x12e0   : > { %v16329_v26 = vadd.f32 %v16328_v43, %v16325_v28 }
0x12e2   : > { %16330 = vst [vmem:[%s516_s19] sm:$0x1] %v16329_v26 }
0x12e3 PF: > { %p17_p9 = scmp.ge.s32.totalorder %s19157_s17, 4   ;;  %s22336_s13 = smov %s19077_s14 }
0x12e4   : > { %s22337_s14 = smov %s19166_s20  ;;  %s22338_s15 = smov %s19157_s17 }
0x12e5   :  { %19 = sbr.rel (!%p17_p9) target bundleno = 2 (0x2), region = 133 }

</bundles_post_ra>
